<compile_context>
chip_gen: v5e
topology: v5e:2x2
jax: 0.10.0
libtpu: 0.0.40
codegen_flags: <defaults>
</compile_context>

<pallas_src>
import jax
import jax.numpy as jnp
from jax.experimental import pallas as pl
from jax.experimental.pallas import tpu as pltpu

NUM_HEADS = 4
LN_EPS = 1e-7


def _layer_norm(x, gamma, beta):
    mu = jnp.mean(x, axis=-1, keepdims=True)
    var = jnp.mean(jnp.square(x - mu), axis=-1, keepdims=True)
    return (x - mu) * jax.lax.rsqrt(var + LN_EPS) * gamma + beta


def rtd_head_kernel(we_ref, ie_ref, mask_ref,
                    wqkv_ref, bqkv_ref,
                    wo_ref, bo_ref, g1_ref, be1_ref,
                    wi_ref, bi_ref, wf_ref, bf_ref, g2_ref, be2_ref,
                    wc_ref, bc_ref,
                    out_ref):
    we = we_ref[...]                     # (TB, 1, H) f32  word_embeds tile
    ie = ie_ref[...]                     # (TB, C, H) f32  initial_embeds tile
    mask = mask_ref[...]                 # (TB, C)    f32  intra_word_mask tile
    TB, C, H = ie.shape
    d = H // NUM_HEADS
    scale = 1.0 / (d ** 0.5)
    M = TB * C

    # char_embeds = concat(word_embeds, initial_embeds[:, 1:, :]) built in-register:
    # char position 0 takes the word embedding, all others the initial char embedding.
    # Pure VPU select; avoids an HBM concat pass and any sublane relayout.
    pos = jax.lax.broadcasted_iota(jnp.int32, (TB, C, 1), 1)
    x = jnp.where(pos == 0, we, ie)      # (TB, C, H)
    x2 = x.reshape(M, H)                 # flatten batch dims into the matmul M dim

    # --- fused QKV projection: one (M,H)@(H,3H) bf16 matmul, f32 accumulate ---
    qkv = jnp.dot(x2.astype(jnp.bfloat16), wqkv_ref[...],
                  preferred_element_type=jnp.float32) + bqkv_ref[...]   # (M, 3H)
    qkv3 = qkv.reshape(TB, C, 3 * H)

    # --- attention mask (XSoftmax semantics), hoisted out of the head loop ---
    mask2 = (mask[:, :, None] * mask[:, None, :]) > 0.0                 # (TB, C, C)
    abias = jnp.where(mask2, 0.0, -1e30)                                # additive fill
    mzero = mask2.astype(jnp.float32)                                   # prob zeroing

    # --- per-head attention (4-way unrolled; single-batch-dim dots) ---
    # TODO(synk): a single multi-batch-dim dot_general would remove the unrolled loop,
    # but Mosaic only reliably lowers <=1 batch dim, so heads are unrolled here.
    ctx_heads = []
    for h in range(NUM_HEADS):
        qh = qkv3[:, :, h * d:(h + 1) * d] * scale          # scale folded into q
        kh = qkv3[:, :, H + h * d:H + (h + 1) * d]
        vh = qkv3[:, :, 2 * H + h * d:2 * H + (h + 1) * d]
        s = jnp.einsum('bqd,bkd->bqk', qh, kh,
                       preferred_element_type=jnp.float32) + abias
        s = s - jnp.max(s, axis=-1, keepdims=True)
        p = jnp.exp(s)
        denom = jnp.sum(p, axis=-1, keepdims=True)
        probs = p * pl.reciprocal(denom, approx=True) * mzero
        ctx_heads.append(jnp.einsum('bqk,bkd->bqd', probs, vh,
                                    preferred_element_type=jnp.float32))
    ctx = jnp.concatenate(ctx_heads, axis=-1).reshape(M, H)             # (M, H)

    # --- attention output projection + residual + LayerNorm ---
    ao = jnp.dot(ctx.astype(jnp.bfloat16), wo_ref[...],
                 preferred_element_type=jnp.float32) + bo_ref[...]
    h1 = _layer_norm(ao + x2, g1_ref[...], be1_ref[...])

    # --- FFN + residual + LayerNorm ---
    # TODO(synk): DeBERTa uses exact erf-GELU; tanh approximation used here (EUP-friendly).
    inter = jax.nn.gelu(
        jnp.dot(h1.astype(jnp.bfloat16), wi_ref[...],
                preferred_element_type=jnp.float32) + bi_ref[...],
        approximate=True)
    ff = jnp.dot(inter.astype(jnp.bfloat16), wf_ref[...],
                 preferred_element_type=jnp.float32) + bf_ref[...]
    h2 = _layer_norm(ff + h1, g2_ref[...], be2_ref[...])

    # --- classifier Linear(H, 1): (1,H) x (M,H)^T -> lane-major (1, M) result ---
    logits = jnp.einsum('oh,mh->om', wc_ref[...], h2,
                        preferred_element_type=jnp.float32) + bc_ref[...]   # (1, M)
    out_ref[...] = logits.reshape(1, 1, M)                # lane-dense store


def _full_spec(arr):
    nd = arr.ndim
    return pl.BlockSpec(arr.shape, lambda i, nd=nd: (0,) * nd)


def _pick_tile_bw(BW, C, max_rows=512):
    """Largest divisor of BW with tile_bw*C <= max_rows, preferring lane-dense
    output (tile_bw*C % 128 == 0) and >=2 grid steps (both v7x TensorCores busy)."""
    cands = [t for t in range(1, BW + 1) if BW % t == 0 and t * C <= max_rows]
    return max(cands, key=lambda t: ((t * C) % 128 == 0, (BW // t) >= 2, t))


def pack_params(params):
    """Fuse q/k/v, cast matmul weights to bf16, reshape classifier weight to a row."""
    bqkv = jnp.concatenate([params["bq"], jnp.zeros_like(params["bq"]),
                            params["bv"]], axis=1)                       # k has no bias
    wqkv = jnp.concatenate([params["wq"], params["wk"], params["wv"]],
                           axis=1).astype(jnp.bfloat16)                  # (H, 3H)
    return [
        wqkv, bqkv,
        params["wo"].astype(jnp.bfloat16), params["bo"],
        params["g1"], params["be1"],
        params["wi"].astype(jnp.bfloat16), params["bi"],
        params["wf"].astype(jnp.bfloat16), params["bf"],
        params["g2"], params["be2"],
        params["wc"].reshape(1, -1), params["bc"],
    ]


def rtd_head_forward(word_embeds, initial_embeds, intra_word_mask, params,
                     input_shape, residual_word_embedding=False,
                     initial_word_embeds=None, tile_bw=None):
    """word_embeds: (B, W, H); initial_embeds: (B*W, C, H); intra_word_mask: (B*W, C)."""
    B, W, C, H = input_shape
    assert H % NUM_HEADS == 0, "hidden size must be divisible by num attention heads"
    BW = B * W
    if tile_bw is None:
        tile_bw = _pick_tile_bw(BW, C)
    assert BW % tile_bw == 0
    num_tiles = BW // tile_bw

    we = word_embeds.reshape(BW, 1, H).astype(jnp.float32)
    if residual_word_embedding:
        we = we + initial_word_embeds[:, None, :]
    ie = initial_embeds.astype(jnp.float32)                              # (BW, C, H)
    mask_f = intra_word_mask.astype(jnp.float32)

    packed = pack_params(params)
    in_specs = [
        pl.BlockSpec((tile_bw, 1, H), lambda i: (i, 0, 0)),   # word_embeds tile
        pl.BlockSpec((tile_bw, C, H), lambda i: (i, 0, 0)),   # initial_embeds tile
        pl.BlockSpec((tile_bw, C), lambda i: (i, 0)),         # mask tile
    ] + [_full_spec(p) for p in packed]                        # grid-invariant weights

    out = pl.pallas_call(
        rtd_head_kernel,
        out_shape=jax.ShapeDtypeStruct((num_tiles, 1, tile_bw * C), jnp.float32),
        grid=(num_tiles,),
        in_specs=in_specs,
        out_specs=pl.BlockSpec((1, 1, tile_bw * C), lambda i: (i, 0, 0)),
        compiler_params=pltpu.CompilerParams(
            dimension_semantics=("parallel",),
            vmem_limit_bytes=32 * 1024 * 1024),
    )(we, ie, mask_f, *packed)

    return out.reshape(B, W * C, 1)


def make_params(key, H, I):
    ks = jax.random.split(key, 8)
    init = lambda k, shape: jax.random.normal(k, shape, jnp.float32) * 0.02
    return dict(
        wq=init(ks[0], (H, H)), bq=jnp.zeros((1, H), jnp.float32),
        wk=init(ks[1], (H, H)),
        wv=init(ks[2], (H, H)), bv=jnp.zeros((1, H), jnp.float32),
        wo=init(ks[3], (H, H)), bo=jnp.zeros((1, H), jnp.float32),
        g1=jnp.ones((1, H), jnp.float32), be1=jnp.zeros((1, H), jnp.float32),
        wi=init(ks[4], (H, I)), bi=jnp.zeros((1, I), jnp.float32),
        wf=init(ks[5], (I, H)), bf=jnp.zeros((1, H), jnp.float32),
        g2=jnp.ones((1, H), jnp.float32), be2=jnp.zeros((1, H), jnp.float32),
        wc=init(ks[6], (H, 1)), bc=jnp.zeros((1, 1), jnp.float32),
    )


def _reference(word_embeds, initial_embeds, intra_word_mask, params, input_shape):
    """Plain-JAX reference mirroring the kernel math (bf16 matmul operands, f32 acc)."""
    B, W, C, H = input_shape
    BW = B * W
    d = H // NUM_HEADS
    bf16 = jnp.bfloat16
    mm = lambda a, w: jnp.dot(a.astype(bf16), w.astype(bf16),
                              preferred_element_type=jnp.float32)
    p = params
    x = jnp.concatenate([word_embeds.reshape(BW, 1, H),
                         initial_embeds[:, 1:, :]], axis=1)
    mask = intra_word_mask.astype(jnp.float32)
    x2 = x.reshape(BW * C, H)
    q = (mm(x2, p["wq"]) + p["bq"]).reshape(BW, C, H)
    k = mm(x2, p["wk"]).reshape(BW, C, H)
    v = (mm(x2, p["wv"]) + p["bv"]).reshape(BW, C, H)
    mask2 = (mask[:, :, None] * mask[:, None, :]) > 0
    abias = jnp.where(mask2, 0.0, -1e30)
    mzero = mask2.astype(jnp.float32)
    heads = []
    for h in range(NUM_HEADS):
        qh, kh, vh = (t[:, :, h * d:(h + 1) * d] for t in (q, k, v))
        s = jnp.einsum('bqd,bkd->bqk', qh * (1.0 / (d ** 0.5)), kh) + abias
        s = s - jnp.max(s, axis=-1, keepdims=True)
        e = jnp.exp(s)
        probs = (e / jnp.sum(e, axis=-1, keepdims=True)) * mzero
        heads.append(jnp.einsum('bqk,bkd->bqd', probs, vh))
    ctx = jnp.concatenate(heads, axis=-1).reshape(BW * C, H)
    ao = mm(ctx, p["wo"]) + p["bo"]
    h1 = _layer_norm(ao + x2, p["g1"], p["be1"])
    inter = jax.nn.gelu(mm(h1, p["wi"]) + p["bi"], approximate=True)
    h2 = _layer_norm(mm(inter, p["wf"]) + p["bf"] + h1, p["g2"], p["be2"])
    logits = h2 @ p["wc"] + p["bc"]
    return logits.reshape(B, W * C, 1)


if __name__ == "__main__":
    B, W, C, H, I = 2, 16, 8, 32, 64       # batch, num_word, num_char, hidden, ffn
    BW = B * W
    key = jax.random.PRNGKey(0)
    k_params, k_we, k_ie, k_m = jax.random.split(key, 4)

    params = make_params(k_params, H, I)
    word_embeds = jax.random.normal(k_we, (B, W, H), jnp.float32)
    initial_embeds = jax.random.normal(k_ie, (BW, C, H), jnp.float32)
    intra_word_mask = (jax.random.uniform(k_m, (BW, C)) > 0.3).astype(jnp.float32)
    intra_word_mask = intra_word_mask.at[:, 0].set(1.0)

    out = rtd_head_forward(word_embeds, initial_embeds, intra_word_mask, params,
                           (B, W, C, H))
    out = jax.block_until_ready(out)
    assert out.shape == (B, W * C, 1), out.shape

    ref = _reference(word_embeds, initial_embeds, intra_word_mask, params,
                     (B, W, C, H))
    err = float(jnp.max(jnp.abs(out - ref)))
    assert err < 5e-3, err

    print("KERNEL_OK")
</pallas_src>

<mosaic_0001>
module attributes {stable_mosaic.version = 11 : i64} {
  func.func @rtd_head_kernel(%arg0: i32, %arg1: memref<16x1x32xf32, #tpu.memory_space<vmem>>, %arg2: memref<16x8x32xf32, #tpu.memory_space<vmem>>, %arg3: memref<16x8xf32, #tpu.memory_space<vmem>>, %arg4: memref<32x96xbf16, #tpu.memory_space<vmem>>, %arg5: memref<1x96xf32, #tpu.memory_space<vmem>>, %arg6: memref<32x32xbf16, #tpu.memory_space<vmem>>, %arg7: memref<1x32xf32, #tpu.memory_space<vmem>>, %arg8: memref<1x32xf32, #tpu.memory_space<vmem>>, %arg9: memref<1x32xf32, #tpu.memory_space<vmem>>, %arg10: memref<32x64xbf16, #tpu.memory_space<vmem>>, %arg11: memref<1x64xf32, #tpu.memory_space<vmem>>, %arg12: memref<64x32xbf16, #tpu.memory_space<vmem>>, %arg13: memref<1x32xf32, #tpu.memory_space<vmem>>, %arg14: memref<1x32xf32, #tpu.memory_space<vmem>>, %arg15: memref<1x32xf32, #tpu.memory_space<vmem>>, %arg16: memref<1x32xf32, #tpu.memory_space<vmem>>, %arg17: memref<1x1xf32, #tpu.memory_space<vmem>>, %arg18: memref<1x1x128xf32, #tpu.memory_space<vmem>>) attributes {dimension_semantics = [#tpu.dimension_semantics<parallel>], iteration_bounds = array<i64: 2>, scalar_prefetch = 0 : i64, scratch_operands = 0 : i64, tpu.core_type = #tpu.core_type<tc>, window_params = [{transform_indices = @transform_0, window_bounds = array<i64: 16, 1, 32>}, {transform_indices = @transform_1, window_bounds = array<i64: 16, 8, 32>}, {transform_indices = @transform_2, window_bounds = array<i64: 16, 8>}, {pipeline_mode = #tpu.pipeline_mode<synchronous>, transform_indices = @transform_3, window_bounds = array<i64: 32, 96>}, {pipeline_mode = #tpu.pipeline_mode<synchronous>, transform_indices = @transform_4, window_bounds = array<i64: 1, 96>}, {pipeline_mode = #tpu.pipeline_mode<synchronous>, transform_indices = @transform_5, window_bounds = array<i64: 32, 32>}, {pipeline_mode = #tpu.pipeline_mode<synchronous>, transform_indices = @transform_6, window_bounds = array<i64: 1, 32>}, {pipeline_mode = #tpu.pipeline_mode<synchronous>, transform_indices = @transform_7, window_bounds = array<i64: 1, 32>}, {pipeline_mode = #tpu.pipeline_mode<synchronous>, transform_indices = @transform_8, window_bounds = array<i64: 1, 32>}, {pipeline_mode = #tpu.pipeline_mode<synchronous>, transform_indices = @transform_9, window_bounds = array<i64: 32, 64>}, {pipeline_mode = #tpu.pipeline_mode<synchronous>, transform_indices = @transform_10, window_bounds = array<i64: 1, 64>}, {pipeline_mode = #tpu.pipeline_mode<synchronous>, transform_indices = @transform_11, window_bounds = array<i64: 64, 32>}, {pipeline_mode = #tpu.pipeline_mode<synchronous>, transform_indices = @transform_12, window_bounds = array<i64: 1, 32>}, {pipeline_mode = #tpu.pipeline_mode<synchronous>, transform_indices = @transform_13, window_bounds = array<i64: 1, 32>}, {pipeline_mode = #tpu.pipeline_mode<synchronous>, transform_indices = @transform_14, window_bounds = array<i64: 1, 32>}, {pipeline_mode = #tpu.pipeline_mode<synchronous>, transform_indices = @transform_15, window_bounds = array<i64: 1, 32>}, {pipeline_mode = #tpu.pipeline_mode<synchronous>, transform_indices = @transform_16, window_bounds = array<i64: 1, 1>}, {transform_indices = @transform_17, window_bounds = array<i64: 1, 1, 128>}]} {
    %c0 = arith.constant 0 : index
    %c0_0 = arith.constant 0 : index
    %c0_1 = arith.constant 0 : index
    %0 = vector.load %arg1[%c0, %c0_0, %c0_1] : memref<16x1x32xf32, #tpu.memory_space<vmem>>, vector<16x1x32xf32>
    %c0_2 = arith.constant 0 : index
    %c0_3 = arith.constant 0 : index
    %c0_4 = arith.constant 0 : index
    %1 = vector.load %arg2[%c0_2, %c0_3, %c0_4] : memref<16x8x32xf32, #tpu.memory_space<vmem>>, vector<16x8x32xf32>
    %c0_5 = arith.constant 0 : index
    %c0_6 = arith.constant 0 : index
    %2 = vector.load %arg3[%c0_5, %c0_6] : memref<16x8xf32, #tpu.memory_space<vmem>>, vector<16x8xf32>
    %3 = tpu.iota {dimensions = array<i32: 1>} : vector<16x8x1xi32>
    %c0_i32 = arith.constant 0 : i32
    %4 = vector.broadcast %c0_i32 : i32 to vector<16x8x1xi32>
    %5 = arith.cmpi eq, %3, %4 : vector<16x8x1xi32>
    %6 = vector.shape_cast %5 : vector<16x8x1xi1> to vector<16x8x1xi1>
    %7 = vector.broadcast %6 : vector<16x8x1xi1> to vector<16x8x32xi1>
    %8 = vector.shape_cast %0 : vector<16x1x32xf32> to vector<16x1x32xf32>
    %9 = vector.broadcast %8 : vector<16x1x32xf32> to vector<16x8x32xf32>
    %10 = arith.select %7, %9, %1 : vector<16x8x32xi1>, vector<16x8x32xf32>
    %11 = vector.shape_cast %10 : vector<16x8x32xf32> to vector<128x32xf32>
    %12 = arith.truncf %11 : vector<128x32xf32> to vector<128x32xbf16>
    %c0_7 = arith.constant 0 : index
    %c0_8 = arith.constant 0 : index
    %13 = vector.load %arg4[%c0_7, %c0_8] : memref<32x96xbf16, #tpu.memory_space<vmem>>, vector<32x96xbf16>
    %cst = arith.constant dense<0.000000e+00> : vector<128x96xf32>
    %14 = tpu.matmul %12, %13, %cst {dimension_numbers = #tpu.dot_dimension_numbers<[1], [0], [0], [1], [0, 0, 1, 1], [], []>} : vector<128x32xbf16>, vector<32x96xbf16>, vector<128x96xf32> -> vector<128x96xf32>
    %c0_9 = arith.constant 0 : index
    %c0_10 = arith.constant 0 : index
    %15 = vector.load %arg5[%c0_9, %c0_10] : memref<1x96xf32, #tpu.memory_space<vmem>>, vector<1x96xf32>
    %16 = vector.broadcast %15 : vector<1x96xf32> to vector<128x96xf32>
    %17 = arith.addf %14, %16 : vector<128x96xf32>
    %18 = vector.shape_cast %17 : vector<128x96xf32> to vector<16x8x96xf32>
    %19 = vector.shape_cast %2 : vector<16x8xf32> to vector<16x8x1xf32>
    %20 = vector.shape_cast %2 : vector<16x8xf32> to vector<16x1x8xf32>
    %21 = vector.broadcast %19 : vector<16x8x1xf32> to vector<16x8x8xf32>
    %22 = vector.broadcast %20 : vector<16x1x8xf32> to vector<16x8x8xf32>
    %23 = arith.mulf %21, %22 : vector<16x8x8xf32>
    %cst_11 = arith.constant 0.000000e+00 : f32
    %24 = vector.broadcast %cst_11 : f32 to vector<16x8x8xf32>
    %25 = arith.cmpf ogt, %23, %24 : vector<16x8x8xf32>
    %cst_12 = arith.constant 0.000000e+00 : f32
    %cst_13 = arith.constant -1.000000e+30 : f32
    %26 = vector.broadcast %cst_12 : f32 to vector<16x8x8xf32>
    %27 = vector.broadcast %cst_13 : f32 to vector<16x8x8xf32>
    %28 = arith.select %25, %26, %27 : vector<16x8x8xi1>, vector<16x8x8xf32>
    %29 = arith.extui %25 : vector<16x8x8xi1> to vector<16x8x8xi32>
    %30 = arith.sitofp %29 : vector<16x8x8xi32> to vector<16x8x8xf32>
    %31 = vector.extract_strided_slice %18 {offsets = [0, 0, 0], sizes = [16, 8, 8], strides = [1, 1, 1]} : vector<16x8x96xf32> to vector<16x8x8xf32>
    %cst_14 = arith.constant 0.353553385 : f32
    %32 = vector.broadcast %cst_14 : f32 to vector<16x8x8xf32>
    %33 = arith.mulf %31, %32 : vector<16x8x8xf32>
    %34 = vector.extract_strided_slice %18 {offsets = [0, 0, 32], sizes = [16, 8, 8], strides = [1, 1, 1]} : vector<16x8x96xf32> to vector<16x8x8xf32>
    %35 = vector.extract_strided_slice %18 {offsets = [0, 0, 64], sizes = [16, 8, 8], strides = [1, 1, 1]} : vector<16x8x96xf32> to vector<16x8x8xf32>
    "tpu.trace_start"() <{level = 10 : i32, message = "bqd,bkd->bqk"}> : () -> ()
    %cst_15 = arith.constant dense<0.000000e+00> : vector<16x8x8xf32>
    %36 = tpu.matmul %33, %34, %cst_15 {dimension_numbers = #tpu.dot_dimension_numbers<[2], [2], [1], [1], [0, 0, 0, 1, 1, 1], [0], [0]>} : vector<16x8x8xf32>, vector<16x8x8xf32>, vector<16x8x8xf32> -> vector<16x8x8xf32>
    "tpu.trace_stop"() : () -> ()
    %37 = arith.addf %36, %28 : vector<16x8x8xf32>
    %cst_16 = arith.constant dense<0xFF800000> : vector<16x8xf32>
    %38 = vector.multi_reduction <maximumf>, %37, %cst_16 [2] : vector<16x8x8xf32> to vector<16x8xf32>
    %39 = vector.shape_cast %38 : vector<16x8xf32> to vector<16x8x1xf32>
    %40 = vector.broadcast %39 : vector<16x8x1xf32> to vector<16x8x8xf32>
    %41 = arith.subf %37, %40 : vector<16x8x8xf32>
    %42 = math.exp %41 : vector<16x8x8xf32>
    %cst_17 = arith.constant dense<0.000000e+00> : vector<16x8xf32>
    %43 = vector.multi_reduction <add>, %42, %cst_17 [2] : vector<16x8x8xf32> to vector<16x8xf32>
    %44 = vector.shape_cast %43 : vector<16x8xf32> to vector<16x8x1xf32>
    %45 = tpu.reciprocal %44 {approx = true} : vector<16x8x1xf32> -> vector<16x8x1xf32>
    %46 = vector.broadcast %45 : vector<16x8x1xf32> to vector<16x8x8xf32>
    %47 = arith.mulf %42, %46 : vector<16x8x8xf32>
    %48 = arith.mulf %47, %30 : vector<16x8x8xf32>
    "tpu.trace_start"() <{level = 10 : i32, message = "bqk,bkd->bqd"}> : () -> ()
    %cst_18 = arith.constant dense<0.000000e+00> : vector<16x8x8xf32>
    %49 = tpu.matmul %48, %35, %cst_18 {dimension_numbers = #tpu.dot_dimension_numbers<[2], [1], [1], [2], [0, 0, 0, 1, 1, 2], [0], [0]>} : vector<16x8x8xf32>, vector<16x8x8xf32>, vector<16x8x8xf32> -> vector<16x8x8xf32>
    "tpu.trace_stop"() : () -> ()
    %50 = vector.extract_strided_slice %18 {offsets = [0, 0, 8], sizes = [16, 8, 8], strides = [1, 1, 1]} : vector<16x8x96xf32> to vector<16x8x8xf32>
    %cst_19 = arith.constant 0.353553385 : f32
    %51 = vector.broadcast %cst_19 : f32 to vector<16x8x8xf32>
    %52 = arith.mulf %50, %51 : vector<16x8x8xf32>
    %53 = vector.extract_strided_slice %18 {offsets = [0, 0, 40], sizes = [16, 8, 8], strides = [1, 1, 1]} : vector<16x8x96xf32> to vector<16x8x8xf32>
    %54 = vector.extract_strided_slice %18 {offsets = [0, 0, 72], sizes = [16, 8, 8], strides = [1, 1, 1]} : vector<16x8x96xf32> to vector<16x8x8xf32>
    "tpu.trace_start"() <{level = 10 : i32, message = "bqd,bkd->bqk"}> : () -> ()
    %cst_20 = arith.constant dense<0.000000e+00> : vector<16x8x8xf32>
    %55 = tpu.matmul %52, %53, %cst_20 {dimension_numbers = #tpu.dot_dimension_numbers<[2], [2], [1], [1], [0, 0, 0, 1, 1, 1], [0], [0]>} : vector<16x8x8xf32>, vector<16x8x8xf32>, vector<16x8x8xf32> -> vector<16x8x8xf32>
    "tpu.trace_stop"() : () -> ()
    %56 = arith.addf %55, %28 : vector<16x8x8xf32>
    %cst_21 = arith.constant dense<0xFF800000> : vector<16x8xf32>
    %57 = vector.multi_reduction <maximumf>, %56, %cst_21 [2] : vector<16x8x8xf32> to vector<16x8xf32>
    %58 = vector.shape_cast %57 : vector<16x8xf32> to vector<16x8x1xf32>
    %59 = vector.broadcast %58 : vector<16x8x1xf32> to vector<16x8x8xf32>
    %60 = arith.subf %56, %59 : vector<16x8x8xf32>
    %61 = math.exp %60 : vector<16x8x8xf32>
    %cst_22 = arith.constant dense<0.000000e+00> : vector<16x8xf32>
    %62 = vector.multi_reduction <add>, %61, %cst_22 [2] : vector<16x8x8xf32> to vector<16x8xf32>
    %63 = vector.shape_cast %62 : vector<16x8xf32> to vector<16x8x1xf32>
    %64 = tpu.reciprocal %63 {approx = true} : vector<16x8x1xf32> -> vector<16x8x1xf32>
    %65 = vector.broadcast %64 : vector<16x8x1xf32> to vector<16x8x8xf32>
    %66 = arith.mulf %61, %65 : vector<16x8x8xf32>
    %67 = arith.mulf %66, %30 : vector<16x8x8xf32>
    "tpu.trace_start"() <{level = 10 : i32, message = "bqk,bkd->bqd"}> : () -> ()
    %cst_23 = arith.constant dense<0.000000e+00> : vector<16x8x8xf32>
    %68 = tpu.matmul %67, %54, %cst_23 {dimension_numbers = #tpu.dot_dimension_numbers<[2], [1], [1], [2], [0, 0, 0, 1, 1, 2], [0], [0]>} : vector<16x8x8xf32>, vector<16x8x8xf32>, vector<16x8x8xf32> -> vector<16x8x8xf32>
    "tpu.trace_stop"() : () -> ()
    %69 = vector.extract_strided_slice %18 {offsets = [0, 0, 16], sizes = [16, 8, 8], strides = [1, 1, 1]} : vector<16x8x96xf32> to vector<16x8x8xf32>
    %cst_24 = arith.constant 0.353553385 : f32
    %70 = vector.broadcast %cst_24 : f32 to vector<16x8x8xf32>
    %71 = arith.mulf %69, %70 : vector<16x8x8xf32>
    %72 = vector.extract_strided_slice %18 {offsets = [0, 0, 48], sizes = [16, 8, 8], strides = [1, 1, 1]} : vector<16x8x96xf32> to vector<16x8x8xf32>
    %73 = vector.extract_strided_slice %18 {offsets = [0, 0, 80], sizes = [16, 8, 8], strides = [1, 1, 1]} : vector<16x8x96xf32> to vector<16x8x8xf32>
    "tpu.trace_start"() <{level = 10 : i32, message = "bqd,bkd->bqk"}> : () -> ()
    %cst_25 = arith.constant dense<0.000000e+00> : vector<16x8x8xf32>
    %74 = tpu.matmul %71, %72, %cst_25 {dimension_numbers = #tpu.dot_dimension_numbers<[2], [2], [1], [1], [0, 0, 0, 1, 1, 1], [0], [0]>} : vector<16x8x8xf32>, vector<16x8x8xf32>, vector<16x8x8xf32> -> vector<16x8x8xf32>
    "tpu.trace_stop"() : () -> ()
    %75 = arith.addf %74, %28 : vector<16x8x8xf32>
    %cst_26 = arith.constant dense<0xFF800000> : vector<16x8xf32>
    %76 = vector.multi_reduction <maximumf>, %75, %cst_26 [2] : vector<16x8x8xf32> to vector<16x8xf32>
    %77 = vector.shape_cast %76 : vector<16x8xf32> to vector<16x8x1xf32>
    %78 = vector.broadcast %77 : vector<16x8x1xf32> to vector<16x8x8xf32>
    %79 = arith.subf %75, %78 : vector<16x8x8xf32>
    %80 = math.exp %79 : vector<16x8x8xf32>
    %cst_27 = arith.constant dense<0.000000e+00> : vector<16x8xf32>
    %81 = vector.multi_reduction <add>, %80, %cst_27 [2] : vector<16x8x8xf32> to vector<16x8xf32>
    %82 = vector.shape_cast %81 : vector<16x8xf32> to vector<16x8x1xf32>
    %83 = tpu.reciprocal %82 {approx = true} : vector<16x8x1xf32> -> vector<16x8x1xf32>
    %84 = vector.broadcast %83 : vector<16x8x1xf32> to vector<16x8x8xf32>
    %85 = arith.mulf %80, %84 : vector<16x8x8xf32>
    %86 = arith.mulf %85, %30 : vector<16x8x8xf32>
    "tpu.trace_start"() <{level = 10 : i32, message = "bqk,bkd->bqd"}> : () -> ()
    %cst_28 = arith.constant dense<0.000000e+00> : vector<16x8x8xf32>
    %87 = tpu.matmul %86, %73, %cst_28 {dimension_numbers = #tpu.dot_dimension_numbers<[2], [1], [1], [2], [0, 0, 0, 1, 1, 2], [0], [0]>} : vector<16x8x8xf32>, vector<16x8x8xf32>, vector<16x8x8xf32> -> vector<16x8x8xf32>
    "tpu.trace_stop"() : () -> ()
    %88 = vector.extract_strided_slice %18 {offsets = [0, 0, 24], sizes = [16, 8, 8], strides = [1, 1, 1]} : vector<16x8x96xf32> to vector<16x8x8xf32>
    %cst_29 = arith.constant 0.353553385 : f32
    %89 = vector.broadcast %cst_29 : f32 to vector<16x8x8xf32>
    %90 = arith.mulf %88, %89 : vector<16x8x8xf32>
    %91 = vector.extract_strided_slice %18 {offsets = [0, 0, 56], sizes = [16, 8, 8], strides = [1, 1, 1]} : vector<16x8x96xf32> to vector<16x8x8xf32>
    %92 = vector.extract_strided_slice %18 {offsets = [0, 0, 88], sizes = [16, 8, 8], strides = [1, 1, 1]} : vector<16x8x96xf32> to vector<16x8x8xf32>
    "tpu.trace_start"() <{level = 10 : i32, message = "bqd,bkd->bqk"}> : () -> ()
    %cst_30 = arith.constant dense<0.000000e+00> : vector<16x8x8xf32>
    %93 = tpu.matmul %90, %91, %cst_30 {dimension_numbers = #tpu.dot_dimension_numbers<[2], [2], [1], [1], [0, 0, 0, 1, 1, 1], [0], [0]>} : vector<16x8x8xf32>, vector<16x8x8xf32>, vector<16x8x8xf32> -> vector<16x8x8xf32>
    "tpu.trace_stop"() : () -> ()
    %94 = arith.addf %93, %28 : vector<16x8x8xf32>
    %cst_31 = arith.constant dense<0xFF800000> : vector<16x8xf32>
    %95 = vector.multi_reduction <maximumf>, %94, %cst_31 [2] : vector<16x8x8xf32> to vector<16x8xf32>
    %96 = vector.shape_cast %95 : vector<16x8xf32> to vector<16x8x1xf32>
    %97 = vector.broadcast %96 : vector<16x8x1xf32> to vector<16x8x8xf32>
    %98 = arith.subf %94, %97 : vector<16x8x8xf32>
    %99 = math.exp %98 : vector<16x8x8xf32>
    %cst_32 = arith.constant dense<0.000000e+00> : vector<16x8xf32>
    %100 = vector.multi_reduction <add>, %99, %cst_32 [2] : vector<16x8x8xf32> to vector<16x8xf32>
    %101 = vector.shape_cast %100 : vector<16x8xf32> to vector<16x8x1xf32>
    %102 = tpu.reciprocal %101 {approx = true} : vector<16x8x1xf32> -> vector<16x8x1xf32>
    %103 = vector.broadcast %102 : vector<16x8x1xf32> to vector<16x8x8xf32>
    %104 = arith.mulf %99, %103 : vector<16x8x8xf32>
    %105 = arith.mulf %104, %30 : vector<16x8x8xf32>
    "tpu.trace_start"() <{level = 10 : i32, message = "bqk,bkd->bqd"}> : () -> ()
    %cst_33 = arith.constant dense<0.000000e+00> : vector<16x8x8xf32>
    %106 = tpu.matmul %105, %92, %cst_33 {dimension_numbers = #tpu.dot_dimension_numbers<[2], [1], [1], [2], [0, 0, 0, 1, 1, 2], [0], [0]>} : vector<16x8x8xf32>, vector<16x8x8xf32>, vector<16x8x8xf32> -> vector<16x8x8xf32>
    "tpu.trace_stop"() : () -> ()
    %107 = tpu.concatenate %49, %68, %87, %106 in 2 : vector<16x8x8xf32>, vector<16x8x8xf32>, vector<16x8x8xf32>, vector<16x8x8xf32> -> vector<16x8x32xf32>
    %108 = vector.shape_cast %107 : vector<16x8x32xf32> to vector<128x32xf32>
    %109 = arith.truncf %108 : vector<128x32xf32> to vector<128x32xbf16>
    %c0_34 = arith.constant 0 : index
    %c0_35 = arith.constant 0 : index
    %110 = vector.load %arg6[%c0_34, %c0_35] : memref<32x32xbf16, #tpu.memory_space<vmem>>, vector<32x32xbf16>
    %cst_36 = arith.constant dense<0.000000e+00> : vector<128x32xf32>
    %111 = tpu.matmul %109, %110, %cst_36 {dimension_numbers = #tpu.dot_dimension_numbers<[1], [0], [0], [1], [0, 0, 1, 1], [], []>} : vector<128x32xbf16>, vector<32x32xbf16>, vector<128x32xf32> -> vector<128x32xf32>
    %c0_37 = arith.constant 0 : index
    %c0_38 = arith.constant 0 : index
    %112 = vector.load %arg7[%c0_37, %c0_38] : memref<1x32xf32, #tpu.memory_space<vmem>>, vector<1x32xf32>
    %113 = vector.broadcast %112 : vector<1x32xf32> to vector<128x32xf32>
    %114 = arith.addf %111, %113 : vector<128x32xf32>
    %115 = arith.addf %114, %11 : vector<128x32xf32>
    %c0_39 = arith.constant 0 : index
    %c0_40 = arith.constant 0 : index
    %116 = vector.load %arg8[%c0_39, %c0_40] : memref<1x32xf32, #tpu.memory_space<vmem>>, vector<1x32xf32>
    %c0_41 = arith.constant 0 : index
    %c0_42 = arith.constant 0 : index
    %117 = vector.load %arg9[%c0_41, %c0_42] : memref<1x32xf32, #tpu.memory_space<vmem>>, vector<1x32xf32>
    %cst_43 = arith.constant dense<0.000000e+00> : vector<128xf32>
    %118 = vector.multi_reduction <add>, %115, %cst_43 [1] : vector<128x32xf32> to vector<128xf32>
    %119 = vector.shape_cast %118 : vector<128xf32> to vector<128x1xf32>
    %cst_44 = arith.constant 3.200000e+01 : f32
    %120 = vector.broadcast %cst_44 : f32 to vector<128x1xf32>
    %121 = arith.divf %119, %120 : vector<128x1xf32>
    %122 = vector.broadcast %121 : vector<128x1xf32> to vector<128x32xf32>
    %123 = arith.subf %115, %122 : vector<128x32xf32>
    %124 = arith.mulf %123, %123 : vector<128x32xf32>
    %cst_45 = arith.constant dense<0.000000e+00> : vector<128xf32>
    %125 = vector.multi_reduction <add>, %124, %cst_45 [1] : vector<128x32xf32> to vector<128xf32>
    %126 = vector.shape_cast %125 : vector<128xf32> to vector<128x1xf32>
    %cst_46 = arith.constant 3.200000e+01 : f32
    %127 = vector.broadcast %cst_46 : f32 to vector<128x1xf32>
    %128 = arith.divf %126, %127 : vector<128x1xf32>
    %129 = vector.broadcast %121 : vector<128x1xf32> to vector<128x32xf32>
    %130 = arith.subf %115, %129 : vector<128x32xf32>
    %cst_47 = arith.constant 1.000000e-07 : f32
    %131 = vector.broadcast %cst_47 : f32 to vector<128x1xf32>
    %132 = arith.addf %128, %131 : vector<128x1xf32>
    %133 = math.rsqrt %132 : vector<128x1xf32>
    %134 = vector.broadcast %133 : vector<128x1xf32> to vector<128x32xf32>
    %135 = arith.mulf %130, %134 : vector<128x32xf32>
    %136 = vector.broadcast %116 : vector<1x32xf32> to vector<128x32xf32>
    %137 = arith.mulf %135, %136 : vector<128x32xf32>
    %138 = vector.broadcast %117 : vector<1x32xf32> to vector<128x32xf32>
    %139 = arith.addf %137, %138 : vector<128x32xf32>
    %140 = arith.truncf %139 : vector<128x32xf32> to vector<128x32xbf16>
    %c0_48 = arith.constant 0 : index
    %c0_49 = arith.constant 0 : index
    %141 = vector.load %arg10[%c0_48, %c0_49] : memref<32x64xbf16, #tpu.memory_space<vmem>>, vector<32x64xbf16>
    %cst_50 = arith.constant dense<0.000000e+00> : vector<128x64xf32>
    %142 = tpu.matmul %140, %141, %cst_50 {dimension_numbers = #tpu.dot_dimension_numbers<[1], [0], [0], [1], [0, 0, 1, 1], [], []>} : vector<128x32xbf16>, vector<32x64xbf16>, vector<128x64xf32> -> vector<128x64xf32>
    %c0_51 = arith.constant 0 : index
    %c0_52 = arith.constant 0 : index
    %143 = vector.load %arg11[%c0_51, %c0_52] : memref<1x64xf32, #tpu.memory_space<vmem>>, vector<1x64xf32>
    %144 = vector.broadcast %143 : vector<1x64xf32> to vector<128x64xf32>
    %145 = arith.addf %142, %144 : vector<128x64xf32>
    %146 = arith.mulf %145, %145 : vector<128x64xf32>
    %147 = arith.mulf %145, %146 : vector<128x64xf32>
    %cst_53 = arith.constant 4.471500e-02 : f32
    %148 = vector.broadcast %cst_53 : f32 to vector<128x64xf32>
    %149 = arith.mulf %148, %147 : vector<128x64xf32>
    %150 = arith.addf %145, %149 : vector<128x64xf32>
    %cst_54 = arith.constant 0.797884583 : f32
    %151 = vector.broadcast %cst_54 : f32 to vector<128x64xf32>
    %152 = arith.mulf %151, %150 : vector<128x64xf32>
    %153 = math.tanh %152 : vector<128x64xf32>
    %cst_55 = arith.constant 1.000000e+00 : f32
    %154 = vector.broadcast %cst_55 : f32 to vector<128x64xf32>
    %155 = arith.addf %154, %153 : vector<128x64xf32>
    %cst_56 = arith.constant 5.000000e-01 : f32
    %156 = vector.broadcast %cst_56 : f32 to vector<128x64xf32>
    %157 = arith.mulf %156, %155 : vector<128x64xf32>
    %158 = arith.mulf %145, %157 : vector<128x64xf32>
    %159 = arith.truncf %158 : vector<128x64xf32> to vector<128x64xbf16>
    %c0_57 = arith.constant 0 : index
    %c0_58 = arith.constant 0 : index
    %160 = vector.load %arg12[%c0_57, %c0_58] : memref<64x32xbf16, #tpu.memory_space<vmem>>, vector<64x32xbf16>
    %cst_59 = arith.constant dense<0.000000e+00> : vector<128x32xf32>
    %161 = tpu.matmul %159, %160, %cst_59 {dimension_numbers = #tpu.dot_dimension_numbers<[1], [0], [0], [1], [0, 0, 1, 1], [], []>} : vector<128x64xbf16>, vector<64x32xbf16>, vector<128x32xf32> -> vector<128x32xf32>
    %c0_60 = arith.constant 0 : index
    %c0_61 = arith.constant 0 : index
    %162 = vector.load %arg13[%c0_60, %c0_61] : memref<1x32xf32, #tpu.memory_space<vmem>>, vector<1x32xf32>
    %163 = vector.broadcast %162 : vector<1x32xf32> to vector<128x32xf32>
    %164 = arith.addf %161, %163 : vector<128x32xf32>
    %165 = arith.addf %164, %139 : vector<128x32xf32>
    %c0_62 = arith.constant 0 : index
    %c0_63 = arith.constant 0 : index
    %166 = vector.load %arg14[%c0_62, %c0_63] : memref<1x32xf32, #tpu.memory_space<vmem>>, vector<1x32xf32>
    %c0_64 = arith.constant 0 : index
    %c0_65 = arith.constant 0 : index
    %167 = vector.load %arg15[%c0_64, %c0_65] : memref<1x32xf32, #tpu.memory_space<vmem>>, vector<1x32xf32>
    %cst_66 = arith.constant dense<0.000000e+00> : vector<128xf32>
    %168 = vector.multi_reduction <add>, %165, %cst_66 [1] : vector<128x32xf32> to vector<128xf32>
    %169 = vector.shape_cast %168 : vector<128xf32> to vector<128x1xf32>
    %cst_67 = arith.constant 3.200000e+01 : f32
    %170 = vector.broadcast %cst_67 : f32 to vector<128x1xf32>
    %171 = arith.divf %169, %170 : vector<128x1xf32>
    %172 = vector.broadcast %171 : vector<128x1xf32> to vector<128x32xf32>
    %173 = arith.subf %165, %172 : vector<128x32xf32>
    %174 = arith.mulf %173, %173 : vector<128x32xf32>
    %cst_68 = arith.constant dense<0.000000e+00> : vector<128xf32>
    %175 = vector.multi_reduction <add>, %174, %cst_68 [1] : vector<128x32xf32> to vector<128xf32>
    %176 = vector.shape_cast %175 : vector<128xf32> to vector<128x1xf32>
    %cst_69 = arith.constant 3.200000e+01 : f32
    %177 = vector.broadcast %cst_69 : f32 to vector<128x1xf32>
    %178 = arith.divf %176, %177 : vector<128x1xf32>
    %179 = vector.broadcast %171 : vector<128x1xf32> to vector<128x32xf32>
    %180 = arith.subf %165, %179 : vector<128x32xf32>
    %cst_70 = arith.constant 1.000000e-07 : f32
    %181 = vector.broadcast %cst_70 : f32 to vector<128x1xf32>
    %182 = arith.addf %178, %181 : vector<128x1xf32>
    %183 = math.rsqrt %182 : vector<128x1xf32>
    %184 = vector.broadcast %183 : vector<128x1xf32> to vector<128x32xf32>
    %185 = arith.mulf %180, %184 : vector<128x32xf32>
    %186 = vector.broadcast %166 : vector<1x32xf32> to vector<128x32xf32>
    %187 = arith.mulf %185, %186 : vector<128x32xf32>
    %188 = vector.broadcast %167 : vector<1x32xf32> to vector<128x32xf32>
    %189 = arith.addf %187, %188 : vector<128x32xf32>
    %c0_71 = arith.constant 0 : index
    %c0_72 = arith.constant 0 : index
    %190 = vector.load %arg16[%c0_71, %c0_72] : memref<1x32xf32, #tpu.memory_space<vmem>>, vector<1x32xf32>
    "tpu.trace_start"() <{level = 10 : i32, message = "oh,mh->om"}> : () -> ()
    %cst_73 = arith.constant dense<0.000000e+00> : vector<1x128xf32>
    %191 = tpu.matmul %190, %189, %cst_73 {dimension_numbers = #tpu.dot_dimension_numbers<[1], [1], [0], [0], [0, 0, 1, 0], [], []>} : vector<1x32xf32>, vector<128x32xf32>, vector<1x128xf32> -> vector<1x128xf32>
    "tpu.trace_stop"() : () -> ()
    %c0_74 = arith.constant 0 : index
    %c0_75 = arith.constant 0 : index
    %192 = vector.load %arg17[%c0_74, %c0_75] : memref<1x1xf32, #tpu.memory_space<vmem>>, vector<1x1xf32>
    %193 = vector.broadcast %192 : vector<1x1xf32> to vector<1x128xf32>
    %194 = arith.addf %191, %193 : vector<1x128xf32>
    %195 = vector.shape_cast %194 : vector<1x128xf32> to vector<1x1x128xf32>
    %c0_76 = arith.constant 0 : index
    %c0_77 = arith.constant 0 : index
    %c0_78 = arith.constant 0 : index
    %196 = vector.load %arg18[%c0_76, %c0_77, %c0_78] : memref<1x1x128xf32, #tpu.memory_space<vmem>>, vector<1x1x128xf32>
    tpu.vector_store %arg18[%c0_76, %c0_77, %c0_78], %195 {strides = array<i32>} : memref<1x1x128xf32, #tpu.memory_space<vmem>>, vector<1x1x128xf32>,
    return
  }
  func.func @transform_0(%arg0: i32) -> (i32, i32, i32) {
    %c0_i32 = arith.constant 0 : i32
    %c0_i32_0 = arith.constant 0 : i32
    %c0_i32_1 = arith.constant 0 : i32
    return %arg0, %c0_i32, %c0_i32_0 : i32, i32, i32
  }
  func.func @transform_1(%arg0: i32) -> (i32, i32, i32) {
    %c0_i32 = arith.constant 0 : i32
    %c0_i32_0 = arith.constant 0 : i32
    %c0_i32_1 = arith.constant 0 : i32
    return %arg0, %c0_i32, %c0_i32_0 : i32, i32, i32
  }
  func.func @transform_2(%arg0: i32) -> (i32, i32) {
    %c0_i32 = arith.constant 0 : i32
    %c0_i32_0 = arith.constant 0 : i32
    return %arg0, %c0_i32 : i32, i32
  }
  func.func @transform_3(%arg0: i32) -> (i32, i32) {
    %c0_i32 = arith.constant 0 : i32
    %c0_i32_0 = arith.constant 0 : i32
    %c0_i32_1 = arith.constant 0 : i32
    return %c0_i32, %c0_i32_0 : i32, i32
  }
  func.func @transform_4(%arg0: i32) -> (i32, i32) {
    %c0_i32 = arith.constant 0 : i32
    %c0_i32_0 = arith.constant 0 : i32
    %c0_i32_1 = arith.constant 0 : i32
    return %c0_i32, %c0_i32_0 : i32, i32
  }
  func.func @transform_5(%arg0: i32) -> (i32, i32) {
    %c0_i32 = arith.constant 0 : i32
    %c0_i32_0 = arith.constant 0 : i32
    %c0_i32_1 = arith.constant 0 : i32
    return %c0_i32, %c0_i32_0 : i32, i32
  }
  func.func @transform_6(%arg0: i32) -> (i32, i32) {
    %c0_i32 = arith.constant 0 : i32
    %c0_i32_0 = arith.constant 0 : i32
    %c0_i32_1 = arith.constant 0 : i32
    return %c0_i32, %c0_i32_0 : i32, i32
  }
  func.func @transform_7(%arg0: i32) -> (i32, i32) {
    %c0_i32 = arith.constant 0 : i32
    %c0_i32_0 = arith.constant 0 : i32
    %c0_i32_1 = arith.constant 0 : i32
    return %c0_i32, %c0_i32_0 : i32, i32
  }
  func.func @transform_8(%arg0: i32) -> (i32, i32) {
    %c0_i32 = arith.constant 0 : i32
    %c0_i32_0 = arith.constant 0 : i32
    %c0_i32_1 = arith.constant 0 : i32
    return %c0_i32, %c0_i32_0 : i32, i32
  }
  func.func @transform_9(%arg0: i32) -> (i32, i32) {
    %c0_i32 = arith.constant 0 : i32
    %c0_i32_0 = arith.constant 0 : i32
    %c0_i32_1 = arith.constant 0 : i32
    return %c0_i32, %c0_i32_0 : i32, i32
  }
  func.func @transform_10(%arg0: i32) -> (i32, i32) {
    %c0_i32 = arith.constant 0 : i32
    %c0_i32_0 = arith.constant 0 : i32
    %c0_i32_1 = arith.constant 0 : i32
    return %c0_i32, %c0_i32_0 : i32, i32
  }
  func.func @transform_11(%arg0: i32) -> (i32, i32) {
    %c0_i32 = arith.constant 0 : i32
    %c0_i32_0 = arith.constant 0 : i32
    %c0_i32_1 = arith.constant 0 : i32
    return %c0_i32, %c0_i32_0 : i32, i32
  }
  func.func @transform_12(%arg0: i32) -> (i32, i32) {
    %c0_i32 = arith.constant 0 : i32
    %c0_i32_0 = arith.constant 0 : i32
    %c0_i32_1 = arith.constant 0 : i32
    return %c0_i32, %c0_i32_0 : i32, i32
  }
  func.func @transform_13(%arg0: i32) -> (i32, i32) {
    %c0_i32 = arith.constant 0 : i32
    %c0_i32_0 = arith.constant 0 : i32
    %c0_i32_1 = arith.constant 0 : i32
    return %c0_i32, %c0_i32_0 : i32, i32
  }
  func.func @transform_14(%arg0: i32) -> (i32, i32) {
    %c0_i32 = arith.constant 0 : i32
    %c0_i32_0 = arith.constant 0 : i32
    %c0_i32_1 = arith.constant 0 : i32
    return %c0_i32, %c0_i32_0 : i32, i32
  }
  func.func @transform_15(%arg0: i32) -> (i32, i32) {
    %c0_i32 = arith.constant 0 : i32
    %c0_i32_0 = arith.constant 0 : i32
    %c0_i32_1 = arith.constant 0 : i32
    return %c0_i32, %c0_i32_0 : i32, i32
  }
  func.func @transform_16(%arg0: i32) -> (i32, i32) {
    %c0_i32 = arith.constant 0 : i32
    %c0_i32_0 = arith.constant 0 : i32
    %c0_i32_1 = arith.constant 0 : i32
    return %c0_i32, %c0_i32_0 : i32, i32
  }
  func.func @transform_17(%arg0: i32) -> (i32, i32, i32) {
    %c0_i32 = arith.constant 0 : i32
    %c0_i32_0 = arith.constant 0 : i32
    %c0_i32_1 = arith.constant 0 : i32
    return %arg0, %c0_i32, %c0_i32_0 : i32, i32, i32
  }
}

</mosaic_0001>

<bundles_post_ra>
// kernel: tpu_custom_call.1
= control target key start
LH: loop header
LB: loop body
LE: loop exit
PB: predicated region body
PF: predicated region fallthrough
CT: control target
= control target key end

     0   :  { %s11684_s0 = inlined_call_operand.vmem [shape: f32[32,1,32], index: 0, kind: input, shape index: {}]   ;;  %s11685_s1 = inlined_call_operand.hbm [shape: f32[32,8,32], index: 1, kind: input, shape index: {}]   ;;  %s11686_s2 = inlined_call_operand.vmem [shape: f32[32,8], index: 2, kind: input, shape index: {}]   ;;  %s11687_s3 = inlined_call_operand.vmem [shape: bf16[32,96], index: 3, kind: input, shape index: {}]   ;;  %s11688_s4 = inlined_call_operand.vmem [shape: f32[1,96], index: 4, kind: input, shape index: {}]   ;;  %s11689_s5 = inlined_call_operand.vmem [shape: bf16[32,32], index: 5, kind: input, shape index: {}]   ;;  %s11690_s6 = inlined_call_operand.hbm [shape: f32[1,32], index: 6, kind: input, shape index: {}]   ;;  %s11691_s7 = inlined_call_operand.hbm [shape: f32[1,32], index: 7, kind: input, shape index: {}]   ;;  %s11692_s8 = inlined_call_operand.hbm [shape: f32[1,32], index: 8, kind: input, shape index: {}]   ;;  %s11693_s9 = inlined_call_operand.vmem [shape: bf16[32,64], index: 9, kind: input, shape index: {}]   ;;  %s11694_s10 = inlined_call_operand.vmem [shape: f32[1,64], index: 10, kind: input, shape index: {}]   ;;  %s11695_s11 = inlined_call_operand.vmem [shape: bf16[64,32], index: 11, kind: input, shape index: {}]   ;;  %s11696_s12 = inlined_call_operand.vmem [shape: f32[1,32], index: 12, kind: input, shape index: {}]   ;;  %s11697_s13 = inlined_call_operand.vmem [shape: f32[1,32], index: 13, kind: input, shape index: {}]   ;;  %s11698_s14 = inlined_call_operand.vmem [shape: f32[1,32], index: 14, kind: input, shape index: {}]   ;;  %s11699_s15 = inlined_call_operand.vmem [shape: f32[1,32], index: 15, kind: input, shape index: {}]   ;;  %s11700_s16 = inlined_call_operand.<no memory space> [shape: f32[1,1], index: 16, kind: input, shape index: {}]   ;;  %s11701_s17 = inlined_call_operand.hbm [shape: f32[2,1,128], index: 17, kind: output, shape index: {}]  }
   0x1   :  { %11836 = sst [smem:[#allocation120_spill]] %s11684_s0  ;;  %v22_v0 = vstv %s11700_s16 }
   0x2   :  { %11837 = sst [smem:[#allocation121_spill]] %s11685_s1  ;;  %23 = vst [vmem:[#allocation2] sm:$0x1] %v22_v0 }
   0x3   :  { %11838 = sst [smem:[#allocation122_spill]] %s11690_s6 }
   0x4   :  { %11839 = sst [smem:[#allocation123_spill]] %s11691_s7 }
   0x5   :  { %11840 = sst [smem:[#allocation124_spill]] %s11692_s8 }
   0x6   :  { %24 = vsyncpa [#allocation4], 0 }
   0x7   :  { %26 = vsyncpa [#allocation4 + $0x1], 0 }
   0x8   :  { %27 = vsyncpa [#allocation7], 0 }
   0x9   :  { %28 = vsyncpa [#allocation10], 0 }
   0xa   :  { %29 = vsyncpa [#allocation5], 0 }
   0xb   :  { %31 = vsyncpa [#allocation5 + $0x1], 0  ;;  %s8475_s26 = smov 0   ;;  %s8477_s27 = smov 0  }
   0xc   :  { %s8479_s28 = smov 0   ;;  %s8481_s29 = smov 0  }
   0xd LB: > { %11841 = sst [smem:[#allocation16_spill]] %s8345_s26  ;;  %s8496_s16 = sadd.s32 4294967295, %s8357_s29   ;;  %s8357_s29 = sphi %s8481_s29, %s12300_s29   ;;  %s8353_s28 = sphi %s8479_s28, %s12302_s28   ;;  %s8349_s27 = sphi %s8477_s27, %s12304_s27   ;;  %s8345_s26 = sphi %s8475_s26, %s12303_s26  }
   0xe   : > { %11842 = sst [smem:[#allocation17_spill]] %s8353_s28  ;;  %s7081_s0 = sadd.s32 4294967294, %s8357_s29  }
   0xf   : > { %p83_p0 = scmp.ne.s32.totalorder %s8349_s27, %s8345_s26  ;;  %p84_p1 = scmp.eq.s32.totalorder %s8496_s16, 0 }
  0x10   : > { %p427_p2 = scmp.eq.s32.totalorder %s8496_s16, 1  ;;  %p433_p3 = scmp.eq.s32.totalorder %s7081_s0, 1 }
  0x11   : > { %p8505_p4 = por %p84_p1, %p83_p0  ;;  %p7082_p5 = scmp.ge.s32.totalorder %s8357_s29, 1 }
  0x12   : > { %p8510_p6 = por %p433_p3, %p83_p0  ;;  %p440_p7 = scmp.lt.s32.totalorder %s8357_s29, 3 }
  0x13   : > { %s11846_s6 = sld [smem:[#allocation122_spill]]  ;;  %s8359_s22 = smov [#allocation6]  }
  0x14   : > { %s11844_s18 = scalar_select %p8510_p6, 1, 0 }
  0x15   : > { %p8518_p8 = pnand %p7082_p5, %p440_p7  ;;  %s463_s23 = sshll.u32 %s8359_s22, 4  ;;  %s464_s23 = int_to_ptr.vmem [resolvable:$true] %s463_s23 }
  0x16   : > { %11845 = sst [smem:[#allocation18_spill]] %s11844_s18  ;;  %s8360_s18 = smov [#allocation8]  }
  0x17   : > { %p7424_p10 = pneg %p8518_p8  ;;  %s11848_s7 = sld [smem:[#allocation123_spill]] }
  0x18   : > { %s11849_s8 = sld [smem:[#allocation124_spill]]  ;;  %s475_s22 = sshll.u32 %s8360_s18, 4  ;;  %s476_s22 = int_to_ptr.vmem [resolvable:$true] %s475_s22 }
  0x19   : > { %s461_s20 = sshll.u32 %s11846_s6, 4  ;;  %p7425_p11 = pnand %p7424_p10, %p84_p1  ;;  %s462_s20 = int_to_ptr.hbm [resolvable:$true] %s461_s20 }
  0x1a   : > { %s8361_s24 = smov [#allocation9]   ;;  %s70_s1 = sadd.s32 1, %s8353_s28 }
  0x1b   : > { %7427 = dma.hbm_to_vmem [thread:$0]  (!%p7425_p11), %s462_s20, 16, %s464_s23, [#allocation7]  }
  0x1c   : > { %s487_s25 = sshll.u32 %s8361_s24, 4  ;;  %p77_p13 = scmp.ne.s32.totalorder %s8353_s28, %s8349_s27  ;;  %s488_s25 = int_to_ptr.vmem [resolvable:$true] %s487_s25 }
  0x1d   : > { %s473_s0 = sshll.u32 %s11848_s7, 4  ;;  %s8534_s7 = sadd.s32 1, %s8357_s29   ;;  %s474_s0 = int_to_ptr.hbm [resolvable:$true] %s473_s0 }
  0x1e   : > { %s485_s6 = sshll.u32 %s11849_s8, 4  ;;  %11850 = sst [smem:[#allocation19_spill]] %s8534_s7  ;;  %s486_s6 = int_to_ptr.hbm [resolvable:$true] %s485_s6 }
  0x1f   : > { %7430 = dma.hbm_to_vmem [thread:$0]  (!%p7425_p11), %s474_s0, 16, %s476_s22, [#allocation7]  }
  0x20   : > { %7433 = dma.hbm_to_vmem [thread:$0]  (!%p7425_p11), %s486_s6, 16, %s488_s25, [#allocation10]  }
  0x21   : > { %s67_s19 = ssub.s32 %s8357_s29, %s8534_s7  ;;  %p78_p0 = scmp.eq.s32.totalorder %s8357_s29, 0 }
  0x22   : > { %p68_p12 = scmp.eq.s32.totalorder %s67_s19, 0  ;;  %p7445_p3 = scmp.lt.s32.totalorder %s8357_s29, 2 }
  0x23   : > { %p79_p5 = por %p78_p0, %p77_p13  ;;  %p8548_p7 = por %p427_p2, %p77_p13 }
  0x24   : > { %s8544_s18 = scalar_select %p68_p12, %s8353_s28, %s70_s1  }
  0x25   : > { %s11852_s20 = scalar_select %p8548_p7, 1, 0 }
  0x26   : > { %11851 = sst [smem:[#allocation20_spill]] %s8544_s18  ;;  %s530_s23 = sand.u32 1, %s8353_s28  }
  0x27   : > { %11853 = sst [smem:[#allocation21_spill]] %s11852_s20  ;;  %s7397_s0 = sshll.u32 %s8357_s29, 7 }
  0x28   : > { %s7087_s22 = sshll.u32 %s530_s23, 7  ;;  %s11854_s25 = sld [smem:[#allocation121_spill]] }
  0x29   : > { %s534_s7 = scalar_lea.vmem [#allocation3], %s7087_s22  ;;  %p8559_p10 = pnand %p7445_p3, %p79_p5 }
  0x2a   : > { %s542_s26 = sshll.u32 %s534_s7, 4  ;;  %s531_s18 = scalar_lea.sflag [#allocation4], %s530_s23  ;;  %s543_s26 = int_to_ptr.vmem [resolvable:$true] %s542_s26 }
  0x2b   : > { %p8257_p11 = pneg %p8559_p10 }
  0x2e   : > { %s539_s8 = scalar_lea.hbm %s11854_s25, %s7397_s0  ;;  %s8260_s7 = scalar_lea.hbm %s11854_s25, 256 }
  0x2f   : > { %s540_s19 = sshll.u32 %s539_s8, 4  ;;  %s541_s19 = int_to_ptr.hbm [resolvable:$true] %s540_s19 }
  0x30   : > { %s8253_s20 = sshra.s32 %s541_s19, 4  ;;  %s8254_s20 = int_to_ptr.hbm [resolvable:$true] %s8253_s20 }
  0x31   : > { %s8255_s28 = scalar_lea.hbm %s8254_s20, 128  ;;  %p8261_p0 = scmp.lt.s32.totalorder %s8254_s20, %s11854_s25 }
  0x32   : > { %p8256_p2 = scmp.ne.s32.totalorder %s8254_s20, %s8255_s28  ;;  %p8262_p3 = scmp.lt.s32.totalorder %s8260_s7, %s8255_s28 }
  0x34   : > { %p8258_p12 = pnand %p8257_p11, %p8256_p2  ;;  %p8263_p5 = por %p8262_p3, %p8261_p0 }
  0x36   : > { %p8259_p13 = pneg %p8258_p12 }
  0x38   : > { %p8264_p9 = pnand %p8263_p5, %p8259_p13 }
  0x3a   : > { %8267 = shalt.err (!%p8264_p9)
}
  0x3b   : > { %s8362_s23 = smov 128   ;;  %s8363_s6 = smov 8  }
  0x3c   : > { %7437 = dma.hbm_to_vmem [thread:$0]  (!%p8559_p10), %s541_s19, 2048, %s543_s26, %s531_s18, %s8362_s23, %s8362_s23, %s8363_s6  }
  0x3d   : > { %563 = sbr.rel (%p8518_p8) target bundleno = 3983 (0xf8f), region = 88 }
  0x42   : > { %s8576_s8 = sand.u32 1, %s8349_s27  }
  0x43   : > { %s7091_s0 = sshll.u32 %s8576_s8, 7  ;;  %s566_s20 = scalar_lea.sflag [#allocation4], %s8576_s8 }
  0x44   : > { %s8580_s28 = scalar_lea.vmem [#allocation3], %s7091_s0 }
  0x45   : > { %8328 = dma.done.wait (%p8505_p4), %s566_s20, 2048  }
  0x46   : > { %8330 = vsyncadd (%p8505_p4), %s566_s20, 4294965248 }
  0x47   : > { %8332 = dma.done.wait (%p84_p1), [#allocation7], 32  }
  0x48   : > { %8334 = vsyncadd (%p84_p1), [#allocation7], 4294967264 }
  0x49   : > { %8336 = dma.done.wait (%p84_p1), [#allocation10], 16  }
  0x4a   : > { %8338 = vsyncadd (%p84_p1), [#allocation10], 4294967280  ;;  %s7095_s26 = sshll.u32 %s8496_s16, 4  ;;  %v691_v1 = vlaneseq  ;;  %s11856_s18 = sld [smem:[#allocation120_spill]]  ;;  %v7399_v3 = vld [vmem:[%s11687_s3 + $0x8] sm:$0xff]  ;;  %v7398_v4 = vld [vmem:[%s11687_s3] sm:$0xff] }
  0x4b   : > { %p645_p8 = scmp.lt.s32.totalorder %s7095_s26, 31  ;;  %v673_v5 = vld [vmem:[%s8580_s28] sm:$0xff]  ;;  %v674_v6 = vld [vmem:[%s8580_s28 + $0x8] sm:$0xff]  ;;  %819 = vmatpush.bf16.msra.mxu0 %v7399_v3  ;;  %vm11781_vm1 = vcmask 261120   ;;  %v675_v14 = vld [vmem:[%s8580_s28 + $0x10] sm:$0xff]  ;;  %s7096_s23 = sshll.u32 %s8496_s16, 1 }
  0x4c   : > { %v8595_v2 = vshrl.u32 %v691_v1, 7  ;;  %v676_v15 = vld [vmem:[%s8580_s28 + $0x18] sm:$0xff]  ;;  %v677_v21 = vld [vmem:[%s8580_s28 + $0x20] sm:$0xff]  ;;  %v678_v22 = vld [vmem:[%s8580_s28 + $0x28] sm:$0xff]  ;;  %p651_p1 = scmp.lt.s32.totalorder %s7096_s23, 3  ;;  %s8364_s21 = smov 96  }
  0x4d   : > { %s12306_s26 = smov (!%p645_p8, %s7095_s26), 31  ;;  %v679_v28 = vld [vmem:[%s8580_s28 + $0x30] sm:$0xff]  ;;  %v680_v29 = vld [vmem:[%s8580_s28 + $0x38] sm:$0xff]  ;;  %v681_v35 = vld [vmem:[%s8580_s28 + $0x40] sm:$0xff]  ;;  %vm1121_vm2 = vcmask 64512   ;;  %s8367_s1 = smov 120  }
  0x4e   : > { %7505 = vset.pattern.permute.xlu1 %v8595_v2  ;;  %7506 = vset.pattern.permute.xlu2 %v8595_v2  ;;  %vm693_vm0 = vcmp.eq.s32.totalorder %v8595_v2, 0  ;;  %v682_v36 = vld [vmem:[%s8580_s28 + $0x48] sm:$0xff]  ;;  %v683_v42 = vld [vmem:[%s8580_s28 + $0x50] sm:$0xff]  ;;  %v684_v43 = vld [vmem:[%s8580_s28 + $0x58] sm:$0xff]  ;;  %s12308_s23 = smov (!%p651_p1, %s7096_s23), 3  ;;  %s8370_s7 = smov 56  }
  0x4f   : > { %7507 = vset.pattern.permute.xlu0 %v8595_v2  ;;  %820 = vmatpush.bf16.msra.mxu0 %v7398_v4  ;;  %v685_v49 = vld [vmem:[%s8580_s28 + $0x60] sm:$0xff]  ;;  %v686_v50 = vld [vmem:[%s8580_s28 + $0x68] sm:$0xff]  ;;  %s7097_s6 = sshll.u32 %s12308_s23, 3  ;;  %v687_v57 = vld [vmem:[%s8580_s28 + $0x70] sm:$0xff]  ;;  %s8371_s22 = smov 80  }
  0x50   : > { %s8603_s19 = scalar_lea.vmem %s11856_s18, %s12306_s26  ;;  %s8721_s26 = scalar_lea.vmem %s11686_s2, %s7097_s6  ;;  %v688_v58 = vld [vmem:[%s8580_s28 + $0x78] sm:$0xff] }
  0x51   : > { %v7785_v7 = vld [vmem:[%s8603_s19] ss:$0 sm:$0xff]  ;;  %v7786_v8 = vld [vmem:[%s8603_s19 + $0x1] ss:$0 sm:$0xff]  ;;  %v7787_v12 = vld [vmem:[%s8603_s19 + $0x2] ss:$0 sm:$0xff] }
  0x52   : > { %v8618_v9 = vsel %vm693_vm0, %v7785_v7, %v673_v5  ;;  %v8622_v10 = vsel %vm693_vm0, %v7786_v8, %v674_v6  ;;  %v7788_v13 = vld [vmem:[%s8603_s19 + $0x3] ss:$0 sm:$0xff]  ;;  %v8633_v16 = vsel %vm693_vm0, %v7787_v12, %v675_v14  ;;  %v7789_v19 = vld [vmem:[%s8603_s19 + $0x4] ss:$0 sm:$0xff]  ;;  %v7790_v20 = vld [vmem:[%s8603_s19 + $0x5] ss:$0 sm:$0xff] }
  0x53   : > { %11857 = vst [vmem:[#allocation22_spill] sm:$0xff] %v8618_v9  ;;  %v760_v11 = vpack.c.bf16 %v8622_v10, %v8618_v9  ;;  %v8637_v17 = vsel %vm693_vm0, %v7788_v13, %v676_v15  ;;  %v8648_v23 = vsel %vm693_vm0, %v7789_v19, %v677_v21  ;;  %v8652_v24 = vsel %vm693_vm0, %v7790_v20, %v678_v22  ;;  %v7791_v26 = vld [vmem:[%s8603_s19 + $0x6] ss:$0 sm:$0xff]  ;;  %v7792_v27 = vld [vmem:[%s8603_s19 + $0x7] ss:$0 sm:$0xff]  ;;  %s8365_s18 = smov 64  }
  0x54   : > { %11858 = vst [vmem:[#allocation23_spill] sm:$0xff] %v8622_v10  ;;  %v761_v18 = vpack.c.bf16 %v8637_v17, %v8633_v16  ;;  %v762_v25 = vpack.c.bf16 %v8652_v24, %v8648_v23  ;;  %v8663_v30 = vsel %vm693_vm0, %v7791_v26, %v679_v28  ;;  %v8667_v31 = vsel %vm693_vm0, %v7792_v27, %v680_v29  ;;  %v7793_v33 = vld [vmem:[%s8603_s19 + $0x8] ss:$0 sm:$0xff]  ;;  %v7794_v34 = vld [vmem:[%s8603_s19 + $0x9] ss:$0 sm:$0xff]  ;;  %v8726_v56 = vld [vmem:[%s8721_s26] sm:$0xff] }
  0x55   : > { %7106 = vmatmul.msk.bf16.vlgmr.msra.gmra.mxu0 %vm11781_vm1, %v760_v11  ;;  %11859 = vst [vmem:[#allocation24_spill] sm:$0xff] %v8633_v16  ;;  %v763_v32 = vpack.c.bf16 %v8667_v31, %v8663_v30  ;;  %v8678_v37 = vsel %vm693_vm0, %v7793_v33, %v681_v35  ;;  %v8682_v38 = vsel %vm693_vm0, %v7794_v34, %v682_v36  ;;  %v7795_v40 = vld [vmem:[%s8603_s19 + $0xa] ss:$0 sm:$0xff]  ;;  %v7796_v41 = vld [vmem:[%s8603_s19 + $0xb] ss:$0 sm:$0xff]  ;;  %v11711_v59 = vperm.slane %v8726_v56, 0 }
  0x56   : > { %11860 = vst [vmem:[#allocation25_spill] sm:$0xff] %v8637_v17  ;;  %v764_v39 = vpack.c.bf16 %v8682_v38, %v8678_v37  ;;  %v8693_v44 = vsel %vm693_vm0, %v7795_v40, %v683_v42  ;;  %v8697_v45 = vsel %vm693_vm0, %v7796_v41, %v684_v43  ;;  %v7797_v47 = vld [vmem:[%s8603_s19 + $0xc] ss:$0 sm:$0xff]  ;;  %v7798_v48 = vld [vmem:[%s8603_s19 + $0xd] ss:$0 sm:$0xff]  ;;  %v869_v63 = vperm.slane %v8726_v56, 1 }
  0x57   : > { %11861 = vst [vmem:[#allocation26_spill] sm:$0xff] %v8648_v23  ;;  %v765_v46 = vpack.c.bf16 %v8697_v45, %v8693_v44  ;;  %v8709_v51 = vsel %vm693_vm0, %v7797_v47, %v685_v49  ;;  %v8713_v52 = vsel %vm693_vm0, %v7798_v48, %v686_v50  ;;  %v7799_v54 = vld [vmem:[%s8603_s19 + $0xe] ss:$0 sm:$0xff]  ;;  %v7800_v55 = vld [vmem:[%s8603_s19 + $0xf] ss:$0 sm:$0xff]  ;;  %867 = vperm.xlu1 %7505, %v11711_v59   ;;  %v883_v35 = vperm.slane %v8726_v56, 3 }
  0x58   : > { %11862 = vst [vmem:[#allocation27_spill] sm:$0xff] %v8652_v24  ;;  %v766_v53 = vpack.c.bf16 %v8713_v52, %v8709_v51  ;;  %v8735_v60 = vsel %vm693_vm0, %v7799_v54, %v687_v57  ;;  %v8739_v61 = vsel %vm693_vm0, %v7800_v55, %v688_v58  ;;  %874 = vperm.xlu2 %7506, %v869_v63   ;;  %v7801_v0 = vld [vmem:[%s11688_s4] ss:$0 sm:$0xff]  ;;  %v897_v40 = vperm.slane %v8726_v56, 5  ;;  %s8366_s19 = smov 88   ;;  %s8372_s24 = smov 112  }
  0x59   : > { %11863 = vst [vmem:[#allocation28_spill] sm:$0xff] %v8663_v30  ;;  %v767_v62 = vpack.c.bf16 %v8739_v61, %v8735_v60  ;;  %v876_v42 = vperm.slane %v8726_v56, 2  ;;  %v890_v49 = vperm.slane %v8726_v56, 4  ;;  %v11897_v9 = vmov -1e+30   ;;  %s8373_s23 = smov 48  }
  0x5a   : > { %11864 = vst [vmem:[#allocation29_spill] sm:$0xff] %v8667_v31  ;;  %s8374_s6 = smov 72   ;;  %s8375_s0 = smov 104  }
  0x5b   : > { %11865 = vst [vmem:[#allocation30_spill] sm:$0xff] %v8678_v37  ;;  %s8376_s20 = smov 40   ;;  %s8378_s28 = smov 8  }
  0x5c   : > { %11866 = vst [vmem:[#allocation31_spill] sm:$0xff] %v8682_v38  ;;  %s8379_s30 = smov 24  }
  0x5d   : > { %11867 = vst [vmem:[#allocation32_spill] sm:$0xff] %v8693_v44 }
  0x5e   : > { %11868 = vst [vmem:[#allocation33_spill] sm:$0xff] %v8697_v45 }
  0x5f   : > { %11869 = vst [vmem:[#allocation34_spill] sm:$0xff] %v8709_v51 }
  0x60   : > { %11870 = vst [vmem:[#allocation35_spill] sm:$0xff] %v8713_v52  ;;  %v977_v52 = vrot.slane %v8726_v56, 2 }
  0x61   : > { %11871 = vst [vmem:[#allocation36_spill] sm:$0xff] %v8735_v60 }
  0x62   : > { %11872 = vst [vmem:[#allocation37_spill] sm:$0xff] %v8739_v61  ;;  %v976_v61 = vrot.slane %v8726_v56, 1  ;;  %v992_v31 = vperm.slane %v977_v52, 0  ;;  %v978_v52 = vrot.slane %v8726_v56, 3 }
  0x65   : > { %7107 = vmatmul.msk.bf16.gmra.mxu0 %vm11781_vm1, %v761_v18 }
  0x75   : > { %7108 = vmatmul.msk.bf16.gmra.mxu0 %vm11781_vm1, %v762_v25 }
  0x85   : > { %7109 = vmatmul.msk.bf16.gmra.mxu0 %vm11781_vm1, %v763_v32 }
  0x95   : > { %7110 = vmatmul.msk.bf16.gmra.mxu0 %vm11781_vm1, %v764_v39 }
  0xa5   : > { %7111 = vmatmul.msk.bf16.gmra.mxu0 %vm11781_vm1, %v765_v46  ;;  %v8812_v46 = vld [vmem:[%s8721_s26 + $0x8] sm:$0xff]  ;;  %s8377_s26 = smov 16  }
  0xa6   : > { %v11710_v50 = vperm.slane %v8812_v46, 0  ;;  %v939_v63 = vperm.slane %v8812_v46, 3 }
  0xb5   : > { %7112 = vmatmul.msk.bf16.gmra.mxu0 %vm11781_vm1, %v766_v53 }
  0xc5   : > { %7113 = vmatmul.msk.bf16.gmra.mxu0 %vm11781_vm1, %v767_v62  ;;  %v904_v62 = vperm.slane %v8726_v56, 6 }
  0xc9   : > { %v8826_v55 = vpop.permute.xlu1 %867 }
  0xd2   : > { %v822_v1 = vpop.f32.mrf.mxu0 }
  0xd3   : > { %v8748_v3 = vadd.f32 %v7801_v0, %v822_v1  ;;  %v8839_v1 = vpop.permute.xlu2 %874 }
  0xd5   : > { %11873 = vst [vmem:[#allocation38_spill] sm:$0xff] %v8748_v3  ;;  %1119 = vrot.lane.b32.xlu0 %v8748_v3, %s8364_s21  ;;  %v8816_v48 = vmul.f32 0.35355338, %v8748_v3 }
  0xd7   : > { %11881 = vst [vmem:[#allocation46_spill] sm:$0xff] %v8816_v48 }
  0xda   : > { %v824_v2 = vpop.f32.mrf.mxu0 }
  0xdb   : > { %v8752_v4 = vadd.f32 %v7801_v0, %v824_v2 }
  0xdd   : > { %11874 = vst [vmem:[#allocation39_spill] sm:$0xff] %v8752_v4  ;;  %1148 = vrot.lane.b32.xlu0 %v8752_v4, %s8364_s21  ;;  %v8832_v58 = vmul.f32 0.35355338, %v8752_v4 }
  0xe2   : > { %v827_v5 = vpop.f32.mrf.mxu0 }
  0xe3   : > { %v8756_v6 = vadd.f32 %v7801_v0, %v827_v5 }
  0xe5   : > { %11875 = vst [vmem:[#allocation40_spill] sm:$0xff] %v8756_v6  ;;  %1176 = vrot.lane.b32.xlu1 %v8756_v6, %s8364_s21  ;;  %v8843_v5 = vmul.f32 0.35355338, %v8756_v6 }
  0xe7   : > { %11882 = vst [vmem:[#allocation47_spill] sm:$0xff] %v8843_v5 }
  0xea   : > { %v829_v7 = vpop.f32.mrf.mxu0 }
  0xeb   : > { %v8760_v8 = vadd.f32 %v7801_v0, %v829_v7  ;;  %v925_v7 = vperm.slane %v8812_v46, 1 }
  0xed   : > { %11876 = vst [vmem:[#allocation41_spill] sm:$0xff] %v8760_v8  ;;  %1204 = vrot.lane.b32.xlu1 %v8760_v8, %s8364_s21 }
  0xf2   : > { %v832_v11 = vpop.f32.mrf.mxu0 }
  0xf3   : > { %v8764_v12 = vadd.f32 %v7801_v0, %v832_v11  ;;  %v960_v11 = vperm.slane %v8812_v46, 6 }
  0xf5   : > { %1232 = vrot.lane.b32.xlu2 %v8764_v12, %s8364_s21 }
  0xfa   : > { %v834_v13 = vpop.f32.mrf.mxu0 }
  0xfb   : > { %v8768_v14 = vadd.f32 %v7801_v0, %v834_v13  ;;  %v932_v13 = vperm.slane %v8812_v46, 2 }
  0xfd   : > { %11877 = vst [vmem:[#allocation42_spill] sm:$0xff] %v8768_v14  ;;  %1260 = vrot.lane.b32.xlu0 %v8768_v14, %s8364_s21 }
 0x102   : > { %v837_v15 = vpop.f32.mrf.mxu0 }
 0x103   : > { %v8772_v18 = vadd.f32 %v7801_v0, %v837_v15 }
 0x105   : > { %1288 = vrot.lane.b32.xlu1 %v8772_v18, %s8364_s21 }
 0x10a   : > { %v839_v19 = vpop.f32.mrf.mxu0 }
 0x10b   : > { %v8776_v20 = vadd.f32 %v7801_v0, %v839_v19 }
 0x10d   : > { %11878 = vst [vmem:[#allocation43_spill] sm:$0xff] %v8776_v20  ;;  %1316 = vrot.lane.b32.xlu2 %v8776_v20, %s8364_s21 }
 0x112   : > { %v842_v21 = vpop.f32.mrf.mxu0 }
 0x113   : > { %v8780_v22 = vadd.f32 %v7801_v0, %v842_v21  ;;  %v8852_v21 = vmul.f32 0.35355338, %v8760_v8 }
 0x115   : > { %1344 = vrot.lane.b32.xlu2 %v8780_v22, %s8364_s21  ;;  %11883 = vst [vmem:[#allocation48_spill] sm:$0xff] %v8852_v21 }
 0x11a   : > { %v844_v25 = vpop.f32.mrf.mxu0 }
 0x11b   : > { %v8784_v26 = vadd.f32 %v7801_v0, %v844_v25  ;;  %v946_v25 = vperm.slane %v8812_v46, 4 }
 0x11d   : > { %1372 = vrot.lane.b32.xlu1 %v8784_v26, %s8364_s21 }
 0x122   : > { %v847_v27 = vpop.f32.mrf.mxu0 }
 0x123   : > { %v8788_v28 = vadd.f32 %v7801_v0, %v847_v27  ;;  %v953_v27 = vperm.slane %v8812_v46, 5 }
 0x125   : > { %1400 = vrot.lane.b32.xlu0 %v8788_v28, %s8364_s21 }
 0x12a   : > { %v849_v29 = vpop.f32.mrf.mxu0 }
 0x12b   : > { %v8792_v32 = vadd.f32 %v7801_v0, %v849_v29  ;;  %v8861_v29 = vpack.i.bf16 %v8760_v8, %v8756_v6 }
 0x12d   : > { %11879 = vst [vmem:[#allocation44_spill] sm:$0xff] %v8792_v32  ;;  %1428 = vrot.lane.b32.xlu2 %v8792_v32, %s8364_s21 }
 0x12e   : > { %11884 = vst [vmem:[#allocation49_spill] sm:$0xff] %v8861_v29 }
 0x132   : > { %v852_v33 = vpop.f32.mrf.mxu0 }
 0x133   : > { %v8796_v34 = vadd.f32 %v7801_v0, %v852_v33 }
 0x135   : > { %1456 = vrot.lane.b32.xlu1 %v8796_v34, %s8364_s21 }
 0x13a   : > { %v854_v36 = vpop.f32.mrf.mxu0 }
 0x13b   : > { %v8801_v39 = vadd.f32 %v7801_v0, %v854_v36  ;;  %v8870_v36 = vmul.f32 0.35355338, %v8776_v20 }
 0x13d   : > { %888 = vperm.xlu1 %7505, %v883_v35   ;;  %1484 = vrot.lane.b32.xlu0 %v8801_v39, %s8364_s21  ;;  %v8867_v35 = vmul.f32 0.35355338, %v8764_v12 }
 0x13f   : > { %11885 = vst [vmem:[#allocation50_spill] sm:$0xff] %v8867_v35 }
 0x142   : > { %v857_v41 = vpop.f32.mrf.mxu0 }
 0x143   : > { %v8807_v43 = vadd.f32 %v7801_v0, %v857_v41  ;;  %v7538_v41 = vpack.i.bf16 %v8801_v39, %v8796_v34 }
 0x145   : > { %11880 = vst [vmem:[#allocation45_spill] sm:$0xff] %v8807_v43  ;;  %1512 = vrot.lane.b32.xlu2 %v8807_v43, %s8364_s21  ;;  %902 = vperm.xlu1 %7505, %v897_v40   ;;  %v967_v40 = vperm.slane %v8812_v46, 7 }
 0x146   : > { %881 = vperm.xlu0 %7507, %v876_v42   ;;  %v7518_v42 = vpack.i.bf16 %v8768_v14, %v8764_v12 }
 0x147   : > { %v1120_v47 = vpop.permute.xlu0 %1119 }
 0x148   : > { %7130 = vmatpush.xpose.msk.msrb.mxu0 %vm1121_vm2, %v1120_v47 }
 0x14a   : > { %v859_v53 = vpop.f32.mrf.mxu0 }
 0x14b   : > { %v8820_v54 = vadd.f32 %v7801_v0, %v859_v53  ;;  %7131 = vmatmul.msk.f32.vlgmr.msrb.gmra.mxu0 %vm1121_vm2, %v8816_v48  ;;  %v911_v0 = vperm.slane %v8726_v56, 7  ;;  %v8886_v53 = vmul.f32 0.35355338, %v8768_v14 }
 0x14d   : > { %895 = vperm.xlu2 %7506, %v890_v49   ;;  %923 = vperm.xlu1 %7505, %v11710_v50   ;;  %11886 = vst [vmem:[#allocation51_spill] sm:$0xff] %v8886_v53  ;;  %v9003_v60 = vmul.f32 0.35355338, %v8820_v54 }
 0x14e   : > { %1540 = vrot.lane.b32.xlu0 %v8820_v54, %s8364_s21 }
 0x14f   : > { %v1149_v57 = vpop.permute.xlu0 %1148  ;;  %v1233_v15 = vpop.permute.xlu2 %1232  ;;  %11894 = vst [vmem:[#allocation59_spill] sm:$0xff] %v9003_v60 }
 0x150   : > { %7132 = vmatpush.xpose.msk.msra.mxu0 %vm1121_vm2, %v1149_v57  ;;  %v8889_v57 = vmul.f32 0.35355338, %v8780_v22 }
 0x153   : > { %7133 = vmatmul.msk.f32.vlgmr.msra.gmra.mxu0 %vm1121_vm2, %v8832_v58 }
 0x155   : > { %909 = vperm.xlu2 %7506, %v904_v62   ;;  %944 = vperm.xlu1 %7505, %v939_v63   ;;  %v7508_v62 = vpack.i.bf16 %v8752_v4, %v8748_v3  ;;  %v7528_v63 = vpack.i.bf16 %v8784_v26, %v8780_v22 }
 0x156   : > { %916 = vperm.xlu0 %7507, %v911_v0  }
 0x157   : > { %v1177_v2 = vpop.permute.xlu1 %1176 }
 0x158   : > { %7134 = vmatpush.xpose.msk.msrb.mxu0 %vm1121_vm2, %v1177_v2  ;;  %v8905_v2 = vmul.f32 0.35355338, %v8772_v18 }
 0x15a   : > { %11887 = vst [vmem:[#allocation52_spill] sm:$0xff] %v8905_v2 }
 0x15b   : > { %7135 = vmatmul.msk.f32.vlgmr.msrb.gmra.mxu0 %vm1121_vm2, %v8843_v5 }
 0x15d   : > { %930 = vperm.xlu2 %7506, %v925_v7   ;;  %965 = vperm.xlu1 %7505, %v960_v11   ;;  %v8911_v7 = vpack.i.bf16 %v8776_v20, %v8772_v18  ;;  %v8921_v11 = vpack.i.bf16 %v8792_v32, %v8788_v28 }
 0x15e   : > { %937 = vperm.xlu0 %7507, %v932_v13  }
 0x15f   : > { %v1205_v19 = vpop.permute.xlu1 %1204  ;;  %11888 = vst [vmem:[#allocation53_spill] sm:$0xff] %v8911_v7 }
 0x160   : > { %7136 = vmatpush.xpose.msk.msra.mxu0 %vm1121_vm2, %v1205_v19  ;;  %11889 = vst [vmem:[#allocation54_spill] sm:$0xff] %v8921_v11 }
 0x163   : > { %7137 = vmatmul.msk.f32.vlgmr.msra.gmra.mxu0 %vm1121_vm2, %v8852_v21 }
 0x164   : > { %7138 = vmatpush.xpose.msk.msrb.mxu0 %vm1121_vm2, %v1233_v15  ;;  %v8931_v15 = vmul.f32 0.35355338, %v8792_v32 }
 0x165   : > { %951 = vperm.xlu2 %7506, %v946_v25   ;;  %7514 = vrot.lane.b32.xlu1 %v8861_v29, %s8365_s18  ;;  %v8943_v25 = vmul.f32 0.35355338, %v8784_v26 }
 0x166   : > { %958 = vperm.xlu0 %7507, %v953_v27  }
 0x167   : > { %v1317_v33 = vpop.permute.xlu2 %1316  ;;  %11890 = vst [vmem:[#allocation55_spill] sm:$0xff] %v8943_v25 }
 0x168   : > { %7144 = vmatpush.xpose.msk.msra.mxu2 %vm1121_vm2, %v1317_v33  ;;  %v8955_v33 = vmul.f32 0.35355338, %v8788_v28 }
 0x16a   : > { %11891 = vst [vmem:[#allocation56_spill] sm:$0xff] %v8955_v33 }
 0x16b   : > { %7139 = vmatmul.msk.f32.vlgmr.msrb.gmra.mxu0 %vm1121_vm2, %v8867_v35  ;;  %7145 = vmatmul.msk.f32.vlgmr.msra.gmra.mxu2 %vm1121_vm2, %v8870_v36 }
 0x16d   : > { %972 = vperm.xlu2 %7506, %v967_v40   ;;  %7539 = vrot.lane.b32.xlu1 %v7538_v41, %s8365_s18  ;;  %v8965_v41 = vmul.f32 0.35355338, %v8807_v43 }
 0x16e   : > { %7519 = vrot.lane.b32.xlu0 %v7518_v42, %s8365_s18 }
 0x16f   : > { %v1345_v47 = vpop.permute.xlu2 %1344  ;;  %v1261_v49 = vpop.permute.xlu0 %1260 }
 0x170   : > { %7140 = vmatpush.xpose.msk.msra.mxu0 %vm1121_vm2, %v1261_v49  ;;  %7146 = vmatpush.xpose.msk.msra.mxu3 %vm1121_vm2, %v1345_v47  ;;  %v8975_v49 = vmul.f32 0.35355338, %v8796_v34 }
 0x172   : > { %11892 = vst [vmem:[#allocation57_spill] sm:$0xff] %v8975_v49 }
 0x173   : > { %7141 = vmatmul.msk.f32.vlgmr.msra.gmra.mxu0 %vm1121_vm2, %v8886_v53  ;;  %7147 = vmatmul.msk.f32.vlgmr.msra.gmra.mxu3 %vm1121_vm2, %v8889_v57 }
 0x175   : > { %2205 = vrot.lane.b32.xlu1 %v8752_v4, %s8366_s19  ;;  %7509 = vrot.lane.b32.xlu2 %v7508_v62, %s8365_s18 }
 0x176   : > { %7529 = vrot.lane.b32.xlu0 %v7528_v63, %s8365_s18 }
 0x177   : > { %v1289_v0 = vpop.permute.xlu1 %1288 }
 0x178   : > { %7142 = vmatpush.xpose.msk.msra.mxu1 %vm1121_vm2, %v1289_v0 }
 0x17b   : > { %7143 = vmatmul.msk.f32.vlgmr.msra.gmra.mxu1 %vm1121_vm2, %v8905_v2 }
 0x17d   : > { %2261 = vrot.lane.b32.xlu1 %v8760_v8, %s8366_s19  ;;  %7524 = vrot.lane.b32.xlu2 %v8911_v7, %s8365_s18 }
 0x17e   : > { %2177 = vrot.lane.b32.xlu0 %v8748_v3, %s8366_s19 }
 0x185   : > { %2259 = vrot.lane.b32.xlu1 %v8852_v21, %s8367_s1  ;;  %7534 = vrot.lane.b32.xlu2 %v8921_v11, %s8365_s18 }
 0x186   : > { %2175 = vrot.lane.b32.xlu0 %v8816_v48, %s8367_s1 }
 0x187   : > { %v1429_v13 = vpop.permute.xlu2 %1428 }
 0x188   : > { %7152 = vmatpush.xpose.msk.msrb.mxu3 %vm1121_vm2, %v1429_v13  ;;  %v8985_v13 = vmul.f32 0.35355338, %v8801_v39 }
 0x18a   : > { %11893 = vst [vmem:[#allocation58_spill] sm:$0xff] %v8985_v13 }
 0x18b   : > { %7153 = vmatmul.msk.f32.vlgmr.msrb.gmra.mxu3 %vm1121_vm2, %v8931_v15 }
 0x18d   : > { %2317 = vrot.lane.b32.xlu1 %v8768_v14, %s8366_s19  ;;  %2203 = vrot.lane.b32.xlu2 %v8832_v58, %s8367_s1 }
 0x18e   : > { %2233 = vrot.lane.b32.xlu0 %v8756_v6, %s8366_s19 }
 0x18f   : > { %v1373_v19 = vpop.permute.xlu1 %1372 }
 0x190   : > { %7148 = vmatpush.xpose.msk.msrb.mxu1 %vm1121_vm2, %v1373_v19  ;;  %v7543_v19 = vpack.i.bf16 %v8820_v54, %v8807_v43 }
 0x193   : > { %7149 = vmatmul.msk.f32.vlgmr.msrb.gmra.mxu1 %vm1121_vm2, %v8943_v25 }
 0x195   : > { %2287 = vrot.lane.b32.xlu1 %v8867_v35, %s8367_s1  ;;  %2315 = vrot.lane.b32.xlu2 %v8886_v53, %s8367_s1 }
 0x196   : > { %2231 = vrot.lane.b32.xlu0 %v8843_v5, %s8367_s1  ;;  %v986_v5 = vrot.slane %v8812_v46, 4 }
 0x197   : > { %v1401_v27 = vpop.permute.xlu0 %1400 }
 0x198   : > { %7150 = vmatpush.xpose.msk.msrb.mxu2 %vm1121_vm2, %v1401_v27 }
 0x19b   : > { %7151 = vmatmul.msk.f32.vlgmr.msrb.gmra.mxu2 %vm1121_vm2, %v8955_v33 }
 0x19d   : > { %2373 = vrot.lane.b32.xlu1 %v8776_v20, %s8366_s19 }
 0x19e   : > { %2289 = vrot.lane.b32.xlu0 %v8764_v12, %s8366_s19 }
 0x19f   : > { %v1513_v40 = vpop.permute.xlu2 %1512 }
 0x1a0   : > { %7158 = vmatpush.xpose.msk.msra.mxu3 %vm1121_vm2, %v1513_v40 }
 0x1a3   : > { %7159 = vmatmul.msk.f32.vlgmr.msra.gmra.mxu3 %vm1121_vm2, %v8965_v41 }
 0x1a6   : > { %2345 = vrot.lane.b32.xlu0 %v8772_v18, %s8366_s19 }
 0x1a7   : > { %v8971_v42 = vpop.permute.xlu2 %895  ;;  %v1457_v47 = vpop.permute.xlu1 %1456 }
 0x1a8   : > { %7154 = vmatpush.xpose.msk.msra.mxu1 %vm1121_vm2, %v1457_v47 }
 0x1ab   : > { %7155 = vmatmul.msk.f32.vlgmr.msra.gmra.mxu1 %vm1121_vm2, %v8975_v49 }
 0x1ae   : > { %2343 = vrot.lane.b32.xlu0 %v8905_v2, %s8367_s1 }
 0x1af   : > { %v8981_v62 = vpop.permute.xlu2 %909  ;;  %v889_v63 = vpop.permute.xlu1 %888 }
 0x1b0   : > { %v1485_v0 = vpop.permute.xlu0 %1484 }
 0x1b1   : > { %7156 = vmatpush.xpose.msk.msra.mxu2 %vm1121_vm2, %v1485_v0 }
 0x1b4   : > { %7157 = vmatmul.msk.f32.vlgmr.msra.gmra.mxu2 %vm1121_vm2, %v8985_v13 }
 0x1b6   : > { %7544 = vrot.lane.b32.xlu0 %v7543_v19, %s8365_s18  ;;  %v991_v19 = vperm.slane %v976_v61, 0  ;;  %v11727_v61 = vmov -1e+30   ;;  %s6961_s18 = scalar_lea.hbm %s11701_s17, %s8496_s16  ;;  %s8303_s16 = scalar_lea.hbm %s11701_s17, 2 }
 0x1b7   : > { %v8992_v27 = vpop.permute.xlu2 %930  ;;  %v8994_v40 = vpop.permute.xlu1 %902 }
 0x1b8   : > { %v882_v47 = vpop.permute.xlu0 %881  ;;  %v9013_v37 = vmul.f32 %v991_v19, %v8839_v1 }
 0x1ba   : > { %vm1039_vm3 = vcmp.gt.f32.partialorder %v9013_v37, 0.0 }
 0x1bb   : > { %v9023_v23 = vsel %vm1039_vm3, 0.0, %v11727_v61  ;;  %v993_v61 = vperm.slane %v978_v52, 0 }
 0x1bc   : > { %11895 = vst [vmem:[#allocation60_spill] sm:$0xff] %v9023_v23 }
 0x1bd   : > { %v9048_v29 = vmul.f32 %v993_v61, %v889_v63  ;;  %v982_v63 = vrot.slane %v8726_v56, 7 }
 0x1bf   : > { %v8996_v50 = vpop.permute.xlu2 %951  ;;  %v8998_v59 = vpop.permute.xlu1 %923  ;;  %vm1041_vm6 = vcmp.gt.f32.partialorder %v9048_v29, 0.0  ;;  %v997_v35 = vperm.slane %v982_v63, 0 }
 0x1c0   : > { %v1541_v0 = vpop.permute.xlu0 %1540 }
 0x1c1   : > { %7160 = vmatpush.xpose.msk.msrb.mxu1 %vm1121_vm2, %v1541_v0  ;;  %v9016_v0 = vmul.f32 %v992_v31, %v882_v47  ;;  %v11896_v31 = vperm.slane %v8726_v56, 0 }
 0x1c3   : > { %v9034_v47 = vmul.f32 %v8826_v55, %v11896_v31  ;;  %vm1040_vm4 = vcmp.gt.f32.partialorder %v9016_v0, 0.0  ;;  %v979_v31 = vrot.slane %v8726_v56, 4 }
 0x1c4   : > { %7161 = vmatmul.msk.f32.vlgmr.msrb.gmra.mxu1 %vm1121_vm2, %v9003_v60  ;;  %v9042_v11 = vsel %vm1040_vm4, 0.0, %v11897_v9 }
 0x1c5   : > { %11898 = vst [vmem:[#allocation61_spill] sm:$0xff] %v9042_v11  ;;  %vm1038_vm5 = vcmp.gt.f32.partialorder %v9034_v47, 0.0 }
 0x1c6   : > { %v9056_v52 = vsel %vm1038_vm5, 0.0, %v11897_v9 }
 0x1c7   : > { %v9008_v51 = vpop.permute.xlu2 %972  ;;  %v9010_v45 = vpop.permute.xlu1 %944  ;;  %11899 = vst [vmem:[#allocation62_spill] sm:$0xff] %v9056_v52 }
 0x1c8   : > { %v917_v44 = vpop.permute.xlu0 %916  ;;  %v1144_v38 = vpop.f32.mrf.mxu0 }
 0x1c9   : > { %v9059_v21 = vadd.f32 %v1144_v38, %v9056_v52  ;;  %v980_v38 = vrot.slane %v8726_v56, 5 }
 0x1cb   : > { %v1567_v61 = vsel %vm1121_vm2, %v9059_v21, -inf  ;;  %v995_v8 = vperm.slane %v980_v38, 0 }
 0x1cf   : > { %v9018_v30 = vpop.permute.xlu1 %965  ;;  %v7510_v24 = vpop.permute.xlu2 %7509 }
 0x1d0   : > { %v7512_v17 = vunpack.i.h.bf16 %v7510_v24  ;;  %v7511_v16 = vunpack.i.l.bf16 %v7510_v24  ;;  %v9025_v10 = vpop.permute.xlu0 %937  ;;  %v1172_v1 = vpop.f32.mrf.mxu0 }
 0x1d1   : > { %v9029_v19 = vadd.f32 %v1172_v1, %v9023_v23  ;;  %v994_v23 = vperm.slane %v979_v31, 0 }
 0x1d2   : > { %1780 = vmatpush.msrb.mxu2 %v7511_v16  ;;  %1806 = vmatpush.msrb.mxu3 %v7512_v17 }
 0x1d3   : > { %v1570_v24 = vsel %vm1121_vm2, %v9029_v19, -inf }
 0x1d4   : > { %1571 = vmax.xlane.f32.xlu1 %v1570_v24 }
 0x1d7   : > { %v7515_v16 = vpop.permute.xlu1 %7514 }
 0x1d8   : > { %v7517_v17 = vunpack.i.h.bf16 %v7515_v16  ;;  %v7516_v1 = vunpack.i.l.bf16 %v7515_v16  ;;  %v9045_v7 = vpop.permute.xlu0 %958  ;;  %v1200_v55 = vpop.f32.mrf.mxu0 }
 0x1d9   : > { %v9051_v24 = vadd.f32 %v1200_v55, %v9042_v11 }
 0x1da   : > { %1832 = vmatpush.msra.mxu1 %v7516_v1  ;;  %1858 = vmatpush.msra.mxu2 %v7517_v17  ;;  %v9070_v1 = vsel %vm1041_vm6, 0.0, %v11897_v9 }
 0x1db   : > { %v1573_v16 = vsel %vm1121_vm2, %v9051_v24, -inf  ;;  %11900 = vst [vmem:[#allocation63_spill] sm:$0xff] %v9070_v1 }
 0x1dc   : > { %1574 = vmax.xlane.f32.xlu2 %v1573_v16  ;;  %v9074_v16 = vmul.f32 %v994_v23, %v8971_v42 }
 0x1de   : > { %vm1042_vm7 = vcmp.gt.f32.partialorder %v9074_v16, 0.0  ;;  %v7563_v16 = vpack.i.bf16 %v8764_v12, %v8801_v39 }
 0x1df   : > { %v9087_v23 = vsel %vm1042_vm7, 0.0, %v11897_v9 }
 0x1e0   : > { %v7520_v17 = vpop.permute.xlu0 %7519  ;;  %1568 = vmax.xlane.f32.xlu0 %v1567_v61  ;;  %v1228_v55 = vpop.f32.mrf.mxu0  ;;  %v9082_v61 = vmul.f32 %v997_v35, %v917_v44  ;;  %11901 = vst [vmem:[#allocation64_spill] sm:$0xff] %v9087_v23 }
 0x1e1   : > { %v7522_v31 = vunpack.i.h.bf16 %v7520_v17  ;;  %v7521_v52 = vunpack.i.l.bf16 %v7520_v17  ;;  %v9077_v11 = vadd.f32 %v1228_v55, %v9070_v1  ;;  %v981_v17 = vrot.slane %v8726_v56, 6  ;;  %v9154_v1 = vpop.permute.xlu1 %7539 }
 0x1e2   : > { %vm1045_vm8 = vcmp.gt.f32.partialorder %v9082_v61, 0.0  ;;  %v7558_v61 = vpack.i.bf16 %v8772_v18, %v8748_v3 }
 0x1e3   : > { %1884 = vmatpush.msra.mxu3 %v7521_v52  ;;  %1910 = vmatpush.msrb.mxu1 %v7522_v31  ;;  %v1576_v2 = vsel %vm1121_vm2, %v9077_v11, -inf  ;;  %v9091_v52 = vmul.f32 %v995_v8, %v8994_v40  ;;  %v996_v35 = vperm.slane %v981_v17, 0  ;;  %v11903_v8 = vperm.slane %v8812_v46, 0 }
 0x1e4   : > { %1577 = vmax.xlane.f32.xlu2 %v1576_v2  ;;  %v9103_v2 = vsel %vm1045_vm8, 0.0, %v11897_v9 }
 0x1e5   : > { %vm1043_vm9 = vcmp.gt.f32.partialorder %v9091_v52, 0.0  ;;  %11902 = vst [vmem:[#allocation65_spill] sm:$0xff] %v9103_v2  ;;  %v9108_v40 = vmul.f32 %v8998_v59, %v11903_v8 }
 0x1e6   : > { %v9116_v55 = vsel %vm1043_vm9, 0.0, %v11897_v9 }
 0x1e7   : > { %11904 = vst [vmem:[#allocation66_spill] sm:$0xff] %v9116_v55  ;;  %vm1046_vm10 = vcmp.gt.f32.partialorder %v9108_v40, 0.0  ;;  %v7542_v40 = vunpack.i.h.bf16 %v9154_v1 }
 0x1e8   : > { %v1256_v42 = vpop.f32.mrf.mxu0 }
 0x1e9   : > { %v9094_v63 = vadd.f32 %v1256_v42, %v9087_v23  ;;  %v9119_v42 = vmul.f32 %v996_v35, %v8981_v62  ;;  %v9133_v62 = vsel %vm1046_vm10, 0.0, %v11897_v9 }
 0x1ea   : > { %11905 = vst [vmem:[#allocation67_spill] sm:$0xff] %v9133_v62 }
 0x1eb   : > { %v1579_v44 = vsel %vm1121_vm2, %v9094_v63, -inf  ;;  %vm1044_vm11 = vcmp.gt.f32.partialorder %v9119_v42, 0.0 }
 0x1ec   : > { %1580 = vmax.xlane.f32.xlu0 %v1579_v44  ;;  %v9141_v8 = vsel %vm1044_vm11, 0.0, %v11897_v9 }
 0x1ed   : > { %11906 = vst [vmem:[#allocation68_spill] sm:$0xff] %v9141_v8 }
 0x1ee   : > { %v1340_v56 = vpop.f32.mrf.mxu2 }
 0x1ef   : > { %v9111_v38 = vadd.f32 %v1340_v56, %v9103_v2 }
 0x1f0   : > { %v1284_v31 = vpop.f32.mrf.mxu0 }
 0x1f1   : > { %v9122_v17 = vadd.f32 %v1284_v31, %v9116_v55  ;;  %v1588_v44 = vsel %vm1121_vm2, %v9111_v38, -inf }
 0x1f3   : > { %v1582_v59 = vsel %vm1121_vm2, %v9122_v17, -inf }
 0x1f4   : > { %1583 = vmax.xlane.f32.xlu1 %v1582_v59  ;;  %1589 = vmax.xlane.f32.xlu0 %v1588_v44  ;;  %v9146_v44 = vpop.permute.xlu0 %7529 }
 0x1f6   : > { %v1368_v35 = vpop.f32.mrf.mxu3 }
 0x1f7   : > { %v9136_v56 = vadd.f32 %v1368_v35, %v9133_v62  ;;  %v985_v35 = vrot.slane %v8812_v46, 3  ;;  %v983_v62 = vrot.slane %v8812_v46, 1 }
 0x1f8   : > { %v1312_v31 = vpop.f32.mrf.mxu1 }
 0x1f9   : > { %v9144_v59 = vadd.f32 %v1312_v31, %v9141_v8  ;;  %v1591_v55 = vsel %vm1121_vm2, %v9136_v56, -inf  ;;  %v1001_v23 = vperm.slane %v985_v35, 0  ;;  %v999_v48 = vperm.slane %v983_v62, 0 }
 0x1fa   : > { %v984_v35 = vrot.slane %v8812_v46, 2 }
 0x1fb   : > { %v1585_v2 = vsel %vm1121_vm2, %v9144_v59, -inf  ;;  %v9159_v8 = vmul.f32 %v1001_v23, %v9010_v45  ;;  %v9162_v6 = vmul.f32 %v999_v48, %v8992_v27 }
 0x1fc   : > { %1586 = vmax.xlane.f32.xlu2 %v1585_v2  ;;  %1592 = vmax.xlane.f32.xlu1 %v1591_v55  ;;  %v9156_v31 = vpop.permute.xlu0 %2177  ;;  %v9166_v2 = vpop.permute.xlu1 %2205 }
 0x1fd   : > { %11907 = vst [vmem:[#allocation69_spill] sm:$0xff] %v9156_v31  ;;  %vm1049_vm12 = vcmp.gt.f32.partialorder %v9159_v8, 0.0  ;;  %vm1047_vm13 = vcmp.gt.f32.partialorder %v9162_v6, 0.0 }
 0x1fe   : > { %11908 = vst [vmem:[#allocation70_spill] sm:$0xff] %v9159_v8  ;;  %v9171_v55 = vsel %vm1049_vm12, 0.0, %v11897_v9  ;;  %v9182_v48 = vsel %vm1047_vm13, 0.0, %v11897_v9 }
 0x1ff   : > { %11909 = vst [vmem:[#allocation71_spill] sm:$0xff] %v9162_v6 }
 0x200   : > { %11910 = vst [vmem:[#allocation72_spill] sm:$0xff] %v9166_v2  ;;  %v1000_v2 = vperm.slane %v984_v35, 0 }
 0x201   : > { %11911 = vst [vmem:[#allocation73_spill] sm:$0xff] %v9171_v55 }
 0x202   : > { %11913 = vst [vmem:[#allocation75_spill] sm:$0xff] %v9182_v48 }
 0x204   : > { %v9174_v31 = vpop.permute.xlu0 %2175  ;;  %v9195_v49 = vpop.permute.xlu1 %2261 }
 0x205   : > { %11912 = vst [vmem:[#allocation74_spill] sm:$0xff] %v9174_v31 }
 0x206   : > { %11915 = vst [vmem:[#allocation77_spill] sm:$0xff] %v9195_v49 }
 0x20c   : > { %v9215_v49 = vpop.permute.xlu1 %2259 }
 0x20d   : > { %11920 = vst [vmem:[#allocation82_spill] sm:$0xff] %v9215_v49 }
 0x20e   : > { %v1452_v62 = vpop.f32.mrf.mxu3 }
 0x20f   : > { %v9177_v45 = vadd.f32 %v1452_v62, %v9171_v55  ;;  %v988_v62 = vrot.slane %v8812_v46, 6  ;;  %v9193_v55 = vmul.f32 %v1000_v2, %v9025_v10 }
 0x210   : > { %v1396_v27 = vpop.f32.mrf.mxu1 }
 0x211   : > { %v9185_v23 = vadd.f32 %v1396_v27, %v9182_v48  ;;  %v1600_v20 = vsel %vm1121_vm2, %v9177_v45, -inf  ;;  %11914 = vst [vmem:[#allocation76_spill] sm:$0xff] %v9193_v55  ;;  %v9198_v27 = vpop.permute.xlu0 %2233  ;;  %v1004_v48 = vperm.slane %v988_v62, 0  ;;  %vm1048_vm14 = vcmp.gt.f32.partialorder %v9193_v55, 0.0 }
 0x212   : > { %1601 = vmax.xlane.f32.xlu1 %v1600_v20  ;;  %11916 = vst [vmem:[#allocation78_spill] sm:$0xff] %v9198_v27  ;;  %v1002_v20 = vperm.slane %v986_v5, 0  ;;  %v9204_v35 = vsel %vm1048_vm14, 0.0, %v11897_v9  ;;  %v989_v55 = vrot.slane %v8812_v46, 7 }
 0x213   : > { %v1594_v31 = vsel %vm1121_vm2, %v9185_v23, -inf  ;;  %11917 = vst [vmem:[#allocation79_spill] sm:$0xff] %v9204_v35  ;;  %v9207_v8 = vmul.f32 %v1004_v48, %v9018_v30 }
 0x214   : > { %1595 = vmax.xlane.f32.xlu2 %v1594_v31  ;;  %v9213_v2 = vmul.f32 %v1002_v20, %v8996_v50 }
 0x215   : > { %11918 = vst [vmem:[#allocation80_spill] sm:$0xff] %v9207_v8  ;;  %vm11784_vm15 = vcmp.gt.f32.partialorder %v9207_v8, 0.0 }
 0x216   : > { %11919 = vst [vmem:[#allocation81_spill] sm:$0xff] %v9213_v2  ;;  %vm1050_vm0 = vcmp.gt.f32.partialorder %v9213_v2, 0.0  ;;  %v9226_v30 = vsel %vm11784_vm15, 0.0, %v11897_v9 }
 0x217   : > { %11922 = vst [vmem:[#allocation84_spill] sm:$0xff] %v9226_v30  ;;  %v9234_v20 = vsel %vm1050_vm0, 0.0, %v11897_v9 }
 0x218   : > { %11923 = vst [vmem:[#allocation85_spill] sm:$0xff] %v9234_v20 }
 0x219   : > { %v9220_v62 = vpop.permute.xlu0 %2231 }
 0x21a   : > { %11921 = vst [vmem:[#allocation83_spill] sm:$0xff] %v9220_v62  ;;  %v9244_v62 = vpop.permute.xlu1 %2317 }
 0x21b   : > { %11924 = vst [vmem:[#allocation86_spill] sm:$0xff] %v9244_v62 }
 0x21e   : > { %v1424_v31 = vpop.f32.mrf.mxu2 }
 0x21f   : > { %v9210_v10 = vadd.f32 %v1424_v31, %v9204_v35  ;;  %v987_v31 = vrot.slane %v8812_v46, 5  ;;  %v9237_v35 = vpop.permute.xlu2 %7524 }
 0x221   : > { %v1597_v5 = vsel %vm1121_vm2, %v9210_v10, -inf  ;;  %v9248_v27 = vpop.permute.xlu0 %2289 }
 0x222   : > { %1598 = vmax.xlane.f32.xlu0 %v1597_v5  ;;  %11925 = vst [vmem:[#allocation87_spill] sm:$0xff] %v9248_v27 }
 0x226   : > { %v1536_v48 = vpop.f32.mrf.mxu3 }
 0x227   : > { %v9229_v50 = vadd.f32 %v1536_v48, %v9226_v30  ;;  %v1003_v30 = vperm.slane %v987_v31, 0 }
 0x228   : > { %v1480_v5 = vpop.f32.mrf.mxu1 }
 0x229   : > { %v9240_v49 = vadd.f32 %v1480_v5, %v9234_v20  ;;  %v1609_v8 = vsel %vm1121_vm2, %v9229_v50, -inf  ;;  %v9251_v2 = vmul.f32 %v1003_v30, %v9045_v7  ;;  %v9254_v5 = vpop.permute.xlu2 %7534  ;;  %v9257_v20 = vpop.permute.xlu1 %2287 }
 0x22a   : > { %1610 = vmax.xlane.f32.xlu1 %v1609_v8  ;;  %11927 = vst [vmem:[#allocation89_spill] sm:$0xff] %v9257_v20  ;;  %v1005_v8 = vperm.slane %v989_v55, 0  ;;  %v9264_v31 = vpop.permute.xlu0 %2345 }
 0x22b   : > { %v1603_v48 = vsel %vm1121_vm2, %v9240_v49, -inf  ;;  %11926 = vst [vmem:[#allocation88_spill] sm:$0xff] %v9251_v2  ;;  %vm1051_vm1 = vcmp.gt.f32.partialorder %v9251_v2, 0.0 }
 0x22c   : > { %1604 = vmax.xlane.f32.xlu2 %v1603_v48  ;;  %v9262_v62 = vsel %vm1051_vm1, 0.0, %v11897_v9  ;;  %11929 = vst [vmem:[#allocation91_spill] sm:$0xff] %v9264_v31  ;;  %v9270_v46 = vmul.f32 %v1005_v8, %v9008_v51 }
 0x22d   : > { %11928 = vst [vmem:[#allocation90_spill] sm:$0xff] %v9262_v62 }
 0x22e   : > { %11930 = vst [vmem:[#allocation92_spill] sm:$0xff] %v9270_v46  ;;  %vm1053_vm15 = vcmp.gt.f32.partialorder %v9270_v46, 0.0 }
 0x22f   : > { %v9282_v31 = vsel %vm1053_vm15, 0.0, %v11897_v9 }
 0x230   : > { %11933 = vst [vmem:[#allocation95_spill] sm:$0xff] %v9282_v31 }
 0x231   : > { %v9274_v20 = vpop.permute.xlu2 %2203  ;;  %v9277_v55 = vpop.permute.xlu1 %2373 }
 0x232   : > { %11931 = vst [vmem:[#allocation93_spill] sm:$0xff] %v9274_v20 }
 0x233   : > { %11932 = vst [vmem:[#allocation94_spill] sm:$0xff] %v9277_v55 }
 0x237   : > { %v1508_v48 = vpop.f32.mrf.mxu2 }
 0x238   : > { %v9267_v7 = vadd.f32 %v1508_v48, %v9262_v62  ;;  %v9284_v48 = vpop.permute.xlu0 %2343 }
 0x239   : > { %11934 = vst [vmem:[#allocation96_spill] sm:$0xff] %v9284_v48 }
 0x23a   : > { %v1606_v30 = vsel %vm1121_vm2, %v9267_v7, -inf }
 0x23b   : > { %1607 = vmax.xlane.f32.xlu0 %v1606_v30  ;;  %v9291_v30 = vpop.permute.xlu2 %2315 }
 0x23c   : > { %11935 = vst [vmem:[#allocation97_spill] sm:$0xff] %v9291_v30 }
 0x240   : > { %v9294_v2 = vpop.permute.xlu0 %7544 }
 0x241   : > { %v1564_v62 = vpop.f32.mrf.mxu1 }
 0x242   : > { %v9287_v51 = vadd.f32 %v1564_v62, %v9282_v31 }
 0x244   : > { %v1612_v8 = vsel %vm1121_vm2, %v9287_v51, -inf }
 0x245   : > { %1613 = vmax.xlane.f32.xlu2 %v1612_v8 }
 0x247   : > { %v1572_v20 = vpop.xlane.xlu1 %1571 }
 0x248   : > { %v1616_v55 = vsub.f32 %v9029_v19, %v1572_v20 }
 0x24a   : > { %v1633_v27 = vmul.f32 1.442695, %v1616_v55 }
 0x24c   : > { %7809 = vpow2.f32 %v1633_v27 }
 0x24f   : > { %v1575_v9 = vpop.xlane.xlu2 %1574 }
 0x250   : > { %v1617_v48 = vsub.f32 %v9051_v24, %v1575_v9 }
 0x252   : > { %v9297_v46 = vpop.eup %7809  ;;  %v1635_v62 = vmul.f32 1.442695, %v1617_v48 }
 0x253   : > { %v1569_v31 = vpop.xlane.xlu0 %1568  ;;  %v1666_v53 = vsel %vm1121_vm2, %v9297_v46, 0.0 }
 0x254   : > { %7811 = vpow2.f32 %v1635_v62  ;;  %v1615_v8 = vsub.f32 %v9059_v21, %v1569_v31  ;;  %1667 = vadd.xlane.f32.xlu1 %v1666_v53 }
 0x256   : > { %v1631_v30 = vmul.f32 1.442695, %v1615_v8 }
 0x257   : > { %v1578_v19 = vpop.xlane.xlu2 %1577 }
 0x258   : > { %7813 = vpow2.f32 %v1631_v30  ;;  %v1618_v20 = vsub.f32 %v9077_v11, %v1578_v19 }
 0x25a   : > { %v9303_v27 = vpop.eup %7811  ;;  %v1637_v55 = vmul.f32 1.442695, %v1618_v20 }
 0x25b   : > { %v1669_v24 = vsel %vm1121_vm2, %v9303_v27, 0.0 }
 0x25c   : > { %1670 = vadd.xlane.f32.xlu2 %v1669_v24  ;;  %7815 = vpow2.f32 %v1637_v55 }
 0x25e   : > { %v9307_v48 = vpop.eup %7813 }
 0x25f   : > { %v1663_v9 = vsel %vm1121_vm2, %v9307_v48, 0.0  ;;  %v1581_v21 = vpop.xlane.xlu0 %1580 }
 0x260   : > { %1664 = vadd.xlane.f32.xlu0 %v1663_v9  ;;  %v1619_v53 = vsub.f32 %v9094_v63, %v1581_v21 }
 0x262   : > { %v1639_v31 = vmul.f32 1.442695, %v1619_v53  ;;  %v9312_v30 = vpop.eup %7815 }
 0x263   : > { %v1672_v62 = vsel %vm1121_vm2, %v9312_v30, 0.0 }
 0x264   : > { %7817 = vpow2.f32 %v1639_v31 }
 0x267   : > { %v1584_v11 = vpop.xlane.xlu1 %1583  ;;  %v1590_v8 = vpop.xlane.xlu0 %1589 }
 0x268   : > { %v1620_v19 = vsub.f32 %v9122_v17, %v1584_v11  ;;  %1673 = vadd.xlane.f32.xlu0 %v1672_v62  ;;  %v1622_v24 = vsub.f32 %v9111_v38, %v1590_v8 }
 0x26a   : > { %v9317_v20 = vpop.eup %7817  ;;  %v1641_v55 = vmul.f32 1.442695, %v1620_v19  ;;  %v1645_v9 = vmul.f32 1.442695, %v1622_v24 }
 0x26b   : > { %v1675_v63 = vsel %vm1121_vm2, %v9317_v20, 0.0 }
 0x26c   : > { %7819 = vpow2.f32 %v1641_v55  ;;  %1676 = vadd.xlane.f32.xlu1 %v1675_v63 }
 0x26d   : > { %7821 = vpow2.f32 %v1645_v9 }
 0x26f   : > { %v1587_v21 = vpop.xlane.xlu2 %1586  ;;  %v1593_v53 = vpop.xlane.xlu1 %1592 }
 0x270   : > { %v1621_v31 = vsub.f32 %v9144_v59, %v1587_v21  ;;  %v1623_v43 = vsub.f32 %v9136_v56, %v1593_v53 }
 0x272   : > { %v9324_v6 = vpop.eup %7819  ;;  %v1643_v17 = vmul.f32 1.442695, %v1621_v31  ;;  %v1647_v11 = vmul.f32 1.442695, %v1623_v43 }
 0x273   : > { %v1678_v38 = vsel %vm1121_vm2, %v9324_v6, 0.0  ;;  %v9328_v62 = vpop.eup %7821 }
 0x274   : > { %7823 = vpow2.f32 %v1643_v17  ;;  %1679 = vadd.xlane.f32.xlu0 %v1678_v38  ;;  %v1684_v59 = vsel %vm1121_vm2, %v9328_v62, 0.0 }
 0x275   : > { %7825 = vpow2.f32 %v1647_v11 }
 0x27a   : > { %v9330_v8 = vpop.eup %7823 }
 0x27b   : > { %v9332_v19 = vpop.eup %7825  ;;  %v1681_v56 = vsel %vm1121_vm2, %v9330_v8, 0.0 }
 0x27c   : > { %v1687_v43 = vsel %vm1121_vm2, %v9332_v19, 0.0  ;;  %1682 = vadd.xlane.f32.xlu1 %v1681_v56  ;;  %1685 = vadd.xlane.f32.xlu0 %v1684_v59 }
 0x27d   : > { %1688 = vadd.xlane.f32.xlu2 %v1687_v43 }
 0x285   : > { %v1602_v55 = vpop.xlane.xlu1 %1601 }
 0x286   : > { %v1626_v9 = vsub.f32 %v9177_v45, %v1602_v55 }
 0x287   : > { %v1596_v24 = vpop.xlane.xlu2 %1595 }
 0x288   : > { %v1624_v63 = vsub.f32 %v9185_v23, %v1596_v24  ;;  %v1653_v53 = vmul.f32 1.442695, %v1626_v9 }
 0x28a   : > { %v1649_v21 = vmul.f32 1.442695, %v1624_v63 }
 0x28c   : > { %7827 = vpow2.f32 %v1649_v21 }
 0x28d   : > { %7829 = vpow2.f32 %v1653_v53 }
 0x292   : > { %v9342_v31 = vpop.eup %7827 }
 0x293   : > { %v1690_v17 = vsel %vm1121_vm2, %v9342_v31, 0.0  ;;  %v9349_v56 = vpop.eup %7829 }
 0x294   : > { %1691 = vadd.xlane.f32.xlu1 %v1690_v17  ;;  %v1696_v45 = vsel %vm1121_vm2, %v9349_v56, 0.0 }
 0x295   : > { %2429 = vrot.lane.b32.xlu2 %v8784_v26, %s8366_s19  ;;  %v1599_v11 = vpop.xlane.xlu0 %1598 }
 0x296   : > { %v1625_v38 = vsub.f32 %v9210_v10, %v1599_v11 }
 0x298   : > { %v1651_v23 = vmul.f32 1.442695, %v1625_v38 }
 0x29a   : > { %7831 = vpow2.f32 %v1651_v23 }
 0x29c   : > { %1697 = vadd.xlane.f32.xlu1 %v1696_v45 }
 0x29f   : > { %v1605_v59 = vpop.xlane.xlu2 %1604 }
 0x2a0   : > { %v9353_v43 = vpop.eup %7831  ;;  %v1627_v55 = vsub.f32 %v9240_v49, %v1605_v59  ;;  %v1611_v49 = vpop.xlane.xlu1 %1610 }
 0x2a1   : > { %v1693_v24 = vsel %vm1121_vm2, %v9353_v43, 0.0 }
 0x2a2   : > { %v1655_v63 = vmul.f32 1.442695, %v1627_v55  ;;  %1694 = vadd.xlane.f32.xlu0 %v1693_v24 }
 0x2a4   : > { %7833 = vpow2.f32 %v1655_v63  ;;  %v8369_v63 = vmov 0.0  }
 0x2a5   : > { %v9403_v0 = vsel %vm1038_vm5, 1.0, %v8369_v63  ;;  %v9433_v29 = vsel %vm1042_vm7, 1.0, %v8369_v63  ;;  %v9475_v42 = vsel %vm1045_vm8, 1.0, %v8369_v63  ;;  %vm12165_vm5 = vcmask 261120  }
 0x2a6   : > { %11938 = vst [vmem:[#allocation100_spill] sm:$0xff] %v9475_v42  ;;  %vm12171_vm7 = vmmov %vm12165_vm5 }
 0x2a7   : > { %vm12174_vm8 = vmmov %vm12165_vm5 }
 0x2aa   : > { %v9358_v10 = vpop.eup %7833 }
 0x2ab   : > { %v1699_v9 = vsel %vm1121_vm2, %v9358_v10, 0.0 }
 0x2ac   : > { %1700 = vadd.xlane.f32.xlu0 %v1699_v9  ;;  %v9378_v9 = vsel %vm1039_vm3, 1.0, %v8369_v63  ;;  %vm5551_vm3 = vcmask 130048  }
 0x2ae   : > { %v1608_v45 = vpop.xlane.xlu0 %1607 }
 0x2b5   : > { %2427 = vrot.lane.b32.xlu1 %v8943_v25, %s8367_s1 }
 0x2b8   : > { %v1614_v21 = vpop.xlane.xlu2 %1613 }
 0x2b9   : > { %v1630_v53 = vsub.f32 %v9287_v51, %v1614_v21  ;;  %v1628_v51 = vsub.f32 %v9267_v7, %v1608_v45 }
 0x2bb   : > { %v1661_v17 = vmul.f32 1.442695, %v1630_v53  ;;  %v1657_v21 = vmul.f32 1.442695, %v1628_v51 }
 0x2bd   : > { %7835 = vpow2.f32 %v1661_v17  ;;  %v7527_v17 = vunpack.i.h.bf16 %v9237_v35 }
 0x2c0   : > { %2371 = vrot.lane.b32.xlu0 %v8870_v36, %s8367_s1 }
 0x2c3   : > { %v9367_v11 = vpop.eup %7835 }
 0x2c4   : > { %v1708_v38 = vsel %vm1121_vm2, %v9367_v11, 0.0 }
 0x2c5   : > { %1709 = vadd.xlane.f32.xlu2 %v1708_v38 }
 0x2c7   : > { %v1668_v23 = vpop.xlane.xlu1 %1667 }
 0x2c8   : > { %7837 = vrcp.f32 %v1668_v23  ;;  %2401 = vrot.lane.b32.xlu0 %v8780_v22, %s8366_s19  ;;  %v9390_v23 = vsel %vm1040_vm4, 1.0, %v8369_v63  ;;  %vm5568_vm4 = vcmask 195584  }
 0x2ce   : > { %v7838_v59 = vpop.eup %7837 }
 0x2cf   : > { %v1728_v55 = vmul.f32 %v7838_v59, %v9297_v46  ;;  %v1671_v24 = vpop.xlane.xlu2 %1670  ;;  %v1629_v46 = vsub.f32 %v9229_v50, %v1611_v49 }
 0x2d0   : > { %7839 = vrcp.f32 %v1671_v24  ;;  %2541 = vrot.lane.b32.xlu0 %v8801_v39, %s8366_s19 }
 0x2d1   : > { %v1744_v53 = vmul.f32 %v9378_v9, %v1728_v55  ;;  %v1659_v45 = vmul.f32 1.442695, %v1629_v46  ;;  %v7531_v55 = vunpack.i.l.bf16 %v9146_v44 }
 0x2d3   : > { %v1665_v7 = vpop.xlane.xlu0 %1664  ;;  %7163 = vmatmul.msk.f32.vlgmr.msrb.gmra.mxu3 %vm1121_vm2, %v1744_v53 }
 0x2d4   : > { %7841 = vrcp.f32 %v1665_v7  ;;  %1962 = vmatpush.msrb.mxu3 %v7527_v17 }
 0x2d5   : > { %7843 = vpow2.f32 %v1657_v21  ;;  %v7526_v21 = vunpack.i.l.bf16 %v9237_v35  ;;  %v9420_v35 = vsel %vm1041_vm6, 1.0, %v8369_v63  ;;  %vm12168_vm6 = vmmov %vm12165_vm5 }
 0x2d6   : > { %v7840_v37 = vpop.eup %7839 }
 0x2d7   : > { %v1729_v38 = vmul.f32 %v7840_v37, %v9303_v27 }
 0x2d8   : > { %2483 = vrot.lane.b32.xlu0 %v8931_v15, %s8367_s1 }
 0x2d9   : > { %v1745_v51 = vmul.f32 %v9390_v23, %v1729_v38  ;;  %v7532_v38 = vunpack.i.h.bf16 %v9146_v44 }
 0x2da   : > { %v7842_v59 = vpop.eup %7841 }
 0x2db   : > { %v9396_v24 = vpop.eup %7843  ;;  %v1727_v50 = vmul.f32 %v7842_v59, %v9307_v48  ;;  %v1674_v49 = vpop.xlane.xlu0 %1673  ;;  %7164 = vmatmul.msk.f32.vlgmr.msra.gmra.mxu1 %vm1121_vm2, %v1745_v51  ;;  %v7536_v59 = vunpack.i.l.bf16 %v9254_v5 }
 0x2dc   : > { %7845 = vrcp.f32 %v1674_v49  ;;  %1988 = vmatpush.msra.mxu1 %v7531_v55  ;;  %v1702_v48 = vsel %vm1121_vm2, %v9396_v24, 0.0 }
 0x2dd   : > { %7847 = vpow2.f32 %v1659_v45  ;;  %v1743_v27 = vmul.f32 %v9403_v0, %v1727_v50  ;;  %2457 = vrot.lane.b32.xlu2 %v8788_v28, %s8366_s19 }
 0x2df   : > { %7162 = vmatmul.msk.f32.vlgmr.msrb.gmra.mxu2 %vm1121_vm2, %v1743_v27  ;;  %v1677_v53 = vpop.xlane.xlu1 %1676  ;;  %1703 = vadd.xlane.f32.xlu1 %v1702_v48  ;;  %v9448_v27 = vsel %vm1043_vm9, 1.0, %v8369_v63  ;;  %vm12177_vm9 = vmmov %vm12165_vm5 }
 0x2e0   : > { %1936 = vmatpush.msrb.mxu2 %v7526_v21  ;;  %7849 = vrcp.f32 %v1677_v53  ;;  %2567 = vrot.lane.b32.xlu0 %v8965_v41, %s8367_s1  ;;  %11936 = vst [vmem:[#allocation98_spill] sm:$0xff] %v9448_v27  ;;  %v7537_v53 = vunpack.i.h.bf16 %v9254_v5  ;;  %v9468_v5 = vsel %vm1046_vm10, 1.0, %v8369_v63  ;;  %vm12179_vm10 = vmmov %vm12165_vm5 }
 0x2e1   : > { %11937 = vst [vmem:[#allocation99_spill] sm:$0xff] %v9468_v5 }
 0x2e2   : > { %v7846_v47 = vpop.eup %7845 }
 0x2e3   : > { %v9414_v17 = vpop.eup %7847  ;;  %v1730_v7 = vmul.f32 %v7846_v47, %v9312_v30 }
 0x2e4   : > { %v1705_v45 = vsel %vm1121_vm2, %v9414_v17, 0.0 }
 0x2e5   : > { %v1746_v46 = vmul.f32 %v9420_v35, %v1730_v7  ;;  %2399 = vrot.lane.b32.xlu2 %v8889_v57, %s8367_s1 }
 0x2e6   : > { %v7850_v37 = vpop.eup %7849 }
 0x2e7   : > { %v1731_v51 = vmul.f32 %v7850_v37, %v9317_v20  ;;  %7165 = vmatmul.msk.f32.vlgmr.msra.gmra.mxu2 %vm1121_vm2, %v1746_v46  ;;  %1706 = vadd.xlane.f32.xlu1 %v1705_v45  ;;  %v1680_v30 = vpop.xlane.xlu0 %1679  ;;  %v9460_v46 = vsel %vm1044_vm11, 1.0, %v8369_v63  ;;  %vm12181_vm11 = vmmov %vm12165_vm5 }
 0x2e8   : > { %2014 = vmatpush.msra.mxu2 %v7532_v38  ;;  %7851 = vrcp.f32 %v1680_v30  ;;  %2595 = vrot.lane.b32.xlu0 %v9003_v60, %s8367_s1 }
 0x2e9   : > { %v1747_v44 = vmul.f32 %v9433_v29, %v1731_v51  ;;  %v7546_v51 = vunpack.i.l.bf16 %v9294_v2 }
 0x2eb   : > { %7166 = vmatmul.msk.f32.vlgmr.msra.gmra.mxu3 %vm1121_vm2, %v1747_v44 }
 0x2ec   : > { %2040 = vmatpush.msra.mxu3 %v7536_v59 }
 0x2ed   : > { %2539 = vrot.lane.b32.xlu2 %v8985_v13, %s8367_s1 }
 0x2ee   : > { %v7852_v20 = vpop.eup %7851 }
 0x2ef   : > { %v1732_v55 = vmul.f32 %v7852_v20, %v9324_v6  ;;  %v1683_v50 = vpop.xlane.xlu1 %1682  ;;  %v1686_v49 = vpop.xlane.xlu0 %1685 }
 0x2f0   : > { %v1689_v21 = vpop.xlane.xlu2 %1688  ;;  %7853 = vrcp.f32 %v1683_v50  ;;  %7564 = vrot.lane.b32.xlu0 %v7563_v16, %s8370_s7  ;;  %v9504_v16 = vsel %vm1047_vm13, 1.0, %v8369_v63  ;;  %vm12186_vm13 = vmmov %vm12165_vm5 }
 0x2f1   : > { %v1748_v48 = vmul.f32 %v9448_v27, %v1732_v55  ;;  %7855 = vrcp.f32 %v1689_v21  ;;  %11940 = vst [vmem:[#allocation71_spill] sm:$0xff] %v9504_v16  ;;  %v11941_v55 = vld [vmem:[#allocation45_spill] sm:$0xff] }
 0x2f2   : > { %7857 = vrcp.f32 %v1686_v49  ;;  %v7547_v49 = vunpack.i.h.bf16 %v9294_v2  ;;  %v11946_v2 = vld [vmem:[#allocation57_spill] sm:$0xff] }
 0x2f3   : > { %7167 = vmatmul.msk.f32.vlgmr.msrb.gmra.mxu1 %vm1121_vm2, %v1748_v48  ;;  %v11942_v48 = vld [vmem:[#allocation51_spill] sm:$0xff] }
 0x2f4   : > { %2066 = vmatpush.msrb.mxu1 %v7537_v53 }
 0x2f5   : > { %2513 = vrot.lane.b32.xlu2 %v8796_v34, %s8366_s19 }
 0x2f6   : > { %v7854_v6 = vpop.eup %7853 }
 0x2f7   : > { %v7856_v52 = vpop.eup %7855  ;;  %v1733_v47 = vmul.f32 %v7854_v6, %v9330_v8 }
 0x2f8   : > { %v7858_v7 = vpop.eup %7857  ;;  %v1735_v37 = vmul.f32 %v7856_v52, %v9332_v19  ;;  %3261 = vrot.lane.b32.xlu0 %v8752_v4, %s8371_s22  ;;  %v7541_v19 = vunpack.i.l.bf16 %v9154_v1  ;;  %v9519_v52 = vsel %vm1049_vm12, 1.0, %v8369_v63  ;;  %vm12184_vm12 = vmmov %vm12165_vm5 }
 0x2f9   : > { %v1749_v38 = vmul.f32 %v9460_v46, %v1733_v47  ;;  %v1734_v8 = vmul.f32 %v7858_v7, %v9328_v62  ;;  %11944 = vst [vmem:[#allocation70_spill] sm:$0xff] %v9519_v52  ;;  %v11945_v47 = vld [vmem:[#allocation47_spill] sm:$0xff] }
 0x2fa   : > { %v1751_v45 = vmul.f32 %v9468_v5, %v1735_v37  ;;  %v12018_v5 = vld [vmem:[#allocation95_spill] sm:$0xff] }
 0x2fb   : > { %v1750_v30 = vmul.f32 %v9475_v42, %v1734_v8  ;;  %7168 = vmatmul.msk.f32.vlgmr.msrb.gmra.mxu2 %vm1121_vm2, %v1749_v38  ;;  %v11947_v38 = vld [vmem:[#allocation72_spill] sm:$0xff] }
 0x2fc   : > { %7170 = vmatmul.msk.f32.vlgmr.msra.gmra.mxu1 %vm1121_vm2, %v1751_v45  ;;  %2092 = vmatpush.msrb.mxu2 %v7541_v19 }
 0x2fd   : > { %7169 = vmatmul.msk.f32.vlgmr.msrb.gmra.mxu3 %vm1121_vm2, %v1750_v30  ;;  %2144 = vmatpush.msra.mxu1 %v7546_v51  ;;  %v9535_v51 = vsel %vm1048_vm14, 1.0, %v8369_v63  ;;  %v9540_v30 = vpack.i.bf16 %v8820_v54, %v8792_v32  ;;  %vm12190_vm14 = vmmov %vm12165_vm5 }
 0x2fe   : > { %2118 = vmatpush.msrb.mxu3 %v7542_v40  ;;  %2597 = vrot.lane.b32.xlu2 %v8820_v54, %s8366_s19  ;;  %11950 = vst [vmem:[#allocation57_spill] sm:$0xff] %v9535_v51  ;;  %v9544_v40 = vpack.i.bf16 %v8768_v14, %v8752_v4 }
 0x2ff   : > { %11951 = vst [vmem:[#allocation72_spill] sm:$0xff] %v9540_v30 }
 0x300   : > { %3373 = vrot.lane.b32.xlu0 %v8768_v14, %s8371_s22  ;;  %2455 = vrot.lane.b32.xlu1 %v8955_v33, %s8367_s1 }
 0x306   : > { %7559 = vrot.lane.b32.xlu2 %v7558_v61, %s8370_s7 }
 0x307   : > { %v1692_v1 = vpop.xlane.xlu1 %1691 }
 0x308   : > { %7859 = vrcp.f32 %v1692_v1  ;;  %3485 = vrot.lane.b32.xlu0 %v8784_v26, %s8371_s22  ;;  %2485 = vrot.lane.b32.xlu1 %v8792_v32, %s8366_s19 }
 0x30e   : > { %v7860_v62 = vpop.eup %7859  ;;  %3259 = vrot.lane.b32.xlu2 %v8832_v58, %s8372_s24 }
 0x30f   : > { %v1736_v44 = vmul.f32 %v7860_v62, %v9342_v31  ;;  %v1698_v59 = vpop.xlane.xlu1 %1697 }
 0x310   : > { %7861 = vrcp.f32 %v1698_v59  ;;  %3233 = vrot.lane.b32.xlu0 %v8748_v3, %s8371_s22  ;;  %2569 = vrot.lane.b32.xlu1 %v11941_v55, %s8366_s19  ;;  %s643_s19 = scalar_lea.vmem [#allocation11], %s8576_s8 }
 0x311   : > { %v1752_v50 = vmul.f32 %v9504_v16, %v1736_v44  ;;  %v11953_v44 = vld [vmem:[#allocation40_spill] sm:$0xff] }
 0x312   : > { %v7553_v59 = vpack.i.bf16 %v8784_v26, %v11953_v44 }
 0x313   : > { %7171 = vmatmul.msk.f32.vlgmr.msra.gmra.mxu2 %vm1121_vm2, %v1752_v50 }
 0x314   : > { %2170 = vmatpush.msra.mxu2 %v7547_v49  ;;  %v9562_v49 = vsel %vm1050_vm0, 1.0, %v8369_v63  ;;  %vm12193_vm0 = vmmov %vm12165_vm5 }
 0x315   : > { %v1695_v31 = vpop.xlane.xlu0 %1694 }
 0x316   : > { %v7862_v21 = vpop.eup %7861  ;;  %3371 = vrot.lane.b32.xlu2 %v11942_v48, %s8372_s24  ;;  %7863 = vrcp.f32 %v1695_v31  ;;  %v11956_v31 = vld [vmem:[#allocation46_spill] sm:$0xff]  ;;  %v12004_v48 = vld [vmem:[#allocation64_spill] sm:$0xff] }
 0x317   : > { %v1738_v53 = vmul.f32 %v7862_v21, %v9349_v56  ;;  %v11948_v56 = vld [vmem:[#allocation43_spill] sm:$0xff] }
 0x318   : > { %3287 = vrot.lane.b32.xlu0 %v11945_v47, %s8372_s24  ;;  %2511 = vrot.lane.b32.xlu1 %v11946_v2, %s8367_s1  ;;  %v7578_v8 = vpack.i.bf16 %v8796_v34, %v11948_v56  ;;  %11955 = vst [vmem:[#allocation43_spill] sm:$0xff] %v9562_v49  ;;  %s6963_s1 = sshll.u32 %s643_s19, 4  ;;  %s6964_s1 = int_to_ptr.vmem [resolvable:$true] %s6963_s1 }
 0x319   : > { %v1754_v7 = vmul.f32 %v9519_v52, %v1738_v53  ;;  %v11957_v53 = vld [vmem:[#allocation78_spill] sm:$0xff] }
 0x31b   : > { %7173 = vmatmul.msk.f32.vlgmr.msrb.gmra.mxu1 %vm1121_vm2, %v1754_v7  ;;  %v2430_v7 = vpop.permute.xlu2 %2429 }
 0x31c   : > { %v7864_v37 = vpop.eup %7863  ;;  %7180 = vmatpush.xpose.msk.msrb.mxu1 %vm1121_vm2, %v11947_v38 }
 0x31d   : > { %v1737_v19 = vmul.f32 %v7864_v37, %v9353_v43  ;;  %v11952_v43 = vld [vmem:[#allocation69_spill] sm:$0xff]  ;;  %v7573_v37 = vpack.i.bf16 %v11941_v55, %v8780_v22 }
 0x31e   : > { %7579 = vrot.lane.b32.xlu2 %v7578_v8, %s8370_s7  ;;  %v11959_v8 = vld [vmem:[#allocation52_spill] sm:$0xff] }
 0x31f   : > { %v1753_v61 = vmul.f32 %v9535_v51, %v1737_v19  ;;  %v1701_v1 = vpop.xlane.xlu0 %1700 }
 0x320   : > { %7865 = vrcp.f32 %v1701_v1  ;;  %7584 = vrot.lane.b32.xlu0 %v9540_v30, %s8370_s7  ;;  %7549 = vrot.lane.b32.xlu1 %v9544_v40, %s8370_s7 }
 0x321   : > { %7172 = vmatmul.msk.f32.vlgmr.msra.gmra.mxu3 %vm1121_vm2, %v1753_v61  ;;  %v11960_v61 = vld [vmem:[#allocation50_spill] sm:$0xff] }
 0x322   : > { %7178 = vmatpush.xpose.msk.msra.mxu3 %vm1121_vm2, %v11952_v43  ;;  %v9593_v43 = vsel %vm1053_vm15, 1.0, %v8369_v63  ;;  %vm12191_vm15 = vmmov %vm12165_vm5 }
 0x323   : > { %11962 = vst [vmem:[#allocation76_spill] sm:$0xff] %v9593_v43 }
 0x326   : > { %v7866_v62 = vpop.eup %7865  ;;  %3289 = vrot.lane.b32.xlu2 %v11953_v44, %s8371_s22 }
 0x327   : > { %v1739_v20 = vmul.f32 %v7866_v62, %v9358_v10  ;;  %v11958_v10 = vld [vmem:[#allocation41_spill] sm:$0xff] }
 0x328   : > { %3231 = vrot.lane.b32.xlu0 %v11956_v31, %s8372_s24  ;;  %7554 = vrot.lane.b32.xlu1 %v7553_v59, %s8370_s7  ;;  %v7568_v6 = vpack.i.bf16 %v11958_v10, %v8788_v28  ;;  %v12005_v31 = vld [vmem:[#allocation66_spill] sm:$0xff] }
 0x329   : > { %v1755_v21 = vmul.f32 %v9562_v49, %v1739_v20  ;;  %v11963_v20 = vld [vmem:[#allocation86_spill] sm:$0xff] }
 0x32b   : > { %7174 = vmatmul.msk.f32.vlgmr.msrb.gmra.mxu2 %vm1121_vm2, %v1755_v21  ;;  %v11964_v21 = vld [vmem:[#allocation83_spill] sm:$0xff] }
 0x32c   : > { %7182 = vmatpush.xpose.msk.msrb.mxu2 %vm1121_vm2, %v11957_v53 }
 0x32e   : > { %3597 = vrot.lane.b32.xlu2 %v8801_v39, %s8371_s22 }
 0x330   : > { %3401 = vrot.lane.b32.xlu0 %v8772_v18, %s8371_s22  ;;  %7569 = vrot.lane.b32.xlu1 %v7568_v6, %s8370_s7 }
 0x332   : > { %v2372_v62 = vpop.permute.xlu0 %2371 }
 0x336   : > { %3457 = vrot.lane.b32.xlu2 %v8780_v22, %s8371_s22 }
 0x338   : > { %v1710_v38 = vpop.xlane.xlu2 %1709  ;;  %3399 = vrot.lane.b32.xlu0 %v11959_v8, %s8372_s24  ;;  %7574 = vrot.lane.b32.xlu1 %v7573_v37, %s8370_s7  ;;  %v11965_v37 = vld [vmem:[#allocation97_spill] sm:$0xff]  ;;  %s6965_s7 = sshll.u32 %s6961_s18, 4  ;;  %s6966_s7 = int_to_ptr.hbm [resolvable:$true] %s6965_s7 }
 0x339   : > { %7867 = vrcp.f32 %v1710_v38 }
 0x33a   : > { %v2402_v50 = vpop.permute.xlu0 %2401 }
 0x33f   : > { %v7868_v19 = vpop.eup %7867 }
 0x340   : > { %v1742_v45 = vmul.f32 %v7868_v19, %v9367_v11  ;;  %3343 = vrot.lane.b32.xlu0 %v11960_v61, %s8372_s24  ;;  %3483 = vrot.lane.b32.xlu1 %v8943_v25, %s8372_s24  ;;  %v2428_v11 = vpop.permute.xlu1 %2427  ;;  %v2458_v53 = vpop.permute.xlu2 %2457 }
 0x342   : > { %v1758_v59 = vmul.f32 %v9593_v43, %v1742_v45 }
 0x344   : > { %7177 = vmatmul.msk.f32.vlgmr.msra.gmra.mxu2 %vm1121_vm2, %v1758_v59  ;;  %v11972_v59 = vld [vmem:[#allocation74_spill] sm:$0xff] }
 0x345   : > { %7188 = vmatpush.xpose.msk.msra.mxu2 %vm1121_vm2, %v11963_v20  ;;  %v9616_v20 = vsel %vm1051_vm1, 1.0, %v8369_v63 }
 0x346   : > { %11967 = vst [vmem:[#allocation69_spill] sm:$0xff] %v9616_v20 }
 0x348   : > { %3317 = vrot.lane.b32.xlu0 %v11958_v10, %s8371_s22  ;;  %3345 = vrot.lane.b32.xlu1 %v8764_v12, %s8371_s22  ;;  %v2400_v19 = vpop.permute.xlu2 %2399 }
 0x34c   : > { %7183 = vmatmul.msk.f32.vlgmr.msrb.gmra.mxu2 %vm1121_vm2, %v11964_v21  ;;  %v11968_v21 = vld [vmem:[#allocation77_spill] sm:$0xff] }
 0x34d   : > { %7194 = vmatpush.xpose.msk.msrb.mxu2 %vm1121_vm2, %v2402_v50 }
 0x350   : > { %3595 = vrot.lane.b32.xlu1 %v8985_v13, %s8372_s24  ;;  %v11975_v13 = vld [vmem:[#allocation93_spill] sm:$0xff] }
 0x352   : > { %v1704_v6 = vpop.xlane.xlu1 %1703 }
 0x353   : > { %7869 = vrcp.f32 %v1704_v6  ;;  %v2542_v6 = vpop.permute.xlu0 %2541 }
 0x354   : > { %7189 = vmatmul.msk.f32.vlgmr.msra.gmra.mxu2 %vm1121_vm2, %v11965_v37 }
 0x358   : > { %3513 = vrot.lane.b32.xlu1 %v8788_v28, %s8371_s22 }
 0x359   : > { %v7870_v38 = vpop.eup %7869 }
 0x35a   : > { %v1740_v45 = vmul.f32 %v7870_v38, %v9396_v24  ;;  %v1707_v1 = vpop.xlane.xlu1 %1706  ;;  %v11969_v38 = vld [vmem:[#allocation80_spill] sm:$0xff] }
 0x35b   : > { %7871 = vrcp.f32 %v1707_v1  ;;  %vm11970_vm1 = vcmp.gt.f32.partialorder %v11969_v38, 0.0 }
 0x35c   : > { %v1756_v50 = vmul.f32 %v9616_v20, %v1740_v45  ;;  %7195 = vmatmul.msk.f32.vlgmr.msrb.gmra.mxu2 %vm1121_vm2, %v2400_v19  ;;  %v9629_v1 = vsel %vm11970_vm1, 1.0, %v8369_v63  ;;  %v2540_v45 = vpop.permute.xlu2 %2539  ;;  %v11976_v63 = vld [vmem:[#allocation82_spill] sm:$0xff]  ;;  %vm12195_vm1 = vmmov %vm12193_vm0 }
 0x35d   : > { %11971 = vst [vmem:[#allocation40_spill] sm:$0xff] %v9629_v1 }
 0x35e   : > { %7175 = vmatmul.msk.f32.vlgmr.msrb.gmra.mxu3 %vm1121_vm2, %v1756_v50  ;;  %v11973_v50 = vld [vmem:[#allocation87_spill] sm:$0xff] }
 0x35f   : > { %7184 = vmatpush.xpose.msk.msrb.mxu3 %vm1121_vm2, %v11968_v21  ;;  %v11974_v21 = vld [vmem:[#allocation91_spill] sm:$0xff] }
 0x360   : > { %3511 = vrot.lane.b32.xlu1 %v8955_v33, %s8372_s24 }
 0x361   : > { %v7872_v24 = vpop.eup %7871 }
 0x362   : > { %v1741_v37 = vmul.f32 %v7872_v24, %v9414_v17  ;;  %v2484_v17 = vpop.permute.xlu0 %2483 }
 0x364   : > { %v1757_v19 = vmul.f32 %v9629_v1, %v1741_v37  ;;  %v2514_v24 = vpop.permute.xlu2 %2513  ;;  %v11977_v37 = vld [vmem:[#allocation94_spill] sm:$0xff] }
 0x366   : > { %7176 = vmatmul.msk.f32.vlgmr.msra.gmra.mxu1 %vm1121_vm2, %v1757_v19  ;;  %7179 = vmatmul.msk.f32.vlgmr.msra.gmra.mxu3 %vm1121_vm2, %v11972_v59  ;;  %v11978_v59 = vld [vmem:[#allocation89_spill] sm:$0xff] }
 0x367   : > { %7186 = vmatpush.xpose.msk.msra.mxu1 %vm1121_vm2, %v11973_v50  ;;  %7190 = vmatpush.xpose.msk.msra.mxu3 %vm1121_vm2, %v11974_v21  ;;  %v11979_v50 = vld [vmem:[#allocation96_spill] sm:$0xff] }
 0x36a   : > { %v2568_v19 = vpop.permute.xlu0 %2567 }
 0x36e   : > { %7181 = vmatmul.msk.f32.vlgmr.msrb.gmra.mxu1 %vm1121_vm2, %v11975_v13  ;;  %7185 = vmatmul.msk.f32.vlgmr.msrb.gmra.mxu3 %vm1121_vm2, %v11976_v63  ;;  %v2598_v13 = vpop.permute.xlu2 %2597 }
 0x36f   : > { %7192 = vmatpush.xpose.msk.msrb.mxu1 %vm1121_vm2, %v11977_v37  ;;  %7196 = vmatpush.xpose.msk.msrb.mxu3 %vm1121_vm2, %v2430_v7 }
 0x372   : > { %v2456_v38 = vpop.permute.xlu1 %2455  ;;  %v2596_v7 = vpop.permute.xlu0 %2595 }
 0x376   : > { %7187 = vmatmul.msk.f32.vlgmr.msra.gmra.mxu1 %vm1121_vm2, %v11978_v59  ;;  %7191 = vmatmul.msk.f32.vlgmr.msra.gmra.mxu3 %vm1121_vm2, %v11979_v50  ;;  %v7560_v63 = vpop.permute.xlu2 %7559 }
 0x377   : > { %7198 = vmatpush.xpose.msk.msra.mxu1 %vm1121_vm2, %v2458_v53  ;;  %7202 = vmatpush.xpose.msk.msra.mxu3 %vm1121_vm2, %v2514_v24  ;;  %v7561_v53 = vunpack.i.l.bf16 %v7560_v63 }
 0x37a   : > { %v2486_v21 = vpop.permute.xlu1 %2485 }
 0x37b   : > { %7200 = vmatpush.xpose.msk.msra.mxu2 %vm1121_vm2, %v2486_v21  ;;  %v7562_v21 = vunpack.i.h.bf16 %v7560_v63 }
 0x37e   : > { %7193 = vmatmul.msk.f32.vlgmr.msrb.gmra.mxu1 %vm1121_vm2, %v2372_v62  ;;  %7197 = vmatmul.msk.f32.vlgmr.msrb.gmra.mxu3 %vm1121_vm2, %v2428_v11  ;;  %v9661_v62 = vpop.permute.xlu0 %7564 }
 0x37f   : > { %7201 = vmatmul.msk.f32.vlgmr.msra.gmra.mxu2 %vm1121_vm2, %v2484_v17  ;;  %7204 = vmatpush.xpose.msk.msrb.mxu1 %vm1121_vm2, %v2542_v6  ;;  %11980 = vst [vmem:[#allocation81_spill] sm:$0xff] %v9661_v62  ;;  %v7567_v6 = vunpack.i.h.bf16 %v9661_v62  ;;  %v9665_v17 = vpop.permute.xlu2 %3259 }
 0x380   : > { %7208 = vmatpush.xpose.msk.msrb.mxu3 %vm1121_vm2, %v2598_v13  ;;  %11981 = vst [vmem:[#allocation78_spill] sm:$0xff] %v9665_v17 }
 0x382   : > { %v2570_v37 = vpop.permute.xlu1 %2569 }
 0x383   : > { %7206 = vmatpush.xpose.msk.msrb.mxu2 %vm1121_vm2, %v2570_v37  ;;  %v9674_v37 = vpop.f32.mrf.mxu2 }
 0x384   : > { %11983 = vst [vmem:[#allocation92_spill] sm:$0xff] %v9674_v37 }
 0x386   : > { %7199 = vmatmul.msk.f32.vlgmr.msra.gmra.mxu1 %vm1121_vm2, %v2456_v38 }
 0x387   : > { %7207 = vmatmul.msk.f32.vlgmr.msrb.gmra.mxu2 %vm1121_vm2, %v2568_v19  ;;  %2836 = vmatpush.msra.mxu1 %v7561_v53  ;;  %v9669_v38 = vpop.permute.xlu2 %3371 }
 0x388   : > { %11982 = vst [vmem:[#allocation41_spill] sm:$0xff] %v9669_v38  ;;  %v12011_v38 = vld [vmem:[#allocation79_spill] sm:$0xff] }
 0x38a   : > { %v2512_v11 = vpop.permute.xlu1 %2511 }
 0x38b   : > { %7203 = vmatmul.msk.f32.vlgmr.msra.gmra.mxu3 %vm1121_vm2, %v2512_v11 }
 0x38e   : > { %7205 = vmatmul.msk.f32.vlgmr.msrb.gmra.mxu1 %vm1121_vm2, %v2540_v45 }
 0x38f   : > { %2940 = vmatpush.msrb.mxu1 %v7567_v6  ;;  %v9676_v45 = vpop.permute.xlu2 %7579  ;;  %v9682_v6 = vpop.f32.mrf.mxu2 }
 0x390   : > { %11984 = vst [vmem:[#allocation86_spill] sm:$0xff] %v9682_v6 }
 0x392   : > { %v7550_v24 = vpop.permute.xlu1 %7549 }
 0x393   : > { %v7552_v59 = vunpack.i.h.bf16 %v7550_v24  ;;  %v7551_v50 = vunpack.i.l.bf16 %v7550_v24  ;;  %7209 = vmatmul.msk.f32.vlgmr.msrb.gmra.mxu3 %vm1121_vm2, %v2596_v7  ;;  %v7581_v7 = vunpack.i.l.bf16 %v9676_v45 }
 0x395   : > { %2862 = vmatpush.msra.mxu2 %v7551_v50  ;;  %v9690_v50 = vpop.f32.mrf.mxu3 }
 0x396   : > { %11988 = vst [vmem:[#allocation77_spill] sm:$0xff] %v9690_v50  ;;  %v12000_v50 = vld [vmem:[#allocation62_spill] sm:$0xff] }
 0x397   : > { %2966 = vmatpush.msrb.mxu2 %v7552_v59  ;;  %v9684_v24 = vpop.f32.mrf.mxu2 }
 0x398   : > { %11985 = vst [vmem:[#allocation83_spill] sm:$0xff] %v9684_v24 }
 0x39a   : > { %v9671_v19 = vpop.permute.xlu1 %7554 }
 0x39b   : > { %v7556_v13 = vunpack.i.l.bf16 %v9671_v19 }
 0x39d   : > { %2888 = vmatpush.msra.mxu3 %v7556_v13  ;;  %v9692_v13 = vpop.f32.mrf.mxu1  ;;  %v9696_v37 = vpop.f32.mrf.mxu3 }
 0x39e   : > { %11989 = vst [vmem:[#allocation80_spill] sm:$0xff] %v9692_v13 }
 0x39f   : > { %2992 = vmatpush.msrb.mxu3 %v7562_v21  ;;  %v9686_v59 = vpop.f32.mrf.mxu2  ;;  %11991 = vst [vmem:[#allocation87_spill] sm:$0xff] %v9696_v37 }
 0x3a0   : > { %11986 = vst [vmem:[#allocation97_spill] sm:$0xff] %v9686_v59 }
 0x3a2   : > { %v9678_v53 = vpop.permute.xlu1 %7569 }
 0x3a3   : > { %v7572_v11 = vunpack.i.h.bf16 %v9678_v53 }
 0x3a5   : > { %2914 = vmatpush.msrb.mxu0 %v7572_v11  ;;  %v9698_v8 = vpop.f32.mrf.mxu1  ;;  %v9703_v6 = vpop.f32.mrf.mxu3 }
 0x3a6   : > { %11992 = vst [vmem:[#allocation91_spill] sm:$0xff] %v9698_v8 }
 0x3a7   : > { %3018 = vmatpush.msra.mxu0 %v7581_v7  ;;  %v11993_v7 = vld [vmem:[#allocation61_spill] sm:$0xff]  ;;  %11994 = vst [vmem:[#allocation93_spill] sm:$0xff] %v9703_v6  ;;  %v12001_v6 = vld [vmem:[#allocation60_spill] sm:$0xff] }
 0x3ad   : > { %v9709_v24 = vpop.f32.mrf.mxu3 }
 0x3ae   : > { %v9688_v63 = vpop.f32.mrf.mxu2  ;;  %11996 = vst [vmem:[#allocation94_spill] sm:$0xff] %v9709_v24 }
 0x3af   : > { %11987 = vst [vmem:[#allocation88_spill] sm:$0xff] %v9688_v63  ;;  %v9707_v63 = vpop.f32.mrf.mxu1 }
 0x3b0   : > { %11995 = vst [vmem:[#allocation82_spill] sm:$0xff] %v9707_v63 }
 0x3b7   : > { %v9711_v13 = vpop.f32.mrf.mxu1 }
 0x3b8   : > { %11997 = vst [vmem:[#allocation89_spill] sm:$0xff] %v9711_v13 }
 0x3c7   : > { %v9694_v21 = vpop.f32.mrf.mxu2 }
 0x3c8   : > { %11990 = vst [vmem:[#allocation74_spill] sm:$0xff] %v9694_v21 }
 0x3cf   : > { %v2256_v11 = vpop.f32.mrf.mxu2 }
 0x3d0   : > { %v9701_v14 = vadd.f32 %v2256_v11, %v11993_v7 }
 0x3d2   : > { %v2629_v59 = vsel %vm1121_vm2, %v9701_v14, -inf }
 0x3d3   : > { %2630 = vmax.xlane.f32.xlu0 %v2629_v59 }
 0x3e1   : > { %v9713_v21 = vpop.f32.mrf.mxu3 }
 0x3e2   : > { %11998 = vst [vmem:[#allocation96_spill] sm:$0xff] %v9713_v21  ;;  %v12002_v21 = vld [vmem:[#allocation63_spill] sm:$0xff] }
 0x3e3   : > { %v9715_v37 = vpop.f32.mrf.mxu1 }
 0x3e4   : > { %11999 = vst [vmem:[#allocation101_spill] sm:$0xff] %v9715_v37  ;;  %v2340_v37 = vpop.f32.mrf.mxu2 }
 0x3e5   : > { %v9740_v47 = vadd.f32 %v2340_v37, %v12005_v31 }
 0x3e9   : > { %v2200_v8 = vpop.f32.mrf.mxu3 }
 0x3ea   : > { %v9718_v11 = vadd.f32 %v2200_v8, %v12000_v50  ;;  %v9730_v8 = vpop.permute.xlu0 %3261 }
 0x3eb   : > { %v2228_v33 = vpop.f32.mrf.mxu1  ;;  %12003 = vst [vmem:[#allocation102_spill] sm:$0xff] %v9730_v8 }
 0x3ec   : > { %v9721_v25 = vadd.f32 %v2228_v33, %v12001_v6  ;;  %v2623_v63 = vsel %vm1121_vm2, %v9718_v11, -inf  ;;  %v12007_v6 = vld [vmem:[#allocation65_spill] sm:$0xff] }
 0x3ed   : > { %2624 = vmax.xlane.f32.xlu2 %v2623_v63 }
 0x3ee   : > { %v2626_v59 = vsel %vm1121_vm2, %v9721_v25, -inf }
 0x3ef   : > { %2627 = vmax.xlane.f32.xlu1 %v2626_v59 }
 0x3f1   : > { %v2284_v24 = vpop.f32.mrf.mxu3 }
 0x3f2   : > { %v9728_v13 = vadd.f32 %v2284_v24, %v12002_v21  ;;  %v12006_v24 = vld [vmem:[#allocation68_spill] sm:$0xff]  ;;  %v9750_v43 = vpop.permute.xlu0 %3373 }
 0x3f3   : > { %v2312_v61 = vpop.f32.mrf.mxu1  ;;  %12008 = vst [vmem:[#allocation103_spill] sm:$0xff] %v9750_v43  ;;  %v12015_v43 = vld [vmem:[#allocation85_spill] sm:$0xff] }
 0x3f4   : > { %v9733_v30 = vadd.f32 %v2312_v61, %v12004_v48  ;;  %v2632_v33 = vsel %vm1121_vm2, %v9728_v13, -inf  ;;  %v2424_v48 = vpop.f32.mrf.mxu2 }
 0x3f6   : > { %v2635_v63 = vsel %vm1121_vm2, %v9733_v30, -inf }
 0x3f7   : > { %2633 = vmax.xlane.f32.xlu1 %v2632_v33  ;;  %2636 = vmax.xlane.f32.xlu2 %v2635_v63  ;;  %v2638_v33 = vsel %vm1121_vm2, %v9740_v47, -inf }
 0x3f9   : > { %v2368_v59 = vpop.f32.mrf.mxu3 }
 0x3fa   : > { %v9743_v7 = vadd.f32 %v2368_v59, %v12006_v24  ;;  %v12009_v59 = vld [vmem:[#allocation75_spill] sm:$0xff] }
 0x3fb   : > { %v2396_v21 = vpop.f32.mrf.mxu1 }
 0x3fc   : > { %v9746_v50 = vadd.f32 %v2396_v21, %v12007_v6  ;;  %v2641_v61 = vsel %vm1121_vm2, %v9743_v7, -inf  ;;  %v12010_v21 = vld [vmem:[#allocation67_spill] sm:$0xff] }
 0x3fd   : > { %2642 = vmax.xlane.f32.xlu0 %v2641_v61  ;;  %v9760_v6 = vadd.f32 %v2424_v48, %v12010_v21  ;;  %v12013_v48 = vld [vmem:[#allocation73_spill] sm:$0xff] }
 0x3fe   : > { %v2644_v37 = vsel %vm1121_vm2, %v9746_v50, -inf }
 0x3ff   : > { %2639 = vmax.xlane.f32.xlu2 %v2638_v33  ;;  %2645 = vmax.xlane.f32.xlu1 %v2644_v37  ;;  %v2647_v33 = vsel %vm1121_vm2, %v9760_v6, -inf  ;;  %v9771_v37 = vpop.permute.xlu0 %3485 }
 0x400   : > { %12012 = vst [vmem:[#allocation104_spill] sm:$0xff] %v9771_v37 }
 0x401   : > { %v2452_v63 = vpop.f32.mrf.mxu3 }
 0x402   : > { %v9757_v24 = vadd.f32 %v2452_v63, %v12009_v59  ;;  %v2508_v1 = vpop.f32.mrf.mxu2 }
 0x403   : > { %v2480_v31 = vpop.f32.mrf.mxu1  ;;  %v9774_v63 = vadd.f32 %v2508_v1, %v12013_v48 }
 0x404   : > { %v9763_v61 = vadd.f32 %v2480_v31, %v12011_v38  ;;  %v2650_v17 = vsel %vm1121_vm2, %v9757_v24, -inf  ;;  %v12014_v38 = vld [vmem:[#allocation90_spill] sm:$0xff] }
 0x406   : > { %v2653_v52 = vsel %vm1121_vm2, %v9763_v61, -inf }
 0x407   : > { %2654 = vmax.xlane.f32.xlu0 %v2653_v52  ;;  %2651 = vmax.xlane.f32.xlu1 %v2650_v17  ;;  %v2656_v52 = vsel %vm1121_vm2, %v9774_v63, -inf }
 0x408   : > { %2648 = vmax.xlane.f32.xlu2 %v2647_v33  ;;  %v9788_v33 = vpop.permute.xlu0 %3233 }
 0x409   : > { %12016 = vst [vmem:[#allocation105_spill] sm:$0xff] %v9788_v33 }
 0x40a   : > { %v2592_v17 = vpop.f32.mrf.mxu2 }
 0x40b   : > { %v2564_v31 = vpop.f32.mrf.mxu1 }
 0x40c   : > { %v9777_v21 = vadd.f32 %v2564_v31, %v12014_v38  ;;  %v12017_v31 = vld [vmem:[#allocation84_spill] sm:$0xff] }
 0x40d   : > { %v9791_v48 = vadd.f32 %v2592_v17, %v12017_v31 }
 0x40e   : > { %v2536_v59 = vpop.f32.mrf.mxu3  ;;  %v2662_v49 = vsel %vm1121_vm2, %v9777_v21, -inf }
 0x40f   : > { %v9784_v20 = vadd.f32 %v2536_v59, %v12015_v43  ;;  %2663 = vmax.xlane.f32.xlu1 %v2662_v49  ;;  %2657 = vmax.xlane.f32.xlu0 %v2656_v52  ;;  %v2665_v37 = vsel %vm1121_vm2, %v9791_v48, -inf  ;;  %v9804_v43 = vpop.permute.xlu1 %7574 }
 0x410   : > { %v9800_v59 = vpop.permute.xlu0 %3287 }
 0x411   : > { %v2659_v1 = vsel %vm1121_vm2, %v9784_v20, -inf  ;;  %12019 = vst [vmem:[#allocation106_spill] sm:$0xff] %v9800_v59 }
 0x412   : > { %2660 = vmax.xlane.f32.xlu2 %v2659_v1 }
 0x416   : > { %v2620_v38 = vpop.f32.mrf.mxu3 }
 0x417   : > { %v9796_v51 = vadd.f32 %v2620_v38, %v12018_v5  ;;  %2666 = vmax.xlane.f32.xlu0 %v2665_v37  ;;  %v9808_v1 = vpop.permute.xlu1 %3483  ;;  %v9814_v38 = vpop.permute.xlu2 %3289 }
 0x418   : > { %v9802_v52 = vpop.permute.xlu0 %7584  ;;  %12021 = vst [vmem:[#allocation108_spill] sm:$0xff] %v9808_v1 }
 0x419   : > { %v2668_v49 = vsel %vm1121_vm2, %v9796_v51, -inf  ;;  %12024 = vst [vmem:[#allocation111_spill] sm:$0xff] %v9814_v38 }
 0x41a   : > { %2669 = vmax.xlane.f32.xlu2 %v2668_v49 }
 0x41f   : > { %v9812_v33 = vpop.permute.xlu1 %3345  ;;  %v9820_v49 = vpop.permute.xlu2 %3597 }
 0x420   : > { %v9806_v17 = vpop.permute.xlu0 %3231  ;;  %12023 = vst [vmem:[#allocation110_spill] sm:$0xff] %v9812_v33 }
 0x421   : > { %12020 = vst [vmem:[#allocation107_spill] sm:$0xff] %v9806_v17 }
 0x422   : > { %12027 = vst [vmem:[#allocation114_spill] sm:$0xff] %v9820_v49 }
 0x427   : > { %v9818_v5 = vpop.permute.xlu1 %3595  ;;  %v9826_v16 = vpop.permute.xlu2 %3457 }
 0x428   : > { %v9810_v31 = vpop.permute.xlu0 %3401  ;;  %12026 = vst [vmem:[#allocation113_spill] sm:$0xff] %v9818_v5 }
 0x429   : > { %12022 = vst [vmem:[#allocation109_spill] sm:$0xff] %v9810_v31 }
 0x42a   : > { %12030 = vst [vmem:[#allocation117_spill] sm:$0xff] %v9826_v16 }
 0x42f   : > { %v9824_v8 = vpop.permute.xlu1 %3513 }
 0x430   : > { %v9816_v37 = vpop.permute.xlu0 %3399  ;;  %12029 = vst [vmem:[#allocation116_spill] sm:$0xff] %v9824_v8 }
 0x431   : > { %12025 = vst [vmem:[#allocation112_spill] sm:$0xff] %v9816_v37 }
 0x437   : > { %v9830_v1 = vpop.permute.xlu1 %3511 }
 0x438   : > { %v9822_v59 = vpop.permute.xlu0 %3343  ;;  %12032 = vst [vmem:[#allocation119_spill] sm:$0xff] %v9830_v1 }
 0x439   : > { %12028 = vst [vmem:[#allocation115_spill] sm:$0xff] %v9822_v59 }
 0x440   : > { %v9828_v17 = vpop.permute.xlu0 %3317 }
 0x441   : > { %12031 = vst [vmem:[#allocation118_spill] sm:$0xff] %v9828_v17 }
 0x448   : > { %v2631_v31 = vpop.xlane.xlu0 %2630 }
 0x449   : > { %v2673_v37 = vsub.f32 %v9701_v14, %v2631_v31 }
 0x44b   : > { %v2691_v62 = vmul.f32 1.442695, %v2673_v37 }
 0x460   : > { %v2625_v33 = vpop.xlane.xlu2 %2624 }
 0x461   : > { %v2671_v38 = vsub.f32 %v9718_v11, %v2625_v33 }
 0x462   : > { %v2628_v42 = vpop.xlane.xlu1 %2627 }
 0x463   : > { %v2687_v5 = vmul.f32 1.442695, %v2671_v38  ;;  %v2672_v49 = vsub.f32 %v9721_v25, %v2628_v42 }
 0x465   : > { %7873 = vpow2.f32 %v2687_v5  ;;  %v2689_v59 = vmul.f32 1.442695, %v2672_v49 }
 0x467   : > { %7875 = vpow2.f32 %v2689_v59 }
 0x468   : > { %7877 = vpow2.f32 %v2691_v62 }
 0x46a   : > { %v2634_v8 = vpop.xlane.xlu1 %2633  ;;  %v2637_v16 = vpop.xlane.xlu2 %2636 }
 0x46b   : > { %v9835_v27 = vpop.eup %7873  ;;  %v2674_v1 = vsub.f32 %v9728_v13, %v2634_v8  ;;  %v2675_v17 = vsub.f32 %v9733_v30, %v2637_v16 }
 0x46c   : > { %v2719_v11 = vsel %vm1121_vm2, %v9835_v27, 0.0 }
 0x46d   : > { %v9841_v14 = vpop.eup %7875  ;;  %v2693_v33 = vmul.f32 1.442695, %v2674_v1  ;;  %v2695_v25 = vmul.f32 1.442695, %v2675_v17  ;;  %2720 = vadd.xlane.f32.xlu2 %v2719_v11 }
 0x46e   : > { %v2722_v5 = vsel %vm1121_vm2, %v9841_v14, 0.0  ;;  %v9845_v62 = vpop.eup %7877 }
 0x46f   : > { %7879 = vpow2.f32 %v2693_v33  ;;  %2723 = vadd.xlane.f32.xlu1 %v2722_v5  ;;  %v2725_v8 = vsel %vm1121_vm2, %v9845_v62, 0.0 }
 0x470   : > { %7881 = vpow2.f32 %v2695_v25  ;;  %v2643_v42 = vpop.xlane.xlu0 %2642 }
 0x471   : > { %v2677_v13 = vsub.f32 %v9743_v7, %v2643_v42 }
 0x472   : > { %v2640_v30 = vpop.xlane.xlu2 %2639  ;;  %v2646_v38 = vpop.xlane.xlu1 %2645 }
 0x473   : > { %v2699_v16 = vmul.f32 1.442695, %v2677_v13  ;;  %v2676_v17 = vsub.f32 %v9740_v47, %v2640_v30  ;;  %v2678_v11 = vsub.f32 %v9746_v50, %v2646_v38 }
 0x475   : > { %v9850_v31 = vpop.eup %7879  ;;  %2726 = vadd.xlane.f32.xlu2 %v2725_v8  ;;  %7883 = vpow2.f32 %v2699_v16  ;;  %v2697_v37 = vmul.f32 1.442695, %v2676_v17  ;;  %v2701_v47 = vmul.f32 1.442695, %v2678_v11 }
 0x476   : > { %v9852_v59 = vpop.eup %7881  ;;  %v2728_v1 = vsel %vm1121_vm2, %v9850_v31, 0.0 }
 0x477   : > { %2729 = vadd.xlane.f32.xlu1 %v2728_v1  ;;  %v2731_v7 = vsel %vm1121_vm2, %v9852_v59, 0.0  ;;  %7885 = vpow2.f32 %v2697_v37 }
 0x478   : > { %2732 = vadd.xlane.f32.xlu0 %v2731_v7  ;;  %7887 = vpow2.f32 %v2701_v47 }
 0x47a   : > { %v2652_v25 = vpop.xlane.xlu1 %2651  ;;  %v2655_v30 = vpop.xlane.xlu0 %2654 }
 0x47b   : > { %v9859_v49 = vpop.eup %7883  ;;  %v2680_v42 = vsub.f32 %v9757_v24, %v2652_v25  ;;  %v2681_v50 = vsub.f32 %v9763_v61, %v2655_v30  ;;  %v2649_v1 = vpop.xlane.xlu2 %2648 }
 0x47c   : > { %v2737_v33 = vsel %vm1121_vm2, %v9859_v49, 0.0  ;;  %v2679_v38 = vsub.f32 %v9760_v6, %v2649_v1 }
 0x47d   : > { %v9864_v5 = vpop.eup %7885  ;;  %v2705_v16 = vmul.f32 1.442695, %v2680_v42  ;;  %v2707_v24 = vmul.f32 1.442695, %v2681_v50 }
 0x47e   : > { %v2734_v13 = vsel %vm1121_vm2, %v9864_v5, 0.0  ;;  %v9869_v8 = vpop.eup %7887  ;;  %v2703_v11 = vmul.f32 1.442695, %v2679_v38 }
 0x47f   : > { %7889 = vpow2.f32 %v2705_v16  ;;  %v2740_v17 = vsel %vm1121_vm2, %v9869_v8, 0.0 }
 0x480   : > { %2738 = vadd.xlane.f32.xlu0 %v2737_v33  ;;  %7891 = vpow2.f32 %v2707_v24 }
 0x481   : > { %7893 = vpow2.f32 %v2703_v11 }
 0x482   : > { %v2664_v25 = vpop.xlane.xlu1 %2663  ;;  %v2658_v6 = vpop.xlane.xlu0 %2657 }
 0x483   : > { %v2682_v38 = vsub.f32 %v9774_v63, %v2658_v6  ;;  %v12033_v6 = vld [vmem:[#allocation48_spill] sm:$0xff] }
 0x485   : > { %v9878_v7 = vpop.eup %7889  ;;  %v2661_v33 = vpop.xlane.xlu2 %2660 }
 0x486   : > { %v2746_v37 = vsel %vm1121_vm2, %v9878_v7, 0.0  ;;  %v9883_v61 = vpop.eup %7891  ;;  %v2683_v50 = vsub.f32 %v9784_v20, %v2661_v33 }
 0x487   : > { %v2749_v47 = vsel %vm1121_vm2, %v9883_v61, 0.0  ;;  %v9887_v42 = vpop.eup %7893 }
 0x488   : > { %2735 = vadd.xlane.f32.xlu0 %v2734_v13  ;;  %v2684_v13 = vsub.f32 %v9777_v21, %v2664_v25  ;;  %v2743_v16 = vsel %vm1121_vm2, %v9887_v42, 0.0  ;;  %v2711_v24 = vmul.f32 1.442695, %v2683_v50  ;;  %v2709_v21 = vmul.f32 1.442695, %v2682_v38 }
 0x489   : > { %v7593_v38 = vpack.i.bf16 %v11953_v44, %v8748_v3 }
 0x48a   : > { %v2713_v30 = vmul.f32 1.442695, %v2684_v13  ;;  %v2667_v11 = vpop.xlane.xlu0 %2666 }
 0x48b   : > { %v2685_v25 = vsub.f32 %v9791_v48, %v2667_v11 }
 0x48c   : > { %7895 = vpow2.f32 %v2713_v30 }
 0x48d   : > { %3455 = vrot.lane.b32.xlu2 %v8889_v57, %s8372_s24  ;;  %7897 = vpow2.f32 %v2711_v24  ;;  %v2715_v13 = vmul.f32 1.442695, %v2685_v25 }
 0x490   : > { %2741 = vadd.xlane.f32.xlu0 %v2740_v17  ;;  %3625 = vrot.lane.b32.xlu1 %v11941_v55, %s8371_s22  ;;  %v2670_v17 = vpop.xlane.xlu2 %2669 }
 0x491   : > { %v2686_v1 = vsub.f32 %v9796_v51, %v2670_v17 }
 0x498   : > { %2747 = vadd.xlane.f32.xlu0 %v2746_v37  ;;  %v2717_v37 = vmul.f32 1.442695, %v2686_v1 }
 0x49a   : > { %7899 = vpow2.f32 %v2717_v37 }
 0x49b   : > { %7901 = vpow2.f32 %v2709_v21 }
 0x49c   : > { %7903 = vpow2.f32 %v2715_v13 }
 0x4a0   : > { %2750 = vadd.xlane.f32.xlu0 %v2749_v47  ;;  %v9895_v47 = vpop.eup %7895 }
 0x4a1   : > { %v2758_v20 = vsel %vm1121_vm2, %v9895_v47, 0.0  ;;  %v9900_v33 = vpop.eup %7897 }
 0x4a2   : > { %v2755_v51 = vsel %vm1121_vm2, %v9900_v33, 0.0  ;;  %v9904_v63 = vpop.eup %7899 }
 0x4a3   : > { %v2764_v48 = vsel %vm1121_vm2, %v9904_v63, 0.0 }
 0x4a8   : > { %2744 = vadd.xlane.f32.xlu0 %v2743_v16  ;;  %v9910_v16 = vpop.eup %7901 }
 0x4a9   : > { %v2752_v30 = vsel %vm1121_vm2, %v9910_v16, 0.0  ;;  %v9914_v50 = vpop.eup %7903 }
 0x4aa   : > { %v2761_v17 = vsel %vm1121_vm2, %v9914_v50, 0.0 }
 0x4b6   : > { %2759 = vadd.xlane.f32.xlu2 %v2758_v20 }
 0x4ba   : > { %2756 = vadd.xlane.f32.xlu1 %v2755_v51  ;;  %v7598_v51 = vpack.i.bf16 %v8764_v12, %v8784_v26 }
 0x4bc   : > { %3315 = vrot.lane.b32.xlu0 %v12033_v6, %s8372_s24 }
 0x4be   : > { %2765 = vadd.xlane.f32.xlu2 %v2764_v48  ;;  %v7576_v48 = vunpack.i.l.bf16 %v9804_v43 }
 0x4c2   : > { %2753 = vadd.xlane.f32.xlu1 %v2752_v30 }
 0x4c4   : > { %3429 = vrot.lane.b32.xlu0 %v11948_v56, %s8371_s22 }
 0x4c6   : > { %2762 = vadd.xlane.f32.xlu2 %v2761_v17 }
 0x4cc   : > { %3427 = vrot.lane.b32.xlu0 %v8870_v36, %s8372_s24 }
 0x4d4   : > { %3539 = vrot.lane.b32.xlu0 %v8931_v15, %s8372_s24 }
 0x4db   : > { %3623 = vrot.lane.b32.xlu1 %v8965_v41, %s8372_s24 }
 0x4dc   : > { %7589 = vrot.lane.b32.xlu0 %v9544_v40, %s8373_s23 }
 0x4de   : > { %3569 = vrot.lane.b32.xlu2 %v8796_v34, %s8371_s22 }
 0x4e0   : > { %v2721_v24 = vpop.xlane.xlu2 %2720 }
 0x4e1   : > { %7905 = vrcp.f32 %v2721_v24 }
 0x4e2   : > { %v2724_v1 = vpop.xlane.xlu1 %2723 }
 0x4e3   : > { %7907 = vrcp.f32 %v2724_v1  ;;  %3541 = vrot.lane.b32.xlu1 %v8792_v32, %s8371_s22 }
 0x4e4   : > { %7594 = vrot.lane.b32.xlu0 %v7593_v38, %s8373_s23  ;;  %v7608_v38 = vpack.i.bf16 %v8780_v22, %v11958_v10 }
 0x4e6   : > { %3567 = vrot.lane.b32.xlu2 %v11946_v2, %s8372_s24 }
 0x4e7   : > { %v7906_v37 = vpop.eup %7905 }
 0x4e8   : > { %v2783_v40 = vmul.f32 %v7906_v37, %v9835_v27  ;;  %v2727_v11 = vpop.xlane.xlu2 %2726 }
 0x4e9   : > { %v7908_v21 = vpop.eup %7907  ;;  %7909 = vrcp.f32 %v2727_v11 }
 0x4ea   : > { %v2799_v25 = vmul.f32 %v9403_v0, %v2783_v40  ;;  %v2784_v20 = vmul.f32 %v7908_v21, %v9841_v14  ;;  %v2730_v13 = vpop.xlane.xlu1 %2729  ;;  %v7557_v14 = vunpack.i.h.bf16 %v9671_v19  ;;  %v7571_v19 = vunpack.i.l.bf16 %v9678_v53 }
 0x4eb   : > { %7911 = vrcp.f32 %v2730_v13  ;;  %v2733_v30 = vpop.xlane.xlu0 %2732  ;;  %3651 = vrot.lane.b32.xlu1 %v9003_v60, %s8372_s24  ;;  %v7613_v13 = vpack.i.bf16 %v11948_v56, %v8788_v28  ;;  %s8297_s24 = sshra.s32 %s6966_s7, 4  ;;  %s8298_s24 = int_to_ptr.hbm [resolvable:$true] %s8297_s24 }
 0x4ec   : > { %v2800_v27 = vmul.f32 %v9378_v9, %v2784_v20  ;;  %7913 = vrcp.f32 %v2733_v30  ;;  %7599 = vrot.lane.b32.xlu0 %v7598_v51, %s8373_s23  ;;  %7210 = vmatmul.msk.f32.vlgmr.msra.gmra.mxu1 %vm1121_vm2, %v2799_v25  ;;  %p8304_p2 = scmp.lt.s32.totalorder %s8298_s24, %s11701_s17 }
 0x4ed   : > { %3044 = vmatpush.msra.mxu1 %v7576_v48 }
 0x4ee   : > { %7211 = vmatmul.msk.f32.vlgmr.msra.gmra.mxu2 %vm1121_vm2, %v2800_v27  ;;  %3653 = vrot.lane.b32.xlu2 %v8820_v54, %s8371_s22  ;;  %s6953_s22 = scalar_lea.sflag [#allocation5], %s8576_s8 }
 0x4ef   : > { %v7910_v17 = vpop.eup %7909  ;;  %3070 = vmatpush.msra.mxu2 %v7557_v14  ;;  %v7577_v14 = vunpack.i.h.bf16 %v9804_v43 }
 0x4f0   : > { %v2785_v24 = vmul.f32 %v7910_v17, %v9845_v62  ;;  %v7603_v62 = vpack.i.bf16 %v8801_v39, %v8772_v18 }
 0x4f1   : > { %v7912_v1 = vpop.eup %7911 }
 0x4f2   : > { %v7914_v37 = vpop.eup %7913  ;;  %v2801_v40 = vmul.f32 %v9390_v23, %v2785_v24  ;;  %v2786_v11 = vmul.f32 %v7912_v1, %v9850_v31  ;;  %v7586_v31 = vunpack.i.l.bf16 %v9802_v52  ;;  %v12034_v1 = vld [vmem:[#allocation98_spill] sm:$0xff] }
 0x4f3   : > { %v2787_v21 = vmul.f32 %v7914_v37, %v9852_v59  ;;  %v2739_v25 = vpop.xlane.xlu0 %2738  ;;  %7609 = vrot.lane.b32.xlu1 %v7608_v38, %s8373_s23  ;;  %v7582_v59 = vunpack.i.h.bf16 %v9676_v45  ;;  %v7618_v45 = vpack.i.bf16 %v11941_v55, %v8796_v34 }
 0x4f4   : > { %v2802_v20 = vmul.f32 %v9420_v35, %v2786_v11  ;;  %7915 = vrcp.f32 %v2739_v25  ;;  %4317 = vrot.lane.b32.xlu0 %v8752_v4, %s8374_s6  ;;  %7212 = vmatmul.msk.f32.vlgmr.msra.gmra.mxu3 %vm1121_vm2, %v2801_v40 }
 0x4f5   : > { %v2803_v53 = vmul.f32 %v9433_v29, %v2787_v21  ;;  %3096 = vmatpush.msra.mxu3 %v7571_v19  ;;  %v12036_v19 = vld [vmem:[#allocation100_spill] sm:$0xff] }
 0x4f6   : > { %7213 = vmatmul.msk.f32.vlgmr.msrb.gmra.mxu0 %vm1121_vm2, %v2802_v20  ;;  %7604 = vrot.lane.b32.xlu2 %v7603_v62, %s8373_s23 }
 0x4f7   : > { %7214 = vmatmul.msk.f32.vlgmr.msrb.gmra.mxu1 %vm1121_vm2, %v2803_v53  ;;  %3122 = vmatpush.msrb.mxu0 %v7586_v31  ;;  %v12037_v31 = vld [vmem:[#allocation71_spill] sm:$0xff] }
 0x4f8   : > { %3148 = vmatpush.msrb.mxu1 %v7582_v59  ;;  %v12038_v59 = vld [vmem:[#allocation102_spill] sm:$0xff] }
 0x4fa   : > { %v7916_v51 = vpop.eup %7915 }
 0x4fb   : > { %v2789_v48 = vmul.f32 %v7916_v51, %v9859_v49  ;;  %v2736_v30 = vpop.xlane.xlu0 %2735  ;;  %7614 = vrot.lane.b32.xlu1 %v7613_v13, %s8373_s23 }
 0x4fc   : > { %7917 = vrcp.f32 %v2736_v30  ;;  %4315 = vrot.lane.b32.xlu0 %v8832_v58, %s8375_s0  ;;  %v12035_v58 = vld [vmem:[#allocation81_spill] sm:$0xff]  ;;  %v12040_v30 = vld [vmem:[#allocation111_spill] sm:$0xff] }
 0x4fd   : > { %v2805_v27 = vmul.f32 %v9460_v46, %v2789_v48  ;;  %v7566_v37 = vunpack.i.l.bf16 %v12035_v58 }
 0x4fe   : > { %7619 = vrot.lane.b32.xlu2 %v7618_v45, %s8373_s23 }
 0x4ff   : > { %7216 = vmatmul.msk.f32.vlgmr.msrb.gmra.mxu3 %vm1121_vm2, %v2805_v27 }
 0x500   : > { %3200 = vmatpush.msrb.mxu3 %v7577_v14 }
 0x502   : > { %v7918_v49 = vpop.eup %7917  ;;  %v10007_v14 = vpop.permute.xlu1 %3625 }
 0x503   : > { %v2788_v17 = vmul.f32 %v7918_v49, %v9864_v5  ;;  %v2742_v24 = vpop.xlane.xlu0 %2741  ;;  %v7587_v5 = vunpack.i.h.bf16 %v9802_v52  ;;  %v12039_v52 = vld [vmem:[#allocation57_spill] sm:$0xff]  ;;  %v12041_v49 = vld [vmem:[#allocation99_spill] sm:$0xff] }
 0x504   : > { %7919 = vrcp.f32 %v2742_v24 }
 0x505   : > { %v2804_v38 = vmul.f32 %v12034_v1, %v2788_v17 }
 0x506   : > { %4289 = vrot.lane.b32.xlu2 %v8748_v3, %s8374_s6  ;;  %v12089_v3 = vld [vmem:[#allocation65_spill] sm:$0xff] }
 0x507   : > { %7215 = vmatmul.msk.f32.vlgmr.msrb.gmra.mxu2 %vm1121_vm2, %v2804_v38 }
 0x508   : > { %3174 = vmatpush.msrb.mxu2 %v7566_v37 }
 0x50a   : > { %v7920_v43 = vpop.eup %7919 }
 0x50b   : > { %v2790_v40 = vmul.f32 %v7920_v43, %v9869_v8  ;;  %v2748_v11 = vpop.xlane.xlu0 %2747 }
 0x50c   : > { %7921 = vrcp.f32 %v2748_v11  ;;  %v12043_v11 = vld [vmem:[#allocation69_spill] sm:$0xff] }
 0x50d   : > { %v2806_v21 = vmul.f32 %v12036_v19, %v2790_v40 }
 0x50f   : > { %7217 = vmatmul.msk.f32.vlgmr.msra.gmra.mxu0 %vm1121_vm2, %v2806_v21 }
 0x510   : > { %3226 = vmatpush.msra.mxu0 %v7587_v5 }
 0x512   : > { %v7922_v25 = vpop.eup %7921 }
 0x513   : > { %v2792_v20 = vmul.f32 %v7922_v25, %v9878_v7  ;;  %v2751_v62 = vpop.xlane.xlu0 %2750  ;;  %v10004_v7 = vpop.permute.xlu2 %3455 }
 0x514   : > { %7923 = vrcp.f32 %v2751_v62  ;;  %v12044_v62 = vld [vmem:[#allocation103_spill] sm:$0xff] }
 0x515   : > { %v2808_v53 = vmul.f32 %v12037_v31, %v2792_v20 }
 0x517   : > { %7219 = vmatmul.msk.f32.vlgmr.msra.gmra.mxu2 %vm1121_vm2, %v2808_v53  ;;  %v12045_v53 = vld [vmem:[#allocation43_spill] sm:$0xff] }
 0x518   : > { %7228 = vmatpush.xpose.msk.msra.mxu2 %vm1121_vm2, %v12038_v59 }
 0x51a   : > { %v7924_v8 = vpop.eup %7923 }
 0x51b   : > { %v2793_v13 = vmul.f32 %v7924_v8, %v9883_v61  ;;  %v2745_v51 = vpop.xlane.xlu0 %2744  ;;  %v12042_v61 = vld [vmem:[#allocation105_spill] sm:$0xff] }
 0x51c   : > { %7925 = vrcp.f32 %v2745_v51  ;;  %v12047_v51 = vld [vmem:[#allocation78_spill] sm:$0xff] }
 0x51d   : > { %v2809_v48 = vmul.f32 %v12039_v52, %v2793_v13 }
 0x51f   : > { %7220 = vmatmul.msk.f32.vlgmr.msra.gmra.mxu3 %vm1121_vm2, %v2809_v48 }
 0x520   : > { %7230 = vmatpush.xpose.msk.msra.mxu3 %vm1121_vm2, %v12040_v30  ;;  %v12048_v30 = vld [vmem:[#allocation104_spill] sm:$0xff] }
 0x522   : > { %v7926_v45 = vpop.eup %7925 }
 0x523   : > { %v2791_v27 = vmul.f32 %v7926_v45, %v9887_v42 }
 0x525   : > { %v2807_v17 = vmul.f32 %v12041_v49, %v2791_v27  ;;  %v12049_v27 = vld [vmem:[#allocation70_spill] sm:$0xff] }
 0x527   : > { %7218 = vmatmul.msk.f32.vlgmr.msra.gmra.mxu1 %vm1121_vm2, %v2807_v17 }
 0x528   : > { %7226 = vmatpush.xpose.msk.msra.mxu1 %vm1121_vm2, %v12042_v61 }
 0x529   : > { %v2760_v24 = vpop.xlane.xlu2 %2759 }
 0x52a   : > { %7927 = vrcp.f32 %v2760_v24 }
 0x52d   : > { %v2757_v38 = vpop.xlane.xlu1 %2756 }
 0x52e   : > { %7929 = vrcp.f32 %v2757_v38  ;;  %v3316_v58 = vpop.permute.xlu0 %3315  ;;  %v12050_v38 = vld [vmem:[#allocation107_spill] sm:$0xff] }
 0x530   : > { %v7928_v37 = vpop.eup %7927 }
 0x531   : > { %v2796_v43 = vmul.f32 %v7928_v37, %v9895_v47  ;;  %v2766_v40 = vpop.xlane.xlu2 %2765  ;;  %v12046_v47 = vld [vmem:[#allocation110_spill] sm:$0xff] }
 0x532   : > { %v12051_v37 = vld [vmem:[#allocation118_spill] sm:$0xff] }
 0x533   : > { %v2812_v42 = vmul.f32 %v12043_v11, %v2796_v43 }
 0x534   : > { %v7930_v21 = vpop.eup %7929 }
 0x535   : > { %v2795_v5 = vmul.f32 %v7930_v21, %v9900_v33  ;;  %v2754_v25 = vpop.xlane.xlu1 %2753  ;;  %7223 = vmatmul.msk.f32.vlgmr.msrb.gmra.mxu2 %vm1121_vm2, %v2812_v42 }
 0x536   : > { %7931 = vrcp.f32 %v2754_v25  ;;  %v3430_v20 = vpop.permute.xlu0 %3429  ;;  %7236 = vmatpush.xpose.msk.msrb.mxu2 %vm1121_vm2, %v12044_v62  ;;  %v12056_v62 = vld [vmem:[#allocation114_spill] sm:$0xff] }
 0x537   : > { %v2811_v59 = vmul.f32 %v12045_v53, %v2795_v5  ;;  %7933 = vrcp.f32 %v2766_v40  ;;  %v12053_v40 = vld [vmem:[#allocation40_spill] sm:$0xff]  ;;  %v12054_v5 = vld [vmem:[#allocation41_spill] sm:$0xff] }
 0x539   : > { %v2763_v8 = vpop.xlane.xlu2 %2762  ;;  %7222 = vmatmul.msk.f32.vlgmr.msrb.gmra.mxu1 %vm1121_vm2, %v2811_v59  ;;  %v12057_v59 = vld [vmem:[#allocation76_spill] sm:$0xff] }
 0x53a   : > { %7935 = vrcp.f32 %v2763_v8  ;;  %7234 = vmatpush.xpose.msk.msrb.mxu1 %vm1121_vm2, %v12046_v47 }
 0x53c   : > { %v7932_v13 = vpop.eup %7931 }
 0x53d   : > { %v2794_v33 = vmul.f32 %v7932_v13, %v9910_v16  ;;  %7229 = vmatmul.msk.f32.vlgmr.msra.gmra.mxu2 %vm1121_vm2, %v12047_v51  ;;  %v7934_v45 = vpop.eup %7933  ;;  %v12052_v16 = vld [vmem:[#allocation117_spill] sm:$0xff]  ;;  %v12060_v51 = vld [vmem:[#allocation108_spill] sm:$0xff] }
 0x53e   : > { %v3428_v48 = vpop.permute.xlu0 %3427  ;;  %7244 = vmatpush.xpose.msk.msra.mxu2 %vm1121_vm2, %v12048_v30  ;;  %v2798_v43 = vmul.f32 %v7934_v45, %v9904_v63  ;;  %v12058_v63 = vld [vmem:[#allocation115_spill] sm:$0xff]  ;;  %v12061_v30 = vld [vmem:[#allocation116_spill] sm:$0xff] }
 0x53f   : > { %v2810_v17 = vmul.f32 %v12049_v27, %v2794_v33  ;;  %v12059_v33 = vld [vmem:[#allocation106_spill] sm:$0xff] }
 0x540   : > { %v7936_v61 = vpop.eup %7935  ;;  %v2814_v8 = vmul.f32 %v12057_v59, %v2798_v43 }
 0x541   : > { %v2797_v24 = vmul.f32 %v7936_v61, %v9914_v50  ;;  %7221 = vmatmul.msk.f32.vlgmr.msrb.gmra.mxu0 %vm1121_vm2, %v2810_v17  ;;  %7227 = vmatmul.msk.f32.vlgmr.msra.gmra.mxu1 %vm1121_vm2, %v12050_v38  ;;  %v3570_v21 = vpop.permute.xlu2 %3569  ;;  %v12055_v50 = vld [vmem:[#allocation109_spill] sm:$0xff] }
 0x542   : > { %7232 = vmatpush.xpose.msk.msrb.mxu0 %vm1121_vm2, %v12051_v37  ;;  %7242 = vmatpush.xpose.msk.msra.mxu1 %vm1121_vm2, %v12052_v16  ;;  %v12063_v38 = vld [vmem:[#allocation113_spill] sm:$0xff] }
 0x543   : > { %v2813_v42 = vmul.f32 %v12053_v40, %v2797_v24  ;;  %v12062_v24 = vld [vmem:[#allocation112_spill] sm:$0xff]  ;;  %v12096_v40 = vld [vmem:[#allocation95_spill] sm:$0xff] }
 0x545   : > { %7224 = vmatmul.msk.f32.vlgmr.msrb.gmra.mxu3 %vm1121_vm2, %v2813_v42  ;;  %7237 = vmatmul.msk.f32.vlgmr.msrb.gmra.mxu2 %vm1121_vm2, %v12054_v5  ;;  %v12064_v42 = vld [vmem:[#allocation119_spill] sm:$0xff] }
 0x546   : > { %7238 = vmatpush.xpose.msk.msrb.mxu3 %vm1121_vm2, %v12055_v50  ;;  %v3540_v25 = vpop.permute.xlu0 %3539  ;;  %7252 = vmatpush.xpose.msk.msrb.mxu2 %vm1121_vm2, %v12056_v62 }
 0x549   : > { %7225 = vmatmul.msk.f32.vlgmr.msra.gmra.mxu0 %vm1121_vm2, %v2814_v8  ;;  %7235 = vmatmul.msk.f32.vlgmr.msrb.gmra.mxu1 %vm1121_vm2, %v12058_v63  ;;  %v3568_v47 = vpop.permute.xlu2 %3567 }
 0x54a   : > { %7240 = vmatpush.xpose.msk.msra.mxu0 %vm1121_vm2, %v3430_v20  ;;  %7250 = vmatpush.xpose.msk.msrb.mxu1 %vm1121_vm2, %v3570_v21 }
 0x54d   : > { %v3624_v13 = vpop.permute.xlu1 %3623  ;;  %7231 = vmatmul.msk.f32.vlgmr.msra.gmra.mxu3 %vm1121_vm2, %v12059_v33  ;;  %7245 = vmatmul.msk.f32.vlgmr.msra.gmra.mxu2 %vm1121_vm2, %v12060_v51 }
 0x54e   : > { %7246 = vmatpush.xpose.msk.msra.mxu3 %vm1121_vm2, %v12061_v30  ;;  %v7590_v45 = vpop.permute.xlu0 %7589 }
 0x54f   : > { %v7591_v17 = vunpack.i.l.bf16 %v7590_v45  ;;  %v7592_v20 = vunpack.i.h.bf16 %v7590_v45 }
 0x551   : > { %3918 = vmatpush.msra.mxu2 %v7591_v17  ;;  %7233 = vmatmul.msk.f32.vlgmr.msrb.gmra.mxu0 %vm1121_vm2, %v3316_v58  ;;  %v3654_v16 = vpop.permute.xlu2 %3653 }
 0x552   : > { %7243 = vmatmul.msk.f32.vlgmr.msra.gmra.mxu1 %vm1121_vm2, %v10004_v7 }
 0x555   : > { %v3542_v61 = vpop.permute.xlu1 %3541  ;;  %7239 = vmatmul.msk.f32.vlgmr.msrb.gmra.mxu3 %vm1121_vm2, %v12062_v24  ;;  %7253 = vmatmul.msk.f32.vlgmr.msrb.gmra.mxu2 %vm1121_vm2, %v12063_v38  ;;  %v12080_v24 = vld [vmem:[#allocation60_spill] sm:$0xff] }
 0x556   : > { %7254 = vmatpush.xpose.msk.msrb.mxu3 %vm1121_vm2, %v10007_v14  ;;  %v7595_v37 = vpop.permute.xlu0 %7594  ;;  %4022 = vmatpush.msrb.mxu2 %v7592_v20 }
 0x557   : > { %v7596_v43 = vunpack.i.l.bf16 %v7595_v37  ;;  %7248 = vmatpush.xpose.msk.msrb.mxu0 %vm1121_vm2, %v3542_v61  ;;  %v7597_v7 = vunpack.i.h.bf16 %v7595_v37 }
 0x559   : > { %3892 = vmatpush.msra.mxu1 %v7596_v43  ;;  %7241 = vmatmul.msk.f32.vlgmr.msra.gmra.mxu0 %vm1121_vm2, %v3428_v48  ;;  %v10076_v5 = vpop.permute.xlu2 %7604 }
 0x55a   : > { %7251 = vmatmul.msk.f32.vlgmr.msrb.gmra.mxu1 %vm1121_vm2, %v3568_v47  ;;  %v7606_v48 = vunpack.i.l.bf16 %v10076_v5 }
 0x55b   : > { %7256 = vmatpush.xpose.msk.msra.mxu0 %vm1121_vm2, %v3654_v16 }
 0x55d   : > { %v3652_v58 = vpop.permute.xlu1 %3651  ;;  %7247 = vmatmul.msk.f32.vlgmr.msra.gmra.mxu3 %vm1121_vm2, %v12064_v42 }
 0x55e   : > { %v10073_v21 = vpop.permute.xlu0 %7599  ;;  %3944 = vmatpush.msra.mxu3 %v7597_v7 }
 0x55f   : > { %v7602_v14 = vunpack.i.h.bf16 %v10073_v21 }
 0x561   : > { %3996 = vmatpush.msrb.mxu1 %v7602_v14  ;;  %7249 = vmatmul.msk.f32.vlgmr.msrb.gmra.mxu0 %vm1121_vm2, %v3540_v25 }
 0x565   : > { %v10080_v50 = vpop.permute.xlu1 %7609  ;;  %7255 = vmatmul.msk.f32.vlgmr.msrb.gmra.mxu3 %vm1121_vm2, %v3624_v13 }
 0x566   : > { %v7611_v62 = vunpack.i.l.bf16 %v10080_v50  ;;  %4048 = vmatpush.msrb.mxu3 %v7606_v48  ;;  %v12079_v48 = vld [vmem:[#allocation62_spill] sm:$0xff] }
 0x568   : > { %3970 = vmatpush.msrb.mxu0 %v7611_v62 }
 0x569   : > { %7257 = vmatmul.msk.f32.vlgmr.msra.gmra.mxu0 %vm1121_vm2, %v3652_v58  ;;  %v10088_v47 = vpop.f32.mrf.mxu1 }
 0x56a   : > { %12065 = vst [vmem:[#allocation48_spill] sm:$0xff] %v10088_v47  ;;  %v12087_v47 = vld [vmem:[#allocation75_spill] sm:$0xff] }
 0x56d   : > { %v10085_v8 = vpop.permute.xlu1 %7614 }
 0x56e   : > { %v7617_v63 = vunpack.i.h.bf16 %v10085_v8 }
 0x570   : > { %4074 = vmatpush.msra.mxu0 %v7617_v63 }
 0x571   : > { %v10090_v25 = vpop.f32.mrf.mxu2 }
 0x572   : > { %12066 = vst [vmem:[#allocation98_spill] sm:$0xff] %v10090_v25 }
 0x573   : > { %v10094_v51 = vpop.f32.mrf.mxu0 }
 0x574   : > { %12067 = vst [vmem:[#allocation81_spill] sm:$0xff] %v10094_v51  ;;  %v10100_v45 = vpop.f32.mrf.mxu1  ;;  %v12088_v51 = vld [vmem:[#allocation67_spill] sm:$0xff] }
 0x575   : > { %12069 = vst [vmem:[#allocation71_spill] sm:$0xff] %v10100_v45  ;;  %v12086_v45 = vld [vmem:[#allocation61_spill] sm:$0xff] }
 0x577   : > { %v10096_v13 = vpop.f32.mrf.mxu3 }
 0x578   : > { %12068 = vst [vmem:[#allocation100_spill] sm:$0xff] %v10096_v13 }
 0x582   : > { %v10110_v38 = vpop.f32.mrf.mxu3 }
 0x583   : > { %12073 = vst [vmem:[#allocation99_spill] sm:$0xff] %v10110_v38 }
 0x58a   : > { %v10102_v17 = vpop.f32.mrf.mxu2 }
 0x58b   : > { %12070 = vst [vmem:[#allocation102_spill] sm:$0xff] %v10102_v17 }
 0x58c   : > { %v10112_v37 = vpop.f32.mrf.mxu0 }
 0x58d   : > { %12074 = vst [vmem:[#allocation105_spill] sm:$0xff] %v10112_v37 }
 0x59a   : > { %v10104_v20 = vpop.f32.mrf.mxu2 }
 0x59b   : > { %12071 = vst [vmem:[#allocation57_spill] sm:$0xff] %v10104_v20  ;;  %v12082_v20 = vld [vmem:[#allocation64_spill] sm:$0xff] }
 0x5a2   : > { %v10118_v7 = vpop.f32.mrf.mxu3 }
 0x5a3   : > { %12077 = vst [vmem:[#allocation78_spill] sm:$0xff] %v10118_v7 }
 0x5a4   : > { %v10106_v61 = vpop.f32.mrf.mxu1 }
 0x5a5   : > { %12072 = vst [vmem:[#allocation111_spill] sm:$0xff] %v10106_v61 }
 0x5b6   : > { %v10114_v16 = vpop.f32.mrf.mxu1 }
 0x5b7   : > { %12075 = vst [vmem:[#allocation103_spill] sm:$0xff] %v10114_v16 }
 0x5b8   : > { %v10116_v43 = vpop.f32.mrf.mxu2 }
 0x5b9   : > { %12076 = vst [vmem:[#allocation110_spill] sm:$0xff] %v10116_v43 }
 0x5be   : > { %v10120_v58 = vpop.f32.mrf.mxu0  ;;  %v3256_v42 = vpop.f32.mrf.mxu1 }
 0x5bf   : > { %12078 = vst [vmem:[#allocation104_spill] sm:$0xff] %v10120_v58  ;;  %v10125_v62 = vadd.f32 %v3256_v42, %v12079_v48  ;;  %v12084_v58 = vld [vmem:[#allocation66_spill] sm:$0xff] }
 0x5c0   : > { %v3284_v63 = vpop.f32.mrf.mxu2 }
 0x5c1   : > { %v10128_v33 = vadd.f32 %v3284_v63, %v12080_v24  ;;  %v3679_v30 = vsel %vm1121_vm2, %v10125_v62, -inf }
 0x5c2   : > { %3680 = vmax.xlane.f32.xlu1 %v3679_v30 }
 0x5c3   : > { %v3682_v43 = vsel %vm1121_vm2, %v10128_v33, -inf }
 0x5c4   : > { %3683 = vmax.xlane.f32.xlu0 %v3682_v43 }
 0x5c6   : > { %v10134_v16 = vpop.f32.mrf.mxu0  ;;  %v3368_v61 = vpop.f32.mrf.mxu1 }
 0x5c7   : > { %12081 = vst [vmem:[#allocation107_spill] sm:$0xff] %v10134_v16  ;;  %v10137_v14 = vadd.f32 %v3368_v61, %v12082_v20  ;;  %v12085_v16 = vld [vmem:[#allocation63_spill] sm:$0xff] }
 0x5c8   : > { %v10139_v42 = vpop.f32.mrf.mxu3  ;;  %v3396_v7 = vpop.f32.mrf.mxu2 }
 0x5c9   : > { %12083 = vst [vmem:[#allocation118_spill] sm:$0xff] %v10139_v42  ;;  %v10142_v63 = vadd.f32 %v3396_v7, %v12084_v58  ;;  %v3691_v37 = vsel %vm1121_vm2, %v10137_v14, -inf }
 0x5ca   : > { %3692 = vmax.xlane.f32.xlu1 %v3691_v37 }
 0x5cb   : > { %v3694_v30 = vsel %vm1121_vm2, %v10142_v63, -inf }
 0x5cc   : > { %3695 = vmax.xlane.f32.xlu2 %v3694_v30 }
 0x5ce   : > { %v3340_v43 = vpop.f32.mrf.mxu0 }
 0x5cf   : > { %v10149_v38 = vadd.f32 %v3340_v43, %v12085_v16  ;;  %v3480_v43 = vpop.f32.mrf.mxu1 }
 0x5d0   : > { %v3312_v61 = vpop.f32.mrf.mxu3  ;;  %v3508_v17 = vpop.f32.mrf.mxu2 }
 0x5d1   : > { %v10152_v42 = vadd.f32 %v3312_v61, %v12086_v45  ;;  %v10155_v7 = vadd.f32 %v3508_v17, %v12087_v47  ;;  %v3688_v25 = vsel %vm1121_vm2, %v10149_v38, -inf  ;;  %v10164_v61 = vadd.f32 %v3480_v43, %v12088_v51  ;;  %v12090_v45 = vld [vmem:[#allocation90_spill] sm:$0xff] }
 0x5d2   : > { %3689 = vmax.xlane.f32.xlu1 %v3688_v25 }
 0x5d3   : > { %v3706_v37 = vsel %vm1121_vm2, %v10155_v7, -inf  ;;  %v3685_v30 = vsel %vm1121_vm2, %v10152_v42, -inf }
 0x5d4   : > { %3707 = vmax.xlane.f32.xlu2 %v3706_v37  ;;  %3686 = vmax.xlane.f32.xlu0 %v3685_v30  ;;  %v3703_v30 = vsel %vm1121_vm2, %v10164_v61, -inf }
 0x5d6   : > { %v3452_v13 = vpop.f32.mrf.mxu0 }
 0x5d7   : > { %v10167_v17 = vadd.f32 %v3452_v13, %v12089_v3  ;;  %v12091_v13 = vld [vmem:[#allocation68_spill] sm:$0xff]  ;;  %v12092_v3 = vld [vmem:[#allocation73_spill] sm:$0xff] }
 0x5d8   : > { %v3424_v4 = vpop.f32.mrf.mxu3  ;;  %v3620_v47 = vpop.f32.mrf.mxu2 }
 0x5d9   : > { %v10170_v25 = vadd.f32 %v3620_v47, %v12090_v45  ;;  %v3700_v20 = vsel %vm1121_vm2, %v10167_v17, -inf  ;;  %v10179_v51 = vadd.f32 %v3424_v4, %v12091_v13  ;;  %v12093_v45 = vld [vmem:[#allocation79_spill] sm:$0xff]  ;;  %v12094_v4 = vld [vmem:[#allocation85_spill] sm:$0xff]  ;;  %v12095_v13 = vld [vmem:[#allocation84_spill] sm:$0xff] }
 0x5da   : > { %3701 = vmax.xlane.f32.xlu1 %v3700_v20 }
 0x5db   : > { %v3718_v37 = vsel %vm1121_vm2, %v10170_v25, -inf }
 0x5dc   : > { %3719 = vmax.xlane.f32.xlu2 %v3718_v37  ;;  %3704 = vmax.xlane.f32.xlu0 %v3703_v30  ;;  %v3697_v37 = vsel %vm1121_vm2, %v10179_v51, -inf  ;;  %v3592_v30 = vpop.f32.mrf.mxu1 }
 0x5de   : > { %v3564_v43 = vpop.f32.mrf.mxu0 }
 0x5df   : > { %v10182_v58 = vadd.f32 %v3564_v43, %v12092_v3  ;;  %v10194_v43 = vadd.f32 %v3592_v30, %v12094_v4 }
 0x5e0   : > { %v3536_v47 = vpop.f32.mrf.mxu3 }
 0x5e1   : > { %v10185_v16 = vadd.f32 %v3536_v47, %v12093_v45  ;;  %v3712_v20 = vsel %vm1121_vm2, %v10182_v58, -inf }
 0x5e2   : > { %3713 = vmax.xlane.f32.xlu1 %v3712_v20  ;;  %v3715_v20 = vsel %vm1121_vm2, %v10194_v43, -inf }
 0x5e3   : > { %v3709_v24 = vsel %vm1121_vm2, %v10185_v16, -inf }
 0x5e4   : > { %3710 = vmax.xlane.f32.xlu2 %v3709_v24  ;;  %3698 = vmax.xlane.f32.xlu0 %v3697_v37  ;;  %v10208_v37 = vpop.permute.xlu0 %4317 }
 0x5e6   : > { %v3676_v48 = vpop.f32.mrf.mxu0 }
 0x5e7   : > { %v10204_v59 = vadd.f32 %v3676_v48, %v12096_v40 }
 0x5e8   : > { %v3648_v3 = vpop.f32.mrf.mxu3 }
 0x5e9   : > { %v10197_v47 = vadd.f32 %v3648_v3, %v12095_v13  ;;  %v3724_v24 = vsel %vm1121_vm2, %v10204_v59, -inf  ;;  %v10210_v3 = vpop.permute.xlu2 %7619 }
 0x5eb   : > { %v3721_v45 = vsel %vm1121_vm2, %v10197_v47, -inf }
 0x5ec   : > { %3722 = vmax.xlane.f32.xlu2 %v3721_v45  ;;  %3716 = vmax.xlane.f32.xlu0 %v3715_v20  ;;  %v10212_v30 = vpop.permute.xlu0 %4315 }
 0x5ed   : > { %12097 = vst [vmem:[#allocation117_spill] sm:$0xff] %v10212_v30 }
 0x5f1   : > { %v10215_v27 = vpop.permute.xlu2 %4289 }
 0x5f4   : > { %3725 = vmax.xlane.f32.xlu0 %v3724_v24 }
 0x635   : > { %v3681_v13 = vpop.xlane.xlu1 %3680 }
 0x636   : > { %v3727_v4 = vsub.f32 %v10125_v62, %v3681_v13 }
 0x637   : > { %v3684_v45 = vpop.xlane.xlu0 %3683 }
 0x638   : > { %v3743_v20 = vmul.f32 1.442695, %v3727_v4  ;;  %v3728_v48 = vsub.f32 %v10128_v33, %v3684_v45 }
 0x63a   : > { %7937 = vpow2.f32 %v3743_v20  ;;  %v3745_v40 = vmul.f32 1.442695, %v3728_v48 }
 0x63c   : > { %7939 = vpow2.f32 %v3745_v40 }
 0x63d   : > { %v3693_v60 = vpop.xlane.xlu1 %3692 }
 0x63e   : > { %v3731_v24 = vsub.f32 %v10137_v14, %v3693_v60 }
 0x63f   : > { %v3696_v55 = vpop.xlane.xlu2 %3695 }
 0x640   : > { %v10219_v11 = vpop.eup %7937  ;;  %v3751_v32 = vmul.f32 1.442695, %v3731_v24  ;;  %v3732_v30 = vsub.f32 %v10142_v63, %v3696_v55 }
 0x641   : > { %v3775_v62 = vsel %vm1121_vm2, %v10219_v11, 0.0 }
 0x642   : > { %7941 = vpow2.f32 %v3751_v32  ;;  %3776 = vadd.xlane.f32.xlu2 %v3775_v62  ;;  %v3753_v13 = vmul.f32 1.442695, %v3732_v30  ;;  %v10224_v33 = vpop.eup %7939 }
 0x643   : > { %v3778_v63 = vsel %vm1121_vm2, %v10224_v33, 0.0 }
 0x644   : > { %7943 = vpow2.f32 %v3753_v13 }
 0x645   : > { %v3690_v4 = vpop.xlane.xlu1 %3689 }
 0x646   : > { %v3730_v45 = vsub.f32 %v10149_v38, %v3690_v4 }
 0x647   : > { %v3708_v20 = vpop.xlane.xlu2 %3707  ;;  %v3687_v60 = vpop.xlane.xlu0 %3686 }
 0x648   : > { %v10227_v14 = vpop.eup %7941  ;;  %v3749_v40 = vmul.f32 1.442695, %v3730_v45  ;;  %v3736_v48 = vsub.f32 %v10155_v7, %v3708_v20  ;;  %v3729_v55 = vsub.f32 %v10152_v42, %v3687_v60 }
 0x649   : > { %v3787_v32 = vsel %vm1121_vm2, %v10227_v14, 0.0 }
 0x64a   : > { %7945 = vpow2.f32 %v3749_v40  ;;  %3788 = vadd.xlane.f32.xlu1 %v3787_v32  ;;  %3779 = vadd.xlane.f32.xlu2 %v3778_v63  ;;  %v3761_v38 = vmul.f32 1.442695, %v3736_v48  ;;  %v3747_v30 = vmul.f32 1.442695, %v3729_v55  ;;  %v10235_v24 = vpop.eup %7943 }
 0x64b   : > { %v3790_v7 = vsel %vm1121_vm2, %v10235_v24, 0.0 }
 0x64c   : > { %7947 = vpow2.f32 %v3761_v38 }
 0x64d   : > { %7949 = vpow2.f32 %v3747_v30  ;;  %v3702_v40 = vpop.xlane.xlu1 %3701 }
 0x64e   : > { %v3734_v63 = vsub.f32 %v10167_v17, %v3702_v40 }
 0x64f   : > { %v3720_v62 = vpop.xlane.xlu2 %3719  ;;  %v3705_v13 = vpop.xlane.xlu0 %3704 }
 0x650   : > { %v10237_v4 = vpop.eup %7945  ;;  %v3735_v42 = vsub.f32 %v10164_v61, %v3705_v13 }
 0x651   : > { %v3784_v45 = vsel %vm1121_vm2, %v10237_v4, 0.0 }
 0x652   : > { %3791 = vadd.xlane.f32.xlu1 %v3790_v7  ;;  %3785 = vadd.xlane.f32.xlu2 %v3784_v45  ;;  %v3759_v20 = vmul.f32 1.442695, %v3735_v42  ;;  %v10244_v60 = vpop.eup %7947  ;;  %v3757_v45 = vmul.f32 1.442695, %v3734_v63 }
 0x653   : > { %v10246_v48 = vpop.eup %7949  ;;  %v3802_v30 = vsel %vm1121_vm2, %v10244_v60, 0.0 }
 0x654   : > { %7951 = vpow2.f32 %v3759_v20  ;;  %v3781_v13 = vsel %vm1121_vm2, %v10246_v48, 0.0 }
 0x657   : > { %v3711_v55 = vpop.xlane.xlu2 %3710  ;;  %v3699_v32 = vpop.xlane.xlu0 %3698 }
 0x658   : > { %v3737_v61 = vsub.f32 %v10185_v16, %v3711_v55  ;;  %v3733_v38 = vsub.f32 %v10179_v51, %v3699_v32 }
 0x65a   : > { %v3763_v42 = vmul.f32 1.442695, %v3737_v61  ;;  %v3755_v7 = vmul.f32 1.442695, %v3733_v38  ;;  %3803 = vadd.xlane.f32.xlu2 %v3802_v30  ;;  %3782 = vadd.xlane.f32.xlu1 %v3781_v13  ;;  %v10255_v53 = vpop.eup %7951  ;;  %v3714_v61 = vpop.xlane.xlu1 %3713 }
 0x65b   : > { %v3799_v51 = vsel %vm1121_vm2, %v10255_v53, 0.0 }
 0x65c   : > { %7953 = vpow2.f32 %v3763_v42 }
 0x65d   : > { %7955 = vpow2.f32 %v3755_v7  ;;  %v3740_v7 = vsub.f32 %v10170_v25, %v3720_v62 }
 0x65e   : > { %7957 = vpow2.f32 %v3757_v45 }
 0x65f   : > { %v3717_v17 = vpop.xlane.xlu0 %3716 }
 0x660   : > { %v3739_v16 = vsub.f32 %v10194_v43, %v3717_v17  ;;  %v3738_v43 = vsub.f32 %v10182_v58, %v3714_v61  ;;  %v3769_v17 = vmul.f32 1.442695, %v3740_v7  ;;  %v12098_v58 = vld [vmem:[#allocation47_spill] sm:$0xff] }
 0x662   : > { %v10260_v20 = vpop.eup %7953  ;;  %3800 = vadd.xlane.f32.xlu1 %v3799_v51  ;;  %v3767_v32 = vmul.f32 1.442695, %v3739_v16  ;;  %v3765_v13 = vmul.f32 1.442695, %v3738_v43  ;;  %v12100_v43 = vld [vmem:[#allocation72_spill] sm:$0xff] }
 0x663   : > { %v10262_v40 = vpop.eup %7955  ;;  %v3805_v55 = vsel %vm1121_vm2, %v10260_v20, 0.0 }
 0x664   : > { %3806 = vadd.xlane.f32.xlu0 %v3805_v55  ;;  %v3793_v63 = vsel %vm1121_vm2, %v10262_v40, 0.0  ;;  %v10268_v38 = vpop.eup %7957  ;;  %7959 = vpow2.f32 %v3767_v32  ;;  %v12099_v55 = vld [vmem:[#allocation46_spill] sm:$0xff] }
 0x665   : > { %3794 = vadd.xlane.f32.xlu2 %v3793_v63  ;;  %v3796_v30 = vsel %vm1121_vm2, %v10268_v38, 0.0  ;;  %7961 = vpow2.f32 %v3765_v13  ;;  %v3723_v13 = vpop.xlane.xlu2 %3722 }
 0x666   : > { %7963 = vpow2.f32 %v3769_v17 }
 0x667   : > { %v3726_v32 = vpop.xlane.xlu0 %3725 }
 0x668   : > { %v3742_v63 = vsub.f32 %v10204_v59, %v3726_v32  ;;  %v12101_v59 = vld [vmem:[#allocation51_spill] sm:$0xff]  ;;  %v7612_v32 = vunpack.i.h.bf16 %v10080_v50 }
 0x66a   : > { %3797 = vadd.xlane.f32.xlu1 %v3796_v30  ;;  %v10273_v42 = vpop.eup %7959  ;;  %v3773_v61 = vmul.f32 1.442695, %v3742_v63 }
 0x66b   : > { %v3811_v45 = vsel %vm1121_vm2, %v10273_v42, 0.0  ;;  %v10278_v16 = vpop.eup %7961 }
 0x66c   : > { %v3808_v51 = vsel %vm1121_vm2, %v10278_v16, 0.0  ;;  %v10286_v25 = vpop.eup %7963  ;;  %7965 = vpow2.f32 %v3773_v61 }
 0x66d   : > { %v3814_v62 = vsel %vm1121_vm2, %v10286_v25, 0.0 }
 0x672   : > { %3812 = vadd.xlane.f32.xlu1 %v3811_v45  ;;  %v10297_v30 = vpop.eup %7965 }
 0x673   : > { %v3820_v7 = vsel %vm1121_vm2, %v10297_v30, 0.0 }
 0x678   : > { %4343 = vrot.lane.b32.xlu0 %v12098_v58, %s8375_s0 }
 0x67a   : > { %3809 = vadd.xlane.f32.xlu1 %v3808_v51 }
 0x67d   : > { %4287 = vrot.lane.b32.xlu2 %v12099_v55, %s8375_s0 }
 0x682   : > { %3815 = vadd.xlane.f32.xlu1 %v3814_v62 }
 0x685   : > { %4345 = vrot.lane.b32.xlu2 %v11953_v44, %s8374_s6  ;;  %v3741_v44 = vsub.f32 %v10197_v47, %v3723_v13 }
 0x68d   : > { %4373 = vrot.lane.b32.xlu2 %v11958_v10, %s8374_s6  ;;  %v3771_v10 = vmul.f32 1.442695, %v3741_v44 }
 0x68f   : > { %7967 = vpow2.f32 %v3771_v10  ;;  %v7601_v10 = vunpack.i.l.bf16 %v10073_v21  ;;  %v12105_v21 = vld [vmem:[#allocation42_spill] sm:$0xff] }
 0x695   : > { %v10306_v45 = vpop.eup %7967 }
 0x696   : > { %v3817_v58 = vsel %vm1121_vm2, %v10306_v45, 0.0 }
 0x69b   : > { %7624 = vrot.lane.b32.xlu1 %v12100_v43, %s8373_s23  ;;  %s8299_s23 = scalar_lea.hbm %s8298_s24, 1 }
 0x69c   : > { %p8300_p4 = scmp.ne.s32.totalorder %s8298_s24, %s8299_s23  ;;  %p8305_p11 = scmp.lt.s32.totalorder %s8303_s16, %s8299_s23 }
 0x69e   : > { %p8301_p9 = pnand %p8300_p4, %p8548_p7  ;;  %p8306_p12 = por %p8305_p11, %p8304_p2 }
 0x6a0   : > { %p8302_p10 = pneg %p8301_p9 }
 0x6a2   : > { %3821 = vadd.xlane.f32.xlu0 %v3820_v7  ;;  %v7621_v7 = vunpack.i.l.bf16 %v10210_v3  ;;  %p8307_p13 = pnand %p8306_p12, %p8302_p10 }
 0x6a3   : > { %4371 = vrot.lane.b32.xlu1 %v12033_v6, %s8375_s0  ;;  %v12102_v6 = vld [vmem:[#allocation50_spill] sm:$0xff] }
 0x6ab   : > { %4427 = vrot.lane.b32.xlu1 %v12101_v59, %s8375_s0 }
 0x6b3   : > { %4457 = vrot.lane.b32.xlu1 %v8772_v18, %s8374_s6 }
 0x6b5   : > { %v3777_v17 = vpop.xlane.xlu2 %3776 }
 0x6b6   : > { %7969 = vrcp.f32 %v3777_v17  ;;  %3818 = vadd.xlane.f32.xlu2 %v3817_v58  ;;  %4399 = vrot.lane.b32.xlu0 %v12102_v6, %s8375_s0 }
 0x6bb   : > { %4483 = vrot.lane.b32.xlu1 %v8870_v36, %s8375_s0 }
 0x6bc   : > { %v7970_v47 = vpop.eup %7969 }
 0x6bd   : > { %v3839_v51 = vmul.f32 %v7970_v47, %v10219_v11  ;;  %v3789_v55 = vpop.xlane.xlu1 %3788  ;;  %v3780_v62 = vpop.xlane.xlu2 %3779 }
 0x6be   : > { %7971 = vrcp.f32 %v3789_v55  ;;  %4485 = vrot.lane.b32.xlu0 %v11948_v56, %s8374_s6  ;;  %v12103_v56 = vld [vmem:[#allocation55_spill] sm:$0xff] }
 0x6bf   : > { %v3855_v18 = vmul.f32 %v9403_v0, %v3839_v51  ;;  %7973 = vrcp.f32 %v3780_v62  ;;  %v7607_v62 = vunpack.i.h.bf16 %v10076_v5 }
 0x6c1   : > { %7258 = vmatmul.msk.f32.vlgmr.msra.gmra.mxu1 %vm1121_vm2, %v3855_v18 }
 0x6c2   : > { %4100 = vmatpush.msra.mxu1 %v7612_v32 }
 0x6c3   : > { %4513 = vrot.lane.b32.xlu1 %v8780_v22, %s8374_s6 }
 0x6c4   : > { %v7972_v36 = vpop.eup %7971 }
 0x6c5   : > { %v7974_v63 = vpop.eup %7973  ;;  %v3843_v11 = vmul.f32 %v7972_v36, %v10227_v14  ;;  %v3792_v61 = vpop.xlane.xlu1 %3791 }
 0x6c6   : > { %v3786_v43 = vpop.xlane.xlu2 %3785  ;;  %v3840_v13 = vmul.f32 %v7974_v63, %v10224_v33  ;;  %7975 = vrcp.f32 %v3792_v61  ;;  %4539 = vrot.lane.b32.xlu0 %v12103_v56, %s8375_s0  ;;  %v12104_v33 = vld [vmem:[#allocation56_spill] sm:$0xff] }
 0x6c7   : > { %v3859_v50 = vmul.f32 %v9433_v29, %v3843_v11  ;;  %7977 = vrcp.f32 %v3786_v43  ;;  %v7616_v11 = vunpack.i.l.bf16 %v10085_v8  ;;  %v12106_v8 = vld [vmem:[#allocation52_spill] sm:$0xff] }
 0x6c8   : > { %v3856_v44 = vmul.f32 %v9378_v9, %v3840_v13 }
 0x6c9   : > { %7262 = vmatmul.msk.f32.vlgmr.msrb.gmra.mxu1 %vm1121_vm2, %v3859_v50  ;;  %v7622_v50 = vunpack.i.h.bf16 %v10210_v3 }
 0x6ca   : > { %7259 = vmatmul.msk.f32.vlgmr.msra.gmra.mxu2 %vm1121_vm2, %v3856_v44  ;;  %4204 = vmatpush.msrb.mxu1 %v7621_v7 }
 0x6cb   : > { %4126 = vmatpush.msra.mxu2 %v7601_v10  ;;  %4567 = vrot.lane.b32.xlu1 %v12104_v33, %s8375_s0 }
 0x6cc   : > { %v7976_v14 = vpop.eup %7975 }
 0x6cd   : > { %v7978_v59 = vpop.eup %7977  ;;  %v3844_v17 = vmul.f32 %v7976_v14, %v10235_v24  ;;  %v3783_v6 = vpop.xlane.xlu1 %3782 }
 0x6ce   : > { %v3804_v58 = vpop.xlane.xlu2 %3803  ;;  %v3842_v47 = vmul.f32 %v7978_v59, %v10237_v4  ;;  %4429 = vrot.lane.b32.xlu2 %v12105_v21, %s8374_s6  ;;  %4569 = vrot.lane.b32.xlu0 %v8788_v28, %s8374_s6  ;;  %v12107_v59 = vld [vmem:[#allocation43_spill] sm:$0xff] }
 0x6cf   : > { %7979 = vrcp.f32 %v3804_v58  ;;  %v3860_v51 = vmul.f32 %v12034_v1, %v3844_v17  ;;  %v12108_v58 = vld [vmem:[#allocation44_spill] sm:$0xff] }
 0x6d0   : > { %7981 = vrcp.f32 %v3783_v6  ;;  %v3858_v55 = vmul.f32 %v9420_v35, %v3842_v47  ;;  %v12109_v47 = vld [vmem:[#allocation58_spill] sm:$0xff] }
 0x6d2   : > { %7261 = vmatmul.msk.f32.vlgmr.msrb.gmra.mxu0 %vm1121_vm2, %v3858_v55  ;;  %7263 = vmatmul.msk.f32.vlgmr.msrb.gmra.mxu2 %vm1121_vm2, %v3860_v51  ;;  %v12110_v51 = vld [vmem:[#allocation69_spill] sm:$0xff] }
 0x6d3   : > { %4230 = vmatpush.msrb.mxu2 %v7607_v62  ;;  %4653 = vrot.lane.b32.xlu1 %v8801_v39, %s8374_s6 }
 0x6d5   : > { %v7980_v24 = vpop.eup %7979  ;;  %v3801_v28 = vpop.xlane.xlu1 %3800 }
 0x6d6   : > { %v7982_v4 = vpop.eup %7981  ;;  %v3848_v18 = vmul.f32 %v7980_v24, %v10244_v60  ;;  %7983 = vrcp.f32 %v3801_v28  ;;  %4401 = vrot.lane.b32.xlu2 %v8764_v12, %s8374_s6  ;;  %4595 = vrot.lane.b32.xlu0 %v8931_v15, %s8375_s0  ;;  %v12112_v24 = vld [vmem:[#allocation117_spill] sm:$0xff] }
 0x6d7   : > { %v3841_v32 = vmul.f32 %v7982_v4, %v10246_v48  ;;  %v3807_v61 = vpop.xlane.xlu0 %3806 }
 0x6d8   : > { %v3864_v5 = vmul.f32 %v12037_v31, %v3848_v18  ;;  %v3795_v63 = vpop.xlane.xlu2 %3794 }
 0x6d9   : > { %v3857_v36 = vmul.f32 %v9390_v23, %v3841_v32  ;;  %7985 = vrcp.f32 %v3795_v63 }
 0x6da   : > { %7267 = vmatmul.msk.f32.vlgmr.msra.gmra.mxu2 %vm1121_vm2, %v3864_v5  ;;  %7987 = vrcp.f32 %v3807_v61 }
 0x6db   : > { %7260 = vmatmul.msk.f32.vlgmr.msra.gmra.mxu3 %vm1121_vm2, %v3857_v36  ;;  %7276 = vmatpush.xpose.msk.msra.mxu2 %vm1121_vm2, %v10208_v37  ;;  %v12114_v36 = vld [vmem:[#allocation70_spill] sm:$0xff] }
 0x6dc   : > { %4152 = vmatpush.msra.mxu3 %v7616_v11  ;;  %v7984_v60 = vpop.eup %7983  ;;  %4623 = vrot.lane.b32.xlu1 %v11946_v2, %s8375_s0 }
 0x6dd   : > { %v3847_v15 = vmul.f32 %v7984_v60, %v10255_v53  ;;  %v3798_v48 = vpop.xlane.xlu1 %3797 }
 0x6de   : > { %7989 = vrcp.f32 %v3798_v48  ;;  %4455 = vrot.lane.b32.xlu2 %v12106_v8, %s8375_s0  ;;  %4625 = vrot.lane.b32.xlu0 %v8796_v34, %s8374_s6  ;;  %v12115_v8 = vld [vmem:[#allocation76_spill] sm:$0xff] }
 0x6df   : > { %v7986_v43 = vpop.eup %7985  ;;  %v3863_v13 = vmul.f32 %v12041_v49, %v3847_v15 }
 0x6e0   : > { %v3845_v37 = vmul.f32 %v7986_v43, %v10262_v40  ;;  %v4288_v56 = vpop.permute.xlu2 %4287  ;;  %v7988_v53 = vpop.eup %7987 }
 0x6e1   : > { %7266 = vmatmul.msk.f32.vlgmr.msra.gmra.mxu1 %vm1121_vm2, %v3863_v13  ;;  %v3849_v10 = vmul.f32 %v7988_v53, %v10260_v20 }
 0x6e2   : > { %v3861_v2 = vmul.f32 %v9460_v46, %v3845_v37  ;;  %7274 = vmatpush.xpose.msk.msra.mxu1 %vm1121_vm2, %v10215_v27 }
 0x6e3   : > { %v3865_v3 = vmul.f32 %v12039_v52, %v3849_v10 }
 0x6e4   : > { %v7990_v7 = vpop.eup %7989  ;;  %7264 = vmatmul.msk.f32.vlgmr.msrb.gmra.mxu3 %vm1121_vm2, %v3861_v2  ;;  %4709 = vrot.lane.b32.xlu1 %v8820_v54, %s8374_s6 }
 0x6e5   : > { %v3846_v44 = vmul.f32 %v7990_v7, %v10268_v38  ;;  %4256 = vmatpush.msrb.mxu3 %v7622_v50  ;;  %v3813_v40 = vpop.xlane.xlu1 %3812 }
 0x6e6   : > { %4541 = vrot.lane.b32.xlu2 %v8784_v26, %s8374_s6  ;;  %7991 = vrcp.f32 %v3813_v40  ;;  %4679 = vrot.lane.b32.xlu0 %v8965_v41, %s8375_s0 }
 0x6e7   : > { %v3862_v27 = vmul.f32 %v12036_v19, %v3846_v44 }
 0x6e8   : > { %v4346_v14 = vpop.permute.xlu2 %4345 }
 0x6e9   : > { %7265 = vmatmul.msk.f32.vlgmr.msra.gmra.mxu0 %vm1121_vm2, %v3862_v27 }
 0x6ea   : > { %v4344_v18 = vpop.permute.xlu0 %4343 }
 0x6ec   : > { %v7992_v33 = vpop.eup %7991  ;;  %7268 = vmatmul.msk.f32.vlgmr.msra.gmra.mxu3 %vm1121_vm2, %v3865_v3 }
 0x6ed   : > { %v3851_v38 = vmul.f32 %v7992_v33, %v10273_v42  ;;  %7278 = vmatpush.xpose.msk.msra.mxu3 %vm1121_vm2, %v4346_v14  ;;  %v3810_v20 = vpop.xlane.xlu1 %3809 }
 0x6ee   : > { %4511 = vrot.lane.b32.xlu2 %v8889_v57, %s8375_s0  ;;  %v12111_v57 = vld [vmem:[#allocation45_spill] sm:$0xff] }
 0x6ef   : > { %v3867_v41 = vmul.f32 %v12107_v59, %v3851_v38 }
 0x6f0   : > { %v4374_v11 = vpop.permute.xlu2 %4373 }
 0x6f1   : > { %7270 = vmatmul.msk.f32.vlgmr.msrb.gmra.mxu1 %vm1121_vm2, %v3867_v41 }
 0x6f5   : > { %v3816_v17 = vpop.xlane.xlu1 %3815 }
 0x6f6   : > { %4597 = vrot.lane.b32.xlu2 %v12108_v58, %s8374_s6  ;;  %7993 = vrcp.f32 %v3816_v17 }
 0x6f7   : > { %7995 = vrcp.f32 %v3810_v20 }
 0x6f9   : > { %7275 = vmatmul.msk.f32.vlgmr.msra.gmra.mxu1 %vm1121_vm2, %v4288_v56 }
 0x6fc   : > { %v7994_v6 = vpop.eup %7993 }
 0x6fd   : > { %v3852_v42 = vmul.f32 %v7994_v6, %v10286_v25  ;;  %v7996_v62 = vpop.eup %7995  ;;  %v12113_v25 = vld [vmem:[#allocation59_spill] sm:$0xff] }
 0x6fe   : > { %4651 = vrot.lane.b32.xlu2 %v12109_v47, %s8375_s0  ;;  %v3850_v4 = vmul.f32 %v7996_v62, %v10278_v16 }
 0x6ff   : > { %v3868_v55 = vmul.f32 %v12110_v51, %v3852_v42 }
 0x700   : > { %v3866_v63 = vmul.f32 %v12114_v36, %v3850_v4 }
 0x701   : > { %7271 = vmatmul.msk.f32.vlgmr.msrb.gmra.mxu2 %vm1121_vm2, %v3868_v55 }
 0x706   : > { %4681 = vrot.lane.b32.xlu2 %v12111_v57, %s8374_s6 }
 0x709   : > { %7277 = vmatmul.msk.f32.vlgmr.msra.gmra.mxu2 %vm1121_vm2, %v12112_v24 }
 0x70d   : > { %v7625_v28 = vpop.permute.xlu1 %7624 }
 0x70e   : > { %4707 = vrot.lane.b32.xlu2 %v12113_v25, %s8375_s0  ;;  %v7627_v32 = vunpack.i.h.bf16 %v7625_v28  ;;  %v7626_v5 = vunpack.i.l.bf16 %v7625_v28 }
 0x710   : > { %4178 = vmatpush.msrb.mxu0 %v7626_v5 }
 0x711   : > { %7269 = vmatmul.msk.f32.vlgmr.msrb.gmra.mxu0 %vm1121_vm2, %v3866_v63 }
 0x712   : > { %4282 = vmatpush.msra.mxu0 %v7627_v32 }
 0x714   : > { %7280 = vmatpush.xpose.msk.msrb.mxu0 %vm1121_vm2, %v4374_v11 }
 0x715   : > { %v4372_v61 = vpop.permute.xlu1 %4371  ;;  %v3822_v60 = vpop.xlane.xlu0 %3821 }
 0x716   : > { %7997 = vrcp.f32 %v3822_v60 }
 0x71c   : > { %v7998_v16 = vpop.eup %7997 }
 0x71d   : > { %v3854_v15 = vmul.f32 %v7998_v16, %v10297_v30  ;;  %v4428_v48 = vpop.permute.xlu1 %4427  ;;  %v12116_v30 = vld [vmem:[#allocation40_spill] sm:$0xff] }
 0x71f   : > { %v3870_v43 = vmul.f32 %v12115_v8, %v3854_v15 }
 0x721   : > { %7273 = vmatmul.msk.f32.vlgmr.msra.gmra.mxu0 %vm1121_vm2, %v3870_v43 }
 0x725   : > { %v4458_v13 = vpop.permute.xlu1 %4457 }
 0x728   : > { %v4400_v37 = vpop.permute.xlu0 %4399 }
 0x729   : > { %v3819_v2 = vpop.xlane.xlu2 %3818  ;;  %7281 = vmatmul.msk.f32.vlgmr.msrb.gmra.mxu0 %vm1121_vm2, %v4372_v61 }
 0x72a   : > { %7999 = vrcp.f32 %v3819_v2 }
 0x72d   : > { %v4484_v56 = vpop.permute.xlu1 %4483 }
 0x730   : > { %v8000_v53 = vpop.eup %7999  ;;  %v4486_v50 = vpop.permute.xlu0 %4485 }
 0x731   : > { %v3853_v7 = vmul.f32 %v8000_v53, %v10306_v45  ;;  %v4430_v44 = vpop.permute.xlu2 %4429  ;;  %7288 = vmatpush.xpose.msk.msra.mxu0 %vm1121_vm2, %v4486_v50 }
 0x732   : > { %7284 = vmatpush.xpose.msk.msrb.mxu2 %vm1121_vm2, %v4430_v44  ;;  %v12118_v44 = vld [vmem:[#allocation60_spill] sm:$0xff] }
 0x733   : > { %v3869_v40 = vmul.f32 %v12116_v30, %v3853_v7 }
 0x734   : > { %7289 = vmatmul.msk.f32.vlgmr.msra.gmra.mxu0 %vm1121_vm2, %v4484_v56 }
 0x735   : > { %7272 = vmatmul.msk.f32.vlgmr.msrb.gmra.mxu3 %vm1121_vm2, %v3869_v40  ;;  %7285 = vmatmul.msk.f32.vlgmr.msrb.gmra.mxu2 %vm1121_vm2, %v4428_v48  ;;  %v4514_v10 = vpop.permute.xlu1 %4513 }
 0x736   : > { %7286 = vmatpush.xpose.msk.msrb.mxu3 %vm1121_vm2, %v4458_v13  ;;  %v12117_v13 = vld [vmem:[#allocation62_spill] sm:$0xff] }
 0x738   : > { %v4540_v27 = vpop.permute.xlu0 %4539 }
 0x739   : > { %v4402_v3 = vpop.permute.xlu2 %4401 }
 0x73a   : > { %7282 = vmatpush.xpose.msk.msrb.mxu1 %vm1121_vm2, %v4402_v3  ;;  %v12129_v3 = vld [vmem:[#allocation38_spill] sm:$0xff] }
 0x73d   : > { %7279 = vmatmul.msk.f32.vlgmr.msra.gmra.mxu3 %vm1121_vm2, %v4344_v18  ;;  %7283 = vmatmul.msk.f32.vlgmr.msrb.gmra.mxu1 %vm1121_vm2, %v4400_v37  ;;  %v4568_v45 = vpop.permute.xlu1 %4567 }
 0x73e   : > { %7290 = vmatpush.xpose.msk.msra.mxu1 %vm1121_vm2, %v4514_v10  ;;  %v10433_v17 = vpop.f32.mrf.mxu1 }
 0x740   : > { %v4570_v33 = vpop.permute.xlu0 %4569 }
 0x741   : > { %v4456_v14 = vpop.permute.xlu2 %4455  ;;  %7294 = vmatpush.xpose.msk.msra.mxu3 %vm1121_vm2, %v4570_v33 }
 0x745   : > { %7287 = vmatmul.msk.f32.vlgmr.msrb.gmra.mxu3 %vm1121_vm2, %v4456_v14  ;;  %v4654_v38 = vpop.permute.xlu1 %4653 }
 0x746   : > { %v10445_v24 = vpop.f32.mrf.mxu1 }
 0x748   : > { %v4596_v20 = vpop.permute.xlu0 %4595 }
 0x749   : > { %v4542_v41 = vpop.permute.xlu2 %4541 }
 0x74a   : > { %7292 = vmatpush.xpose.msk.msra.mxu2 %vm1121_vm2, %v4542_v41 }
 0x74d   : > { %v10435_v58 = vpop.f32.mrf.mxu2  ;;  %7293 = vmatmul.msk.f32.vlgmr.msra.gmra.mxu2 %vm1121_vm2, %v4540_v27  ;;  %7295 = vmatmul.msk.f32.vlgmr.msra.gmra.mxu3 %vm1121_vm2, %v4568_v45 }
 0x74e   : > { %7300 = vmatpush.xpose.msk.msrb.mxu2 %vm1121_vm2, %v4654_v38  ;;  %v4624_v42 = vpop.permute.xlu1 %4623  ;;  %v12119_v38 = vld [vmem:[#allocation63_spill] sm:$0xff] }
 0x74f   : > { %v10450_v28 = vpop.f32.mrf.mxu0 }
 0x750   : > { %v4626_v47 = vpop.permute.xlu0 %4625 }
 0x751   : > { %v4512_v55 = vpop.permute.xlu2 %4511  ;;  %7298 = vmatpush.xpose.msk.msrb.mxu1 %vm1121_vm2, %v4626_v47 }
 0x752   : > { %7291 = vmatmul.msk.f32.vlgmr.msra.gmra.mxu1 %vm1121_vm2, %v4512_v55  ;;  %v12120_v55 = vld [vmem:[#allocation66_spill] sm:$0xff] }
 0x755   : > { %v10443_v62 = vpop.f32.mrf.mxu2 }
 0x756   : > { %v4710_v18 = vpop.permute.xlu1 %4709 }
 0x758   : > { %v4680_v16 = vpop.permute.xlu0 %4679 }
 0x759   : > { %v4598_v4 = vpop.permute.xlu2 %4597 }
 0x75a   : > { %7296 = vmatpush.xpose.msk.msrb.mxu0 %vm1121_vm2, %v4598_v4  ;;  %7299 = vmatmul.msk.f32.vlgmr.msrb.gmra.mxu1 %vm1121_vm2, %v4624_v42 }
 0x75d   : > { %7297 = vmatmul.msk.f32.vlgmr.msrb.gmra.mxu0 %vm1121_vm2, %v4596_v20  ;;  %v10457_v5 = vpop.f32.mrf.mxu2 }
 0x75e   : > { %7304 = vmatpush.xpose.msk.msra.mxu0 %vm1121_vm2, %v4710_v18  ;;  %v10452_v25 = vpop.f32.mrf.mxu3  ;;  %v10459_v63 = vpop.f32.mrf.mxu1 }
 0x761   : > { %v4652_v61 = vpop.permute.xlu2 %4651 }
 0x762   : > { %7301 = vmatmul.msk.f32.vlgmr.msrb.gmra.mxu2 %vm1121_vm2, %v4652_v61  ;;  %v12121_v61 = vld [vmem:[#allocation64_spill] sm:$0xff] }
 0x766   : > { %v10475_v50 = vpop.f32.mrf.mxu0 }
 0x767   : > { %v10471_v56 = vpop.f32.mrf.mxu3 }
 0x769   : > { %v4682_v60 = vpop.permute.xlu2 %4681 }
 0x76a   : > { %7302 = vmatpush.xpose.msk.msrb.mxu3 %vm1121_vm2, %v4682_v60 }
 0x76d   : > { %7303 = vmatmul.msk.f32.vlgmr.msrb.gmra.mxu3 %vm1121_vm2, %v4680_v16 }
 0x76e   : > { %v10466_v15 = vpop.f32.mrf.mxu1 }
 0x76f   : > { %v10478_v10 = vpop.f32.mrf.mxu3 }
 0x771   : > { %v4708_v48 = vpop.permute.xlu2 %4707 }
 0x772   : > { %7305 = vmatmul.msk.f32.vlgmr.msra.gmra.mxu0 %vm1121_vm2, %v4708_v48 }
 0x776   : > { %v4312_v43 = vpop.f32.mrf.mxu1 }
 0x777   : > { %v4313_v37 = vadd.f32 %v4312_v43, %v12117_v13 }
 0x779   : > { %v4735_v2 = vsel %vm1121_vm2, %v4313_v37, -inf }
 0x77a   : > { %4736 = vmax.xlane.f32.xlu1 %v4735_v2  ;;  %v12122_v2 = vld [vmem:[#allocation65_spill] sm:$0xff] }
 0x784   : > { %v10473_v53 = vpop.f32.mrf.mxu2 }
 0x78c   : > { %v4340_v7 = vpop.f32.mrf.mxu2 }
 0x78d   : > { %v4341_v40 = vadd.f32 %v4340_v7, %v12118_v44 }
 0x78e   : > { %v10480_v27 = vpop.f32.mrf.mxu0 }
 0x78f   : > { %v4738_v45 = vsel %vm1121_vm2, %v4341_v40, -inf }
 0x790   : > { %4739 = vmax.xlane.f32.xlu0 %v4738_v45 }
 0x79e   : > { %v10485_v33 = vpop.f32.mrf.mxu0 }
 0x7a6   : > { %v4396_v14 = vpop.f32.mrf.mxu0 }
 0x7a7   : > { %v4397_v20 = vadd.f32 %v4396_v14, %v12119_v38  ;;  %v12123_v14 = vld [vmem:[#allocation61_spill] sm:$0xff] }
 0x7a9   : > { %v4744_v41 = vsel %vm1121_vm2, %v4397_v20, -inf }
 0x7aa   : > { %4745 = vmax.xlane.f32.xlu0 %v4744_v41  ;;  %v12124_v41 = vld [vmem:[#allocation68_spill] sm:$0xff] }
 0x7b1   : > { %v4508_v43 = vpop.f32.mrf.mxu0 }
 0x7b2   : > { %v10499_v7 = vadd.f32 %v4508_v43, %v12122_v2 }
 0x7b4   : > { %v4756_v44 = vsel %vm1121_vm2, %v10499_v7, -inf }
 0x7b8   : > { %v10489_v42 = vpop.f32.mrf.mxu3  ;;  %v4452_v47 = vpop.f32.mrf.mxu2 }
 0x7b9   : > { %v10492_v4 = vadd.f32 %v4452_v47, %v12120_v55 }
 0x7ba   : > { %v4424_v18 = vpop.f32.mrf.mxu1 }
 0x7bb   : > { %v4425_v60 = vadd.f32 %v4424_v18, %v12121_v61  ;;  %v4750_v16 = vsel %vm1121_vm2, %v10492_v4, -inf }
 0x7bc   : > { %4751 = vmax.xlane.f32.xlu1 %v4750_v16  ;;  %v12125_v16 = vld [vmem:[#allocation75_spill] sm:$0xff] }
 0x7bd   : > { %v4747_v48 = vsel %vm1121_vm2, %v4425_v60, -inf }
 0x7be   : > { %4748 = vmax.xlane.f32.xlu2 %v4747_v48 }
 0x7c0   : > { %v4368_v13 = vpop.f32.mrf.mxu3 }
 0x7c1   : > { %v10504_v38 = vadd.f32 %v4368_v13, %v12123_v14  ;;  %v12126_v13 = vld [vmem:[#allocation67_spill] sm:$0xff] }
 0x7c3   : > { %v4741_v18 = vsel %vm1121_vm2, %v10504_v38, -inf }
 0x7c6   : > { %4757 = vmax.xlane.f32.xlu2 %v4756_v44 }
 0x7c8   : > { %v4480_v45 = vpop.f32.mrf.mxu3 }
 0x7c9   : > { %v4481_v47 = vadd.f32 %v4480_v45, %v12124_v41 }
 0x7cb   : > { %v4753_v55 = vsel %vm1121_vm2, %v4481_v47, -inf }
 0x7cc   : > { %4754 = vmax.xlane.f32.xlu0 %v4753_v55 }
 0x7ce   : > { %4742 = vmax.xlane.f32.xlu2 %v4741_v18  ;;  %v12127_v18 = vld [vmem:[#allocation49_spill] sm:$0xff] }
 0x7cf   : > { %v4536_v2 = vpop.f32.mrf.mxu1 }
 0x7d0   : > { %v4564_v61 = vpop.f32.mrf.mxu2  ;;  %v10516_v44 = vadd.f32 %v4536_v2, %v12126_v13 }
 0x7d1   : > { %v10511_v48 = vadd.f32 %v4564_v61, %v12125_v16 }
 0x7d2   : > { %v4759_v45 = vsel %vm1121_vm2, %v10516_v44, -inf }
 0x7d3   : > { %v4762_v43 = vsel %vm1121_vm2, %v10511_v48, -inf }
 0x7d6   : > { %4763 = vmax.xlane.f32.xlu2 %v4762_v43  ;;  %v7638_v43 = vpack.i.bf16 %v8764_v12, %v12105_v21 }
 0x7de   : > { %4760 = vmax.xlane.f32.xlu2 %v4759_v45 }
 0x7ed   : > { %v4737_v14 = vpop.xlane.xlu1 %4736 }
 0x7ee   : > { %v4783_v41 = vsub.f32 %v4313_v37, %v4737_v14 }
 0x7f0   : > { %v4799_v55 = vmul.f32 1.442695, %v4783_v41 }
 0x7f2   : > { %8001 = vpow2.f32 %v4799_v55 }
 0x7f6   : > { %7634 = vrot.lane.b32.xlu2 %v12127_v18, %s8376_s20 }
 0x7f8   : > { %v10522_v61 = vpop.eup %8001 }
 0x7f9   : > { %v4831_v16 = vsel %vm1121_vm2, %v10522_v61, 0.0 }
 0x7fa   : > { %4832 = vadd.xlane.f32.xlu0 %v4831_v16  ;;  %v12128_v16 = vld [vmem:[#allocation39_spill] sm:$0xff] }
 0x7fb   : > { %v7628_v11 = vpack.i.bf16 %v12129_v3, %v12128_v16 }
 0x7fe   : > { %7639 = vrot.lane.b32.xlu2 %v7638_v43, %s8376_s20  ;;  %v12130_v43 = vld [vmem:[#allocation79_spill] sm:$0xff] }
 0x803   : > { %v4740_v2 = vpop.xlane.xlu0 %4739 }
 0x804   : > { %v4784_v13 = vsub.f32 %v4341_v40, %v4740_v2  ;;  %v4592_v40 = vpop.f32.mrf.mxu3 }
 0x805   : > { %v10541_v2 = vadd.f32 %v4592_v40, %v12130_v43 }
 0x806   : > { %v4801_v37 = vmul.f32 1.442695, %v4784_v13 }
 0x808   : > { %8003 = vpow2.f32 %v4801_v37  ;;  %v4620_v37 = vpop.f32.mrf.mxu0 }
 0x80e   : > { %v10529_v45 = vpop.eup %8003 }
 0x80f   : > { %v4834_v14 = vsel %vm1121_vm2, %v10529_v45, 0.0 }
 0x810   : > { %4835 = vadd.xlane.f32.xlu1 %v4834_v14 }
 0x81d   : > { %v4746_v41 = vpop.xlane.xlu0 %4745 }
 0x81e   : > { %v4786_v55 = vsub.f32 %v4397_v20, %v4746_v41  ;;  %v4765_v20 = vsel %vm1121_vm2, %v10541_v2, -inf  ;;  %v12131_v41 = vld [vmem:[#allocation73_spill] sm:$0xff] }
 0x820   : > { %v4805_v18 = vmul.f32 1.442695, %v4786_v55  ;;  %v10546_v55 = vadd.f32 %v4620_v37, %v12131_v41 }
 0x822   : > { %8005 = vpow2.f32 %v4805_v18  ;;  %v4768_v18 = vsel %vm1121_vm2, %v10546_v55, -inf }
 0x828   : > { %v10535_v12 = vpop.eup %8005 }
 0x829   : > { %7629 = vrot.lane.b32.xlu1 %v7628_v11, %s8376_s20  ;;  %v4840_v21 = vsel %vm1121_vm2, %v10535_v12, 0.0 }
 0x82a   : > { %4841 = vadd.xlane.f32.xlu0 %v4840_v21 }
 0x82f   : > { %v4752_v21 = vpop.xlane.xlu1 %4751 }
 0x830   : > { %v4788_v32 = vsub.f32 %v10492_v4, %v4752_v21  ;;  %v4676_v21 = vpop.f32.mrf.mxu2 }
 0x831   : > { %v4749_v13 = vpop.xlane.xlu2 %4748 }
 0x832   : > { %v4787_v14 = vsub.f32 %v4425_v60, %v4749_v13  ;;  %4766 = vmax.xlane.f32.xlu0 %v4765_v20 }
 0x834   : > { %v4807_v3 = vmul.f32 1.442695, %v4787_v14  ;;  %v4809_v14 = vmul.f32 1.442695, %v4788_v32 }
 0x836   : > { %8007 = vpow2.f32 %v4807_v3 }
 0x839   : > { %v4758_v11 = vpop.xlane.xlu2 %4757 }
 0x83a   : > { %4769 = vmax.xlane.f32.xlu0 %v4768_v18 }
 0x83c   : > { %v10550_v16 = vpop.eup %8007 }
 0x83d   : > { %v4843_v60 = vsel %vm1121_vm2, %v10550_v16, 0.0 }
 0x83f   : > { %v4755_v40 = vpop.xlane.xlu0 %4754 }
 0x840   : > { %v4789_v43 = vsub.f32 %v4481_v47, %v4755_v40 }
 0x841   : > { %v4743_v6 = vpop.xlane.xlu2 %4742 }
 0x842   : > { %v4811_v13 = vmul.f32 1.442695, %v4789_v43  ;;  %v4785_v20 = vsub.f32 %v10504_v38, %v4743_v6  ;;  %4844 = vadd.xlane.f32.xlu0 %v4843_v60  ;;  %v12132_v38 = vld [vmem:[#allocation90_spill] sm:$0xff] }
 0x843   : > { %v10567_v32 = vadd.f32 %v4676_v21, %v12132_v38 }
 0x844   : > { %8009 = vpow2.f32 %v4811_v13  ;;  %v4803_v37 = vmul.f32 1.442695, %v4785_v20  ;;  %v4790_v13 = vsub.f32 %v10499_v7, %v4758_v11 }
 0x846   : > { %8011 = vpow2.f32 %v4803_v37  ;;  %v4774_v37 = vsel %vm1121_vm2, %v10567_v32, -inf }
 0x847   : > { %8013 = vpow2.f32 %v4809_v14  ;;  %v4648_v14 = vpop.f32.mrf.mxu1 }
 0x849   : > { %v4764_v3 = vpop.xlane.xlu2 %4763 }
 0x84a   : > { %v10556_v41 = vpop.eup %8009 }
 0x84b   : > { %v4849_v47 = vsel %vm1121_vm2, %v10556_v41, 0.0 }
 0x84c   : > { %v10560_v4 = vpop.eup %8011  ;;  %4850 = vadd.xlane.f32.xlu2 %v4849_v47  ;;  %v4813_v47 = vmul.f32 1.442695, %v4790_v13  ;;  %v4704_v13 = vpop.f32.mrf.mxu3 }
 0x84d   : > { %v4837_v18 = vsel %vm1121_vm2, %v10560_v4, 0.0  ;;  %v10564_v6 = vpop.eup %8013 }
 0x84e   : > { %4838 = vadd.xlane.f32.xlu0 %v4837_v18  ;;  %v4846_v60 = vsel %vm1121_vm2, %v10564_v6, 0.0  ;;  %v12133_v18 = vld [vmem:[#allocation85_spill] sm:$0xff] }
 0x84f   : > { %v10576_v21 = vadd.f32 %v4648_v14, %v12133_v18  ;;  %v12135_v14 = vld [vmem:[#allocation53_spill] sm:$0xff]  ;;  %v4732_v18 = vpop.f32.mrf.mxu0 }
 0x851   : > { %v4761_v40 = vpop.xlane.xlu2 %4760  ;;  %v4771_v7 = vsel %vm1121_vm2, %v10576_v21, -inf }
 0x852   : > { %v4791_v43 = vsub.f32 %v10516_v44, %v4761_v40 }
 0x853   : > { %4847 = vadd.xlane.f32.xlu1 %v4846_v60 }
 0x854   : > { %v4815_v20 = vmul.f32 1.442695, %v4791_v43 }
 0x856   : > { %8015 = vpow2.f32 %v4815_v20  ;;  %4775 = vmax.xlane.f32.xlu0 %v4774_v37  ;;  %v12134_v20 = vld [vmem:[#allocation84_spill] sm:$0xff] }
 0x857   : > { %8017 = vpow2.f32 %v4813_v47  ;;  %v10589_v37 = vadd.f32 %v4704_v13, %v12134_v20  ;;  %v7658_v20 = vpack.i.bf16 %v8796_v34, %v8801_v39 }
 0x859   : > { %v7635_v38 = vpop.permute.xlu2 %7634  ;;  %v4777_v47 = vsel %vm1121_vm2, %v10589_v37, -inf }
 0x85a   : > { %v7637_v8 = vunpack.i.h.bf16 %v7635_v38  ;;  %v7636_v44 = vunpack.i.l.bf16 %v7635_v38 }
 0x85c   : > { %v10578_v40 = vpop.eup %8015  ;;  %5000 = vmatpush.msra.mxu3 %v7636_v44  ;;  %5026 = vmatpush.msrb.mxu0 %v7637_v8  ;;  %v4792_v8 = vsub.f32 %v10511_v48, %v4764_v3  ;;  %v12136_v44 = vld [vmem:[#allocation95_spill] sm:$0xff] }
 0x85d   : > { %v4855_v11 = vsel %vm1121_vm2, %v10578_v40, 0.0  ;;  %v10584_v43 = vpop.eup %8017 }
 0x85e   : > { %4772 = vmax.xlane.f32.xlu0 %v4771_v7  ;;  %4856 = vadd.xlane.f32.xlu2 %v4855_v11  ;;  %v4852_v60 = vsel %vm1121_vm2, %v10584_v43, 0.0  ;;  %v4817_v38 = vmul.f32 1.442695, %v4792_v8  ;;  %v10597_v7 = vadd.f32 %v4732_v18, %v12136_v44  ;;  %v7648_v11 = vpack.i.bf16 %v8780_v22, %v8784_v26 }
 0x85f   : > { %v12138_v8 = vpack.i.bf16 %v10435_v58, %v10433_v17 }
 0x860   : > { %8019 = vpow2.f32 %v4817_v38  ;;  %v4780_v48 = vsel %vm1121_vm2, %v10597_v7, -inf }
 0x861   : > { %v7640_v39 = vpop.permute.xlu2 %7639 }
 0x866   : > { %4853 = vadd.xlane.f32.xlu0 %v4852_v60  ;;  %v10604_v3 = vpop.eup %8019  ;;  %v12137_v60 = vld [vmem:[#allocation54_spill] sm:$0xff] }
 0x867   : > { %v4858_v13 = vsel %vm1121_vm2, %v10604_v3, 0.0 }
 0x86c   : > { %7644 = vrot.lane.b32.xlu1 %v12135_v14, %s8376_s20 }
 0x86d   : > { %v4833_v22 = vpop.xlane.xlu0 %4832 }
 0x86e   : > { %4778 = vmax.xlane.f32.xlu0 %v4777_v47  ;;  %8021 = vrcp.f32 %v4833_v22 }
 0x874   : > { %7649 = vrot.lane.b32.xlu1 %v7648_v11, %s8376_s20  ;;  %v8022_v14 = vpop.eup %8021 }
 0x875   : > { %v4895_v18 = vmul.f32 %v8022_v14, %v10522_v61 }
 0x876   : > { %4781 = vmax.xlane.f32.xlu0 %v4780_v48 }
 0x87c   : > { %7654 = vrot.lane.b32.xlu1 %v12137_v60, %s8376_s20 }
 0x87e   : > { %4859 = vadd.xlane.f32.xlu0 %v4858_v13  ;;  %v7642_v13 = vunpack.i.h.bf16 %v7640_v39 }
 0x883   : > { %v4836_v26 = vpop.xlane.xlu1 %4835 }
 0x884   : > { %7659 = vrot.lane.b32.xlu1 %v7658_v20, %s8376_s20  ;;  %8023 = vrcp.f32 %v4836_v26  ;;  %v7641_v20 = vunpack.i.l.bf16 %v7640_v39 }
 0x88a   : > { %v8024_v47 = vpop.eup %8023 }
 0x88b   : > { %v4896_v34 = vmul.f32 %v8024_v47, %v10529_v45 }
 0x88c   : > { %5291 = vrot.lane.b32.xlu1 %v12111_v57, %s8376_s20  ;;  %v4911_v57 = vmul.f32 %v9403_v0, %v4895_v18 }
 0x88d   : > { %v4912_v48 = vmul.f32 %v9378_v9, %v4896_v34 }
 0x894   : > { %7669 = vrot.lane.b32.xlu1 %v12138_v8, %s8377_s26 }
 0x89b   : > { %v7630_v38 = vpop.permute.xlu1 %7629 }
 0x89c   : > { %v7632_v44 = vunpack.i.h.bf16 %v7630_v38  ;;  %v7631_v11 = vunpack.i.l.bf16 %v7630_v38 }
 0x89d   : > { %v4842_v60 = vpop.xlane.xlu0 %4841 }
 0x89e   : > { %8025 = vrcp.f32 %v4842_v60  ;;  %4948 = vmatpush.msra.mxu1 %v7632_v44  ;;  %4974 = vmatpush.msra.mxu2 %v7631_v11 }
 0x89f   : > { %7306 = vmatmul.msk.f32.vlgmr.msra.gmra.mxu1 %vm1121_vm2, %v4911_v57  ;;  %7307 = vmatmul.msk.f32.vlgmr.msra.gmra.mxu2 %vm1121_vm2, %v4912_v48 }
 0x8a0   : > { %5052 = vmatpush.msrb.mxu1 %v7642_v13  ;;  %5078 = vmatpush.msrb.mxu2 %v7641_v20 }
 0x8a4   : > { %v8026_v17 = vpop.eup %8025 }
 0x8a5   : > { %v4898_v58 = vmul.f32 %v8026_v17, %v10535_v12  ;;  %v4767_v61 = vpop.xlane.xlu0 %4766 }
 0x8a6   : > { %v4793_v0 = vsub.f32 %v10541_v2, %v4767_v61 }
 0x8a7   : > { %v4914_v9 = vmul.f32 %v9420_v35, %v4898_v58 }
 0x8a8   : > { %v4819_v45 = vmul.f32 1.442695, %v4793_v0 }
 0x8a9   : > { %7309 = vmatmul.msk.f32.vlgmr.msrb.gmra.mxu0 %vm1121_vm2, %v4914_v9 }
 0x8aa   : > { %8027 = vpow2.f32 %v4819_v45 }
 0x8ad   : > { %v4770_v22 = vpop.xlane.xlu0 %4769 }
 0x8ae   : > { %v4794_v26 = vsub.f32 %v10546_v55, %v4770_v22 }
 0x8b0   : > { %v10630_v8 = vpop.eup %8027  ;;  %v4821_v14 = vmul.f32 1.442695, %v4794_v26 }
 0x8b1   : > { %v4861_v47 = vsel %vm1121_vm2, %v10630_v8, 0.0 }
 0x8b2   : > { %8029 = vpow2.f32 %v4821_v14  ;;  %4862 = vadd.xlane.f32.xlu0 %v4861_v47 }
 0x8b5   : > { %v4845_v12 = vpop.xlane.xlu0 %4844 }
 0x8b6   : > { %8031 = vrcp.f32 %v4845_v12 }
 0x8b8   : > { %v10634_v2 = vpop.eup %8029 }
 0x8b9   : > { %v4864_v35 = vsel %vm1121_vm2, %v10634_v2, 0.0 }
 0x8ba   : > { %4865 = vadd.xlane.f32.xlu2 %v4864_v35 }
 0x8bc   : > { %v8032_v18 = vpop.eup %8031 }
 0x8bd   : > { %v4899_v34 = vmul.f32 %v8032_v18, %v10550_v16 }
 0x8bf   : > { %v4915_v55 = vmul.f32 %v9433_v29, %v4899_v34  ;;  %v4851_v16 = vpop.xlane.xlu2 %4850 }
 0x8c1   : > { %v4839_v39 = vpop.xlane.xlu0 %4838  ;;  %7310 = vmatmul.msk.f32.vlgmr.msrb.gmra.mxu1 %vm1121_vm2, %v4915_v55 }
 0x8c2   : > { %8033 = vrcp.f32 %v4839_v39 }
 0x8c6   : > { %v4848_v38 = vpop.xlane.xlu1 %4847 }
 0x8c7   : > { %8035 = vrcp.f32 %v4848_v38 }
 0x8c8   : > { %v8034_v44 = vpop.eup %8033 }
 0x8c9   : > { %v4897_v11 = vmul.f32 %v8034_v44, %v10560_v4  ;;  %v4776_v57 = vpop.xlane.xlu0 %4775 }
 0x8ca   : > { %v4796_v48 = vsub.f32 %v10567_v32, %v4776_v57 }
 0x8cb   : > { %v4913_v60 = vmul.f32 %v9390_v23, %v4897_v11 }
 0x8cc   : > { %v4825_v13 = vmul.f32 1.442695, %v4796_v48 }
 0x8cd   : > { %v8036_v20 = vpop.eup %8035  ;;  %7308 = vmatmul.msk.f32.vlgmr.msra.gmra.mxu3 %vm1121_vm2, %v4913_v60 }
 0x8ce   : > { %v4900_v29 = vmul.f32 %v8036_v20, %v10564_v6  ;;  %8037 = vpow2.f32 %v4825_v13 }
 0x8cf   : > { %8039 = vrcp.f32 %v4851_v16 }
 0x8d0   : > { %v4916_v17 = vmul.f32 %v12034_v1, %v4900_v29 }
 0x8d1   : > { %v4773_v58 = vpop.xlane.xlu0 %4772  ;;  %v4857_v0 = vpop.xlane.xlu2 %4856 }
 0x8d2   : > { %v4795_v61 = vsub.f32 %v10576_v21, %v4773_v58  ;;  %7311 = vmatmul.msk.f32.vlgmr.msrb.gmra.mxu2 %vm1121_vm2, %v4916_v17 }
 0x8d4   : > { %v10649_v4 = vpop.eup %8037  ;;  %v4823_v32 = vmul.f32 1.442695, %v4795_v61 }
 0x8d5   : > { %v4870_v23 = vsel %vm1121_vm2, %v10649_v4, 0.0  ;;  %v8040_v6 = vpop.eup %8039 }
 0x8d6   : > { %8041 = vpow2.f32 %v4823_v32  ;;  %4871 = vadd.xlane.f32.xlu0 %v4870_v23  ;;  %v4901_v21 = vmul.f32 %v8040_v6, %v10556_v41  ;;  %v12139_v6 = vld [vmem:[#allocation81_spill] sm:$0xff] }
 0x8d8   : > { %v4917_v12 = vmul.f32 %v9460_v46, %v4901_v21 }
 0x8d9   : > { %v4854_v9 = vpop.xlane.xlu0 %4853 }
 0x8da   : > { %8043 = vrcp.f32 %v4854_v9  ;;  %v12140_v9 = vld [vmem:[#allocation100_spill] sm:$0xff] }
 0x8db   : > { %8045 = vrcp.f32 %v4857_v0  ;;  %v12141_v21 = vpack.i.bf16 %v12139_v6, %v12140_v9  ;;  %v7773_v6 = vpack.i.bf16 %v10485_v33, %v10489_v42 }
 0x8dc   : > { %v10653_v1 = vpop.eup %8041 }
 0x8dd   : > { %v4867_v45 = vsel %vm1121_vm2, %v10653_v1, 0.0 }
 0x8de   : > { %4868 = vadd.xlane.f32.xlu2 %v4867_v45  ;;  %v7645_v22 = vpop.permute.xlu1 %7644  ;;  %v12142_v45 = vld [vmem:[#allocation98_spill] sm:$0xff] }
 0x8df   : > { %v7647_v26 = vunpack.i.h.bf16 %v7645_v22  ;;  %v7646_v14 = vunpack.i.l.bf16 %v7645_v22 }
 0x8e0   : > { %v8044_v47 = vpop.eup %8043 }
 0x8e1   : > { %v8046_v35 = vpop.eup %8045  ;;  %v4902_v18 = vmul.f32 %v8044_v47, %v10584_v43  ;;  %v4779_v34 = vpop.xlane.xlu0 %4778  ;;  %5104 = vmatpush.msrb.mxu3 %v7646_v14  ;;  %5130 = vmatpush.msra.mxu0 %v7647_v26  ;;  %v12145_v26 = vld [vmem:[#allocation71_spill] sm:$0xff] }
 0x8e2   : > { %v4797_v55 = vsub.f32 %v10589_v37, %v4779_v34  ;;  %7312 = vmatmul.msk.f32.vlgmr.msrb.gmra.mxu3 %vm1121_vm2, %v4917_v12  ;;  %v4903_v39 = vmul.f32 %v8046_v35, %v10578_v40  ;;  %v12147_v47 = vld [vmem:[#allocation99_spill] sm:$0xff]  ;;  %v12148_v12 = vld [vmem:[#allocation105_spill] sm:$0xff] }
 0x8e3   : > { %v4918_v41 = vmul.f32 %v12036_v19, %v4902_v18  ;;  %v7708_v35 = vpack.i.bf16 %v12148_v12, %v12147_v47 }
 0x8e4   : > { %v4827_v38 = vmul.f32 1.442695, %v4797_v55  ;;  %v4919_v43 = vmul.f32 %v12041_v49, %v4903_v39  ;;  %v12150_v39 = vld [vmem:[#allocation111_spill] sm:$0xff] }
 0x8e5   : > { %7313 = vmatmul.msk.f32.vlgmr.msra.gmra.mxu0 %vm1121_vm2, %v4918_v41  ;;  %v12149_v41 = vld [vmem:[#allocation57_spill] sm:$0xff] }
 0x8e6   : > { %8047 = vpow2.f32 %v4827_v38  ;;  %v7650_v44 = vpop.permute.xlu1 %7649  ;;  %v12151_v38 = vpack.i.bf16 %v12149_v41, %v12150_v39  ;;  %v12164_v41 = vld [vmem:[#allocation92_spill] sm:$0xff] }
 0x8e7   : > { %v7652_v46 = vunpack.i.h.bf16 %v7650_v44  ;;  %v7651_v11 = vunpack.i.l.bf16 %v7650_v44 }
 0x8e9   : > { %v4782_v57 = vpop.xlane.xlu0 %4781  ;;  %5156 = vmatpush.msra.mxu1 %v7652_v46  ;;  %5182 = vmatpush.msra.mxu2 %v7651_v11  ;;  %v12152_v11 = vpack.i.bf16 %v10450_v28, %v10452_v25 }
 0x8ea   : > { %v4798_v37 = vsub.f32 %v10597_v7, %v4782_v57  ;;  %7314 = vmatmul.msk.f32.vlgmr.msra.gmra.mxu1 %vm1121_vm2, %v4919_v43  ;;  %v12153_v57 = vld [vmem:[#allocation104_spill] sm:$0xff] }
 0x8ec   : > { %v10668_v48 = vpop.eup %8047  ;;  %v4829_v19 = vmul.f32 1.442695, %v4798_v37  ;;  %v12154_v37 = vld [vmem:[#allocation78_spill] sm:$0xff] }
 0x8ed   : > { %v4873_v40 = vsel %vm1121_vm2, %v10668_v48, 0.0 }
 0x8ee   : > { %8049 = vpow2.f32 %v4829_v19  ;;  %4874 = vadd.xlane.f32.xlu0 %v4873_v40  ;;  %v7655_v60 = vpop.permute.xlu1 %7654  ;;  %v12155_v19 = vpack.i.bf16 %v12153_v57, %v12154_v37 }
 0x8ef   : > { %v7657_v13 = vunpack.i.h.bf16 %v7655_v60  ;;  %v7656_v20 = vunpack.i.l.bf16 %v7655_v60  ;;  %v7698_v60 = vpack.i.bf16 %v10443_v62, %v10445_v24  ;;  %v12160_v24 = vpack.i.bf16 %v10457_v5, %v10459_v63 }
 0x8f1   : > { %v4860_v29 = vpop.xlane.xlu0 %4859  ;;  %5208 = vmatpush.msra.mxu3 %v7656_v20  ;;  %5234 = vmatpush.msrb.mxu0 %v7657_v13  ;;  %v12156_v13 = vld [vmem:[#allocation103_spill] sm:$0xff]  ;;  %v12157_v20 = vld [vmem:[#allocation110_spill] sm:$0xff] }
 0x8f2   : > { %8051 = vrcp.f32 %v4860_v29  ;;  %v7753_v29 = vpack.i.bf16 %v12157_v20, %v12156_v13 }
 0x8f4   : > { %v10672_v49 = vpop.eup %8049 }
 0x8f5   : > { %v4876_v7 = vsel %vm1121_vm2, %v10672_v49, 0.0 }
 0x8f6   : > { %4877 = vadd.xlane.f32.xlu2 %v4876_v7  ;;  %v7660_v16 = vpop.permute.xlu1 %7659  ;;  %v12158_v7 = vld [vmem:[#allocation118_spill] sm:$0xff] }
 0x8f7   : > { %v7662_v17 = vunpack.i.h.bf16 %v7660_v16  ;;  %v7661_v58 = vunpack.i.l.bf16 %v7660_v16  ;;  %v12159_v16 = vld [vmem:[#allocation107_spill] sm:$0xff] }
 0x8f8   : > { %v8052_v61 = vpop.eup %8051  ;;  %v7768_v62 = vpack.i.bf16 %v12159_v16, %v12158_v7 }
 0x8f9   : > { %v4904_v32 = vmul.f32 %v8052_v61, %v10604_v3  ;;  %5260 = vmatpush.msrb.mxu1 %v7662_v17  ;;  %5286 = vmatpush.msrb.mxu2 %v7661_v58  ;;  %v12143_v3 = vld [vmem:[#allocation48_spill] sm:$0xff] }
 0x8fa   : > { %v12144_v22 = vpack.i.bf16 %v12142_v45, %v12143_v3 }
 0x8fb   : > { %v4920_v23 = vmul.f32 %v12037_v31, %v4904_v32  ;;  %v12146_v31 = vld [vmem:[#allocation102_spill] sm:$0xff] }
 0x8fc   : > { %v7693_v14 = vpack.i.bf16 %v12146_v31, %v12145_v26 }
 0x8fd   : > { %7315 = vmatmul.msk.f32.vlgmr.msra.gmra.mxu2 %vm1121_vm2, %v4920_v23  ;;  %v7758_v23 = vpack.i.bf16 %v10473_v53, %v10466_v15 }
 0x8fe   : > { %v5292_v0 = vpop.permute.xlu1 %5291 }
 0x8ff   : > { %5312 = vmatpush.msrb.mxu3 %v5292_v0 }
 0x902   : > { %5317 = vrot.lane.b32.xlu0 %v8820_v54, %s8376_s20 }
 0x90a   : > { %7679 = vrot.lane.b32.xlu0 %v12141_v21, %s8378_s28 }
 0x90e   : > { %7664 = vrot.lane.b32.xlu2 %v12144_v22, %s8378_s28  ;;  %v12162_v22 = vld [vmem:[#allocation76_spill] sm:$0xff] }
 0x916   : > { %7694 = vrot.lane.b32.xlu2 %v7693_v14, %s8378_s28  ;;  %v7401_v14 = vld [vmem:[%s11689_s5 + $0x8] sm:$0xff] }
 0x917   : > { %5643 = vmatpush.bf16.msra.mxu1 %v7401_v14 }
 0x91c   : > { %v4950_v54 = vpop.f32.mrf.mxu1 }
 0x91e   : > { %7709 = vrot.lane.b32.xlu2 %v7708_v35, %s8378_s28 }
 0x922   : > { %v4976_v18 = vpop.f32.mrf.mxu2 }
 0x923   : > { %v7673_v34 = vpack.i.bf16 %v4976_v18, %v4950_v54 }
 0x925   : > { %7674 = vrot.lane.b32.xlu1 %v7673_v34, %s8379_s30  ;;  %v4863_v55 = vpop.xlane.xlu0 %4862  ;;  %v12163_v34 = vld [vmem:[#allocation77_spill] sm:$0xff] }
 0x926   : > { %7724 = vrot.lane.b32.xlu2 %v12151_v38, %s8378_s28  ;;  %8053 = vrcp.f32 %v4863_v55 }
 0x92c   : > { %v8054_v44 = vpop.eup %8053 }
 0x92d   : > { %v4905_v46 = vmul.f32 %v8054_v44, %v10630_v8  ;;  %7684 = vrot.lane.b32.xlu1 %v12152_v11, %s8377_s26  ;;  %v4866_v43 = vpop.xlane.xlu2 %4865 }
 0x92e   : > { %8055 = vrcp.f32 %v4866_v43  ;;  %7739 = vrot.lane.b32.xlu2 %v12155_v19, %s8378_s28 }
 0x92f   : > { %v4921_v40 = vmul.f32 %v12039_v52, %v4905_v46  ;;  %v7713_v52 = vpack.i.bf16 %v10475_v50, %v10471_v56  ;;  %v5028_v50 = vpop.f32.mrf.mxu0 }
 0x931   : > { %7316 = vmatmul.msk.f32.vlgmr.msra.gmra.mxu3 %vm1121_vm2, %v4921_v40 }
 0x934   : > { %v8056_v8 = vpop.eup %8055 }
 0x935   : > { %v4906_v28 = vmul.f32 %v8056_v8, %v10634_v2  ;;  %7699 = vrot.lane.b32.xlu1 %v7698_v60, %s8377_s26 }
 0x936   : > { %7754 = vrot.lane.b32.xlu2 %v7753_v29, %s8378_s28 }
 0x937   : > { %v4922_v25 = vmul.f32 %v12114_v36, %v4906_v28  ;;  %v12161_v36 = vpack.i.bf16 %v10480_v27, %v10478_v10 }
 0x939   : > { %7317 = vmatmul.msk.f32.vlgmr.msrb.gmra.mxu0 %vm1121_vm2, %v4922_v25 }
 0x93d   : > { %7714 = vrot.lane.b32.xlu1 %v7713_v52, %s8377_s26 }
 0x93e   : > { %7769 = vrot.lane.b32.xlu2 %v7768_v62, %s8378_s28  ;;  %v5054_v27 = vpop.f32.mrf.mxu1 }
 0x945   : > { %7729 = vrot.lane.b32.xlu1 %v12160_v24, %s8377_s26  ;;  %v12166_v24 = vld [vmem:[#allocation86_spill] sm:$0xff] }
 0x949   : > { %v4872_v2 = vpop.xlane.xlu0 %4871 }
 0x94a   : > { %8057 = vrcp.f32 %v4872_v2 }
 0x94d   : > { %7744 = vrot.lane.b32.xlu1 %v12161_v36, %s8377_s26  ;;  %v12167_v36 = vld [vmem:[#allocation80_spill] sm:$0xff] }
 0x950   : > { %v8058_v56 = vpop.eup %8057  ;;  %v5002_v17 = vpop.f32.mrf.mxu3 }
 0x951   : > { %v4908_v58 = vmul.f32 %v8058_v56, %v10649_v4  ;;  %v7688_v61 = vpack.i.bf16 %v5028_v50, %v5002_v17  ;;  %v4869_v32 = vpop.xlane.xlu2 %4868 }
 0x952   : > { %8059 = vrcp.f32 %v4869_v32 }
 0x953   : > { %v4924_v5 = vmul.f32 %v12110_v51, %v4908_v58  ;;  %7689 = vrot.lane.b32.xlu0 %v7688_v61, %s8379_s30 }
 0x955   : > { %7319 = vmatmul.msk.f32.vlgmr.msrb.gmra.mxu2 %vm1121_vm2, %v4924_v5  ;;  %7759 = vrot.lane.b32.xlu1 %v7758_v23, %s8377_s26  ;;  %v5080_v63 = vpop.f32.mrf.mxu2 }
 0x956   : > { %v7703_v4 = vpack.i.bf16 %v5080_v63, %v5054_v27 }
 0x958   : > { %v8060_v10 = vpop.eup %8059 }
 0x959   : > { %v4907_v0 = vmul.f32 %v8060_v10, %v10653_v1 }
 0x95b   : > { %v4923_v9 = vmul.f32 %v12107_v59, %v4907_v0  ;;  %7704 = vrot.lane.b32.xlu0 %v7703_v4, %s8379_s30 }
 0x95d   : > { %7318 = vmatmul.msk.f32.vlgmr.msrb.gmra.mxu1 %vm1121_vm2, %v4923_v9  ;;  %7774 = vrot.lane.b32.xlu1 %v7773_v6, %s8377_s26 }
 0x961   : > { %v4875_v51 = vpop.xlane.xlu0 %4874 }
 0x962   : > { %8061 = vrcp.f32 %v4875_v51  ;;  %v5132_v15 = vpop.f32.mrf.mxu0 }
 0x965   : > { %v5106_v53 = vpop.f32.mrf.mxu3 }
 0x966   : > { %v7718_v21 = vpack.i.bf16 %v5132_v15, %v5106_v53  ;;  %v12169_v53 = vld [vmem:[#allocation91_spill] sm:$0xff] }
 0x968   : > { %v8062_v45 = vpop.eup %8061  ;;  %7719 = vrot.lane.b32.xlu0 %v7718_v21, %s8379_s30 }
 0x969   : > { %v4909_v1 = vmul.f32 %v8062_v45, %v10668_v48  ;;  %v4878_v3 = vpop.xlane.xlu2 %4877  ;;  %v5158_v48 = vpop.f32.mrf.mxu1  ;;  %v12170_v45 = vld [vmem:[#allocation87_spill] sm:$0xff] }
 0x96a   : > { %8063 = vrcp.f32 %v4878_v3 }
 0x96b   : > { %v4925_v59 = vmul.f32 %v12116_v30, %v4909_v1  ;;  %v7400_v30 = vld [vmem:[%s11689_s5] sm:$0xff] }
 0x96c   : > { %5644 = vmatpush.bf16.msra.mxu1 %v7400_v30 }
 0x96d   : > { %7320 = vmatmul.msk.f32.vlgmr.msrb.gmra.mxu3 %vm1121_vm2, %v4925_v59 }
 0x970   : > { %v8064_v33 = vpop.eup %8063 }
 0x971   : > { %v4910_v42 = vmul.f32 %v8064_v33, %v10672_v49  ;;  %v7670_v49 = vpop.permute.xlu1 %7669  ;;  %v7665_v35 = vpop.permute.xlu2 %7664 }
 0x972   : > { %v7667_v54 = vunpack.i.h.bf16 %v7665_v35  ;;  %v7666_v18 = vunpack.i.l.bf16 %v7665_v35  ;;  %v7672_v38 = vunpack.i.h.bf16 %v7670_v49  ;;  %v7671_v44 = vunpack.i.l.bf16 %v7670_v49 }
 0x973   : > { %v4926_v26 = vmul.f32 %v12162_v22, %v4910_v42 }
 0x974   : > { %v5318_v31 = vpop.permute.xlu0 %5317  ;;  %v5536_v55 = vsel %vm1121_vm2, %v12163_v34, %v7667_v54  ;;  %v5535_v39 = vsel %vm1121_vm2, %v12164_v41, %v7666_v18 }
 0x975   : > { %5338 = vmatpush.msra.mxu0 %v5318_v31  ;;  %v5552_v57 = vsel %vm5551_vm3, %v5535_v39, %v7671_v44  ;;  %v5553_v37 = vsel %vm5551_vm3, %v5536_v55, %v7672_v38  ;;  %v12172_v55 = vld [vmem:[#allocation93_spill] sm:$0xff]  ;;  %v12173_v39 = vld [vmem:[#allocation83_spill] sm:$0xff] }
 0x976   : > { %7321 = vmatmul.msk.f32.vlgmr.msra.gmra.mxu0 %vm1121_vm2, %v4926_v26 }
 0x979   : > { %v7695_v63 = vpop.permute.xlu2 %7694 }
 0x97a   : > { %v7697_v0 = vunpack.i.h.bf16 %v7695_v63  ;;  %v7696_v4 = vunpack.i.l.bf16 %v7695_v63 }
 0x97c   : > { %v7680_v29 = vpop.permute.xlu0 %7679  ;;  %v5540_v21 = vsel %vm1121_vm2, %v12169_v53, %v7697_v0  ;;  %v5539_v1 = vsel %vm1121_vm2, %v12170_v45, %v7696_v4 }
 0x97d   : > { %v7682_v25 = vunpack.i.h.bf16 %v7680_v29  ;;  %v7681_v52 = vunpack.i.l.bf16 %v7680_v29 }
 0x97f   : > { %v5538_v2 = vsel %vm1121_vm2, %v12166_v24, %v7682_v25  ;;  %v5537_v56 = vsel %vm1121_vm2, %v12167_v36, %v7681_v52  ;;  %v12175_v52 = vld [vmem:[#allocation97_spill] sm:$0xff] }
 0x980   : > { %v5184_v47 = vpop.f32.mrf.mxu2 }
 0x981   : > { %v7733_v12 = vpack.i.bf16 %v5184_v47, %v5158_v48  ;;  %v7710_v30 = vpop.permute.xlu2 %7709 }
 0x982   : > { %v7711_v49 = vunpack.i.l.bf16 %v7710_v30 }
 0x983   : > { %7734 = vrot.lane.b32.xlu0 %v7733_v12, %s8379_s30  ;;  %v7712_v12 = vunpack.i.h.bf16 %v7710_v30 }
 0x984   : > { %v5541_v38 = vsel %vm1121_vm2, %v12173_v39, %v7711_v49 }
 0x985   : > { %v5542_v41 = vsel %vm1121_vm2, %v12172_v55, %v7712_v12 }
 0x997   : > { %v7675_v46 = vpop.permute.xlu1 %7674 }
 0x998   : > { %v7677_v11 = vunpack.i.h.bf16 %v7675_v46  ;;  %v7676_v43 = vunpack.i.l.bf16 %v7675_v46 }
 0x99a   : > { %v5569_v19 = vsel %vm5568_vm4, %v5552_v57, %v7676_v43  ;;  %v5570_v40 = vsel %vm5568_vm4, %v5553_v37, %v7677_v11  ;;  %v7725_v37 = vpop.permute.xlu2 %7724 }
 0x99b   : > { %v5585_v60 = vpack.c.bf16 %v5570_v40, %v5569_v19  ;;  %v7727_v40 = vunpack.i.h.bf16 %v7725_v37 }
 0x99d   : > { %7330 = vmatmul.msk.bf16.vlgmr.msra.gmra.mxu1 %vm12165_vm5, %v5585_v60  ;;  %v7726_v60 = vunpack.i.l.bf16 %v7725_v37  ;;  %v12188_v37 = vld [vmem:[#allocation88_spill] sm:$0xff]  ;;  %vm12199_vm5 = vmmov %vm12193_vm0 }
 0x99f   : > { %v7685_v28 = vpop.permute.xlu1 %7684 }
 0x9a0   : > { %v7687_v7 = vunpack.i.h.bf16 %v7685_v28  ;;  %v7686_v16 = vunpack.i.l.bf16 %v7685_v28 }
 0x9a2   : > { %v5554_v58 = vsel %vm5551_vm3, %v5537_v56, %v7686_v16  ;;  %v5555_v61 = vsel %vm5551_vm3, %v5538_v2, %v7687_v7  ;;  %v5544_v7 = vsel %vm1121_vm2, %v12175_v52, %v7727_v40  ;;  %v12176_v16 = vld [vmem:[#allocation82_spill] sm:$0xff]  ;;  %v7740_v4 = vpop.permute.xlu2 %7739 }
 0x9a3   : > { %v7742_v53 = vunpack.i.h.bf16 %v7740_v4 }
 0x9a7   : > { %v7700_v10 = vpop.permute.xlu1 %7699 }
 0x9a8   : > { %v7702_v6 = vunpack.i.h.bf16 %v7700_v10  ;;  %v7701_v9 = vunpack.i.l.bf16 %v7700_v10 }
 0x9aa   : > { %v5556_v3 = vsel %vm5551_vm3, %v5539_v1, %v7701_v9  ;;  %v5557_v59 = vsel %vm5551_vm3, %v5540_v21, %v7702_v6  ;;  %v12180_v6 = vld [vmem:[#allocation23_spill] sm:$0xff]  ;;  %v7741_v21 = vunpack.i.l.bf16 %v7740_v4 }
 0x9af   : > { %v7715_v48 = vpop.permute.xlu1 %7714 }
 0x9b0   : > { %v7717_v35 = vunpack.i.h.bf16 %v7715_v48  ;;  %v7716_v54 = vunpack.i.l.bf16 %v7715_v48 }
 0x9b2   : > { %v5558_v44 = vsel %vm5551_vm3, %v5541_v38, %v7716_v54  ;;  %v5559_v46 = vsel %vm5551_vm3, %v5542_v41, %v7717_v35  ;;  %v7755_v35 = vpop.permute.xlu2 %7754 }
 0x9b3   : > { %v7757_v41 = vunpack.i.h.bf16 %v7755_v35  ;;  %v7756_v39 = vunpack.i.l.bf16 %v7755_v35 }
 0x9b4   : > { %v5210_v8 = vpop.f32.mrf.mxu3 }
 0x9b6   : > { %v5236_v13 = vpop.f32.mrf.mxu0 }
 0x9b7   : > { %v7748_v20 = vpack.i.bf16 %v5236_v13, %v5210_v8  ;;  %v7730_v19 = vpop.permute.xlu1 %7729 }
 0x9b8   : > { %v7732_v8 = vunpack.i.h.bf16 %v7730_v19  ;;  %v7731_v13 = vunpack.i.l.bf16 %v7730_v19  ;;  %v5547_v19 = vsel %vm1121_vm2, %v12188_v37, %v7756_v39 }
 0x9b9   : > { %7749 = vrot.lane.b32.xlu0 %v7748_v20, %s8379_s30 }
 0x9ba   : > { %v5561_v56 = vsel %vm5551_vm3, %v5544_v7, %v7732_v8  ;;  %v12189_v7 = vld [vmem:[#allocation25_spill] sm:$0xff] }
 0x9c5   : > { %v7690_v62 = vpop.permute.xlu0 %7689 }
 0x9c6   : > { %v7692_v50 = vunpack.i.h.bf16 %v7690_v62  ;;  %v7691_v17 = vunpack.i.l.bf16 %v7690_v62  ;;  %v5543_v62 = vsel %vm1121_vm2, %v12176_v16, %v7726_v60 }
 0x9c7   : > { %v5560_v36 = vsel %vm5551_vm3, %v5543_v62, %v7731_v13 }
 0x9c8   : > { %v5571_v32 = vsel %vm5568_vm4, %v5554_v58, %v7691_v17  ;;  %v5572_v23 = vsel %vm5568_vm4, %v5555_v61, %v7692_v50  ;;  %v10810_v61 = vld [vmem:[#allocation6] ss:$0 sm:$0xff] }
 0x9c9   : > { %v5586_v5 = vpack.c.bf16 %v5572_v23, %v5571_v32 }
 0x9cb   : > { %7331 = vmatmul.msk.bf16.gmra.mxu1 %vm12168_vm6, %v5586_v5  ;;  %v12178_v5 = vld [vmem:[#allocation22_spill] sm:$0xff]  ;;  %vm12203_vm6 = vmmov %vm12193_vm0 }
 0x9cd   : > { %v7705_v27 = vpop.permute.xlu0 %7704 }
 0x9ce   : > { %v7707_v51 = vunpack.i.h.bf16 %v7705_v27  ;;  %v7706_v15 = vunpack.i.l.bf16 %v7705_v27 }
 0x9d0   : > { %v5574_v33 = vsel %vm5568_vm4, %v5557_v59, %v7707_v51  ;;  %v5573_v42 = vsel %vm5568_vm4, %v5556_v3, %v7706_v15  ;;  %v7745_v51 = vpop.permute.xlu1 %7744  ;;  %v12182_v59 = vld [vmem:[#allocation89_spill] sm:$0xff] }
 0x9d1   : > { %v5587_v22 = vpack.c.bf16 %v5574_v33, %v5573_v42  ;;  %v7747_v45 = vunpack.i.h.bf16 %v7745_v51  ;;  %v7746_v1 = vunpack.i.l.bf16 %v7745_v51  ;;  %v5546_v33 = vsel %vm1121_vm2, %v12182_v59, %v7742_v53  ;;  %v12183_v42 = vld [vmem:[#allocation94_spill] sm:$0xff] }
 0x9d3   : > { %v5563_v30 = vsel %vm5551_vm3, %v5546_v33, %v7747_v45 }
 0x9d8   : > { %v5288_v26 = vpop.f32.mrf.mxu2 }
 0x9da   : > { %v5262_v31 = vpop.f32.mrf.mxu1  ;;  %v7720_v47 = vpop.permute.xlu0 %7719 }
 0x9db   : > { %v7763_v14 = vpack.i.bf16 %v5288_v26, %v5262_v31  ;;  %7332 = vmatmul.msk.bf16.gmra.mxu1 %vm12171_vm7, %v5587_v22  ;;  %v7722_v18 = vunpack.i.h.bf16 %v7720_v47  ;;  %v7721_v34 = vunpack.i.l.bf16 %v7720_v47  ;;  %v5545_v22 = vsel %vm1121_vm2, %v12183_v42, %v7741_v21  ;;  %vm12204_vm7 = vmmov %vm12193_vm0 }
 0x9dd   : > { %7764 = vrot.lane.b32.xlu0 %v7763_v14, %s8379_s30  ;;  %v5576_v11 = vsel %vm5568_vm4, %v5559_v46, %v7722_v18  ;;  %v5575_v43 = vsel %vm5568_vm4, %v5558_v44, %v7721_v34  ;;  %v5562_v14 = vsel %vm5551_vm3, %v5545_v22, %v7746_v1  ;;  %v7760_v18 = vpop.permute.xlu1 %7759  ;;  %v12185_v34 = vld [vmem:[#allocation24_spill] sm:$0xff]  ;;  %v12197_v1 = vld [vmem:[#allocation101_spill] sm:$0xff] }
 0x9de   : > { %v5588_v57 = vpack.c.bf16 %v5576_v11, %v5575_v43  ;;  %v7762_v38 = vunpack.i.h.bf16 %v7760_v18  ;;  %v7761_v44 = vunpack.i.l.bf16 %v7760_v18  ;;  %v12187_v43 = vld [vmem:[#allocation96_spill] sm:$0xff] }
 0x9e0   : > { %v5564_v13 = vsel %vm5551_vm3, %v5547_v19, %v7761_v44 }
 0x9eb   : > { %7333 = vmatmul.msk.bf16.gmra.mxu1 %vm12174_vm8, %v5588_v57  ;;  %v5548_v57 = vsel %vm1121_vm2, %v12187_v43, %v7757_v41  ;;  %vm12206_vm8 = vmmov %vm12193_vm0 }
 0x9f0   : > { %v5314_v20 = vpop.f32.mrf.mxu3 }
 0x9f3   : > { %v5340_v29 = vpop.f32.mrf.mxu0 }
 0x9f4   : > { %v7778_v28 = vpack.i.bf16 %v5340_v29, %v5314_v20  ;;  %v5565_v20 = vsel %vm5551_vm3, %v5548_v57, %v7762_v38 }
 0x9f5   : > { %v7735_v25 = vpop.permute.xlu0 %7734 }
 0x9f6   : > { %v7737_v24 = vunpack.i.h.bf16 %v7735_v25  ;;  %v7736_v2 = vunpack.i.l.bf16 %v7735_v25  ;;  %7779 = vrot.lane.b32.xlu0 %v7778_v28, %s8379_s30 }
 0x9f8   : > { %v5578_v50 = vsel %vm5568_vm4, %v5561_v56, %v7737_v24  ;;  %v5577_v17 = vsel %vm5568_vm4, %v5560_v36, %v7736_v2  ;;  %v12192_v36 = vld [vmem:[#allocation26_spill] sm:$0xff] }
 0x9f9   : > { %v5589_v58 = vpack.c.bf16 %v5578_v50, %v5577_v17 }
 0x9fb   : > { %7334 = vmatmul.msk.bf16.gmra.mxu1 %vm12177_vm9, %v5589_v58  ;;  %v7770_v58 = vpop.permute.xlu2 %7769  ;;  %vm12207_vm9 = vmmov %vm12193_vm0 }
 0xa1a   : > { %v5646_v32 = vpop.f32.mrf.mxu1 }
 0xa1b   : > { %v5647_v23 = vadd.f32 %v10810_v61, %v5646_v32 }
 0xa1d   : > { %v10814_v63 = vadd.f32 %v5647_v23, %v12178_v5  ;;  %v7775_v23 = vpop.permute.xlu1 %7774  ;;  %v12194_v5 = vld [vmem:[#allocation27_spill] sm:$0xff] }
 0xa1e   : > { %v7776_v51 = vunpack.i.l.bf16 %v7775_v23 }
 0xa1f   : > { %v5704_v10 = vsel %vm12179_vm10, %v10814_v63, 0.0  ;;  %vm12209_vm10 = vmmov %vm12193_vm0 }
 0xa20   : > { %5705 = vadd.xlane.f32.xlu2 %v5704_v10 }
 0xa22   : > { %v5648_v27 = vpop.f32.mrf.mxu1 }
 0xa23   : > { %v5649_v0 = vadd.f32 %v10810_v61, %v5648_v27  ;;  %v7772_v27 = vunpack.i.h.bf16 %v7770_v58 }
 0xa25   : > { %v10820_v9 = vadd.f32 %v5649_v0, %v12180_v6  ;;  %v7771_v0 = vunpack.i.l.bf16 %v7770_v58  ;;  %v7777_v6 = vunpack.i.h.bf16 %v7775_v23 }
 0xa27   : > { %v5707_v15 = vsel %vm12181_vm11, %v10820_v9, 0.0  ;;  %vm12210_vm11 = vmmov %vm12193_vm0 }
 0xa28   : > { %5708 = vadd.xlane.f32.xlu1 %v5707_v15  ;;  %v12196_v15 = vld [vmem:[#allocation74_spill] sm:$0xff] }
 0xa29   : > { %v5550_v53 = vsel %vm1121_vm2, %v12196_v15, %v7772_v27  ;;  %v12208_v27 = vld [vmem:[#allocation31_spill] sm:$0xff] }
 0xa2b   : > { %v7750_v3 = vpop.permute.xlu0 %7749 }
 0xa2c   : > { %v7752_v26 = vunpack.i.h.bf16 %v7750_v3  ;;  %v7751_v31 = vunpack.i.l.bf16 %v7750_v3  ;;  %v5549_v3 = vsel %vm1121_vm2, %v12197_v1, %v7771_v0  ;;  %vm12200_vm2 = vmmov %vm12193_vm0  ;;  %v12211_v1 = vld [vmem:[#allocation32_spill] sm:$0xff] }
 0xa2d   : > { %v5566_v22 = vsel %vm5551_vm3, %v5549_v3, %v7776_v51 }
 0xa2e   : > { %v5580_v48 = vsel %vm5568_vm4, %v5563_v30, %v7752_v26  ;;  %v5579_v47 = vsel %vm5568_vm4, %v5562_v14, %v7751_v31  ;;  %v5567_v26 = vsel %vm5551_vm3, %v5550_v53, %v7777_v6  ;;  %v12198_v30 = vld [vmem:[#allocation28_spill] sm:$0xff] }
 0xa2f   : > { %v5590_v12 = vpack.c.bf16 %v5580_v48, %v5579_v47 }
 0xa31   : > { %7335 = vmatmul.msk.bf16.gmra.mxu1 %vm12184_vm12, %v5590_v12  ;;  %vm12212_vm12 = vmmov %vm12193_vm0 }
 0xa48   : > { %v5651_v49 = vpop.f32.mrf.mxu1 }
 0xa49   : > { %v5652_v54 = vadd.f32 %v10810_v61, %v5651_v49  ;;  %v8380_v49 = vmov 32.0  }
 0xa4a   : > { %8065 = vrcp.f32 %v8380_v49 }
 0xa4b   : > { %v10835_v55 = vadd.f32 %v5652_v54, %v12185_v34 }
 0xa4d   : > { %v5710_v46 = vsel %vm12186_vm13, %v10835_v55, 0.0  ;;  %vm12213_vm13 = vmmov %vm12193_vm0 }
 0xa4e   : > { %5711 = vadd.xlane.f32.xlu0 %v5710_v46 }
 0xa4f   : > { %v7765_v11 = vpop.permute.xlu0 %7764 }
 0xa50   : > { %v7767_v40 = vunpack.i.h.bf16 %v7765_v11  ;;  %v7766_v60 = vunpack.i.l.bf16 %v7765_v11  ;;  %v5653_v8 = vpop.f32.mrf.mxu1  ;;  %v8066_v35 = vpop.eup %8065 }
 0xa51   : > { %v5654_v29 = vadd.f32 %v10810_v61, %v5653_v8  ;;  %v5753_v54 = vmul.f32 32.0, %v8066_v35  ;;  %vm5757_vm3 = vweird.f32 %v8066_v35 }
 0xa52   : > { %v5582_v28 = vsel %vm5568_vm4, %v5565_v20, %v7767_v40  ;;  %v5581_v25 = vsel %vm5568_vm4, %v5564_v13, %v7766_v60  ;;  %v12202_v60 = vld [vmem:[#allocation29_spill] sm:$0xff] }
 0xa53   : > { %v5591_v52 = vpack.c.bf16 %v5582_v28, %v5581_v25  ;;  %v10849_v16 = vadd.f32 %v5654_v29, %v12189_v7  ;;  %v5754_v18 = vsub.f32 1.0, %v5753_v54 }
 0xa55   : > { %7336 = vmatmul.msk.bf16.gmra.mxu1 %vm12190_vm14, %v5591_v52  ;;  %v5713_v62 = vsel %vm12191_vm15, %v10849_v16, 0.0  ;;  %v5755_v34 = vmul.f32 %v8066_v35, %v5754_v18  ;;  %v12205_v52 = vld [vmem:[#allocation30_spill] sm:$0xff]  ;;  %vm12215_vm14 = vmmov %vm12193_vm0 }
 0xa56   : > { %5714 = vadd.xlane.f32.xlu2 %v5713_v62  ;;  %vm12216_vm15 = vmmov %vm12193_vm0 }
 0xa57   : > { %v5756_v41 = vadd.f32 %v8066_v35, %v5755_v34 }
 0xa58   : > { %v5656_v24 = vpop.f32.mrf.mxu1 }
 0xa59   : > { %v5657_v2 = vadd.f32 %v10810_v61, %v5656_v24  ;;  %v10881_v39 = vsel %vm5757_vm3, %v8066_v35, %v5756_v41  ;;  %v12217_v41 = vld [vmem:[#allocation34_spill] sm:$0xff]  ;;  %vm12223_vm3 = vmmov %vm12193_vm0 }
 0xa5b   : > { %v10856_v56 = vadd.f32 %v5657_v2, %v12192_v36 }
 0xa5d   : > { %v5716_v50 = vsel %vm12193_vm0, %v10856_v56, 0.0 }
 0xa5e   : > { %5717 = vadd.xlane.f32.xlu1 %v5716_v50 }
 0xa60   : > { %v5658_v17 = vpop.f32.mrf.mxu1 }
 0xa61   : > { %v5659_v32 = vadd.f32 %v10810_v61, %v5658_v17 }
 0xa63   : > { %v10862_v10 = vadd.f32 %v5659_v32, %v12194_v5 }
 0xa65   : > { %v5719_v4 = vsel %vm12195_vm1, %v10862_v10, 0.0  ;;  %vm12218_vm1 = vmmov %vm12193_vm0 }
 0xa66   : > { %5720 = vadd.xlane.f32.xlu0 %v5719_v4 }
 0xa68   : > { %v7780_v21 = vpop.permute.xlu0 %7779  ;;  %v5661_v45 = vpop.f32.mrf.mxu1 }
 0xa69   : > { %v7782_v59 = vunpack.i.h.bf16 %v7780_v21  ;;  %v7781_v33 = vunpack.i.l.bf16 %v7780_v21  ;;  %v5662_v42 = vadd.f32 %v10810_v61, %v5661_v45 }
 0xa6b   : > { %v5584_v31 = vsel %vm5568_vm4, %v5567_v26, %v7782_v59  ;;  %v5583_v14 = vsel %vm5568_vm4, %v5566_v22, %v7781_v33  ;;  %v10876_v48 = vadd.f32 %v5662_v42, %v12198_v30  ;;  %vm12201_vm4 = vmmov %vm12193_vm0  ;;  %v12214_v30 = vld [vmem:[#allocation33_spill] sm:$0xff] }
 0xa6c   : > { %v5592_v47 = vpack.c.bf16 %v5584_v31, %v5583_v14 }
 0xa6d   : > { %v5722_v12 = vsel %vm12199_vm5, %v10876_v48, 0.0  ;;  %vm12220_vm5 = vmmov %vm12193_vm0 }
 0xa6e   : > { %7337 = vmatmul.msk.bf16.gmra.mxu1 %vm12200_vm2, %v5592_v47  ;;  %5723 = vadd.xlane.f32.xlu0 %v5722_v12  ;;  %vm12222_vm2 = vmmov %vm12193_vm0 }
 0xa70   : > { %v5663_v46 = vpop.f32.mrf.mxu1 }
 0xa71   : > { %v5664_v57 = vadd.f32 %v10810_v61, %v5663_v46 }
 0xa73   : > { %v10893_v8 = vadd.f32 %v5664_v57, %v12202_v60 }
 0xa75   : > { %v5725_v25 = vsel %vm12204_vm7, %v10893_v8, 0.0 }
 0xa78   : > { %v5666_v20 = vpop.f32.mrf.mxu1 }
 0xa79   : > { %v5667_v29 = vadd.f32 %v10810_v61, %v5666_v20 }
 0xa7b   : > { %v10905_v7 = vadd.f32 %v5667_v29, %v12205_v52 }
 0xa80   : > { %v5668_v62 = vpop.f32.mrf.mxu1 }
 0xa81   : > { %v5669_v17 = vadd.f32 %v10810_v61, %v5668_v62 }
 0xa83   : > { %v10919_v0 = vadd.f32 %v5669_v17, %v12208_v27 }
 0xa85   : > { %v5731_v15 = vsel %vm12210_vm11, %v10919_v0, 0.0 }
 0xa93   : > { %v5706_v38 = vpop.xlane.xlu2 %5705 }
 0xa94   : > { %v5759_v44 = vmul.f32 %v10881_v39, %v5706_v38 }
 0xa96   : > { %v10885_v11 = vsub.f32 %v10814_v63, %v5759_v44 }
 0xa98   : > { %v5791_v43 = vmul.f32 %v10885_v11, %v10885_v11 }
 0xa9a   : > { %v5807_v37 = vsel %vm12201_vm4, %v5791_v43, 0.0 }
 0xa9b   : > { %v5709_v19 = vpop.xlane.xlu1 %5708  ;;  %5808 = vadd.xlane.f32.xlu2 %v5807_v37 }
 0xa9c   : > { %v5760_v40 = vmul.f32 %v10881_v39, %v5709_v19  ;;  %v12219_v19 = vld [vmem:[#allocation35_spill] sm:$0xff] }
 0xa9e   : > { %v10896_v13 = vsub.f32 %v10820_v9, %v5760_v40  ;;  %v5728_v9 = vsel %vm12206_vm8, %v10905_v7, 0.0  ;;  %vm12224_vm8 = vmmov %vm12193_vm0 }
 0xaa0   : > { %v5792_v63 = vmul.f32 %v10896_v13, %v10896_v13 }
 0xaa2   : > { %v5810_v28 = vsel %vm12203_vm6, %v5792_v63, 0.0  ;;  %v12221_v63 = vld [vmem:[#allocation36_spill] sm:$0xff] }
 0xaa3   : > { %5811 = vadd.xlane.f32.xlu1 %v5810_v28  ;;  %5726 = vadd.xlane.f32.xlu2 %v5725_v25 }
 0xaab   : > { %5729 = vadd.xlane.f32.xlu2 %v5728_v9  ;;  %v7403_v9 = vld [vmem:[%s11693_s9 + $0x8] sm:$0xff] }
 0xaac   : > { %6159 = vmatpush.bf16.msra.mxu2 %v7403_v9 }
 0xaae   : > { %v5671_v32 = vpop.f32.mrf.mxu1 }
 0xaaf   : > { %v5672_v6 = vadd.f32 %v10810_v61, %v5671_v32 }
 0xab1   : > { %v10932_v3 = vadd.f32 %v5672_v6, %v12211_v1 }
 0xab3   : > { %v5734_v22 = vsel %vm12213_vm13, %v10932_v3, 0.0  ;;  %vm12227_vm13 = vmmov %vm12193_vm0 }
 0xab6   : > { %v5673_v45 = vpop.f32.mrf.mxu1 }
 0xab7   : > { %v5674_v33 = vadd.f32 %v10810_v61, %v5673_v45 }
 0xab9   : > { %v10945_v47 = vadd.f32 %v5674_v33, %v12214_v30 }
 0xabb   : > { %v5737_v35 = vsel %vm12215_vm14, %v10945_v47, 0.0  ;;  %vm12228_vm14 = vmmov %vm12193_vm0 }
 0xac1   : > { %v5712_v24 = vpop.xlane.xlu0 %5711 }
 0xac2   : > { %v5761_v2 = vmul.f32 %v10881_v39, %v5712_v24  ;;  %v7402_v24 = vld [vmem:[%s11693_s9] sm:$0xff] }
 0xac3   : > { %6160 = vmatpush.bf16.msra.mxu2 %v7402_v24 }
 0xac4   : > { %v10911_v36 = vsub.f32 %v10835_v55, %v5761_v2 }
 0xac6   : > { %v5793_v50 = vmul.f32 %v10911_v36, %v10911_v36 }
 0xac8   : > { %v5813_v58 = vsel %vm12207_vm9, %v5793_v50, 0.0 }
 0xac9   : > { %v5715_v23 = vpop.xlane.xlu2 %5714  ;;  %5814 = vadd.xlane.f32.xlu1 %v5813_v58 }
 0xaca   : > { %v5762_v5 = vmul.f32 %v10881_v39, %v5715_v23 }
 0xacc   : > { %v10922_v4 = vsub.f32 %v10849_v16, %v5762_v5 }
 0xace   : > { %v5794_v55 = vmul.f32 %v10922_v4, %v10922_v4 }
 0xad0   : > { %v5816_v51 = vsel %vm12209_vm10, %v5794_v55, 0.0 }
 0xad1   : > { %v5718_v53 = vpop.xlane.xlu1 %5717  ;;  %5817 = vadd.xlane.f32.xlu0 %v5816_v51  ;;  %5732 = vadd.xlane.f32.xlu1 %v5731_v15 }
 0xad2   : > { %v5763_v21 = vmul.f32 %v10881_v39, %v5718_v53  ;;  %v5676_v14 = vpop.f32.mrf.mxu1 }
 0xad3   : > { %v5677_v49 = vadd.f32 %v10810_v61, %v5676_v14 }
 0xad4   : > { %v10935_v16 = vsub.f32 %v10856_v56, %v5763_v21 }
 0xad5   : > { %v10958_v38 = vadd.f32 %v5677_v49, %v12217_v41 }
 0xad6   : > { %v5795_v59 = vmul.f32 %v10935_v16, %v10935_v16 }
 0xad7   : > { %v5740_v57 = vsel %vm12193_vm0, %v10958_v38, 0.0 }
 0xad8   : > { %v5819_v42 = vsel %vm12212_vm12, %v5795_v59, 0.0  ;;  %vm12226_vm12 = vmmov %vm12193_vm0 }
 0xad9   : > { %5820 = vadd.xlane.f32.xlu0 %v5819_v42  ;;  %5735 = vadd.xlane.f32.xlu1 %v5734_v22  ;;  %v5721_v26 = vpop.xlane.xlu0 %5720 }
 0xada   : > { %v5764_v31 = vmul.f32 %v10881_v39, %v5721_v26  ;;  %v5678_v44 = vpop.f32.mrf.mxu1 }
 0xadb   : > { %v5679_v43 = vadd.f32 %v10810_v61, %v5678_v44 }
 0xadc   : > { %v10948_v56 = vsub.f32 %v10862_v10, %v5764_v31 }
 0xadd   : > { %v10970_v40 = vadd.f32 %v5679_v43, %v12219_v19 }
 0xade   : > { %v5796_v12 = vmul.f32 %v10948_v56, %v10948_v56 }
 0xadf   : > { %v5743_v20 = vsel %vm12220_vm5, %v10970_v40, 0.0  ;;  %vm12229_vm5 = vmmov %vm12222_vm2 }
 0xae0   : > { %v5822_v54 = vsel %vm12216_vm15, %v5796_v12, 0.0 }
 0xae1   : > { %5738 = vadd.xlane.f32.xlu0 %v5737_v35  ;;  %5823 = vadd.xlane.f32.xlu2 %v5822_v54  ;;  %v5724_v18 = vpop.xlane.xlu0 %5723  ;;  %v11006_v54 = vld [vmem:[#allocation8] ss:$0 sm:$0xff] }
 0xae2   : > { %v5765_v34 = vmul.f32 %v10881_v39, %v5724_v18 }
 0xae4   : > { %v10961_v10 = vsub.f32 %v10876_v48, %v5765_v34 }
 0xae6   : > { %v5797_v46 = vmul.f32 %v10961_v10, %v10961_v10 }
 0xae8   : > { %v5825_v37 = vsel %vm12218_vm1, %v5797_v46, 0.0 }
 0xae9   : > { %5741 = vadd.xlane.f32.xlu0 %v5740_v57  ;;  %5826 = vadd.xlane.f32.xlu2 %v5825_v37 }
 0xaeb   : > { %v5681_v60 = vpop.f32.mrf.mxu1 }
 0xaec   : > { %v5682_v48 = vadd.f32 %v10810_v61, %v5681_v60 }
 0xaee   : > { %v10976_v29 = vadd.f32 %v5682_v48, %v12221_v63 }
 0xaf0   : > { %v5746_v28 = vsel %vm12222_vm2, %v10976_v29, 0.0 }
 0xaf1   : > { %5744 = vadd.xlane.f32.xlu2 %v5743_v20 }
 0xaf9   : > { %5747 = vadd.xlane.f32.xlu2 %v5746_v28 }
 0xb0e   : > { %v5809_v25 = vpop.xlane.xlu2 %5808 }
 0xb0f   : > { %v5855_v52 = vmul.f32 %v5809_v25, %v10881_v39 }
 0xb11   : > { %v5871_v62 = vadd.f32 1e-07, %v5855_v52 }
 0xb13   : > { %8067 = vrsqrt.f32 %v5871_v62  ;;  %vm5893_vm6 = vweird.f32 %v5871_v62 }
 0xb16   : > { %v5812_v2 = vpop.xlane.xlu1 %5811  ;;  %v5727_v50 = vpop.xlane.xlu2 %5726 }
 0xb17   : > { %v5856_v17 = vmul.f32 %v5812_v2, %v10881_v39  ;;  %v5766_v58 = vmul.f32 %v10881_v39, %v5727_v50 }
 0xb19   : > { %v8068_v32 = vpop.eup %8067  ;;  %v5872_v23 = vadd.f32 1e-07, %v5856_v17  ;;  %v10990_v5 = vsub.f32 %v10893_v8, %v5766_v58  ;;  %v5683_v8 = vpop.f32.mrf.mxu1 }
 0xb1a   : > { %v5888_v27 = vmul.f32 %v8068_v32, %v5871_v62  ;;  %vm5894_vm4 = vweird.f32 %v8068_v32  ;;  %v5684_v31 = vadd.f32 %v10810_v61, %v5683_v8  ;;  %v11009_v61 = vld [vmem:[#allocation9] ss:$0 sm:$0xff] }
 0xb1b   : > { %8069 = vrsqrt.f32 %v5872_v23  ;;  %v5798_v55 = vmul.f32 %v10990_v5, %v10990_v5  ;;  %vm5895_vm7 = vmor %vm5893_vm6, %vm5894_vm4  ;;  %vm5903_vm10 = vweird.f32 %v5872_v23 }
 0xb1c   : > { %v5889_v6 = vmul.f32 %v8068_v32, %v5888_v27  ;;  %vm12230_vm6 = vmmov %vm12229_vm5 }
 0xb1d   : > { %v5828_v51 = vsel %vm12223_vm3, %v5798_v55, 0.0 }
 0xb1e   : > { %v5890_v15 = vmul.f32 0.5, %v5889_v6  ;;  %v5730_v53 = vpop.xlane.xlu2 %5729  ;;  %5829 = vadd.xlane.f32.xlu1 %v5828_v51 }
 0xb1f   : > { %v5767_v21 = vmul.f32 %v10881_v39, %v5730_v53 }
 0xb20   : > { %v5891_v45 = vsub.f32 1.5, %v5890_v15 }
 0xb21   : > { %v8070_v1 = vpop.eup %8069  ;;  %v10997_v59 = vsub.f32 %v10905_v7, %v5767_v21  ;;  %v12225_v7 = vld [vmem:[#allocation37_spill] sm:$0xff] }
 0xb22   : > { %v5892_v33 = vmul.f32 %v8068_v32, %v5891_v45  ;;  %v5898_v42 = vmul.f32 %v8070_v1, %v5872_v23  ;;  %vm5904_vm9 = vweird.f32 %v8070_v1  ;;  %v11004_v35 = vadd.f32 %v5684_v31, %v12225_v7 }
 0xb23   : > { %v5799_v22 = vmul.f32 %v10997_v59, %v10997_v59  ;;  %vm5905_vm11 = vmor %vm5903_vm10, %vm5904_vm9 }
 0xb24   : > { %v5899_v26 = vmul.f32 %v8070_v1, %v5898_v42  ;;  %v5896_v30 = vsel %vm5895_vm7, %v8068_v32, %v5892_v33  ;;  %v5749_v43 = vsel %vm12226_vm12, %v11004_v35, 0.0  ;;  %vm12231_vm10 = vmmov %vm12229_vm5 }
 0xb25   : > { %v5831_v14 = vsel %vm12224_vm8, %v5799_v22, 0.0  ;;  %v6047_v18 = vmul.f32 %v5896_v30, %v10885_v11 }
 0xb26   : > { %v5900_v12 = vmul.f32 0.5, %v5899_v26  ;;  %5832 = vadd.xlane.f32.xlu1 %v5831_v14 }
 0xb27   : > { %v6066_v44 = vmul.f32 %v11006_v54, %v6047_v18 }
 0xb28   : > { %v5901_v49 = vsub.f32 1.5, %v5900_v12 }
 0xb29   : > { %v11017_v37 = vadd.f32 %v11009_v61, %v6066_v44 }
 0xb2a   : > { %v5902_v34 = vmul.f32 %v8070_v1, %v5901_v49 }
 0xb2c   : > { %v5906_v41 = vsel %vm5905_vm11, %v8070_v1, %v5902_v34  ;;  %vm12232_vm11 = vmmov %vm12229_vm5 }
 0xb2d   : > { %v6048_v46 = vmul.f32 %v5906_v41, %v10896_v13 }
 0xb2e   : > { %5750 = vadd.xlane.f32.xlu1 %v5749_v43 }
 0xb2f   : > { %v6067_v57 = vmul.f32 %v11006_v54, %v6048_v46 }
 0xb31   : > { %v11020_v11 = vadd.f32 %v11009_v61, %v6067_v57 }
 0xb33   : > { %v6101_v19 = vpack.c.bf16 %v11020_v11, %v11017_v37 }
 0xb35   : > { %7346 = vmatmul.msk.bf16.vlgmr.msra.gmra.mxu2 %vm12227_vm13, %v6101_v19 }
 0xb3c   : > { %v5815_v60 = vpop.xlane.xlu1 %5814 }
 0xb3d   : > { %v5857_v13 = vmul.f32 %v5815_v60, %v10881_v39 }
 0xb3f   : > { %v5873_v48 = vadd.f32 1e-07, %v5857_v13 }
 0xb41   : > { %8071 = vrsqrt.f32 %v5873_v48  ;;  %vm5913_vm0 = vweird.f32 %v5873_v48 }
 0xb44   : > { %v5733_v20 = vpop.xlane.xlu1 %5732  ;;  %v5818_v63 = vpop.xlane.xlu0 %5817 }
 0xb45   : > { %v5768_v28 = vmul.f32 %v10881_v39, %v5733_v20  ;;  %v5858_v25 = vmul.f32 %v5818_v63, %v10881_v39 }
 0xb47   : > { %v8072_v52 = vpop.eup %8071  ;;  %v11029_v9 = vsub.f32 %v10919_v0, %v5768_v28  ;;  %v5874_v62 = vadd.f32 1e-07, %v5858_v25 }
 0xb48   : > { %v5908_v24 = vmul.f32 %v8072_v52, %v5873_v48  ;;  %vm5914_vm15 = vweird.f32 %v8072_v52 }
 0xb49   : > { %8073 = vrsqrt.f32 %v5874_v62  ;;  %v5800_v2 = vmul.f32 %v11029_v9, %v11029_v9  ;;  %vm5915_vm1 = vmor %vm5913_vm0, %vm5914_vm15  ;;  %vm5923_vm3 = vweird.f32 %v5874_v62 }
 0xb4a   : > { %v5909_v50 = vmul.f32 %v8072_v52, %v5908_v24  ;;  %vm12233_vm15 = vmmov %vm12229_vm5 }
 0xb4b   : > { %v5834_v17 = vsel %vm12228_vm14, %v5800_v2, 0.0  ;;  %vm12234_vm0 = vmmov %vm12229_vm5 }
 0xb4c   : > { %v5910_v58 = vmul.f32 0.5, %v5909_v50  ;;  %5835 = vadd.xlane.f32.xlu0 %v5834_v17  ;;  %v5736_v32 = vpop.xlane.xlu1 %5735  ;;  %v5821_v23 = vpop.xlane.xlu0 %5820 }
 0xb4d   : > { %v5769_v27 = vmul.f32 %v10881_v39, %v5736_v32  ;;  %v5859_v55 = vmul.f32 %v5821_v23, %v10881_v39 }
 0xb4e   : > { %v5911_v6 = vsub.f32 1.5, %v5910_v58 }
 0xb4f   : > { %v8074_v0 = vpop.eup %8073  ;;  %v11037_v51 = vsub.f32 %v10932_v3, %v5769_v27  ;;  %v5875_v15 = vadd.f32 1e-07, %v5859_v55 }
 0xb50   : > { %v5912_v53 = vmul.f32 %v8072_v52, %v5911_v6  ;;  %v5918_v21 = vmul.f32 %v8074_v0, %v5874_v62  ;;  %vm5924_vm2 = vweird.f32 %v8074_v0 }
 0xb51   : > { %8075 = vrsqrt.f32 %v5875_v15  ;;  %v5801_v45 = vmul.f32 %v11037_v51, %v11037_v51  ;;  %vm5925_vm4 = vmor %vm5923_vm3, %vm5924_vm2  ;;  %vm5933_vm8 = vweird.f32 %v5875_v15 }
 0xb52   : > { %v5919_v1 = vmul.f32 %v8074_v0, %v5918_v21  ;;  %v5916_v33 = vsel %vm5915_vm1, %v8072_v52, %v5912_v53  ;;  %vm12235_vm1 = vmmov %vm12234_vm0 }
 0xb53   : > { %v5837_v8 = vsel %vm12229_vm5, %v5801_v45, 0.0  ;;  %v6049_v12 = vmul.f32 %v5916_v33, %v10911_v36 }
 0xb54   : > { %v5920_v42 = vmul.f32 0.5, %v5919_v1  ;;  %5838 = vadd.xlane.f32.xlu0 %v5837_v8  ;;  %v5824_v22 = vpop.xlane.xlu2 %5823  ;;  %v5739_v26 = vpop.xlane.xlu0 %5738 }
 0xb55   : > { %v5860_v3 = vmul.f32 %v5824_v22, %v10881_v39  ;;  %v5770_v31 = vmul.f32 %v10881_v39, %v5739_v26  ;;  %v6068_v36 = vmul.f32 %v11006_v54, %v6049_v12 }
 0xb56   : > { %v5921_v14 = vsub.f32 1.5, %v5920_v42 }
 0xb57   : > { %v8076_v30 = vpop.eup %8075  ;;  %v5876_v49 = vadd.f32 1e-07, %v5860_v3  ;;  %v11046_v7 = vsub.f32 %v10945_v47, %v5770_v31  ;;  %v11059_v25 = vadd.f32 %v11009_v61, %v6068_v36 }
 0xb58   : > { %v5922_v18 = vmul.f32 %v8074_v0, %v5921_v14  ;;  %v5928_v34 = vmul.f32 %v8076_v30, %v5875_v15  ;;  %vm5934_vm7 = vweird.f32 %v8076_v30 }
 0xb59   : > { %8077 = vrsqrt.f32 %v5876_v49  ;;  %v5802_v41 = vmul.f32 %v11046_v7, %v11046_v7  ;;  %vm5935_vm9 = vmor %vm5933_vm8, %vm5934_vm7  ;;  %vm5943_vm13 = vweird.f32 %v5876_v49 }
 0xb5a   : > { %v5926_v44 = vsel %vm5925_vm4, %v8074_v0, %v5922_v18  ;;  %v5929_v46 = vmul.f32 %v8076_v30, %v5928_v34  ;;  %vm12236_vm8 = vmmov %vm12234_vm0 }
 0xb5b   : > { %v6050_v43 = vmul.f32 %v5926_v44, %v10922_v4  ;;  %v5840_v57 = vsel %vm12230_vm6, %v5802_v41, 0.0 }
 0xb5c   : > { %v5930_v19 = vmul.f32 0.5, %v5929_v46  ;;  %v5827_v60 = vpop.xlane.xlu2 %5826  ;;  %5841 = vadd.xlane.f32.xlu2 %v5840_v57  ;;  %v5742_v47 = vpop.xlane.xlu0 %5741 }
 0xb5d   : > { %v5771_v13 = vmul.f32 %v10881_v39, %v5742_v47  ;;  %v6069_v48 = vmul.f32 %v11006_v54, %v6050_v43 }
 0xb5e   : > { %v5931_v20 = vsub.f32 1.5, %v5930_v19 }
 0xb5f   : > { %v8078_v63 = vpop.eup %8077  ;;  %v11056_v28 = vsub.f32 %v10958_v38, %v5771_v13  ;;  %v11062_v4 = vadd.f32 %v11009_v61, %v6069_v48 }
 0xb60   : > { %v5932_v52 = vmul.f32 %v8076_v30, %v5931_v20  ;;  %v5938_v62 = vmul.f32 %v8078_v63, %v5876_v49  ;;  %vm5944_vm12 = vweird.f32 %v8078_v63 }
 0xb61   : > { %v6102_v24 = vpack.c.bf16 %v11062_v4, %v11059_v25  ;;  %v5803_v2 = vmul.f32 %v11056_v28, %v11056_v28  ;;  %vm5945_vm14 = vmor %vm5943_vm13, %vm5944_vm12 }
 0xb62   : > { %v5939_v50 = vmul.f32 %v8078_v63, %v5938_v62  ;;  %v5936_v17 = vsel %vm5935_vm9, %v8076_v30, %v5932_v52  ;;  %vm12237_vm9 = vmmov %vm12234_vm0 }
 0xb63   : > { %7347 = vmatmul.msk.bf16.gmra.mxu2 %vm12231_vm10, %v6102_v24  ;;  %v5843_v38 = vsel %vm12232_vm11, %v5803_v2, 0.0  ;;  %v6051_v55 = vmul.f32 %v5936_v17, %v10935_v16 }
 0xb64   : > { %v5940_v58 = vmul.f32 0.5, %v5939_v50  ;;  %v5745_v32 = vpop.xlane.xlu2 %5744  ;;  %5844 = vadd.xlane.f32.xlu1 %v5843_v38 }
 0xb65   : > { %v5772_v23 = vmul.f32 %v10881_v39, %v5745_v32  ;;  %v6070_v1 = vmul.f32 %v11006_v54, %v6051_v55  ;;  %v7406_v55 = vld [vmem:[%s11695_s11 + $0x10] sm:$0xff] }
 0xb66   : > { %v5941_v27 = vsub.f32 1.5, %v5940_v58 }
 0xb67   : > { %v11073_v6 = vsub.f32 %v10970_v40, %v5772_v23  ;;  %v11086_v42 = vadd.f32 %v11009_v61, %v6070_v1  ;;  %v7404_v1 = vld [vmem:[%s11695_s11] sm:$0xff] }
 0xb68   : > { %v5942_v0 = vmul.f32 %v8078_v63, %v5941_v27 }
 0xb69   : > { %v5804_v15 = vmul.f32 %v11073_v6, %v11073_v6 }
 0xb6a   : > { %v5946_v53 = vsel %vm5945_vm14, %v8078_v63, %v5942_v0  ;;  %v11129_v0 = vld [vmem:[%s11694_s10] ss:$0 sm:$0xff] }
 0xb6b   : > { %v6052_v21 = vmul.f32 %v5946_v53, %v10948_v56  ;;  %v5846_v45 = vsel %vm12233_vm15, %v5804_v15, 0.0  ;;  %v7405_v15 = vld [vmem:[%s11695_s11 + $0x8] sm:$0xff] }
 0xb6c   : > { %5847 = vadd.xlane.f32.xlu0 %v5846_v45  ;;  %v5748_v8 = vpop.xlane.xlu2 %5747 }
 0xb6d   : > { %v5773_v16 = vmul.f32 %v10881_v39, %v5748_v8  ;;  %v6071_v40 = vmul.f32 %v11006_v54, %v6052_v21 }
 0xb6f   : > { %v11083_v33 = vsub.f32 %v10976_v29, %v5773_v16  ;;  %v11089_v22 = vadd.f32 %v11009_v61, %v6071_v40  ;;  %v5861_v29 = vmul.f32 %v5827_v60, %v10881_v39 }
 0xb71   : > { %v6103_v56 = vpack.c.bf16 %v11089_v22, %v11086_v42  ;;  %v5805_v26 = vmul.f32 %v11083_v33, %v11083_v33  ;;  %v5877_v31 = vadd.f32 1e-07, %v5861_v29 }
 0xb73   : > { %7348 = vmatmul.msk.bf16.gmra.mxu2 %vm12234_vm0, %v6103_v56  ;;  %v5849_v3 = vsel %vm12235_vm1, %v5805_v26, 0.0  ;;  %8079 = vrsqrt.f32 %v5877_v31  ;;  %vm5953_vm2 = vweird.f32 %v5877_v31  ;;  %vm6390_vm0 = vcmask 523264  }
 0xb74   : > { %5850 = vadd.xlane.f32.xlu2 %v5849_v3 }
 0xb79   : > { %v8080_v14 = vpop.eup %8079 }
 0xb7a   : > { %v5948_v30 = vmul.f32 %v8080_v14, %v5877_v31  ;;  %vm5954_vm5 = vweird.f32 %v8080_v14 }
 0xb7b   : > { %vm5955_vm3 = vmor %vm5953_vm2, %vm5954_vm5 }
 0xb7c   : > { %v5949_v12 = vmul.f32 %v8080_v14, %v5948_v30 }
 0xb7e   : > { %v5950_v41 = vmul.f32 0.5, %v5949_v12 }
 0xb80   : > { %v5951_v44 = vsub.f32 1.5, %v5950_v41 }
 0xb82   : > { %v5952_v57 = vmul.f32 %v8080_v14, %v5951_v44 }
 0xb84   : > { %v5956_v60 = vsel %vm5955_vm3, %v8080_v14, %v5952_v57  ;;  %vm12238_vm3 = vmmov %vm12236_vm8 }
 0xb85   : > { %v6053_v63 = vmul.f32 %v5956_v60, %v10961_v10 }
 0xb87   : > { %v6072_v17 = vmul.f32 %v11006_v54, %v6053_v63 }
 0xb91   : > { %v5830_v49 = vpop.xlane.xlu1 %5829 }
 0xb92   : > { %v5862_v18 = vmul.f32 %v5830_v49, %v10881_v39 }
 0xb94   : > { %v5878_v34 = vadd.f32 1e-07, %v5862_v18 }
 0xb96   : > { %8081 = vrsqrt.f32 %v5878_v34  ;;  %vm5963_vm6 = vweird.f32 %v5878_v34 }
 0xb99   : > { %v5833_v46 = vpop.xlane.xlu1 %5832 }
 0xb9a   : > { %v5863_v58 = vmul.f32 %v5833_v46, %v10881_v39 }
 0xb9c   : > { %v8082_v43 = vpop.eup %8081  ;;  %v5879_v23 = vadd.f32 1e-07, %v5863_v58 }
 0xb9d   : > { %v5958_v36 = vmul.f32 %v8082_v43, %v5878_v34  ;;  %vm5964_vm4 = vweird.f32 %v8082_v43 }
 0xb9e   : > { %vm5965_vm7 = vmor %vm5963_vm6, %vm5964_vm4  ;;  %8083 = vrsqrt.f32 %v5879_v23  ;;  %vm5973_vm11 = vweird.f32 %v5879_v23 }
 0xb9f   : > { %v5959_v19 = vmul.f32 %v8082_v43, %v5958_v36 }
 0xba1   : > { %v5960_v47 = vmul.f32 0.5, %v5959_v19  ;;  %v5751_v13 = vpop.xlane.xlu1 %5750 }
 0xba2   : > { %v5774_v48 = vmul.f32 %v10881_v39, %v5751_v13 }
 0xba3   : > { %v5961_v20 = vsub.f32 1.5, %v5960_v47 }
 0xba4   : > { %v11102_v52 = vsub.f32 %v11004_v35, %v5774_v48  ;;  %v11112_v35 = vadd.f32 %v11009_v61, %v6072_v17  ;;  %v8084_v53 = vpop.eup %8083 }
 0xba5   : > { %v5962_v62 = vmul.f32 %v8082_v43, %v5961_v20  ;;  %v5968_v8 = vmul.f32 %v8084_v53, %v5879_v23  ;;  %vm5974_vm10 = vweird.f32 %v8084_v53 }
 0xba6   : > { %v5806_v24 = vmul.f32 %v11102_v52, %v11102_v52  ;;  %vm5975_vm12 = vmor %vm5973_vm11, %vm5974_vm10 }
 0xba7   : > { %v5966_v2 = vsel %vm5965_vm7, %v8082_v43, %v5962_v62  ;;  %v5969_v56 = vmul.f32 %v8084_v53, %v5968_v8  ;;  %vm12239_vm11 = vmmov %vm12238_vm3 }
 0xba8   : > { %v6054_v50 = vmul.f32 %v5966_v2, %v10990_v5  ;;  %v5852_v38 = vsel %vm12236_vm8, %v5806_v24, 0.0  ;;  %v7407_v5 = vld [vmem:[%s11695_s11 + $0x18] sm:$0xff] }
 0xba9   : > { %5853 = vadd.xlane.f32.xlu1 %v5852_v38  ;;  %6419 = vmatpush.bf16.msra.mxu3 %v7407_v5  ;;  %v5970_v49 = vmul.f32 0.5, %v5969_v56 }
 0xbaa   : > { %v6073_v10 = vmul.f32 %v11006_v54, %v6054_v50 }
 0xbab   : > { %v5971_v44 = vsub.f32 1.5, %v5970_v49 }
 0xbac   : > { %v11115_v32 = vadd.f32 %v11009_v61, %v6073_v10 }
 0xbad   : > { %6420 = vmatpush.bf16.msra.mxu3 %v7406_v55  ;;  %v5972_v47 = vmul.f32 %v8084_v53, %v5971_v44 }
 0xbae   : > { %v6104_v27 = vpack.c.bf16 %v11115_v32, %v11112_v35 }
 0xbaf   : > { %v5976_v62 = vsel %vm5975_vm12, %v8084_v53, %v5972_v47 }
 0xbb0   : > { %7349 = vmatmul.msk.bf16.gmra.mxu2 %vm12237_vm9, %v6104_v27  ;;  %v6055_v10 = vmul.f32 %v5976_v62, %v10997_v59 }
 0xbb1   : > { %6421 = vmatpush.bf16.msra.mxu3 %v7405_v15 }
 0xbb5   : > { %6422 = vmatpush.bf16.msra.mxu3 %v7404_v1 }
 0xbb8   : > { %v6162_v21 = vpop.f32.mrf.mxu2 }
 0xbb9   : > { %v6163_v45 = vadd.f32 %v11129_v0, %v6162_v21 }
 0xbbb   : > { %v6202_v16 = vmul.f32 %v6163_v45, %v6163_v45 }
 0xbbd   : > { %v6218_v40 = vmul.f32 %v6202_v16, %v6163_v45 }
 0xbbf   : > { %v6234_v26 = vmul.f32 0.044715, %v6218_v40  ;;  %v5836_v3 = vpop.xlane.xlu0 %5835  ;;  %v6074_v40 = vmul.f32 %v11006_v54, %v6055_v10 }
 0xbc0   : > { %v5864_v29 = vmul.f32 %v5836_v3, %v10881_v39  ;;  %v6164_v31 = vpop.f32.mrf.mxu2 }
 0xbc1   : > { %v6250_v14 = vadd.f32 %v6234_v26, %v6163_v45  ;;  %v6165_v30 = vadd.f32 %v11129_v0, %v6164_v31 }
 0xbc2   : > { %v5880_v12 = vadd.f32 1e-07, %v5864_v29 }
 0xbc3   : > { %v6266_v18 = vmul.f32 0.7978846, %v6250_v14  ;;  %v6203_v34 = vmul.f32 %v6165_v30, %v6165_v30 }
 0xbc4   : > { %8085 = vrsqrt.f32 %v5880_v12  ;;  %vm5983_vm14 = vweird.f32 %v5880_v12 }
 0xbc5   : > { %v6219_v41 = vmul.f32 %v6203_v34, %v6165_v30  ;;  %8087 = vtanh.f32 %v6266_v18  ;;  %v11148_v34 = vadd.f32 %v11009_v61, %v6074_v40 }
 0xbc7   : > { %v6235_v46 = vmul.f32 0.044715, %v6219_v41  ;;  %v5839_v43 = vpop.xlane.xlu0 %5838 }
 0xbc8   : > { %v5865_v57 = vmul.f32 %v5839_v43, %v10881_v39 }
 0xbc9   : > { %v6251_v36 = vadd.f32 %v6235_v46, %v6165_v30 }
 0xbca   : > { %v8086_v19 = vpop.eup %8085  ;;  %v5881_v60 = vadd.f32 1e-07, %v5865_v57 }
 0xbcb   : > { %v5978_v13 = vmul.f32 %v8086_v19, %v5880_v12  ;;  %v6267_v48 = vmul.f32 0.7978846, %v6251_v36  ;;  %v8088_v20 = vpop.eup %8087  ;;  %vm5984_vm13 = vweird.f32 %v8086_v19 }
 0xbcc   : > { %8089 = vrsqrt.f32 %v5881_v60  ;;  %v6298_v50 = vadd.f32 1.0, %v8088_v20  ;;  %vm5985_vm15 = vmor %vm5983_vm14, %vm5984_vm13  ;;  %vm5993_vm5 = vweird.f32 %v5881_v60 }
 0xbcd   : > { %v5979_v63 = vmul.f32 %v8086_v19, %v5978_v13  ;;  %8091 = vtanh.f32 %v6267_v48 }
 0xbce   : > { %v6314_v23 = vmul.f32 0.5, %v6298_v50 }
 0xbcf   : > { %v5980_v24 = vmul.f32 0.5, %v5979_v63  ;;  %v5842_v2 = vpop.xlane.xlu2 %5841 }
 0xbd0   : > { %v5866_v38 = vmul.f32 %v5842_v2, %v10881_v39  ;;  %v6330_v3 = vmul.f32 %v6314_v23, %v6163_v45 }
 0xbd1   : > { %v5981_v17 = vsub.f32 1.5, %v5980_v24 }
 0xbd2   : > { %v8090_v58 = vpop.eup %8089  ;;  %v5882_v27 = vadd.f32 1e-07, %v5866_v38 }
 0xbd3   : > { %v8092_v5 = vpop.eup %8091  ;;  %v5982_v55 = vmul.f32 %v8086_v19, %v5981_v17  ;;  %v5988_v15 = vmul.f32 %v8090_v58, %v5881_v60  ;;  %vm5994_vm1 = vweird.f32 %v8090_v58 }
 0xbd4   : > { %v6299_v21 = vadd.f32 1.0, %v8092_v5  ;;  %8093 = vrsqrt.f32 %v5882_v27  ;;  %vm5995_vm2 = vmor %vm5993_vm5, %vm5994_vm1  ;;  %vm6003_vm6 = vweird.f32 %v5882_v27 }
 0xbd5   : > { %v5986_v53 = vsel %vm5985_vm15, %v8086_v19, %v5982_v55  ;;  %v5989_v1 = vmul.f32 %v8090_v58, %v5988_v15  ;;  %vm12240_vm15 = vmmov %vm12238_vm3 }
 0xbd6   : > { %v6056_v8 = vmul.f32 %v5986_v53, %v11029_v9  ;;  %v6315_v16 = vmul.f32 0.5, %v6299_v21 }
 0xbd7   : > { %v5990_v56 = vmul.f32 0.5, %v5989_v1  ;;  %v5845_v26 = vpop.xlane.xlu1 %5844 }
 0xbd8   : > { %v6331_v59 = vmul.f32 %v6315_v16, %v6165_v30  ;;  %v5867_v29 = vmul.f32 %v5845_v26, %v10881_v39  ;;  %v6075_v31 = vmul.f32 %v11006_v54, %v6056_v8 }
 0xbd9   : > { %v5991_v14 = vsub.f32 1.5, %v5990_v56 }
 0xbda   : > { %v8094_v12 = vpop.eup %8093  ;;  %v6346_v49 = vpack.c.bf16 %v6331_v59, %v6330_v3  ;;  %v5883_v18 = vadd.f32 1e-07, %v5867_v29  ;;  %v11151_v9 = vadd.f32 %v11009_v61, %v6075_v31 }
 0xbdb   : > { %v5992_v41 = vmul.f32 %v8090_v58, %v5991_v14  ;;  %v5998_v44 = vmul.f32 %v8094_v12, %v5882_v27  ;;  %vm6004_vm4 = vweird.f32 %v8094_v12 }
 0xbdc   : > { %8095 = vrsqrt.f32 %v5883_v18  ;;  %7370 = vmatmul.msk.bf16.vlgmr.msra.gmra.mxu3 %vm6390_vm0, %v6346_v49  ;;  %v6105_v45 = vpack.c.bf16 %v11151_v9, %v11148_v34  ;;  %vm6005_vm7 = vmor %vm6003_vm6, %vm6004_vm4  ;;  %vm6013_vm9 = vweird.f32 %v5883_v18 }
 0xbdd   : > { %v5999_v30 = vmul.f32 %v8094_v12, %v5998_v44  ;;  %v5996_v46 = vsel %vm5995_vm2, %v8090_v58, %v5992_v41 }
 0xbde   : > { %7350 = vmatmul.msk.bf16.gmra.mxu2 %vm12238_vm3, %v6105_v45  ;;  %v6057_v13 = vmul.f32 %v5996_v46, %v11037_v51 }
 0xbdf   : > { %v6000_v43 = vmul.f32 0.5, %v5999_v30  ;;  %v5848_v57 = vpop.xlane.xlu0 %5847 }
 0xbe0   : > { %v5868_v36 = vmul.f32 %v5848_v57, %v10881_v39  ;;  %v6076_v50 = vmul.f32 %v11006_v54, %v6057_v13 }
 0xbe1   : > { %v6001_v19 = vsub.f32 1.5, %v6000_v43 }
 0xbe2   : > { %v8096_v47 = vpop.eup %8095  ;;  %v5884_v48 = vadd.f32 1e-07, %v5868_v36  ;;  %v11168_v5 = vadd.f32 %v11009_v61, %v6076_v50 }
 0xbe3   : > { %v6002_v20 = vmul.f32 %v8094_v12, %v6001_v19  ;;  %v6008_v63 = vmul.f32 %v8096_v47, %v5883_v18  ;;  %vm6014_vm8 = vweird.f32 %v8096_v47 }
 0xbe4   : > { %8097 = vrsqrt.f32 %v5884_v48  ;;  %vm6015_vm10 = vmor %vm6013_vm9, %vm6014_vm8  ;;  %vm6023_vm13 = vweird.f32 %v5884_v48 }
 0xbe5   : > { %v6006_v60 = vsel %vm6005_vm7, %v8094_v12, %v6002_v20  ;;  %v6009_v62 = vmul.f32 %v8096_v47, %v6008_v63  ;;  %vm12241_vm7 = vmmov %vm12239_vm11 }
 0xbe6   : > { %v6058_v24 = vmul.f32 %v6006_v60, %v11046_v7  ;;  %v6167_v2 = vpop.f32.mrf.mxu2 }
 0xbe7   : > { %v6010_v38 = vmul.f32 0.5, %v6009_v62  ;;  %v11162_v17 = vadd.f32 %v11129_v0, %v6167_v2 }
 0xbe8   : > { %v6077_v58 = vmul.f32 %v11006_v54, %v6058_v24 }
 0xbe9   : > { %v6011_v51 = vsub.f32 1.5, %v6010_v38  ;;  %v6204_v10 = vmul.f32 %v11162_v17, %v11162_v17 }
 0xbea   : > { %v8098_v27 = vpop.eup %8097  ;;  %v11171_v55 = vadd.f32 %v11009_v61, %v6077_v58 }
 0xbeb   : > { %v6012_v7 = vmul.f32 %v8096_v47, %v6011_v51  ;;  %v6018_v15 = vmul.f32 %v8098_v27, %v5884_v48  ;;  %v6220_v23 = vmul.f32 %v6204_v10, %v11162_v17  ;;  %vm6024_vm12 = vweird.f32 %v8098_v27  ;;  %v5851_v10 = vpop.xlane.xlu2 %5850 }
 0xbec   : > { %v6106_v21 = vpack.c.bf16 %v11171_v55, %v11168_v5  ;;  %vm6025_vm14 = vmor %vm6023_vm13, %vm6024_vm12 }
 0xbed   : > { %v6019_v53 = vmul.f32 %v8098_v27, %v6018_v15  ;;  %v6236_v1 = vmul.f32 0.044715, %v6220_v23  ;;  %v6016_v16 = vsel %vm6015_vm10, %v8096_v47, %v6012_v7  ;;  %v5869_v23 = vmul.f32 %v5851_v10, %v10881_v39 }
 0xbee   : > { %v6169_v8 = vpop.f32.mrf.mxu2  ;;  %7351 = vmatmul.msk.bf16.gmra.mxu2 %vm12239_vm11, %v6106_v21  ;;  %v6059_v29 = vmul.f32 %v6016_v16, %v11056_v28 }
 0xbef   : > { %v6020_v40 = vmul.f32 0.5, %v6019_v53  ;;  %v6252_v56 = vadd.f32 %v6236_v1, %v11162_v17  ;;  %v6170_v26 = vadd.f32 %v11129_v0, %v6169_v8 }
 0xbf0   : > { %v6078_v45 = vmul.f32 %v11006_v54, %v6059_v29 }
 0xbf1   : > { %v6021_v3 = vsub.f32 1.5, %v6020_v40  ;;  %v6205_v59 = vmul.f32 %v6170_v26, %v6170_v26  ;;  %v6268_v31 = vmul.f32 0.7978846, %v6252_v56  ;;  %v5885_v40 = vadd.f32 1e-07, %v5869_v23 }
 0xbf2   : > { %v11185_v36 = vadd.f32 %v11009_v61, %v6078_v45 }
 0xbf3   : > { %v6022_v14 = vmul.f32 %v8098_v27, %v6021_v3  ;;  %v6221_v12 = vmul.f32 %v6205_v59, %v6170_v26  ;;  %8099 = vtanh.f32 %v6268_v31  ;;  %vm6033_vm5 = vweird.f32 %v5885_v40 }
 0xbf5   : > { %v6026_v49 = vsel %vm6025_vm14, %v8098_v27, %v6022_v14  ;;  %v6237_v41 = vmul.f32 0.044715, %v6221_v12 }
 0xbf6   : > { %v6060_v18 = vmul.f32 %v6026_v49, %v11073_v6  ;;  %v6172_v44 = vpop.f32.mrf.mxu2 }
 0xbf7   : > { %v6173_v30 = vadd.f32 %v11129_v0, %v6172_v44  ;;  %v6253_v46 = vadd.f32 %v6237_v41, %v6170_v26 }
 0xbf8   : > { %v6079_v43 = vmul.f32 %v11006_v54, %v6060_v18 }
 0xbf9   : > { %v6206_v57 = vmul.f32 %v6173_v30, %v6173_v30  ;;  %v6269_v28 = vmul.f32 0.7978846, %v6253_v46  ;;  %v8100_v6 = vpop.eup %8099 }
 0xbfa   : > { %v11188_v19 = vadd.f32 %v11009_v61, %v6079_v43  ;;  %v6300_v63 = vadd.f32 1.0, %v8100_v6 }
 0xbfb   : > { %v6222_v47 = vmul.f32 %v6206_v57, %v6173_v30  ;;  %8101 = vtanh.f32 %v6269_v28 }
 0xbfc   : > { %v6107_v13 = vpack.c.bf16 %v11188_v19, %v11185_v36  ;;  %v6316_v38 = vmul.f32 0.5, %v6300_v63 }
 0xbfd   : > { %v6238_v48 = vmul.f32 0.044715, %v6222_v47 }
 0xbfe   : > { %v6174_v20 = vpop.f32.mrf.mxu2  ;;  %7352 = vmatmul.msk.bf16.gmra.mxu2 %vm12240_vm15, %v6107_v13  ;;  %v6332_v15 = vmul.f32 %v6316_v38, %v11162_v17 }
 0xbff   : > { %v6254_v60 = vadd.f32 %v6238_v48, %v6173_v30  ;;  %v6175_v62 = vadd.f32 %v11129_v0, %v6174_v20 }
 0xc01   : > { %v6270_v24 = vmul.f32 0.7978846, %v6254_v60  ;;  %v6207_v2 = vmul.f32 %v6175_v62, %v6175_v62  ;;  %v8102_v50 = vpop.eup %8101 }
 0xc02   : > { %v6301_v58 = vadd.f32 1.0, %v8102_v50 }
 0xc03   : > { %v6223_v51 = vmul.f32 %v6207_v2, %v6175_v62  ;;  %8103 = vtanh.f32 %v6270_v24 }
 0xc04   : > { %v6317_v27 = vmul.f32 0.5, %v6301_v58 }
 0xc05   : > { %v6239_v7 = vmul.f32 0.044715, %v6223_v51 }
 0xc06   : > { %v6333_v21 = vmul.f32 %v6317_v27, %v6170_v26 }
 0xc07   : > { %v6255_v53 = vadd.f32 %v6239_v7, %v6175_v62 }
 0xc08   : > { %v6347_v8 = vpack.c.bf16 %v6333_v21, %v6332_v15 }
 0xc09   : > { %v6271_v1 = vmul.f32 0.7978846, %v6255_v53  ;;  %v8104_v16 = vpop.eup %8103 }
 0xc0a   : > { %7371 = vmatmul.msk.bf16.gmra.mxu3 %vm6390_vm0, %v6347_v8  ;;  %v6302_v56 = vadd.f32 1.0, %v8104_v16 }
 0xc0b   : > { %8105 = vtanh.f32 %v6271_v1 }
 0xc0c   : > { %8107 = vrsqrt.f32 %v5885_v40  ;;  %v6318_v59 = vmul.f32 0.5, %v6302_v56 }
 0xc0e   : > { %v6334_v12 = vmul.f32 %v6318_v59, %v6173_v30 }
 0xc11   : > { %v8106_v3 = vpop.eup %8105 }
 0xc12   : > { %v6303_v29 = vadd.f32 1.0, %v8106_v3  ;;  %v8108_v14 = vpop.eup %8107 }
 0xc13   : > { %v6028_v49 = vmul.f32 %v8108_v14, %v5885_v40  ;;  %vm6034_vm1 = vweird.f32 %v8108_v14 }
 0xc14   : > { %v6319_v31 = vmul.f32 0.5, %v6303_v29  ;;  %vm6035_vm2 = vmor %vm6033_vm5, %vm6034_vm1 }
 0xc15   : > { %v6029_v26 = vmul.f32 %v8108_v14, %v6028_v49 }
 0xc16   : > { %v6335_v17 = vmul.f32 %v6319_v31, %v6175_v62 }
 0xc17   : > { %v6030_v46 = vmul.f32 0.5, %v6029_v26 }
 0xc18   : > { %v6348_v18 = vpack.c.bf16 %v6335_v17, %v6334_v12 }
 0xc19   : > { %v6031_v43 = vsub.f32 1.5, %v6030_v46 }
 0xc1a   : > { %7372 = vmatmul.msk.bf16.gmra.mxu3 %vm6390_vm0, %v6348_v18 }
 0xc1b   : > { %v6032_v28 = vmul.f32 %v8108_v14, %v6031_v43 }
 0xc1c   : > { %v5854_v41 = vpop.xlane.xlu1 %5853 }
 0xc1d   : > { %v5870_v44 = vmul.f32 %v5854_v41, %v10881_v39  ;;  %v6036_v30 = vsel %vm6035_vm2, %v8108_v14, %v6032_v28 }
 0xc1e   : > { %v6061_v20 = vmul.f32 %v6036_v30, %v11083_v33 }
 0xc1f   : > { %v5886_v45 = vadd.f32 1e-07, %v5870_v44 }
 0xc20   : > { %v6080_v2 = vmul.f32 %v11006_v54, %v6061_v20 }
 0xc21   : > { %8109 = vrsqrt.f32 %v5886_v45  ;;  %vm6043_vm4 = vweird.f32 %v5886_v45 }
 0xc22   : > { %v11205_v51 = vadd.f32 %v11009_v61, %v6080_v2 }
 0xc27   : > { %v8110_v57 = vpop.eup %8109 }
 0xc28   : > { %v6038_v47 = vmul.f32 %v8110_v57, %v5886_v45  ;;  %vm6044_vm3 = vweird.f32 %v8110_v57 }
 0xc29   : > { %vm6045_vm6 = vmor %vm6043_vm4, %vm6044_vm3 }
 0xc2a   : > { %v6039_v6 = vmul.f32 %v8110_v57, %v6038_v47 }
 0xc2c   : > { %v6040_v13 = vmul.f32 0.5, %v6039_v6 }
 0xc2e   : > { %v6041_v48 = vsub.f32 1.5, %v6040_v13 }
 0xc30   : > { %v6042_v63 = vmul.f32 %v8110_v57, %v6041_v48 }
 0xc32   : > { %v6046_v60 = vsel %vm6045_vm6, %v8110_v57, %v6042_v63 }
 0xc33   : > { %v6062_v62 = vmul.f32 %v6046_v60, %v11102_v52  ;;  %v6177_v24 = vpop.f32.mrf.mxu2 }
 0xc34   : > { %v6178_v50 = vadd.f32 %v11129_v0, %v6177_v24 }
 0xc35   : > { %v6081_v38 = vmul.f32 %v11006_v54, %v6062_v62 }
 0xc36   : > { %v6208_v58 = vmul.f32 %v6178_v50, %v6178_v50 }
 0xc37   : > { %v11208_v10 = vadd.f32 %v11009_v61, %v6081_v38 }
 0xc38   : > { %v6224_v33 = vmul.f32 %v6208_v58, %v6178_v50 }
 0xc39   : > { %v6108_v27 = vpack.c.bf16 %v11208_v10, %v11205_v51 }
 0xc3a   : > { %v6240_v7 = vmul.f32 0.044715, %v6224_v33 }
 0xc3b   : > { %v6179_v52 = vpop.f32.mrf.mxu2  ;;  %7353 = vmatmul.msk.bf16.gmra.mxu2 %vm12241_vm7, %v6108_v27 }
 0xc3c   : > { %v6256_v15 = vadd.f32 %v6240_v7, %v6178_v50  ;;  %v6180_v23 = vadd.f32 %v11129_v0, %v6179_v52 }
 0xc3e   : > { %v6272_v21 = vmul.f32 0.7978846, %v6256_v15  ;;  %v6209_v54 = vmul.f32 %v6180_v23, %v6180_v23 }
 0xc40   : > { %v6225_v53 = vmul.f32 %v6209_v54, %v6180_v23  ;;  %8111 = vtanh.f32 %v6272_v21 }
 0xc42   : > { %v6241_v1 = vmul.f32 0.044715, %v6225_v53 }
 0xc44   : > { %v6257_v8 = vadd.f32 %v6241_v1, %v6180_v23 }
 0xc46   : > { %v6273_v16 = vmul.f32 0.7978846, %v6257_v8  ;;  %v8112_v61 = vpop.eup %8111 }
 0xc47   : > { %v6304_v40 = vadd.f32 1.0, %v8112_v61 }
 0xc48   : > { %8113 = vtanh.f32 %v6273_v16 }
 0xc49   : > { %v6320_v3 = vmul.f32 0.5, %v6304_v40 }
 0xc4b   : > { %v6336_v31 = vmul.f32 %v6320_v3, %v6178_v50 }
 0xc4e   : > { %v8114_v56 = vpop.eup %8113 }
 0xc4f   : > { %v6305_v59 = vadd.f32 1.0, %v8114_v56 }
 0xc51   : > { %v6321_v29 = vmul.f32 0.5, %v6305_v59 }
 0xc53   : > { %v6337_v14 = vmul.f32 %v6321_v29, %v6180_v23 }
 0xc55   : > { %v6349_v12 = vpack.c.bf16 %v6337_v14, %v6336_v31 }
 0xc57   : > { %7373 = vmatmul.msk.bf16.gmra.mxu3 %vm6390_vm0, %v6349_v12 }
 0xc61   : > { %v6182_v17 = vpop.f32.mrf.mxu2 }
 0xc62   : > { %v6183_v49 = vadd.f32 %v11129_v0, %v6182_v17 }
 0xc64   : > { %v6210_v18 = vmul.f32 %v6183_v49, %v6183_v49 }
 0xc66   : > { %v6226_v26 = vmul.f32 %v6210_v18, %v6183_v49 }
 0xc68   : > { %v6242_v41 = vmul.f32 0.044715, %v6226_v26 }
 0xc69   : > { %v6184_v44 = vpop.f32.mrf.mxu2 }
 0xc6a   : > { %v6258_v45 = vadd.f32 %v6242_v41, %v6183_v49  ;;  %v6185_v46 = vadd.f32 %v11129_v0, %v6184_v44 }
 0xc6c   : > { %v6274_v43 = vmul.f32 0.7978846, %v6258_v45  ;;  %v6211_v57 = vmul.f32 %v6185_v46, %v6185_v46 }
 0xc6e   : > { %v6227_v28 = vmul.f32 %v6211_v57, %v6185_v46  ;;  %8115 = vtanh.f32 %v6274_v43 }
 0xc70   : > { %v6243_v47 = vmul.f32 0.044715, %v6227_v28 }
 0xc71   : > { %v6187_v6 = vpop.f32.mrf.mxu2 }
 0xc72   : > { %v6259_v30 = vadd.f32 %v6243_v47, %v6185_v46  ;;  %v6188_v13 = vadd.f32 %v11129_v0, %v6187_v6 }
 0xc74   : > { %v6275_v48 = vmul.f32 0.7978846, %v6259_v30  ;;  %v6212_v20 = vmul.f32 %v6188_v13, %v6188_v13  ;;  %v8116_v63 = vpop.eup %8115 }
 0xc75   : > { %v6306_v24 = vadd.f32 1.0, %v8116_v63 }
 0xc76   : > { %8117 = vtanh.f32 %v6275_v48  ;;  %v6228_v60 = vmul.f32 %v6212_v20, %v6188_v13 }
 0xc77   : > { %v6322_v7 = vmul.f32 0.5, %v6306_v24 }
 0xc78   : > { %v6244_v62 = vmul.f32 0.044715, %v6228_v60 }
 0xc79   : > { %v6189_v2 = vpop.f32.mrf.mxu2  ;;  %v6338_v54 = vmul.f32 %v6322_v7, %v6183_v49 }
 0xc7a   : > { %v6260_v50 = vadd.f32 %v6244_v62, %v6188_v13  ;;  %v6190_v38 = vadd.f32 %v11129_v0, %v6189_v2 }
 0xc7c   : > { %v8118_v58 = vpop.eup %8117  ;;  %v6276_v33 = vmul.f32 0.7978846, %v6260_v50  ;;  %v6213_v27 = vmul.f32 %v6190_v38, %v6190_v38 }
 0xc7d   : > { %v6307_v52 = vadd.f32 1.0, %v8118_v58 }
 0xc7e   : > { %v6229_v15 = vmul.f32 %v6213_v27, %v6190_v38  ;;  %8119 = vtanh.f32 %v6276_v33  ;;  %v11224_v33 = vpop.f32.mrf.mxu3 }
 0xc7f   : > { %v6323_v23 = vmul.f32 0.5, %v6307_v52 }
 0xc80   : > { %v6245_v21 = vmul.f32 0.044715, %v6229_v15 }
 0xc81   : > { %v6339_v53 = vmul.f32 %v6323_v23, %v6185_v46  ;;  %v6192_v1 = vpop.f32.mrf.mxu2 }
 0xc82   : > { %v6261_v8 = vadd.f32 %v6245_v21, %v6190_v38  ;;  %v6193_v16 = vadd.f32 %v11129_v0, %v6192_v1 }
 0xc83   : > { %v6350_v61 = vpack.c.bf16 %v6339_v53, %v6338_v54 }
 0xc84   : > { %v6277_v40 = vmul.f32 0.7978846, %v6261_v8  ;;  %v6214_v56 = vmul.f32 %v6193_v16, %v6193_v16  ;;  %v8120_v3 = vpop.eup %8119 }
 0xc85   : > { %7374 = vmatmul.msk.bf16.gmra.mxu3 %vm6390_vm0, %v6350_v61  ;;  %v6308_v31 = vadd.f32 1.0, %v8120_v3 }
 0xc86   : > { %8121 = vtanh.f32 %v6277_v40  ;;  %v6230_v59 = vmul.f32 %v6214_v56, %v6193_v16  ;;  %v11228_v54 = vpop.f32.mrf.mxu3 }
 0xc87   : > { %v6324_v41 = vmul.f32 0.5, %v6308_v31 }
 0xc88   : > { %v6246_v29 = vmul.f32 0.044715, %v6230_v59 }
 0xc89   : > { %v6194_v14 = vpop.f32.mrf.mxu2  ;;  %v6340_v57 = vmul.f32 %v6324_v41, %v6188_v13 }
 0xc8a   : > { %v6262_v12 = vadd.f32 %v6246_v29, %v6193_v16  ;;  %v6195_v17 = vadd.f32 %v11129_v0, %v6194_v14 }
 0xc8c   : > { %v8122_v49 = vpop.eup %8121  ;;  %v6278_v18 = vmul.f32 0.7978846, %v6262_v12  ;;  %v6215_v26 = vmul.f32 %v6195_v17, %v6195_v17 }
 0xc8d   : > { %v6309_v44 = vadd.f32 1.0, %v8122_v49 }
 0xc8e   : > { %v6231_v45 = vmul.f32 %v6215_v26, %v6195_v17  ;;  %8123 = vtanh.f32 %v6278_v18  ;;  %v11230_v40 = vpop.f32.mrf.mxu3 }
 0xc8f   : > { %v6325_v46 = vmul.f32 0.5, %v6309_v44 }
 0xc90   : > { %v6247_v43 = vmul.f32 0.044715, %v6231_v45 }
 0xc91   : > { %v6341_v28 = vmul.f32 %v6325_v46, %v6190_v38 }
 0xc92   : > { %v6263_v47 = vadd.f32 %v6247_v43, %v6195_v17 }
 0xc93   : > { %v6351_v6 = vpack.c.bf16 %v6341_v28, %v6340_v57 }
 0xc94   : > { %v6279_v30 = vmul.f32 0.7978846, %v6263_v47  ;;  %v8124_v48 = vpop.eup %8123 }
 0xc95   : > { %7375 = vmatmul.msk.bf16.gmra.mxu3 %vm6390_vm0, %v6351_v6  ;;  %v6310_v20 = vadd.f32 1.0, %v8124_v48  ;;  %v11236_v6 = vld [vmem:[%s11696_s12] ss:$0 sm:$0xff] }
 0xc96   : > { %8125 = vtanh.f32 %v6279_v30  ;;  %v6431_v31 = vpop.f32.mrf.mxu3 }
 0xc97   : > { %v6326_v60 = vmul.f32 0.5, %v6310_v20 }
 0xc99   : > { %v6342_v2 = vmul.f32 %v6326_v60, %v6193_v16 }
 0xc9c   : > { %v8126_v63 = vpop.eup %8125 }
 0xc9d   : > { %v6311_v62 = vadd.f32 1.0, %v8126_v63 }
 0xc9e   : > { %v6434_v26 = vpop.f32.mrf.mxu3 }
 0xc9f   : > { %v6327_v24 = vmul.f32 0.5, %v6311_v62 }
 0xca1   : > { %v6343_v50 = vmul.f32 %v6327_v24, %v6195_v17 }
 0xca3   : > { %v6352_v58 = vpack.c.bf16 %v6343_v50, %v6342_v2 }
 0xca5   : > { %7376 = vmatmul.msk.bf16.gmra.mxu3 %vm6390_vm0, %v6352_v58  ;;  %v6435_v58 = vadd.f32 %v11236_v6, %v6434_v26 }
 0xca6   : > { %v6436_v41 = vpop.f32.mrf.mxu3 }
 0xcbe   : > { %v6197_v13 = vpop.f32.mrf.mxu2 }
 0xcbf   : > { %v6198_v38 = vadd.f32 %v11129_v0, %v6197_v13  ;;  %v11255_v13 = vadd.f32 %v6435_v58, %v11086_v42 }
 0xcc1   : > { %v6216_v27 = vmul.f32 %v6198_v38, %v6198_v38 }
 0xcc3   : > { %v6232_v7 = vmul.f32 %v6216_v27, %v6198_v38 }
 0xcc5   : > { %v6248_v52 = vmul.f32 0.044715, %v6232_v7 }
 0xcc6   : > { %v6199_v15 = vpop.f32.mrf.mxu2 }
 0xcc7   : > { %v6264_v23 = vadd.f32 %v6248_v52, %v6198_v38  ;;  %v6200_v21 = vadd.f32 %v11129_v0, %v6199_v15 }
 0xcc9   : > { %v6280_v53 = vmul.f32 0.7978846, %v6264_v23  ;;  %v6217_v1 = vmul.f32 %v6200_v21, %v6200_v21 }
 0xccb   : > { %v6233_v8 = vmul.f32 %v6217_v1, %v6200_v21  ;;  %8127 = vtanh.f32 %v6280_v53 }
 0xccd   : > { %v6249_v16 = vmul.f32 0.044715, %v6233_v8 }
 0xccf   : > { %v6265_v61 = vadd.f32 %v6249_v16, %v6200_v21 }
 0xcd1   : > { %v6281_v56 = vmul.f32 0.7978846, %v6265_v61  ;;  %v8128_v3 = vpop.eup %8127 }
 0xcd2   : > { %v6312_v59 = vadd.f32 1.0, %v8128_v3 }
 0xcd3   : > { %8129 = vtanh.f32 %v6281_v56 }
 0xcd4   : > { %v6328_v14 = vmul.f32 0.5, %v6312_v59 }
 0xcd6   : > { %v6344_v0 = vmul.f32 %v6328_v14, %v6198_v38  ;;  %v6432_v14 = vadd.f32 %v11236_v6, %v6431_v31 }
 0xcd9   : > { %v8130_v29 = vpop.eup %8129 }
 0xcda   : > { %v6313_v12 = vadd.f32 1.0, %v8130_v29  ;;  %v6439_v44 = vpop.f32.mrf.mxu3 }
 0xcdc   : > { %v6329_v17 = vmul.f32 0.5, %v6313_v12 }
 0xcde   : > { %v6345_v49 = vmul.f32 %v6329_v17, %v6200_v21  ;;  %v11286_v17 = vadd.f32 %v6432_v14, %v11062_v4 }
 0xce0   : > { %v6353_v18 = vpack.c.bf16 %v6345_v49, %v6344_v0 }
 0xce2   : > { %7377 = vmatmul.msk.bf16.gmra.mxu3 %vm6390_vm0, %v6353_v18  ;;  %v6441_v45 = vpop.f32.mrf.mxu3  ;;  %vm12242_vm0 = vmmov %vm12241_vm7 }
 0xce3   : > { %v6442_v24 = vadd.f32 %v11236_v6, %v6441_v45  ;;  %vm12243_vm8 = vmmov %vm12242_vm0 }
 0xce4   : > { %vm12244_vm9 = vmmov %vm12242_vm0 }
 0xce5   : > { %v11249_v50 = vadd.f32 %v6442_v24, %v11115_v32  ;;  %vm12245_vm10 = vmmov %vm12242_vm0 }
 0xce6   : > { %vm12246_vm11 = vmmov %vm12242_vm0 }
 0xce7   : > { %vm12247_vm12 = vmmov %vm12242_vm0 }
 0xce8   : > { %vm12248_vm13 = vmmov %vm12242_vm0 }
 0xce9   : > { %vm12249_vm14 = vmmov %vm12242_vm0 }
 0xcea   : > { %vm12250_vm15 = vmmov %vm12242_vm0 }
 0xceb   : > { %vm12251_vm1 = vmmov %vm12242_vm0 }
 0xcec   : > { %vm12252_vm5 = vmmov %vm12242_vm0 }
 0xced   : > { %vm12253_vm2 = vmmov %vm12242_vm0 }
 0xcee   : > { %vm12254_vm3 = vmmov %vm12242_vm0 }
 0xcef   : > { %vm12255_vm4 = vmmov %vm12242_vm0 }
 0xcf0   : > { %vm12256_vm6 = vmmov %vm12242_vm0 }
 0xcf1   : > { %vm12257_vm7 = vmmov %vm12242_vm0 }
 0xd08   : > { %v6444_v46 = vpop.f32.mrf.mxu3 }
 0xd09   : > { %v6445_v53 = vadd.f32 %v11236_v6, %v6444_v46 }
 0xd0b   : > { %v6472_v16 = vadd.f32 %v6445_v53, %v11148_v34  ;;  %v6440_v34 = vadd.f32 %v11236_v6, %v6439_v44 }
 0xd0d   : > { %v11289_v0 = vadd.f32 %v6440_v34, %v11112_v35  ;;  %v6425_v35 = vadd.f32 %v11236_v6, %v11224_v33  ;;  %v6427_v33 = vadd.f32 %v11236_v6, %v11228_v54  ;;  %v6430_v54 = vadd.f32 %v11236_v6, %v11230_v40 }
 0xd10   : > { %v6446_v43 = vpop.f32.mrf.mxu3 }
 0xd11   : > { %v6447_v56 = vadd.f32 %v11236_v6, %v6446_v43 }
 0xd13   : > { %v6473_v29 = vadd.f32 %v6447_v56, %v11151_v9  ;;  %v6500_v9 = vsel %vm12254_vm3, %v11289_v0, 0.0  ;;  %vm12269_vm3 = vmmov %vm12242_vm0 }
 0xd15   : > { %v6509_v12 = vsel %vm12252_vm5, %v6473_v29, 0.0  ;;  %vm12267_vm5 = vmmov %vm12242_vm0 }
 0xd18   : > { %v6449_v57 = vpop.f32.mrf.mxu3 }
 0xd19   : > { %v6450_v63 = vadd.f32 %v11236_v6, %v6449_v57 }
 0xd1b   : > { %v11243_v62 = vadd.f32 %v6450_v63, %v11168_v5  ;;  %v6494_v5 = vsel %vm12245_vm10, %v11255_v13, 0.0  ;;  %vm12260_vm10 = vmmov %vm12242_vm0 }
 0xd1d   : > { %v6512_v2 = vsel %vm12243_vm8, %v11243_v62, 0.0  ;;  %vm12258_vm8 = vmmov %vm12242_vm0 }
 0xd20   : > { %v6451_v28 = vpop.f32.mrf.mxu3 }
 0xd21   : > { %v6452_v32 = vadd.f32 %v11236_v6, %v6451_v28 }
 0xd23   : > { %v6475_v23 = vadd.f32 %v6452_v32, %v11171_v55  ;;  %v6437_v55 = vadd.f32 %v11236_v6, %v6436_v41  ;;  %v11304_v41 = vadd.f32 %v6425_v35, %v11017_v37 }
 0xd25   : > { %v11277_v59 = vadd.f32 %v6437_v55, %v11089_v22  ;;  %v6491_v22 = vsel %vm12253_vm2, %v11286_v17, 0.0  ;;  %v6482_v44 = vsel %vm12256_vm6, %v11304_v41, 0.0  ;;  %vm12268_vm2 = vmmov %vm12242_vm0 }
 0xd26   : > { %vm12271_vm6 = vmmov %vm12242_vm0 }
 0xd28   : > { %v6454_v47 = vpop.f32.mrf.mxu3 }
 0xd29   : > { %v6455_v1 = vadd.f32 %v11236_v6, %v6454_v47 }
 0xd2b   : > { %v6476_v61 = vadd.f32 %v6455_v1, %v11185_v36  ;;  %v6497_v36 = vsel %vm12251_vm1, %v11277_v59, 0.0  ;;  %vm12266_vm1 = vmmov %vm12242_vm0 }
 0xd2d   : > { %v6518_v3 = vsel %vm12250_vm15, %v6476_v61, 0.0  ;;  %vm12265_vm15 = vmmov %vm12242_vm0 }
 0xd30   : > { %v6456_v30 = vpop.f32.mrf.mxu3 }
 0xd31   : > { %v6457_v48 = vadd.f32 %v11236_v6, %v6456_v30 }
 0xd33   : > { %v6477_v20 = vadd.f32 %v6457_v48, %v11188_v19  ;;  %v6503_v19 = vsel %vm12244_vm9, %v11249_v50, 0.0  ;;  %v11318_v48 = vadd.f32 %v6427_v33, %v11020_v11  ;;  %vm12259_vm9 = vmmov %vm12242_vm0 }
 0xd35   : > { %v6521_v60 = vsel %vm12242_vm0, %v6477_v20, 0.0 }
 0xd36   : > { %6522 = vadd.xlane.f32.xlu1 %v6521_v60 }
 0xd3e   : > { %6513 = vadd.xlane.f32.xlu1 %v6512_v2  ;;  %v6485_v2 = vsel %vm12242_vm0, %v11318_v48, 0.0 }
 0xd46   : > { %6504 = vadd.xlane.f32.xlu1 %v6503_v19 }
 0xd4e   : > { %6495 = vadd.xlane.f32.xlu1 %v6494_v5  ;;  %v11333_v5 = vadd.f32 %v6430_v54, %v11059_v25 }
 0xd65   : > { %v6459_v38 = vpop.f32.mrf.mxu3 }
 0xd66   : > { %v6460_v27 = vadd.f32 %v11236_v6, %v6459_v38 }
 0xd68   : > { %v6478_v7 = vadd.f32 %v6460_v27, %v11205_v51  ;;  %v6515_v51 = vsel %vm12248_vm13, %v6475_v23, 0.0  ;;  %vm12263_vm13 = vmmov %vm12242_vm0 }
 0xd6a   : > { %v6524_v52 = vsel %vm12246_vm11, %v6478_v7, 0.0  ;;  %vm12261_vm11 = vmmov %vm12242_vm0 }
 0xd6b   : > { %6525 = vadd.xlane.f32.xlu2 %v6524_v52 }
 0xd6d   : > { %v6461_v15 = vpop.f32.mrf.mxu3 }
 0xd6e   : > { %v6462_v42 = vadd.f32 %v11236_v6, %v6461_v15  ;;  %v6488_v15 = vsel %vm12260_vm10, %v11333_v5, 0.0 }
 0xd70   : > { %v6479_v21 = vadd.f32 %v6462_v42, %v11208_v10  ;;  %v6506_v10 = vsel %vm12249_vm14, %v6472_v16, 0.0  ;;  %vm12264_vm14 = vmmov %vm12242_vm0 }
 0xd72   : > { %v6527_v8 = vsel %vm12247_vm12, %v6479_v21, 0.0  ;;  %vm12262_vm12 = vmmov %vm12242_vm0 }
 0xd73   : > { %6528 = vadd.xlane.f32.xlu0 %v6527_v8  ;;  %6516 = vadd.xlane.f32.xlu2 %v6515_v51 }
 0xd7b   : > { %6507 = vadd.xlane.f32.xlu2 %v6506_v10  ;;  %6519 = vadd.xlane.f32.xlu0 %v6518_v3 }
 0xd83   : > { %6498 = vadd.xlane.f32.xlu2 %v6497_v36  ;;  %6510 = vadd.xlane.f32.xlu0 %v6509_v12 }
 0xd8b   : > { %6492 = vadd.xlane.f32.xlu2 %v6491_v22  ;;  %6501 = vadd.xlane.f32.xlu0 %v6500_v9 }
 0xda9   : > { %v6523_v31 = vpop.xlane.xlu1 %6522 }
 0xdaa   : > { %v6543_v49 = vmul.f32 %v6523_v31, %v10881_v39 }
 0xdac   : > { %v11296_v18 = vsub.f32 %v6477_v20, %v6543_v49 }
 0xdae   : > { %v6575_v4 = vmul.f32 %v11296_v18, %v11296_v18 }
 0xdb0   : > { %v6617_v26 = vsel %vm12255_vm4, %v6575_v4, 0.0  ;;  %vm12270_vm4 = vmmov %vm12242_vm0 }
 0xdb1   : > { %6618 = vadd.xlane.f32.xlu2 %v6617_v26  ;;  %v6514_v6 = vpop.xlane.xlu1 %6513 }
 0xdb9   : > { %6483 = vadd.xlane.f32.xlu2 %v6482_v44  ;;  %v6505_v55 = vpop.xlane.xlu1 %6504 }
 0xdc1   : > { %v6496_v26 = vpop.xlane.xlu1 %6495 }
 0xdde   : > { %v6526_v45 = vpop.xlane.xlu2 %6525 }
 0xddf   : > { %v6544_v46 = vmul.f32 %v6526_v45, %v10881_v39  ;;  %v6534_v45 = vmul.f32 %v6496_v26, %v10881_v39 }
 0xde1   : > { %v11309_v43 = vsub.f32 %v6478_v7, %v6544_v46 }
 0xde3   : > { %v6576_v57 = vmul.f32 %v11309_v43, %v11309_v43 }
 0xde5   : > { %v6620_v28 = vsel %vm12257_vm7, %v6576_v57, 0.0  ;;  %v11393_v57 = vsub.f32 %v11255_v13, %v6534_v45  ;;  %vm12272_vm7 = vmmov %vm12242_vm0 }
 0xde6   : > { %v6529_v47 = vpop.xlane.xlu0 %6528  ;;  %v6517_v37 = vpop.xlane.xlu2 %6516  ;;  %6621 = vadd.xlane.f32.xlu1 %v6620_v28 }
 0xde7   : > { %v6545_v30 = vmul.f32 %v6529_v47, %v10881_v39  ;;  %v6541_v63 = vmul.f32 %v6517_v37, %v10881_v39  ;;  %v6566_v28 = vmul.f32 %v11393_v57, %v11393_v57 }
 0xde9   : > { %v11320_v20 = vsub.f32 %v6479_v21, %v6545_v30  ;;  %v11327_v24 = vsub.f32 %v6475_v23, %v6541_v63  ;;  %v6540_v21 = vmul.f32 %v6514_v6, %v10881_v39  ;;  %v6590_v47 = vsel %vm12269_vm3, %v6566_v28, 0.0 }
 0xdeb   : > { %v6577_v60 = vmul.f32 %v11320_v20, %v11320_v20  ;;  %v6573_v40 = vmul.f32 %v11327_v24, %v11327_v24 }
 0xded   : > { %v6623_v58 = vsel %vm12258_vm8, %v6577_v60, 0.0  ;;  %v6611_v52 = vsel %vm12259_vm9, %v6573_v40, 0.0 }
 0xdee   : > { %v6508_v19 = vpop.xlane.xlu2 %6507  ;;  %6486 = vadd.xlane.f32.xlu1 %v6485_v2  ;;  %6624 = vadd.xlane.f32.xlu0 %v6623_v58  ;;  %v6520_v11 = vpop.xlane.xlu0 %6519 }
 0xdef   : > { %v6538_v38 = vmul.f32 %v6508_v19, %v10881_v39  ;;  %v6542_v27 = vmul.f32 %v6520_v11, %v10881_v39 }
 0xdf1   : > { %v11339_v7 = vsub.f32 %v6472_v16, %v6538_v38  ;;  %v11341_v32 = vsub.f32 %v6476_v61, %v6542_v27  ;;  %v11358_v61 = vsub.f32 %v11243_v62, %v6540_v21  ;;  %v6537_v62 = vmul.f32 %v6505_v55, %v10881_v39 }
 0xdf3   : > { %v6570_v8 = vmul.f32 %v11339_v7, %v11339_v7  ;;  %v6574_v51 = vmul.f32 %v11341_v32, %v11341_v32  ;;  %v6572_v22 = vmul.f32 %v11358_v61, %v11358_v61  ;;  %v11379_v49 = vsub.f32 %v11249_v50, %v6537_v62 }
 0xdf5   : > { %v6602_v10 = vsel %vm12261_vm11, %v6570_v8, 0.0  ;;  %v6614_v3 = vsel %vm12262_vm12, %v6574_v51, 0.0  ;;  %v6608_v35 = vsel %vm12265_vm15, %v6572_v22, 0.0  ;;  %v6569_v46 = vmul.f32 %v11379_v49, %v11379_v49 }
 0xdf6   : > { %v6499_v23 = vpop.xlane.xlu2 %6498  ;;  %6612 = vadd.xlane.f32.xlu1 %v6611_v52  ;;  %6489 = vadd.xlane.f32.xlu0 %v6488_v15  ;;  %v6511_v25 = vpop.xlane.xlu0 %6510 }
 0xdf7   : > { %v6539_v42 = vmul.f32 %v6511_v25, %v10881_v39  ;;  %v6535_v53 = vmul.f32 %v6499_v23, %v10881_v39  ;;  %v6599_v33 = vsel %vm12267_vm5, %v6569_v46, 0.0 }
 0xdf9   : > { %v11349_v1 = vsub.f32 %v6473_v29, %v6539_v42  ;;  %v11361_v56 = vsub.f32 %v11277_v59, %v6535_v53 }
 0xdfb   : > { %v6571_v16 = vmul.f32 %v11349_v1, %v11349_v1  ;;  %v6567_v59 = vmul.f32 %v11361_v56, %v11361_v56 }
 0xdfd   : > { %v6605_v29 = vsel %vm12263_vm13, %v6571_v16, 0.0  ;;  %v6593_v4 = vsel %vm12264_vm14, %v6567_v59, 0.0 }
 0xdfe   : > { %6603 = vadd.xlane.f32.xlu1 %v6602_v10  ;;  %6615 = vadd.xlane.f32.xlu0 %v6614_v3  ;;  %v6502_v14 = vpop.xlane.xlu0 %6501  ;;  %v6493_v34 = vpop.xlane.xlu2 %6492 }
 0xdff   : > { %6606 = vadd.xlane.f32.xlu2 %v6605_v29  ;;  %v6536_v36 = vmul.f32 %v6502_v14, %v10881_v39  ;;  %v6533_v9 = vmul.f32 %v6493_v34, %v10881_v39 }
 0xe01   : > { %v11369_v12 = vsub.f32 %v11289_v0, %v6536_v36  ;;  %v11385_v44 = vsub.f32 %v11286_v17, %v6533_v9 }
 0xe03   : > { %v6568_v31 = vmul.f32 %v11369_v12, %v11369_v12  ;;  %v6565_v50 = vmul.f32 %v11385_v44, %v11385_v44 }
 0xe05   : > { %v6596_v0 = vsel %vm12266_vm1, %v6568_v31, 0.0  ;;  %v6587_v17 = vsel %vm12268_vm2, %v6565_v50, 0.0  ;;  %vm12277_vm2 = vmmov %vm12266_vm1 }
 0xe06   : > { %6594 = vadd.xlane.f32.xlu1 %v6593_v4  ;;  %6609 = vadd.xlane.f32.xlu0 %v6608_v35 }
 0xe07   : > { %6597 = vadd.xlane.f32.xlu2 %v6596_v0 }
 0xe0e   : > { %6600 = vadd.xlane.f32.xlu0 %v6599_v33 }
 0xe0f   : > { %6588 = vadd.xlane.f32.xlu2 %v6587_v17 }
 0xe16   : > { %6591 = vadd.xlane.f32.xlu0 %v6590_v47 }
 0xe24   : > { %v6619_v37 = vpop.xlane.xlu2 %6618 }
 0xe25   : > { %v6639_v2 = vmul.f32 %v6619_v37, %v10881_v39 }
 0xe27   : > { %v11408_v58 = vadd.f32 1e-07, %v6639_v2 }
 0xe29   : > { %8131 = vrsqrt.f32 %v11408_v58  ;;  %vm6794_vm14 = vweird.f32 %v11408_v58 }
 0xe2c   : > { %v6484_v30 = vpop.xlane.xlu2 %6483 }
 0xe2d   : > { %v6530_v63 = vmul.f32 %v6484_v30, %v10881_v39 }
 0xe2f   : > { %v11402_v60 = vsub.f32 %v11304_v41, %v6530_v63  ;;  %v11412_v27 = vpop.eup %8131 }
 0xe30   : > { %v6789_v23 = vmul.f32 %v11412_v27, %v11408_v58  ;;  %vm6795_vm8 = vweird.f32 %v11412_v27 }
 0xe31   : > { %v6562_v13 = vmul.f32 %v11402_v60, %v11402_v60  ;;  %vm11464_vm15 = vmor %vm6794_vm14, %vm6795_vm8 }
 0xe32   : > { %v6790_v51 = vmul.f32 %v11412_v27, %v6789_v23 }
 0xe33   : > { %v6578_v54 = vsel %vm12270_vm4, %v6562_v13, 0.0 }
 0xe34   : > { %6579 = vadd.xlane.f32.xlu2 %v6578_v54  ;;  %v6791_v34 = vmul.f32 0.5, %v6790_v51 }
 0xe36   : > { %v6792_v4 = vsub.f32 1.5, %v6791_v34 }
 0xe38   : > { %v6793_v37 = vmul.f32 %v11412_v27, %v6792_v4 }
 0xe59   : > { %v6622_v19 = vpop.xlane.xlu1 %6621 }
 0xe5a   : > { %v6640_v11 = vmul.f32 %v6622_v19, %v10881_v39 }
 0xe5c   : > { %v6656_v38 = vadd.f32 1e-07, %v6640_v11 }
 0xe5e   : > { %8133 = vrsqrt.f32 %v6656_v38  ;;  %vm6804_vm9 = vweird.f32 %v6656_v38 }
 0xe61   : > { %v6487_v41 = vpop.xlane.xlu1 %6486  ;;  %v6625_v40 = vpop.xlane.xlu0 %6624 }
 0xe62   : > { %v6531_v6 = vmul.f32 %v6487_v41, %v10881_v39  ;;  %v6641_v52 = vmul.f32 %v6625_v40, %v10881_v39 }
 0xe64   : > { %v8134_v15 = vpop.eup %8133  ;;  %v11419_v25 = vsub.f32 %v11318_v48, %v6531_v6  ;;  %v6657_v42 = vadd.f32 1e-07, %v6641_v52  ;;  %v11472_v52 = vld [vmem:[%s11697_s13] ss:$0 sm:$0xff] }
 0xe65   : > { %v6799_v21 = vmul.f32 %v8134_v15, %v6656_v38  ;;  %vm6805_vm0 = vweird.f32 %v8134_v15 }
 0xe66   : > { %8135 = vrsqrt.f32 %v6657_v42  ;;  %v6563_v53 = vmul.f32 %v11419_v25, %v11419_v25  ;;  %vm11444_vm11 = vmor %vm6804_vm9, %vm6805_vm0  ;;  %vm6814_vm12 = vweird.f32 %v6657_v42 }
 0xe67   : > { %v6800_v8 = vmul.f32 %v8134_v15, %v6799_v21 }
 0xe68   : > { %v6581_v16 = vsel %vm12271_vm6, %v6563_v53, 0.0 }
 0xe69   : > { %v6801_v55 = vmul.f32 0.5, %v6800_v8  ;;  %v6613_v10 = vpop.xlane.xlu1 %6612  ;;  %6582 = vadd.xlane.f32.xlu0 %v6581_v16  ;;  %v6490_v3 = vpop.xlane.xlu0 %6489 }
 0xe6a   : > { %v6637_v29 = vmul.f32 %v6613_v10, %v10881_v39  ;;  %v6532_v48 = vmul.f32 %v6490_v3, %v10881_v39 }
 0xe6b   : > { %v6802_v59 = vsub.f32 1.5, %v6801_v55 }
 0xe6c   : > { %v8136_v14 = vpop.eup %8135  ;;  %v11427_v36 = vadd.f32 1e-07, %v6637_v29  ;;  %v11430_v62 = vsub.f32 %v11333_v5, %v6532_v48 }
 0xe6d   : > { %v6809_v22 = vmul.f32 %v8136_v14, %v6657_v42  ;;  %v6803_v0 = vmul.f32 %v8134_v15, %v6802_v59  ;;  %vm6815_vm10 = vweird.f32 %v8136_v14 }
 0xe6e   : > { %8137 = vrsqrt.f32 %v11427_v36  ;;  %v6564_v9 = vmul.f32 %v11430_v62, %v11430_v62  ;;  %vm6816_vm13 = vmor %vm6814_vm12, %vm6815_vm10  ;;  %vm6774_vm3 = vweird.f32 %v11427_v36 }
 0xe6f   : > { %v6810_v31 = vmul.f32 %v8136_v14, %v6809_v22  ;;  %v6807_v54 = vsel %vm11444_vm11, %v8134_v15, %v6803_v0  ;;  %v6797_v15 = vsel %vm11464_vm15, %v11412_v27, %v6793_v37  ;;  %vm12283_vm15 = vmmov %vm12266_vm1 }
 0xe70   : > { %v6584_v35 = vsel %vm12272_vm7, %v6564_v9, 0.0  ;;  %v6832_v6 = vmul.f32 %v6807_v54, %v11309_v43  ;;  %v6831_v27 = vmul.f32 %v6797_v15, %v11296_v18  ;;  %vm12280_vm7 = vmmov %vm12266_vm1 }
 0xe71   : > { %v6811_v26 = vmul.f32 0.5, %v6810_v31  ;;  %v6604_v45 = vpop.xlane.xlu1 %6603  ;;  %6585 = vadd.xlane.f32.xlu1 %v6584_v35  ;;  %v6616_v46 = vpop.xlane.xlu0 %6615 }
 0xe72   : > { %v6634_v5 = vmul.f32 %v6604_v45, %v10881_v39  ;;  %v6607_v50 = vpop.xlane.xlu2 %6606  ;;  %v6638_v33 = vmul.f32 %v6616_v46, %v10881_v39  ;;  %v6851_v3 = vmul.f32 %v11472_v52, %v6832_v6  ;;  %v6850_v35 = vmul.f32 %v11472_v52, %v6831_v27 }
 0xe73   : > { %v6812_v17 = vsub.f32 1.5, %v6811_v26  ;;  %v6635_v28 = vmul.f32 %v6607_v50, %v10881_v39 }
 0xe74   : > { %v11440_v47 = vpop.eup %8137  ;;  %v11448_v63 = vadd.f32 1e-07, %v6634_v5  ;;  %v11450_v13 = vadd.f32 1e-07, %v6638_v33 }
 0xe75   : > { %v6813_v2 = vmul.f32 %v8136_v14, %v6812_v17  ;;  %v6769_v19 = vmul.f32 %v11440_v47, %v11427_v36  ;;  %v11456_v11 = vadd.f32 1e-07, %v6635_v28  ;;  %vm6775_vm5 = vweird.f32 %v11440_v47 }
 0xe76   : > { %8139 = vrsqrt.f32 %v11448_v63  ;;  %vm11523_vm4 = vmor %vm6774_vm3, %vm6775_vm5  ;;  %vm6784_vm0 = vweird.f32 %v11450_v13  ;;  %vm6744_vm5 = vweird.f32 %v11448_v63 }
 0xe77   : > { %v6817_v38 = vsel %vm6816_vm13, %v8136_v14, %v6813_v2  ;;  %v6770_v41 = vmul.f32 %v11440_v47, %v6769_v19  ;;  %8141 = vrsqrt.f32 %v11456_v11  ;;  %vm6754_vm9 = vweird.f32 %v11456_v11  ;;  %vm12284_vm3 = vmmov %vm12280_vm7 }
 0xe78   : > { %v6833_v58 = vmul.f32 %v6817_v38, %v11320_v20  ;;  %8143 = vrsqrt.f32 %v11450_v13  ;;  %v11485_v20 = vld [vmem:[%s11698_s14] ss:$0 sm:$0xff] }
 0xe79   : > { %v6595_v23 = vpop.xlane.xlu1 %6594  ;;  %v6610_v42 = vpop.xlane.xlu0 %6609  ;;  %v6771_v53 = vmul.f32 0.5, %v6770_v41  ;;  %v6870_v4 = vadd.f32 %v11485_v20, %v6851_v3  ;;  %v6869_v30 = vadd.f32 %v11485_v20, %v6850_v35 }
 0xe7a   : > { %v6852_v21 = vmul.f32 %v11472_v52, %v6833_v58  ;;  %v6631_v43 = vmul.f32 %v6595_v23, %v10881_v39  ;;  %v6598_v8 = vpop.xlane.xlu2 %6597  ;;  %v6636_v51 = vmul.f32 %v6610_v42, %v10881_v39 }
 0xe7b   : > { %v6632_v16 = vmul.f32 %v6598_v8, %v10881_v39  ;;  %v6772_v59 = vsub.f32 1.5, %v6771_v53 }
 0xe7c   : > { %v11488_v55 = vpop.eup %8139  ;;  %v6871_v10 = vadd.f32 %v11485_v20, %v6852_v21  ;;  %v11497_v14 = vadd.f32 1e-07, %v6636_v51  ;;  %v11501_v9 = vadd.f32 1e-07, %v6631_v43 }
 0xe7d   : > { %v11493_v29 = vpop.eup %8141  ;;  %v11495_v48 = vadd.f32 1e-07, %v6632_v16  ;;  %v6739_v18 = vmul.f32 %v11488_v55, %v11448_v63  ;;  %v6773_v46 = vmul.f32 %v11440_v47, %v6772_v59  ;;  %vm6745_vm12 = vweird.f32 %v11488_v55 }
 0xe7e   : > { %v8144_v34 = vpop.eup %8143  ;;  %v6749_v22 = vmul.f32 %v11493_v29, %v11456_v11  ;;  %7378 = vmatpush.xpose.msk.msrb.mxu0 %vm12266_vm1, %v6871_v10  ;;  %vm6755_vm10 = vweird.f32 %v11493_v29  ;;  %vm6764_vm13 = vweird.f32 %v11497_v14 }
 0xe7f   : > { %v6779_v31 = vmul.f32 %v8144_v34, %v11450_v13  ;;  %8145 = vrsqrt.f32 %v11495_v48  ;;  %v6740_v33 = vmul.f32 %v11488_v55, %v6739_v18  ;;  %vm6785_vm6 = vweird.f32 %v8144_v34  ;;  %vm11563_vm14 = vmor %vm6754_vm9, %vm6755_vm10 }
 0xe80   : > { %v6750_v0 = vmul.f32 %v11493_v29, %v6749_v22  ;;  %8147 = vrsqrt.f32 %v11497_v14  ;;  %v6777_v41 = vsel %vm11523_vm4, %v11440_v47, %v6773_v46  ;;  %vm6786_vm8 = vmor %vm6784_vm0, %vm6785_vm6  ;;  %vm6724_vm9 = vweird.f32 %v11495_v48 }
 0xe81   : > { %v6780_v26 = vmul.f32 %v8144_v34, %v6779_v31  ;;  %v6601_v45 = vpop.xlane.xlu0 %6600  ;;  %8149 = vrsqrt.f32 %v11501_v9  ;;  %v6741_v40 = vmul.f32 0.5, %v6740_v33  ;;  %v6829_v47 = vmul.f32 %v6777_v41, %v11327_v24 }
 0xe82   : > { %v6589_v5 = vpop.xlane.xlu2 %6588  ;;  %v6633_v50 = vmul.f32 %v6601_v45, %v10881_v39  ;;  %7379 = vmatpush.xpose.msk.msrb.mxu0 %vm12277_vm2, %v6870_v4  ;;  %v6751_v2 = vmul.f32 0.5, %v6750_v0  ;;  %vm6746_vm2 = vmor %vm6744_vm5, %vm6745_vm12 }
 0xe83   : > { %v6781_v17 = vmul.f32 0.5, %v6780_v26  ;;  %v6629_v28 = vmul.f32 %v6589_v5, %v10881_v39  ;;  %v6742_v16 = vsub.f32 1.5, %v6741_v40  ;;  %v6848_v22 = vmul.f32 %v11472_v52, %v6829_v47  ;;  %vm12286_vm12 = vmmov %vm12284_vm3 }
 0xe84   : > { %v11520_v37 = vadd.f32 1e-07, %v6633_v50  ;;  %v6752_v21 = vsub.f32 1.5, %v6751_v2 }
 0xe85   : > { %v6782_v19 = vsub.f32 1.5, %v6781_v17  ;;  %v11527_v38 = vpop.eup %8145  ;;  %v11540_v42 = vadd.f32 1e-07, %v6629_v28  ;;  %v6743_v35 = vmul.f32 %v11488_v55, %v6742_v16  ;;  %v6867_v17 = vadd.f32 %v11485_v20, %v6848_v22 }
 0xe86   : > { %8151 = vrsqrt.f32 %v11520_v37  ;;  %7380 = vmatpush.xpose.msk.msrb.mxu0 %vm12280_vm7, %v6869_v30  ;;  %v8148_v36 = vpop.eup %8147  ;;  %v6719_v15 = vmul.f32 %v11527_v38, %v11495_v48  ;;  %vm6734_vm6 = vweird.f32 %v11520_v37  ;;  %vm6725_vm7 = vweird.f32 %v11527_v38 }
 0xe87   : > { %v6783_v6 = vmul.f32 %v8144_v34, %v6782_v19  ;;  %v11535_v58 = vpop.eup %8149  ;;  %v6759_v23 = vmul.f32 %v8148_v36, %v11497_v14  ;;  %8153 = vrsqrt.f32 %v11540_v42  ;;  %vm6765_vm11 = vweird.f32 %v8148_v36 }
 0xe88   : > { %v6709_v13 = vmul.f32 %v11535_v58, %v11501_v9  ;;  %v6720_v3 = vmul.f32 %v11527_v38, %v6719_v15  ;;  %vm6766_vm1 = vmor %vm6764_vm13, %vm6765_vm11  ;;  %v6747_v54 = vsel %vm6746_vm2, %v11488_v55, %v6743_v35  ;;  %vm6715_vm10 = vweird.f32 %v11535_v58 }
 0xe89   : > { %v6787_v53 = vsel %vm6786_vm8, %v8144_v34, %v6783_v6  ;;  %v6592_v43 = vpop.xlane.xlu0 %6591  ;;  %v6760_v51 = vmul.f32 %v8148_v36, %v6759_v23  ;;  %v6753_v34 = vmul.f32 %v11493_v29, %v6752_v21  ;;  %v6826_v6 = vmul.f32 %v6747_v54, %v11339_v7  ;;  %vm12285_vm8 = vmmov %vm12284_vm3 }
 0xe8a   : > { %v6830_v8 = vmul.f32 %v6787_v53, %v11341_v32  ;;  %v6630_v27 = vmul.f32 %v6592_v43, %v10881_v39  ;;  %v6710_v45 = vmul.f32 %v11535_v58, %v6709_v13  ;;  %v6721_v46 = vmul.f32 0.5, %v6720_v3  ;;  %vm6726_vm11 = vmor %vm6724_vm9, %vm6725_vm7 }
 0xe8b   : > { %v6761_v59 = vmul.f32 0.5, %v6760_v51  ;;  %v6757_v50 = vsel %vm11563_vm14, %v11493_v29, %v6753_v34  ;;  %vm6714_vm13 = vweird.f32 %v11501_v9 }
 0xe8c   : > { %v8152_v10 = vpop.eup %8151  ;;  %v6849_v24 = vmul.f32 %v11472_v52, %v6830_v8  ;;  %v11555_v31 = vadd.f32 1e-07, %v6630_v27  ;;  %v6827_v2 = vmul.f32 %v6757_v50, %v11349_v1  ;;  %v6711_v29 = vmul.f32 0.5, %v6710_v45  ;;  %vm6716_vm14 = vmor %vm6714_vm13, %vm6715_vm10 }
 0xe8d   : > { %v6729_v32 = vmul.f32 %v8152_v10, %v11520_v37  ;;  %v6762_v18 = vsub.f32 1.5, %v6761_v59  ;;  %v11573_v33 = vpop.eup %8153  ;;  %v6722_v19 = vsub.f32 1.5, %v6721_v46  ;;  %vm6735_vm4 = vweird.f32 %v8152_v10 }
 0xe8e   : > { %v6868_v4 = vadd.f32 %v11485_v20, %v6849_v24  ;;  %8155 = vrsqrt.f32 %v11555_v31  ;;  %v6689_v63 = vmul.f32 %v11573_v33, %v11540_v42  ;;  %v6712_v55 = vsub.f32 1.5, %v6711_v29  ;;  %vm6736_vm0 = vmor %vm6734_vm6, %vm6735_vm4 }
 0xe8f   : > { %v6730_v0 = vmul.f32 %v8152_v10, %v6729_v32  ;;  %v6763_v5 = vmul.f32 %v8148_v36, %v6762_v18  ;;  %v6846_v15 = vmul.f32 %v11472_v52, %v6827_v2  ;;  %v6723_v23 = vmul.f32 %v11527_v38, %v6722_v19 }
 0xe90   : > { %7381 = vmatpush.xpose.msk.msrb.mxu0 %vm12283_vm15, %v6868_v4  ;;  %v6690_v47 = vmul.f32 %v11573_v33, %v6689_v63  ;;  %v6845_v8 = vmul.f32 %v11472_v52, %v6826_v6  ;;  %v6713_v51 = vmul.f32 %v11535_v58, %v6712_v55  ;;  %vm6704_vm5 = vweird.f32 %v11555_v31  ;;  %v6873_v63 = vld [vmem:[#allocation2] sm:$0x1] }
 0xe91   : > { %v6731_v14 = vmul.f32 0.5, %v6730_v0  ;;  %v6767_v11 = vsel %vm6766_vm1, %v8148_v36, %v6763_v5  ;;  %v6865_v43 = vadd.f32 %v11485_v20, %v6846_v15  ;;  %v6727_v16 = vsel %vm6726_vm11, %v11527_v38, %v6723_v23  ;;  %vm12287_vm1 = vmmov %vm12284_vm3 }
 0xe92   : > { %v6828_v28 = vmul.f32 %v6767_v11, %v11358_v61  ;;  %v6691_v13 = vmul.f32 0.5, %v6690_v47  ;;  %v6824_v48 = vmul.f32 %v6727_v16, %v11369_v12  ;;  %v6717_v3 = vsel %vm6716_vm14, %v11535_v58, %v6713_v51  ;;  %vm12288_vm4 = vmmov %vm12287_vm1 }
 0xe93   : > { %v6732_v30 = vsub.f32 1.5, %v6731_v14  ;;  %v6823_v38 = vmul.f32 %v6717_v3, %v11361_v56  ;;  %vm6694_vm6 = vweird.f32 %v11540_v42 }
 0xe94   : > { %7382 = vmatpush.xpose.msk.msrb.mxu0 %vm12284_vm3, %v6867_v17  ;;  %v6847_v36 = vmul.f32 %v11472_v52, %v6828_v28  ;;  %v8156_v40 = vpop.eup %8155  ;;  %v6692_v59 = vsub.f32 1.5, %v6691_v13  ;;  %v6843_v12 = vmul.f32 %v11472_v52, %v6824_v48  ;;  %vm6695_vm3 = vweird.f32 %v11573_v33 }
 0xe95   : > { %v6733_v41 = vmul.f32 %v8152_v10, %v6732_v30  ;;  %v6699_v61 = vmul.f32 %v8156_v40, %v11555_v31  ;;  %vm6705_vm15 = vweird.f32 %v8156_v40  ;;  %vm6696_vm7 = vmor %vm6694_vm6, %vm6695_vm3  ;;  %v6842_v56 = vmul.f32 %v11472_v52, %v6823_v38 }
 0xe96   : > { %v6866_v1 = vadd.f32 %v11485_v20, %v6847_v36  ;;  %vm6706_vm2 = vmor %vm6704_vm5, %vm6705_vm15  ;;  %v6693_v34 = vmul.f32 %v11573_v33, %v6692_v59  ;;  %v6862_v22 = vadd.f32 %v11485_v20, %v6843_v12 }
 0xe97   : > { %v6737_v21 = vsel %vm6736_vm0, %v8152_v10, %v6733_v41  ;;  %v6700_v53 = vmul.f32 %v8156_v40, %v6699_v61  ;;  %v6864_v10 = vadd.f32 %v11485_v20, %v6845_v8  ;;  %vm12289_vm0 = vmmov %vm12287_vm1  ;;  %v6861_v4 = vadd.f32 %v11485_v20, %v6842_v56 }
 0xe98   : > { %7383 = vmatpush.xpose.msk.msrb.mxu0 %vm12285_vm8, %v6866_v1  ;;  %v6825_v37 = vmul.f32 %v6737_v21, %v11379_v49  ;;  %v6697_v18 = vsel %vm6696_vm7, %v11573_v33, %v6693_v34  ;;  %vm12290_vm8 = vmmov %vm12289_vm0  ;;  %v8381_v41 = vmov 0  }
 0xe99   : > { %v6701_v7 = vmul.f32 0.5, %v6700_v53  ;;  %v6821_v31 = vmul.f32 %v6697_v18, %v11385_v44  ;;  %vm12291_vm9 = vmmov %vm12289_vm0  ;;  %7783 = vset.pattern.permute.xlu1 %v8381_v41  ;;  %7784 = vset.pattern.permute.xlu0 %v8381_v41 }
 0xe9a   : > { %v6844_v49 = vmul.f32 %v11472_v52, %v6825_v37  ;;  %vm12292_vm10 = vmmov %vm12289_vm0  ;;  %6876 = vperm.xlu1 %7783, %v6873_v63  }
 0xe9b   : > { %v6702_v27 = vsub.f32 1.5, %v6701_v7  ;;  %vm12294_vm6 = vmmov %vm12289_vm0 }
 0xe9c   : > { %7384 = vmatpush.xpose.msk.msrb.mxu0 %vm12286_vm12, %v6865_v43  ;;  %v6863_v9 = vadd.f32 %v11485_v20, %v6844_v49  ;;  %vm12295_vm7 = vmmov %vm12289_vm0 }
 0xe9d   : > { %v6703_v24 = vmul.f32 %v8156_v40, %v6702_v27 }
 0xe9f   : > { %v6707_v32 = vsel %vm6706_vm2, %v8156_v40, %v6703_v24 }
 0xea0   : > { %7385 = vmatpush.xpose.msk.msrb.mxu0 %vm12287_vm1, %v6864_v10  ;;  %v6822_v58 = vmul.f32 %v6707_v32, %v11393_v57  ;;  %v6840_v57 = vmul.f32 %v11472_v52, %v6821_v31 }
 0xea2   : > { %v6841_v35 = vmul.f32 %v11472_v52, %v6822_v58  ;;  %v6859_v0 = vadd.f32 %v11485_v20, %v6840_v57 }
 0xea4   : > { %7386 = vmatpush.xpose.msk.msrb.mxu0 %vm12288_vm4, %v6863_v9  ;;  %v6860_v42 = vadd.f32 %v11485_v20, %v6841_v35  ;;  %vm12293_vm4 = vmmov %vm12289_vm0 }
 0xea7   : > { %v6580_v26 = vpop.xlane.xlu2 %6579 }
 0xea8   : > { %7387 = vmatpush.xpose.msk.msrb.mxu0 %vm12289_vm0, %v6862_v22  ;;  %v6626_v45 = vmul.f32 %v6580_v26, %v10881_v39 }
 0xeaa   : > { %v6642_v44 = vadd.f32 1e-07, %v6626_v45 }
 0xeac   : > { %7388 = vmatpush.xpose.msk.msrb.mxu0 %vm12290_vm8, %v6861_v4  ;;  %8157 = vrsqrt.f32 %v6642_v44  ;;  %vm6664_vm2 = vweird.f32 %v6642_v44 }
 0xeb0   : > { %7389 = vmatpush.xpose.msk.msrb.mxu0 %vm12291_vm9, %v6860_v42 }
 0xeb2   : > { %v8158_v33 = vpop.eup %8157 }
 0xeb3   : > { %v6659_v30 = vmul.f32 %v8158_v33, %v6642_v44  ;;  %vm6665_vm14 = vweird.f32 %v8158_v33 }
 0xeb4   : > { %7390 = vmatpush.xpose.msk.msrb.mxu0 %vm12292_vm10, %v6859_v0  ;;  %vm6666_vm3 = vmor %vm6664_vm2, %vm6665_vm14 }
 0xeb5   : > { %v6660_v29 = vmul.f32 %v8158_v33, %v6659_v30 }
 0xeb7   : > { %v6661_v40 = vmul.f32 0.5, %v6660_v29 }
 0xeb9   : > { %v6662_v1 = vsub.f32 1.5, %v6661_v40 }
 0xebb   : > { %v6663_v47 = vmul.f32 %v8158_v33, %v6662_v1 }
 0xebd   : > { %v6667_v8 = vsel %vm6666_vm3, %v8158_v33, %v6663_v47 }
 0xebe   : > { %v6818_v16 = vmul.f32 %v6667_v8, %v11402_v60  ;;  %v6872_v60 = vld [vmem:[%s11699_s15] sm:$0x1] }
 0xec0   : > { %v6837_v10 = vmul.f32 %v11472_v52, %v6818_v16 }
 0xedc   : > { %v6583_v46 = vpop.xlane.xlu0 %6582 }
 0xedd   : > { %v6627_v5 = vmul.f32 %v6583_v46, %v10881_v39 }
 0xedf   : > { %v6643_v50 = vadd.f32 1e-07, %v6627_v5 }
 0xee1   : > { %8159 = vrsqrt.f32 %v6643_v50  ;;  %vm6674_vm12 = vweird.f32 %v6643_v50 }
 0xee4   : > { %v6586_v14 = vpop.xlane.xlu1 %6585 }
 0xee5   : > { %v6628_v11 = vmul.f32 %v6586_v14, %v10881_v39 }
 0xee7   : > { %v8160_v17 = vpop.eup %8159  ;;  %v6644_v28 = vadd.f32 1e-07, %v6628_v11 }
 0xee8   : > { %v6669_v54 = vmul.f32 %v8160_v17, %v6643_v50  ;;  %vm6675_vm11 = vweird.f32 %v8160_v17 }
 0xee9   : > { %8161 = vrsqrt.f32 %v6644_v28  ;;  %vm6676_vm15 = vmor %vm6674_vm12, %vm6675_vm11  ;;  %vm6684_vm1 = vweird.f32 %v6644_v28 }
 0xeea   : > { %v6670_v2 = vmul.f32 %v8160_v17, %v6669_v54 }
 0xeec   : > { %v6671_v19 = vmul.f32 0.5, %v6670_v2 }
 0xeee   : > { %v6672_v6 = vsub.f32 1.5, %v6671_v19 }
 0xeef   : > { %v8162_v36 = vpop.eup %8161 }
 0xef0   : > { %v6679_v61 = vmul.f32 %v8162_v36, %v6644_v28  ;;  %v6673_v39 = vmul.f32 %v8160_v17, %v6672_v6  ;;  %vm6685_vm13 = vweird.f32 %v8162_v36 }
 0xef1   : > { %vm6686_vm5 = vmor %vm6684_vm1, %vm6685_vm13 }
 0xef2   : > { %v6680_v55 = vmul.f32 %v8162_v36, %v6679_v61  ;;  %v6677_v21 = vsel %vm6676_vm15, %v8160_v17, %v6673_v39 }
 0xef3   : > { %v6819_v37 = vmul.f32 %v6677_v21, %v11419_v25  ;;  %v6856_v25 = vadd.f32 %v11485_v20, %v6837_v10 }
 0xef4   : > { %v6681_v15 = vmul.f32 0.5, %v6680_v55 }
 0xef5   : > { %v6838_v27 = vmul.f32 %v11472_v52, %v6819_v37 }
 0xef6   : > { %v6682_v23 = vsub.f32 1.5, %v6681_v15 }
 0xef7   : > { %v6857_v48 = vadd.f32 %v11485_v20, %v6838_v27 }
 0xef8   : > { %v6683_v53 = vmul.f32 %v8162_v36, %v6682_v23 }
 0xefa   : > { %v6687_v7 = vsel %vm6686_vm5, %v8162_v36, %v6683_v53 }
 0xefb   : > { %v6820_v43 = vmul.f32 %v6687_v7, %v11430_v62 }
 0xefd   : > { %v6839_v51 = vmul.f32 %v11472_v52, %v6820_v43 }
 0xeff   : > { %v6858_v13 = vadd.f32 %v11485_v20, %v6839_v51 }
 0xf01   : > { %7391 = vmatpush.xpose.msk.msrb.mxu0 %vm12293_vm4, %v6858_v13 }
 0xf05   : > { %7392 = vmatpush.xpose.msk.msrb.mxu0 %vm12294_vm6, %v6857_v48 }
 0xf09   : > { %7393 = vmatpush.xpose.msk.msrb.mxu0 %vm12295_vm7, %v6856_v25 }
 0xf0c   : > { %7394 = vmatmul.msk.f32.vlgmr.msrb.gmra.mxu0 %vm12289_vm0, %v6872_v60  ;;  %v6877_v62 = vpop.permute.xlu1 %6876 }
 0xf0d   : > { %v6879_v52 = vperm.slane %v6877_v62, 0 }
 0xf89   : > { %v6948_v49 = vpop.f32.mrf.mxu0 }
 0xf8a   : > { %v6949_v20 = vadd.f32 %v6948_v49, %v6879_v52 }
 0xf8c   : > { %6951 = vst [vmem:[%s643_s19] sm:$0x1] %v6949_v20 }
 0xf8d   : > { %8310 = shalt.err (!%p8307_p13)
}
 0xf8e   : > { %7422 = dma.vmem_to_hbm [thread:$0]  (%p8548_p7), %s6964_s1, 16, %s6966_s7, %s6953_s22  }
 0xf8f PF: > { %s12297_s8 = sld [smem:[#allocation16_spill]]  ;;  %p12299_p0 = scmp.ge.s32.totalorder %s8357_s29, 2 }
 0xf91   : > { %p7439_p3 = pnand %p12299_p0, %p8510_p6 }
 0xf93   : > { %p7440_p5 = pneg %p7439_p3 }
 0xf95   : > { %s6977_s30 = sand.u32 1, %s12297_s8  }
 0xf96   : > { %s6978_s18 = scalar_lea.sflag [#allocation5], %s6977_s30 }
 0xf97   : > { %8340 = dma.done.wait (%p7440_p5), %s6978_s18, 16  }
 0xf98   : > { %8342 = vsyncadd (%p7440_p5), %s6978_s18, 4294967280  ;;  %s12300_s29 = sld [smem:[#allocation19_spill]]  ;;  %s12303_s26 = smov %s8349_s27 }
 0xf99   : > { %s12301_s19 = sld [smem:[#allocation17_spill]] }
 0xf9a   : > { %s12302_s28 = sld [smem:[#allocation20_spill]] }
 0xf9e   : > { %p34_p8 = scmp.ge.s32.totalorder %s12300_s29, 4  }
 0xf9f   : > { %s12304_s27 = smov %s12301_s19 }
 0xfa0   :  { %36 = sbr.rel (!%p34_p8) target bundleno = 13 (0xd), region = 151 }
 0xfa5   :  { %6983 = vsyncpa [#allocation4], 1 }
 0xfa6   :  { %6985 = vsyncpa [#allocation4 + $0x1], 1 }
 0xfa7   :  { %6986 = vsyncpa [#allocation7], 1 }
 0xfa8   :  { %6987 = vsyncpa [#allocation10], 1 }
 0xfa9   :  { %6988 = vsyncpa [#allocation5], 1 }
 0xfaa   :  { %6990 = vsyncpa [#allocation5 + $0x1], 1 }

</bundles_post_ra>
